<compile_context>
chip_gen: v5e
topology: v5e:2x2
jax: 0.10.0
libtpu: 0.0.40
codegen_flags: <defaults>
</compile_context>

<pallas_src>
import functools

import jax
import jax.numpy as jnp
from jax import lax
from jax.experimental import pallas as pl
from jax.experimental.pallas import tpu as pltpu

HIDDEN = 768       # BERT hidden size
TAB_HIDDEN = 32    # tabular_mlp output
CLS_HIDDEN = 64    # classifier hidden
CLS_PAD = 128      # lane-dense padded classifier output width


def hybrid_kernel(emb_ref, tab_ref,
                  w_enc_ref, b_enc_ref,
                  w_tab_ref, b_tab_ref,
                  w_cls1_txt_ref, w_cls1_tab_ref, b_cls1_ref,
                  w_cls2_ref, b_cls2_ref,
                  out_ref,
                  acc_ref,
                  *, seq_len, ts_chunk, n_chunks, apply_seq_mask, gelu_bf16):
    s_idx = pl.program_id(1)

    # ---- init the streaming mean-pool accumulator on the first seq tile ----
    @pl.when(s_idx == 0)
    def _init():
        acc_ref[...] = jnp.zeros_like(acc_ref)

    tb, ts, hh = emb_ref.shape

    # ---- surrogate BERT encoder, chunked along the tile's seq axis so only a
    #      small f32 intermediate (~TB*ts_chunk rows) is ever live ----
    def _encode_chunk(c):
        start = c * ts_chunk
        if not isinstance(start, int):
            start = pl.multiple_of(start, ts_chunk)
        x = emb_ref[:, pl.ds(start, ts_chunk), :]                   # (tb,tc,H) bf16
        x2 = x.reshape(tb * ts_chunk, hh)
        h = jnp.dot(x2, w_enc_ref[...], preferred_element_type=jnp.float32)
        h = h + b_enc_ref[...]
        if gelu_bf16:
            h = h.astype(jnp.bfloat16)   # v6e/v7x: bf16 VPU/EUP for the GELU
        # TODO(synk): torch nn.GELU() default is the exact erf form; tanh
        # approx is used (encoder is a surrogate for the unloadable BERT).
        h = jax.nn.gelu(h, approximate=True)
        h3 = h.reshape(tb, ts_chunk, hh)
        if apply_seq_mask:
            pos = (s_idx * ts + start
                   + lax.broadcasted_iota(jnp.int32, (tb, ts_chunk, 1), 1))
            h3 = jnp.where(pos < seq_len, h3, jnp.zeros_like(h3))
        # fused mean-pool: per-batch-row partial sum in f32
        acc_ref[...] += jnp.sum(h3.astype(jnp.float32), axis=1)     # (tb,H)

    if n_chunks == 1:
        _encode_chunk(0)
    else:
        def _body(c, carry):
            _encode_chunk(c)
            return carry
        lax.fori_loop(0, n_chunks, _body, 0)

    # ---- tail runs ONCE per batch tile, on the last seq step ----
    @pl.when(s_idx == pl.num_programs(1) - 1)
    def _tail():
        text_feat = acc_ref[...] * (1.0 / seq_len)                  # (tb,H) f32

        # tabular MLP: Linear(T, 32) + ReLU   (Dropout == identity in eval)
        tab_feat = jnp.dot(tab_ref[...], w_tab_ref[...],
                           preferred_element_type=jnp.float32) + b_tab_ref[...]
        tab_feat = jnp.maximum(tab_feat, 0.0)                       # (tb,32)

        # classifier: Linear(768+32, 64) + ReLU + Linear(64, C)
        z = (jnp.dot(text_feat, w_cls1_txt_ref[...],
                     preferred_element_type=jnp.float32)
             + jnp.dot(tab_feat, w_cls1_tab_ref[...],
                       preferred_element_type=jnp.float32)
             + b_cls1_ref[...])
        z = jnp.maximum(z, 0.0)                                     # (tb,64)

        out_ref[...] = (jnp.dot(z, w_cls2_ref[...],
                                preferred_element_type=jnp.float32)
                        + b_cls2_ref[...])                          # (tb,128)


def init_params(key, vocab_size, tabular_dim, n_classes):
    ks = jax.random.split(key, 6)
    s = 0.02
    return {
        # bf16 table: the XLA gather reads/writes 2 B/elem and feeds the
        # kernel's bf16 MXU inputs without a separate convert pass.
        'tok_emb': (jax.random.normal(ks[0], (vocab_size, HIDDEN), jnp.float32) * s
                    ).astype(jnp.bfloat16),
        'w_enc': jax.random.normal(ks[1], (HIDDEN, HIDDEN), jnp.float32) * s,
        'b_enc': jnp.zeros((1, HIDDEN), jnp.float32),
        'w_tab': jax.random.normal(ks[2], (tabular_dim, TAB_HIDDEN), jnp.float32) * s,
        'b_tab': jnp.zeros((1, TAB_HIDDEN), jnp.float32),
        'w_cls1_txt': jax.random.normal(ks[3], (HIDDEN, CLS_HIDDEN), jnp.float32) * s,
        'w_cls1_tab': jax.random.normal(ks[4], (TAB_HIDDEN, CLS_HIDDEN), jnp.float32) * s,
        'b_cls1': jnp.zeros((1, CLS_HIDDEN), jnp.float32),
        'w_cls2': jax.random.normal(ks[5], (CLS_HIDDEN, n_classes), jnp.float32) * s,
        'b_cls2': jnp.zeros((1, n_classes), jnp.float32),
    }


def _round_up(x, m):
    return ((x + m - 1) // m) * m


def _largest_divisor(n, cap, align=1):
    cap = min(cap, n)
    for d in range(cap, 0, -1):
        if n % d == 0 and d % align == 0:
            return d
    return None


def _device_info():
    kind = ""
    try:
        kind = jax.devices()[0].device_kind.lower()
    except Exception:
        pass
    vmem_cap = None
    try:
        vmem_cap = getattr(pltpu.get_tpu_info(), "vmem_capacity_bytes", None)
    except Exception:
        vmem_cap = None
    if not vmem_cap:
        vmem_cap = 64 * 2**20 if "v7" in kind else 128 * 2**20
    num_cores = 2 if ("v7" in kind or "v4" in kind or "v5p" in kind) else 1
    gelu_bf16 = ("v6" in kind) or ("v7" in kind)   # v5e VPU/EUP have no bf16
    return kind, int(vmem_cap), num_cores, gelu_bf16


def _derive_tiling(B, S, tab_dim, kind, vmem_cap, num_cores):
    # Scoped-VMEM limit: ~75% of physical, capped at 96 MiB
    # (v5e/v6e: 128 MiB -> 96 MiB; v7x: 64 MiB -> 48 MiB).
    vmem_limit = min(int(vmem_cap) * 3 // 4, 96 * 2**20)

    # Fixed reserve: weights (worst case double-buffered) + f32 encoder chunk
    # temporaries + Mosaic internal scratch headroom.
    weights_bytes = (HIDDEN * HIDDEN * 2                              # w_enc bf16
                     + (HIDDEN + TAB_HIDDEN + CLS_HIDDEN + CLS_PAD) * 4
                     + tab_dim * TAB_HIDDEN * 4
                     + HIDDEN * CLS_HIDDEN * 4 + TAB_HIDDEN * CLS_HIDDEN * 4
                     + CLS_HIDDEN * CLS_PAD * 4)
    reserve = 2 * weights_bytes + 8 * 2**20 + 2 * 2**20
    emb_budget = max(2 * 2**20, vmem_limit - reserve)

    # Tokens/grid-step bounded by the double-buffered bf16 emb tile, plus a
    # generation soft cap (v6e tolerates the biggest tiles; v5e is MXU-bound,
    # v7x has half the VMEM).
    tokens_cap = emb_budget // (2 * HIDDEN * 2)
    soft_cap = 16384 if "v6" in kind else 8192
    tokens_cap = max(256, min(tokens_cap, soft_cap))

    # ---- batch tile: multiple of 8 (or full B when tiny); on 2-TC chips keep
    # at least 2 batch tiles so the "parallel" axis can split across cores ----
    if B <= 8:
        tb, b_pad = B, B
    else:
        cap = min(32, max(8, tokens_cap // 16))
        if num_cores >= 2 and B >= 16:
            cap = min(cap, max(8, (B // 2 // 8) * 8))
        cap = max(8, (cap // 8) * 8)
        best = None
        for t in range(8, cap + 1, 8):
            pad = _round_up(B, t) - B
            if best is None or pad < best[1] or (pad == best[1] and t > best[0]):
                best = (t, pad)
        tb = best[0]
        b_pad = _round_up(B, tb)

    # ---- seq tile: multiple of 16 (bf16 sublane packing) within the token
    # budget; pad S (masked in-kernel) when it does not divide evenly ----
    ts_cap = max(16, tokens_cap // max(tb, 1))
    if S <= 16:
        ts, s_pad = S, S
    elif S <= ts_cap and S % 16 == 0:
        ts, s_pad = S, S
    elif _round_up(S, 16) <= ts_cap:
        s_pad = _round_up(S, 16)
        ts = s_pad
    elif S <= ts_cap:
        ts, s_pad = S, S
    else:
        ts = max(16, (ts_cap // 16) * 16)
        ts_div = _largest_divisor(S, ts, align=16)
        if ts_div is not None and ts_div * 2 >= ts:
            ts = ts_div            # prefer a divisor (no padding / no mask)
        s_pad = _round_up(S, ts)

    # ---- inner chunk along the tile's seq axis: keep the live f32 GELU
    # intermediate to ~512-1024 flattened rows (a few MiB) ----
    target = max(8, (1024 // max(tb, 1)) // 8 * 8)
    target = min(target, ts)
    ts_chunk = _largest_divisor(ts, target, align=8)
    if ts_chunk is None:
        ts_chunk = _largest_divisor(ts, target, align=1)
    if ts_chunk is None:
        ts_chunk = ts
    n_chunks = ts // ts_chunk

    return tb, b_pad, ts, s_pad, ts_chunk, n_chunks, vmem_limit


def hybrid_forward(params, input_ids, attention_mask, tabular_input):
    # attention_mask only affects the real BERT self-attention, which the
    # surrogate dense encoder replaces; the reference .mean(dim=1) is unmasked.
    del attention_mask

    B, S = input_ids.shape
    tab_dim = tabular_input.shape[-1]
    n_classes = params['b_cls2'].shape[-1]

    kind, vmem_cap, num_cores, gelu_bf16 = _device_info()
    tb, b_pad, ts, s_pad, ts_chunk, n_chunks, vmem_limit = _derive_tiling(
        B, S, tab_dim, kind, vmem_cap, num_cores)

    # Embedding gather (bf16 table -> bf16 rows, 2 B/elem each way).
    # TODO(synk): fuse the gather in-kernel (scalar-prefetched input_ids +
    # pl.Element row gather / manual DMA) to drop this standalone HBM pass.
    emb = jnp.take(params['tok_emb'], input_ids, axis=0)       # [B,S,768] bf16
    tab = tabular_input.astype(jnp.float32)

    if s_pad != S or b_pad != B:
        emb = jnp.pad(emb, ((0, b_pad - B), (0, s_pad - S), (0, 0)))
    if b_pad != B:
        tab = jnp.pad(tab, ((0, b_pad - B), (0, 0)))

    w_enc = params['w_enc'].astype(jnp.bfloat16)

    # Lane-dense (128-wide) padded classifier output slab, sliced back below.
    w_cls2 = jnp.zeros((CLS_HIDDEN, CLS_PAD), jnp.float32).at[:, :n_classes].set(params['w_cls2'])
    b_cls2 = jnp.zeros((1, CLS_PAD), jnp.float32).at[:, :n_classes].set(params['b_cls2'])

    nb, ns = b_pad // tb, s_pad // ts
    kernel = functools.partial(
        hybrid_kernel, seq_len=S, ts_chunk=ts_chunk, n_chunks=n_chunks,
        apply_seq_mask=(s_pad != S), gelu_bf16=gelu_bf16)

    def _run(single_buffer_weights):
        wkw = {}
        if single_buffer_weights:
            # Constant-index weights are DMA'd once; single-buffer them and
            # hand the saved VMEM to the streamed emb tile.
            wkw = dict(pipeline_mode=pl.Buffered(1))
        grid_spec = pltpu.PrefetchScalarGridSpec(
            num_scalar_prefetch=0,
            grid=(nb, ns),
            in_specs=[
                pl.BlockSpec((tb, ts, HIDDEN), lambda b, s: (b, s, 0)),        # emb (streamed)
                pl.BlockSpec((tb, tab_dim), lambda b, s: (b, 0)),              # tabular
                pl.BlockSpec((HIDDEN, HIDDEN), lambda b, s: (0, 0), **wkw),    # w_enc (bf16)
                pl.BlockSpec((1, HIDDEN), lambda b, s: (0, 0), **wkw),         # b_enc
                pl.BlockSpec((tab_dim, TAB_HIDDEN), lambda b, s: (0, 0), **wkw),
                pl.BlockSpec((1, TAB_HIDDEN), lambda b, s: (0, 0), **wkw),
                pl.BlockSpec((HIDDEN, CLS_HIDDEN), lambda b, s: (0, 0), **wkw),     # w_cls1[:768]
                pl.BlockSpec((TAB_HIDDEN, CLS_HIDDEN), lambda b, s: (0, 0), **wkw), # w_cls1[768:]
                pl.BlockSpec((1, CLS_HIDDEN), lambda b, s: (0, 0), **wkw),
                pl.BlockSpec((CLS_HIDDEN, CLS_PAD), lambda b, s: (0, 0), **wkw),    # w_cls2 (padded)
                pl.BlockSpec((1, CLS_PAD), lambda b, s: (0, 0), **wkw),             # b_cls2 (padded)
            ],
            out_specs=pl.BlockSpec((tb, CLS_PAD), lambda b, s: (b, 0)),
            scratch_shapes=[pltpu.VMEM((tb, HIDDEN), jnp.float32)],             # mean-pool acc
        )
        fn = pl.pallas_call(
            kernel,
            out_shape=jax.ShapeDtypeStruct((b_pad, CLS_PAD), jnp.float32),
            grid_spec=grid_spec,
            compiler_params=pltpu.CompilerParams(
                dimension_semantics=("parallel", "arbitrary"),
                vmem_limit_bytes=vmem_limit,
            ),
        )
        return fn(emb, tab, w_enc, params['b_enc'],
                  params['w_tab'], params['b_tab'],
                  params['w_cls1_txt'], params['w_cls1_tab'], params['b_cls1'],
                  w_cls2, b_cls2)

    try:
        out_padded = _run(True)
    except Exception:
        # pipeline_mode=pl.Buffered(1) not supported by this jax version;
        # fall back to default double-buffered weights (costs ~1.5 MiB VMEM).
        out_padded = _run(False)

    return out_padded[:B, :n_classes]


if __name__ == "__main__":
    B, S = 2, 8               # batch, sequence length
    VOCAB = 64
    TAB_DIM = 8               # tabular_dim
    N_CLASSES = 4             # n_classes

    key = jax.random.PRNGKey(0)
    k_ids, k_tab, k_params = jax.random.split(key, 3)

    input_ids = jax.random.randint(k_ids, (B, S), 0, VOCAB, dtype=jnp.int32)
    attention_mask = jnp.ones((B, S), dtype=jnp.int32)
    tabular_input = jax.random.normal(k_tab, (B, TAB_DIM), jnp.float32)

    params = init_params(k_params, VOCAB, TAB_DIM, N_CLASSES)

    out = hybrid_forward(params, input_ids, attention_mask, tabular_input)
    out = jax.block_until_ready(out)
    assert out.shape == (B, N_CLASSES) and out.dtype == jnp.float32
    assert bool(jnp.all(jnp.isfinite(out)))
    print("KERNEL_OK")
</pallas_src>

<mosaic_0001>
module attributes {stable_mosaic.version = 11 : i64} {
  func.func @hybrid_kernel(%arg0: i32, %arg1: i32, %arg2: memref<2x8x768xbf16, #tpu.memory_space<vmem>>, %arg3: memref<2x8xf32, #tpu.memory_space<vmem>>, %arg4: memref<768x768xbf16, #tpu.memory_space<vmem>>, %arg5: memref<1x768xf32, #tpu.memory_space<vmem>>, %arg6: memref<8x32xf32, #tpu.memory_space<vmem>>, %arg7: memref<1x32xf32, #tpu.memory_space<vmem>>, %arg8: memref<768x64xf32, #tpu.memory_space<vmem>>, %arg9: memref<32x64xf32, #tpu.memory_space<vmem>>, %arg10: memref<1x64xf32, #tpu.memory_space<vmem>>, %arg11: memref<64x128xf32, #tpu.memory_space<vmem>>, %arg12: memref<1x128xf32, #tpu.memory_space<vmem>>, %arg13: memref<2x128xf32, #tpu.memory_space<vmem>>, %arg14: memref<2x768xf32, #tpu.memory_space<vmem>>) attributes {dimension_semantics = [#tpu.dimension_semantics<parallel>, #tpu.dimension_semantics<arbitrary>], iteration_bounds = array<i64: 1, 1>, scalar_prefetch = 0 : i64, scratch_operands = 1 : i64, tpu.core_type = #tpu.core_type<tc>, window_params = [{transform_indices = @transform_0, window_bounds = array<i64: 2, 8, 768>}, {transform_indices = @transform_1, window_bounds = array<i64: 2, 8>}, {pipeline_mode = #tpu.pipeline_mode<synchronous>, transform_indices = @transform_2, window_bounds = array<i64: 768, 768>}, {pipeline_mode = #tpu.pipeline_mode<synchronous>, transform_indices = @transform_3, window_bounds = array<i64: 1, 768>}, {pipeline_mode = #tpu.pipeline_mode<synchronous>, transform_indices = @transform_4, window_bounds = array<i64: 8, 32>}, {pipeline_mode = #tpu.pipeline_mode<synchronous>, transform_indices = @transform_5, window_bounds = array<i64: 1, 32>}, {pipeline_mode = #tpu.pipeline_mode<synchronous>, transform_indices = @transform_6, window_bounds = array<i64: 768, 64>}, {pipeline_mode = #tpu.pipeline_mode<synchronous>, transform_indices = @transform_7, window_bounds = array<i64: 32, 64>}, {pipeline_mode = #tpu.pipeline_mode<synchronous>, transform_indices = @transform_8, window_bounds = array<i64: 1, 64>}, {pipeline_mode = #tpu.pipeline_mode<synchronous>, transform_indices = @transform_9, window_bounds = array<i64: 64, 128>}, {pipeline_mode = #tpu.pipeline_mode<synchronous>, transform_indices = @transform_10, window_bounds = array<i64: 1, 128>}, {transform_indices = @transform_11, window_bounds = array<i64: 2, 128>}]} {
    %c0_i32 = arith.constant 0 : i32
    %0 = arith.cmpi eq, %arg1, %c0_i32 : i32
    %1 = arith.extui %0 : i1 to i32
    %c0_i32_0 = arith.constant 0 : i32
    %2 = arith.cmpi ne, %1, %c0_i32_0 : i32
    scf.if %2 {
      %cst_18 = arith.constant 0.000000e+00 : f32
      %31 = vector.broadcast %cst_18 : f32 to vector<2x768xf32>
      %c0_19 = arith.constant 0 : index
      %c0_20 = arith.constant 0 : index
      %32 = vector.load %arg14[%c0_19, %c0_20] : memref<2x768xf32, #tpu.memory_space<vmem>>, vector<2x768xf32>
      tpu.vector_store %arg14[%c0_19, %c0_20], %31 {strides = array<i32>} : memref<2x768xf32, #tpu.memory_space<vmem>>, vector<2x768xf32>,
    } else {
    }
    %c0 = arith.constant 0 : index
    %c0_1 = arith.constant 0 : index
    %c0_2 = arith.constant 0 : index
    %3 = vector.load %arg2[%c0, %c0_1, %c0_2] : memref<2x8x768xbf16, #tpu.memory_space<vmem>>, vector<2x8x768xbf16>
    %4 = vector.shape_cast %3 : vector<2x8x768xbf16> to vector<16x768xbf16>
    %c0_3 = arith.constant 0 : index
    %c0_4 = arith.constant 0 : index
    %5 = vector.load %arg4[%c0_3, %c0_4] : memref<768x768xbf16, #tpu.memory_space<vmem>>, vector<768x768xbf16>
    %cst = arith.constant dense<0.000000e+00> : vector<16x768xf32>
    %6 = tpu.matmul %4, %5, %cst {dimension_numbers = #tpu.dot_dimension_numbers<[1], [0], [0], [1], [0, 0, 1, 1], [], []>} : vector<16x768xbf16>, vector<768x768xbf16>, vector<16x768xf32> -> vector<16x768xf32>
    %c0_5 = arith.constant 0 : index
    %c0_6 = arith.constant 0 : index
    %7 = vector.load %arg5[%c0_5, %c0_6] : memref<1x768xf32, #tpu.memory_space<vmem>>, vector<1x768xf32>
    %8 = vector.broadcast %7 : vector<1x768xf32> to vector<16x768xf32>
    %9 = arith.addf %6, %8 : vector<16x768xf32>
    %10 = arith.mulf %9, %9 : vector<16x768xf32>
    %11 = arith.mulf %9, %10 : vector<16x768xf32>
    %cst_7 = arith.constant 4.471500e-02 : f32
    %12 = vector.broadcast %cst_7 : f32 to vector<16x768xf32>
    %13 = arith.mulf %12, %11 : vector<16x768xf32>
    %14 = arith.addf %9, %13 : vector<16x768xf32>
    %cst_8 = arith.constant 0.797884583 : f32
    %15 = vector.broadcast %cst_8 : f32 to vector<16x768xf32>
    %16 = arith.mulf %15, %14 : vector<16x768xf32>
    %17 = math.tanh %16 : vector<16x768xf32>
    %cst_9 = arith.constant 1.000000e+00 : f32
    %18 = vector.broadcast %cst_9 : f32 to vector<16x768xf32>
    %19 = arith.addf %18, %17 : vector<16x768xf32>
    %cst_10 = arith.constant 5.000000e-01 : f32
    %20 = vector.broadcast %cst_10 : f32 to vector<16x768xf32>
    %21 = arith.mulf %20, %19 : vector<16x768xf32>
    %22 = arith.mulf %9, %21 : vector<16x768xf32>
    %23 = vector.shape_cast %22 : vector<16x768xf32> to vector<2x8x768xf32>
    %c0_11 = arith.constant 0 : index
    %c0_12 = arith.constant 0 : index
    %24 = vector.load %arg14[%c0_11, %c0_12] : memref<2x768xf32, #tpu.memory_space<vmem>>, vector<2x768xf32>
    %cst_13 = arith.constant dense<0.000000e+00> : vector<2x768xf32>
    %25 = vector.multi_reduction <add>, %23, %cst_13 [1] : vector<2x8x768xf32> to vector<2x768xf32>
    %26 = arith.addf %24, %25 : vector<2x768xf32>
    %c0_14 = arith.constant 0 : index
    %c0_15 = arith.constant 0 : index
    %27 = vector.load %arg14[%c0_14, %c0_15] : memref<2x768xf32, #tpu.memory_space<vmem>>, vector<2x768xf32>
    tpu.vector_store %arg14[%c0_14, %c0_15], %26 {strides = array<i32>} : memref<2x768xf32, #tpu.memory_space<vmem>>, vector<2x768xf32>,
    %c0_i32_16 = arith.constant 0 : i32
    %28 = arith.cmpi eq, %arg1, %c0_i32_16 : i32
    %29 = arith.extui %28 : i1 to i32
    %c0_i32_17 = arith.constant 0 : i32
    %30 = arith.cmpi ne, %29, %c0_i32_17 : i32
    scf.if %30 {
      %c0_18 = arith.constant 0 : index
      %c0_19 = arith.constant 0 : index
      %31 = vector.load %arg14[%c0_18, %c0_19] : memref<2x768xf32, #tpu.memory_space<vmem>>, vector<2x768xf32>
      %cst_20 = arith.constant 1.250000e-01 : f32
      %32 = vector.broadcast %cst_20 : f32 to vector<2x768xf32>
      %33 = arith.mulf %31, %32 : vector<2x768xf32>
      %c0_21 = arith.constant 0 : index
      %c0_22 = arith.constant 0 : index
      %34 = vector.load %arg3[%c0_21, %c0_22] : memref<2x8xf32, #tpu.memory_space<vmem>>, vector<2x8xf32>
      %c0_23 = arith.constant 0 : index
      %c0_24 = arith.constant 0 : index
      %35 = vector.load %arg6[%c0_23, %c0_24] : memref<8x32xf32, #tpu.memory_space<vmem>>, vector<8x32xf32>
      %cst_25 = arith.constant dense<0.000000e+00> : vector<2x32xf32>
      %36 = tpu.matmul %34, %35, %cst_25 {dimension_numbers = #tpu.dot_dimension_numbers<[1], [0], [0], [1], [0, 0, 1, 1], [], []>} : vector<2x8xf32>, vector<8x32xf32>, vector<2x32xf32> -> vector<2x32xf32>
      %c0_26 = arith.constant 0 : index
      %c0_27 = arith.constant 0 : index
      %37 = vector.load %arg7[%c0_26, %c0_27] : memref<1x32xf32, #tpu.memory_space<vmem>>, vector<1x32xf32>
      %38 = vector.broadcast %37 : vector<1x32xf32> to vector<2x32xf32>
      %39 = arith.addf %36, %38 : vector<2x32xf32>
      %cst_28 = arith.constant 0.000000e+00 : f32
      %40 = vector.broadcast %cst_28 : f32 to vector<2x32xf32>
      %41 = arith.maximumf %39, %40 : vector<2x32xf32>
      %c0_29 = arith.constant 0 : index
      %c0_30 = arith.constant 0 : index
      %42 = vector.load %arg8[%c0_29, %c0_30] : memref<768x64xf32, #tpu.memory_space<vmem>>, vector<768x64xf32>
      %cst_31 = arith.constant dense<0.000000e+00> : vector<2x64xf32>
      %43 = tpu.matmul %33, %42, %cst_31 {dimension_numbers = #tpu.dot_dimension_numbers<[1], [0], [0], [1], [0, 0, 1, 1], [], []>} : vector<2x768xf32>, vector<768x64xf32>, vector<2x64xf32> -> vector<2x64xf32>
      %c0_32 = arith.constant 0 : index
      %c0_33 = arith.constant 0 : index
      %44 = vector.load %arg9[%c0_32, %c0_33] : memref<32x64xf32, #tpu.memory_space<vmem>>, vector<32x64xf32>
      %cst_34 = arith.constant dense<0.000000e+00> : vector<2x64xf32>
      %45 = tpu.matmul %41, %44, %cst_34 {dimension_numbers = #tpu.dot_dimension_numbers<[1], [0], [0], [1], [0, 0, 1, 1], [], []>} : vector<2x32xf32>, vector<32x64xf32>, vector<2x64xf32> -> vector<2x64xf32>
      %46 = arith.addf %43, %45 : vector<2x64xf32>
      %c0_35 = arith.constant 0 : index
      %c0_36 = arith.constant 0 : index
      %47 = vector.load %arg10[%c0_35, %c0_36] : memref<1x64xf32, #tpu.memory_space<vmem>>, vector<1x64xf32>
      %48 = vector.broadcast %47 : vector<1x64xf32> to vector<2x64xf32>
      %49 = arith.addf %46, %48 : vector<2x64xf32>
      %cst_37 = arith.constant 0.000000e+00 : f32
      %50 = vector.broadcast %cst_37 : f32 to vector<2x64xf32>
      %51 = arith.maximumf %49, %50 : vector<2x64xf32>
      %c0_38 = arith.constant 0 : index
      %c0_39 = arith.constant 0 : index
      %52 = vector.load %arg11[%c0_38, %c0_39] : memref<64x128xf32, #tpu.memory_space<vmem>>, vector<64x128xf32>
      %cst_40 = arith.constant dense<0.000000e+00> : vector<2x128xf32>
      %53 = tpu.matmul %51, %52, %cst_40 {dimension_numbers = #tpu.dot_dimension_numbers<[1], [0], [0], [1], [0, 0, 1, 1], [], []>} : vector<2x64xf32>, vector<64x128xf32>, vector<2x128xf32> -> vector<2x128xf32>
      %c0_41 = arith.constant 0 : index
      %c0_42 = arith.constant 0 : index
      %54 = vector.load %arg12[%c0_41, %c0_42] : memref<1x128xf32, #tpu.memory_space<vmem>>, vector<1x128xf32>
      %55 = vector.broadcast %54 : vector<1x128xf32> to vector<2x128xf32>
      %56 = arith.addf %53, %55 : vector<2x128xf32>
      %c0_43 = arith.constant 0 : index
      %c0_44 = arith.constant 0 : index
      %57 = vector.load %arg13[%c0_43, %c0_44] : memref<2x128xf32, #tpu.memory_space<vmem>>, vector<2x128xf32>
      tpu.vector_store %arg13[%c0_43, %c0_44], %56 {strides = array<i32>} : memref<2x128xf32, #tpu.memory_space<vmem>>, vector<2x128xf32>,
    } else {
    }
    return
  }
  func.func @transform_0(%arg0: i32, %arg1: i32) -> (i32, i32, i32) {
    %c0_i32 = arith.constant 0 : i32
    %c0_i32_0 = arith.constant 0 : i32
    return %arg0, %arg1, %c0_i32 : i32, i32, i32
  }
  func.func @transform_1(%arg0: i32, %arg1: i32) -> (i32, i32) {
    %c0_i32 = arith.constant 0 : i32
    %c0_i32_0 = arith.constant 0 : i32
    return %arg0, %c0_i32 : i32, i32
  }
  func.func @transform_2(%arg0: i32, %arg1: i32) -> (i32, i32) {
    %c0_i32 = arith.constant 0 : i32
    %c0_i32_0 = arith.constant 0 : i32
    %c0_i32_1 = arith.constant 0 : i32
    return %c0_i32, %c0_i32_0 : i32, i32
  }
  func.func @transform_3(%arg0: i32, %arg1: i32) -> (i32, i32) {
    %c0_i32 = arith.constant 0 : i32
    %c0_i32_0 = arith.constant 0 : i32
    %c0_i32_1 = arith.constant 0 : i32
    return %c0_i32, %c0_i32_0 : i32, i32
  }
  func.func @transform_4(%arg0: i32, %arg1: i32) -> (i32, i32) {
    %c0_i32 = arith.constant 0 : i32
    %c0_i32_0 = arith.constant 0 : i32
    %c0_i32_1 = arith.constant 0 : i32
    return %c0_i32, %c0_i32_0 : i32, i32
  }
  func.func @transform_5(%arg0: i32, %arg1: i32) -> (i32, i32) {
    %c0_i32 = arith.constant 0 : i32
    %c0_i32_0 = arith.constant 0 : i32
    %c0_i32_1 = arith.constant 0 : i32
    return %c0_i32, %c0_i32_0 : i32, i32
  }
  func.func @transform_6(%arg0: i32, %arg1: i32) -> (i32, i32) {
    %c0_i32 = arith.constant 0 : i32
    %c0_i32_0 = arith.constant 0 : i32
    %c0_i32_1 = arith.constant 0 : i32
    return %c0_i32, %c0_i32_0 : i32, i32
  }
  func.func @transform_7(%arg0: i32, %arg1: i32) -> (i32, i32) {
    %c0_i32 = arith.constant 0 : i32
    %c0_i32_0 = arith.constant 0 : i32
    %c0_i32_1 = arith.constant 0 : i32
    return %c0_i32, %c0_i32_0 : i32, i32
  }
  func.func @transform_8(%arg0: i32, %arg1: i32) -> (i32, i32) {
    %c0_i32 = arith.constant 0 : i32
    %c0_i32_0 = arith.constant 0 : i32
    %c0_i32_1 = arith.constant 0 : i32
    return %c0_i32, %c0_i32_0 : i32, i32
  }
  func.func @transform_9(%arg0: i32, %arg1: i32) -> (i32, i32) {
    %c0_i32 = arith.constant 0 : i32
    %c0_i32_0 = arith.constant 0 : i32
    %c0_i32_1 = arith.constant 0 : i32
    return %c0_i32, %c0_i32_0 : i32, i32
  }
  func.func @transform_10(%arg0: i32, %arg1: i32) -> (i32, i32) {
    %c0_i32 = arith.constant 0 : i32
    %c0_i32_0 = arith.constant 0 : i32
    %c0_i32_1 = arith.constant 0 : i32
    return %c0_i32, %c0_i32_0 : i32, i32
  }
  func.func @transform_11(%arg0: i32, %arg1: i32) -> (i32, i32) {
    %c0_i32 = arith.constant 0 : i32
    %c0_i32_0 = arith.constant 0 : i32
    return %arg0, %c0_i32 : i32, i32
  }
}

module attributes {stable_mosaic.version = 11 : i64} {
  func.func @hybrid_kernel(%arg0: i32, %arg1: i32, %arg2: memref<2x8x768xbf16, #tpu.memory_space<vmem>>, %arg3: memref<2x8xf32, #tpu.memory_space<vmem>>, %arg4: memref<768x768xbf16, #tpu.memory_space<vmem>>, %arg5: memref<1x768xf32, #tpu.memory_space<vmem>>, %arg6: memref<8x32xf32, #tpu.memory_space<vmem>>, %arg7: memref<1x32xf32, #tpu.memory_space<vmem>>, %arg8: memref<768x64xf32, #tpu.memory_space<vmem>>, %arg9: memref<32x64xf32, #tpu.memory_space<vmem>>, %arg10: memref<1x64xf32, #tpu.memory_space<vmem>>, %arg11: memref<64x128xf32, #tpu.memory_space<vmem>>, %arg12: memref<1x128xf32, #tpu.memory_space<vmem>>, %arg13: memref<2x128xf32, #tpu.memory_space<vmem>>, %arg14: memref<2x768xf32, #tpu.memory_space<vmem>>) attributes {dimension_semantics = [#tpu.dimension_semantics<parallel>, #tpu.dimension_semantics<arbitrary>], iteration_bounds = array<i64: 1, 1>, scalar_prefetch = 0 : i64, scratch_operands = 1 : i64, tpu.core_type = #tpu.core_type<tc>, window_params = [{transform_indices = @transform_0, window_bounds = array<i64: 2, 8, 768>}, {transform_indices = @transform_1, window_bounds = array<i64: 2, 8>}, {pipeline_mode = #tpu.pipeline_mode<synchronous>, transform_indices = @transform_2, window_bounds = array<i64: 768, 768>}, {pipeline_mode = #tpu.pipeline_mode<synchronous>, transform_indices = @transform_3, window_bounds = array<i64: 1, 768>}, {pipeline_mode = #tpu.pipeline_mode<synchronous>, transform_indices = @transform_4, window_bounds = array<i64: 8, 32>}, {pipeline_mode = #tpu.pipeline_mode<synchronous>, transform_indices = @transform_5, window_bounds = array<i64: 1, 32>}, {pipeline_mode = #tpu.pipeline_mode<synchronous>, transform_indices = @transform_6, window_bounds = array<i64: 768, 64>}, {pipeline_mode = #tpu.pipeline_mode<synchronous>, transform_indices = @transform_7, window_bounds = array<i64: 32, 64>}, {pipeline_mode = #tpu.pipeline_mode<synchronous>, transform_indices = @transform_8, window_bounds = array<i64: 1, 64>}, {pipeline_mode = #tpu.pipeline_mode<synchronous>, transform_indices = @transform_9, window_bounds = array<i64: 64, 128>}, {pipeline_mode = #tpu.pipeline_mode<synchronous>, transform_indices = @transform_10, window_bounds = array<i64: 1, 128>}, {transform_indices = @transform_11, window_bounds = array<i64: 2, 128>}]} {
    %c0_i32 = arith.constant 0 : i32
    %0 = arith.cmpi eq, %arg1, %c0_i32 : i32
    %1 = arith.extui %0 : i1 to i32
    %c0_i32_0 = arith.constant 0 : i32
    %2 = arith.cmpi ne, %1, %c0_i32_0 : i32
    scf.if %2 {
      %cst_18 = arith.constant 0.000000e+00 : f32
      %31 = vector.broadcast %cst_18 : f32 to vector<2x768xf32>
      %c0_19 = arith.constant 0 : index
      %c0_20 = arith.constant 0 : index
      %32 = vector.load %arg14[%c0_19, %c0_20] : memref<2x768xf32, #tpu.memory_space<vmem>>, vector<2x768xf32>
      tpu.vector_store %arg14[%c0_19, %c0_20], %31 {strides = array<i32>} : memref<2x768xf32, #tpu.memory_space<vmem>>, vector<2x768xf32>,
    } else {
    }
    %c0 = arith.constant 0 : index
    %c0_1 = arith.constant 0 : index
    %c0_2 = arith.constant 0 : index
    %3 = vector.load %arg2[%c0, %c0_1, %c0_2] : memref<2x8x768xbf16, #tpu.memory_space<vmem>>, vector<2x8x768xbf16>
    %4 = vector.shape_cast %3 : vector<2x8x768xbf16> to vector<16x768xbf16>
    %c0_3 = arith.constant 0 : index
    %c0_4 = arith.constant 0 : index
    %5 = vector.load %arg4[%c0_3, %c0_4] : memref<768x768xbf16, #tpu.memory_space<vmem>>, vector<768x768xbf16>
    %cst = arith.constant dense<0.000000e+00> : vector<16x768xf32>
    %6 = tpu.matmul %4, %5, %cst {dimension_numbers = #tpu.dot_dimension_numbers<[1], [0], [0], [1], [0, 0, 1, 1], [], []>} : vector<16x768xbf16>, vector<768x768xbf16>, vector<16x768xf32> -> vector<16x768xf32>
    %c0_5 = arith.constant 0 : index
    %c0_6 = arith.constant 0 : index
    %7 = vector.load %arg5[%c0_5, %c0_6] : memref<1x768xf32, #tpu.memory_space<vmem>>, vector<1x768xf32>
    %8 = vector.broadcast %7 : vector<1x768xf32> to vector<16x768xf32>
    %9 = arith.addf %6, %8 : vector<16x768xf32>
    %10 = arith.mulf %9, %9 : vector<16x768xf32>
    %11 = arith.mulf %9, %10 : vector<16x768xf32>
    %cst_7 = arith.constant 4.471500e-02 : f32
    %12 = vector.broadcast %cst_7 : f32 to vector<16x768xf32>
    %13 = arith.mulf %12, %11 : vector<16x768xf32>
    %14 = arith.addf %9, %13 : vector<16x768xf32>
    %cst_8 = arith.constant 0.797884583 : f32
    %15 = vector.broadcast %cst_8 : f32 to vector<16x768xf32>
    %16 = arith.mulf %15, %14 : vector<16x768xf32>
    %17 = math.tanh %16 : vector<16x768xf32>
    %cst_9 = arith.constant 1.000000e+00 : f32
    %18 = vector.broadcast %cst_9 : f32 to vector<16x768xf32>
    %19 = arith.addf %18, %17 : vector<16x768xf32>
    %cst_10 = arith.constant 5.000000e-01 : f32
    %20 = vector.broadcast %cst_10 : f32 to vector<16x768xf32>
    %21 = arith.mulf %20, %19 : vector<16x768xf32>
    %22 = arith.mulf %9, %21 : vector<16x768xf32>
    %23 = vector.shape_cast %22 : vector<16x768xf32> to vector<2x8x768xf32>
    %c0_11 = arith.constant 0 : index
    %c0_12 = arith.constant 0 : index
    %24 = vector.load %arg14[%c0_11, %c0_12] : memref<2x768xf32, #tpu.memory_space<vmem>>, vector<2x768xf32>
    %cst_13 = arith.constant dense<0.000000e+00> : vector<2x768xf32>
    %25 = vector.multi_reduction <add>, %23, %cst_13 [1] : vector<2x8x768xf32> to vector<2x768xf32>
    %26 = arith.addf %24, %25 : vector<2x768xf32>
    %c0_14 = arith.constant 0 : index
    %c0_15 = arith.constant 0 : index
    %27 = vector.load %arg14[%c0_14, %c0_15] : memref<2x768xf32, #tpu.memory_space<vmem>>, vector<2x768xf32>
    tpu.vector_store %arg14[%c0_14, %c0_15], %26 {strides = array<i32>} : memref<2x768xf32, #tpu.memory_space<vmem>>, vector<2x768xf32>,
    %c0_i32_16 = arith.constant 0 : i32
    %28 = arith.cmpi eq, %arg1, %c0_i32_16 : i32
    %29 = arith.extui %28 : i1 to i32
    %c0_i32_17 = arith.constant 0 : i32
    %30 = arith.cmpi ne, %29, %c0_i32_17 : i32
    scf.if %30 {
      %c0_18 = arith.constant 0 : index
      %c0_19 = arith.constant 0 : index
      %31 = vector.load %arg14[%c0_18, %c0_19] : memref<2x768xf32, #tpu.memory_space<vmem>>, vector<2x768xf32>
      %cst_20 = arith.constant 1.250000e-01 : f32
      %32 = vector.broadcast %cst_20 : f32 to vector<2x768xf32>
      %33 = arith.mulf %31, %32 : vector<2x768xf32>
      %c0_21 = arith.constant 0 : index
      %c0_22 = arith.constant 0 : index
      %34 = vector.load %arg3[%c0_21, %c0_22] : memref<2x8xf32, #tpu.memory_space<vmem>>, vector<2x8xf32>
      %c0_23 = arith.constant 0 : index
      %c0_24 = arith.constant 0 : index
      %35 = vector.load %arg6[%c0_23, %c0_24] : memref<8x32xf32, #tpu.memory_space<vmem>>, vector<8x32xf32>
      %cst_25 = arith.constant dense<0.000000e+00> : vector<2x32xf32>
      %36 = tpu.matmul %34, %35, %cst_25 {dimension_numbers = #tpu.dot_dimension_numbers<[1], [0], [0], [1], [0, 0, 1, 1], [], []>} : vector<2x8xf32>, vector<8x32xf32>, vector<2x32xf32> -> vector<2x32xf32>
      %c0_26 = arith.constant 0 : index
      %c0_27 = arith.constant 0 : index
      %37 = vector.load %arg7[%c0_26, %c0_27] : memref<1x32xf32, #tpu.memory_space<vmem>>, vector<1x32xf32>
      %38 = vector.broadcast %37 : vector<1x32xf32> to vector<2x32xf32>
      %39 = arith.addf %36, %38 : vector<2x32xf32>
      %cst_28 = arith.constant 0.000000e+00 : f32
      %40 = vector.broadcast %cst_28 : f32 to vector<2x32xf32>
      %41 = arith.maximumf %39, %40 : vector<2x32xf32>
      %c0_29 = arith.constant 0 : index
      %c0_30 = arith.constant 0 : index
      %42 = vector.load %arg8[%c0_29, %c0_30] : memref<768x64xf32, #tpu.memory_space<vmem>>, vector<768x64xf32>
      %cst_31 = arith.constant dense<0.000000e+00> : vector<2x64xf32>
      %43 = tpu.matmul %33, %42, %cst_31 {dimension_numbers = #tpu.dot_dimension_numbers<[1], [0], [0], [1], [0, 0, 1, 1], [], []>} : vector<2x768xf32>, vector<768x64xf32>, vector<2x64xf32> -> vector<2x64xf32>
      %c0_32 = arith.constant 0 : index
      %c0_33 = arith.constant 0 : index
      %44 = vector.load %arg9[%c0_32, %c0_33] : memref<32x64xf32, #tpu.memory_space<vmem>>, vector<32x64xf32>
      %cst_34 = arith.constant dense<0.000000e+00> : vector<2x64xf32>
      %45 = tpu.matmul %41, %44, %cst_34 {dimension_numbers = #tpu.dot_dimension_numbers<[1], [0], [0], [1], [0, 0, 1, 1], [], []>} : vector<2x32xf32>, vector<32x64xf32>, vector<2x64xf32> -> vector<2x64xf32>
      %46 = arith.addf %43, %45 : vector<2x64xf32>
      %c0_35 = arith.constant 0 : index
      %c0_36 = arith.constant 0 : index
      %47 = vector.load %arg10[%c0_35, %c0_36] : memref<1x64xf32, #tpu.memory_space<vmem>>, vector<1x64xf32>
      %48 = vector.broadcast %47 : vector<1x64xf32> to vector<2x64xf32>
      %49 = arith.addf %46, %48 : vector<2x64xf32>
      %cst_37 = arith.constant 0.000000e+00 : f32
      %50 = vector.broadcast %cst_37 : f32 to vector<2x64xf32>
      %51 = arith.maximumf %49, %50 : vector<2x64xf32>
      %c0_38 = arith.constant 0 : index
      %c0_39 = arith.constant 0 : index
      %52 = vector.load %arg11[%c0_38, %c0_39] : memref<64x128xf32, #tpu.memory_space<vmem>>, vector<64x128xf32>
      %cst_40 = arith.constant dense<0.000000e+00> : vector<2x128xf32>
      %53 = tpu.matmul %51, %52, %cst_40 {dimension_numbers = #tpu.dot_dimension_numbers<[1], [0], [0], [1], [0, 0, 1, 1], [], []>} : vector<2x64xf32>, vector<64x128xf32>, vector<2x128xf32> -> vector<2x128xf32>
      %c0_41 = arith.constant 0 : index
      %c0_42 = arith.constant 0 : index
      %54 = vector.load %arg12[%c0_41, %c0_42] : memref<1x128xf32, #tpu.memory_space<vmem>>, vector<1x128xf32>
      %55 = vector.broadcast %54 : vector<1x128xf32> to vector<2x128xf32>
      %56 = arith.addf %53, %55 : vector<2x128xf32>
      %c0_43 = arith.constant 0 : index
      %c0_44 = arith.constant 0 : index
      %57 = vector.load %arg13[%c0_43, %c0_44] : memref<2x128xf32, #tpu.memory_space<vmem>>, vector<2x128xf32>
      tpu.vector_store %arg13[%c0_43, %c0_44], %56 {strides = array<i32>} : memref<2x128xf32, #tpu.memory_space<vmem>>, vector<2x128xf32>,
    } else {
    }
    return
  }
  func.func @transform_0(%arg0: i32, %arg1: i32) -> (i32, i32, i32) {
    %c0_i32 = arith.constant 0 : i32
    %c0_i32_0 = arith.constant 0 : i32
    return %arg0, %arg1, %c0_i32 : i32, i32, i32
  }
  func.func @transform_1(%arg0: i32, %arg1: i32) -> (i32, i32) {
    %c0_i32 = arith.constant 0 : i32
    %c0_i32_0 = arith.constant 0 : i32
    return %arg0, %c0_i32 : i32, i32
  }
  func.func @transform_2(%arg0: i32, %arg1: i32) -> (i32, i32) {
    %c0_i32 = arith.constant 0 : i32
    %c0_i32_0 = arith.constant 0 : i32
    %c0_i32_1 = arith.constant 0 : i32
    return %c0_i32, %c0_i32_0 : i32, i32
  }
  func.func @transform_3(%arg0: i32, %arg1: i32) -> (i32, i32) {
    %c0_i32 = arith.constant 0 : i32
    %c0_i32_0 = arith.constant 0 : i32
    %c0_i32_1 = arith.constant 0 : i32
    return %c0_i32, %c0_i32_0 : i32, i32
  }
  func.func @transform_4(%arg0: i32, %arg1: i32) -> (i32, i32) {
    %c0_i32 = arith.constant 0 : i32
    %c0_i32_0 = arith.constant 0 : i32
    %c0_i32_1 = arith.constant 0 : i32
    return %c0_i32, %c0_i32_0 : i32, i32
  }
  func.func @transform_5(%arg0: i32, %arg1: i32) -> (i32, i32) {
    %c0_i32 = arith.constant 0 : i32
    %c0_i32_0 = arith.constant 0 : i32
    %c0_i32_1 = arith.constant 0 : i32
    return %c0_i32, %c0_i32_0 : i32, i32
  }
  func.func @transform_6(%arg0: i32, %arg1: i32) -> (i32, i32) {
    %c0_i32 = arith.constant 0 : i32
    %c0_i32_0 = arith.constant 0 : i32
    %c0_i32_1 = arith.constant 0 : i32
    return %c0_i32, %c0_i32_0 : i32, i32
  }
  func.func @transform_7(%arg0: i32, %arg1: i32) -> (i32, i32) {
    %c0_i32 = arith.constant 0 : i32
    %c0_i32_0 = arith.constant 0 : i32
    %c0_i32_1 = arith.constant 0 : i32
    return %c0_i32, %c0_i32_0 : i32, i32
  }
  func.func @transform_8(%arg0: i32, %arg1: i32) -> (i32, i32) {
    %c0_i32 = arith.constant 0 : i32
    %c0_i32_0 = arith.constant 0 : i32
    %c0_i32_1 = arith.constant 0 : i32
    return %c0_i32, %c0_i32_0 : i32, i32
  }
  func.func @transform_9(%arg0: i32, %arg1: i32) -> (i32, i32) {
    %c0_i32 = arith.constant 0 : i32
    %c0_i32_0 = arith.constant 0 : i32
    %c0_i32_1 = arith.constant 0 : i32
    return %c0_i32, %c0_i32_0 : i32, i32
  }
  func.func @transform_10(%arg0: i32, %arg1: i32) -> (i32, i32) {
    %c0_i32 = arith.constant 0 : i32
    %c0_i32_0 = arith.constant 0 : i32
    %c0_i32_1 = arith.constant 0 : i32
    return %c0_i32, %c0_i32_0 : i32, i32
  }
  func.func @transform_11(%arg0: i32, %arg1: i32) -> (i32, i32) {
    %c0_i32 = arith.constant 0 : i32
    %c0_i32_0 = arith.constant 0 : i32
    return %arg0, %c0_i32 : i32, i32
  }
}

</mosaic_0001>

<bundles_post_ra>
// kernel: tpu_custom_call.1
= control target key start
LH: loop header
LB: loop body
LE: loop exit
PB: predicated region body
PF: predicated region fallthrough
CT: control target
= control target key end

     0   :  { %16 = vsyncpa [#allocation4], 0  ;;  %s5457_s0 = inlined_call_operand.hbm [shape: bf16[2,8,768], index: 0, kind: input, shape index: {}]   ;;  %s5458_s1 = inlined_call_operand.hbm [shape: f32[2,8], index: 1, kind: input, shape index: {}]   ;;  %s5459_s2 = inlined_call_operand.hbm [shape: bf16[768,768], index: 2, kind: input, shape index: {}]   ;;  %s5460_s3 = inlined_call_operand.hbm [shape: f32[1,768], index: 3, kind: input, shape index: {}]   ;;  %s5461_s4 = inlined_call_operand.hbm [shape: f32[8,32], index: 4, kind: input, shape index: {}]   ;;  %s5462_s5 = inlined_call_operand.hbm [shape: f32[1,32], index: 5, kind: input, shape index: {}]   ;;  %s5463_s6 = inlined_call_operand.vmem [shape: f32[768,64], index: 6, kind: input, shape index: {}]   ;;  %s5464_s7 = inlined_call_operand.hbm [shape: f32[32,64], index: 7, kind: input, shape index: {}]   ;;  %s5465_s8 = inlined_call_operand.hbm [shape: f32[1,64], index: 8, kind: input, shape index: {}]   ;;  %s5466_s9 = inlined_call_operand.hbm [shape: f32[64,128], index: 9, kind: input, shape index: {}]   ;;  %s5467_s10 = inlined_call_operand.hbm [shape: f32[1,128], index: 10, kind: input, shape index: {}]   ;;  %s5468_s11 = inlined_call_operand.hbm [shape: f32[2,128], index: 11, kind: output, shape index: {}]  }
   0x1   :  { %17 = vsyncpa [#allocation7], 0 }
   0x2   :  { %18 = vsyncpa [#allocation10], 0 }
   0x3   :  { %19 = vsyncpa [#allocation13], 0 }
   0x4   :  { %20 = vsyncpa [#allocation16], 0 }
   0x5   :  { %21 = vsyncpa [#allocation19], 0  ;;  %s41_s19 = sshll.u32 %s5458_s1, 4  ;;  %s42_s19 = int_to_ptr.hbm [resolvable:$true] %s41_s19 }
   0x6   :  { %22 = vsyncpa [#allocation5], 0  ;;  %s4869_s20 = smov [#allocation6]   ;;  %s65_s24 = sshll.u32 %s5460_s3, 4  ;;  %s66_s24 = int_to_ptr.hbm [resolvable:$true] %s65_s24 }
   0x7   :  { %s43_s21 = sshll.u32 %s4869_s20, 4  ;;  %s4870_s25 = smov [#allocation9]   ;;  %s44_s21 = int_to_ptr.vmem [resolvable:$true] %s43_s21 }
   0x8   :  { %46 = dma.hbm_to_vmem [thread:$0]  %s42_s19, 32, %s44_s21, [#allocation7]  }
   0x9   :  { %s67_s26 = sshll.u32 %s4870_s25, 4  ;;  %s87_s29 = sshll.u32 %s5462_s5, 4  ;;  %s68_s26 = int_to_ptr.vmem [resolvable:$true] %s67_s26  ;;  %s88_s29 = int_to_ptr.hbm [resolvable:$true] %s87_s29 }
   0xa   :  { %70 = dma.hbm_to_vmem [thread:$0]  %s66_s24, 96, %s68_s26, [#allocation10]  }
   0xb   :  { %s113_s12 = sshll.u32 %s5465_s8, 4  ;;  %s4871_s13 = smov [#allocation12]   ;;  %s114_s12 = int_to_ptr.hbm [resolvable:$true] %s113_s12 }
   0xc   :  { %s89_s14 = sshll.u32 %s4871_s13, 4  ;;  %s4872_s3 = smov [#allocation15]   ;;  %s90_s14 = int_to_ptr.vmem [resolvable:$true] %s89_s14 }
   0xd   :  { %92 = dma.hbm_to_vmem [thread:$0]  %s88_s29, 16, %s90_s14, [#allocation13]  }
   0xe   :  { %s115_s15 = sshll.u32 %s4872_s3, 4  ;;  %s27_s18 = sshll.u32 %s5457_s0, 4  ;;  %s116_s15 = int_to_ptr.vmem [resolvable:$true] %s115_s15  ;;  %s28_s18 = int_to_ptr.hbm [resolvable:$true] %s27_s18 }
   0xf   :  { %118 = dma.hbm_to_vmem [thread:$0]  %s114_s12, 16, %s116_s15, [#allocation16]  }
  0x10   :  { %s4873_s5 = smov [#allocation3]   ;;  %s51_s8 = sshll.u32 %s5459_s2, 4  ;;  %s52_s8 = int_to_ptr.hbm [resolvable:$true] %s51_s8 }
  0x11   :  { %s29_s19 = sshll.u32 %s4873_s5, 4  ;;  %s4874_s22 = smov 384   ;;  %s30_s19 = int_to_ptr.vmem [resolvable:$true] %s29_s19 }
  0x12   :  { %s4875_s23 = smov 24   ;;  %s4876_s24 = smov [#allocation8]  }
  0x13   :  { %35 = dma.hbm_to_vmem [thread:$0]  %s28_s18, 768, %s30_s19, [#allocation4], %s4874_s22, %s4874_s22, %s4875_s23  }
  0x14   :  { %s53_s25 = sshll.u32 %s4876_s24, 4  ;;  %s76_s0 = sshll.u32 %s5461_s4, 4  ;;  %s54_s25 = int_to_ptr.vmem [resolvable:$true] %s53_s25  ;;  %s77_s0 = int_to_ptr.hbm [resolvable:$true] %s76_s0 }
  0x15   :  { %59 = dma.hbm_to_vmem [thread:$0]  %s52_s8, 36864, %s54_s25, [#allocation7], %s4874_s22, %s4874_s22, %s4875_s23  }
  0x16   :  { %s99_s1 = sshll.u32 %s5464_s7, 4  ;;  %s4877_s30 = smov [#allocation11]   ;;  %s100_s1 = int_to_ptr.hbm [resolvable:$true] %s99_s1 }
  0x17   :  { %s78_s12 = sshll.u32 %s4877_s30, 4  ;;  %s4878_s2 = smov [#allocation14]   ;;  %s79_s12 = int_to_ptr.vmem [resolvable:$true] %s78_s12 }
  0x18   :  { %81 = dma.hbm_to_vmem [thread:$0]  %s77_s0, 128, %s79_s12, [#allocation10]  }
  0x19   :  { %s101_s13 = sshll.u32 %s4878_s2, 4  ;;  %s4879_s14 = smov 128   ;;  %s102_s13 = int_to_ptr.vmem [resolvable:$true] %s101_s13 }
  0x1a   :  { %s4880_s3 = smov 8   ;;  %s123_s16 = sshll.u32 %s5466_s9, 4  ;;  %s124_s16 = int_to_ptr.hbm [resolvable:$true] %s123_s16 }
  0x1b   :  { %107 = dma.hbm_to_vmem [thread:$0]  %s100_s1, 512, %s102_s13, [#allocation13], %s4879_s14, %s4879_s14, %s4880_s3  }
  0x1c   :  { %s4881_s17 = smov [#allocation17]   ;;  %s137_s19 = sshll.u32 %s5467_s10, 4  ;;  %s138_s19 = int_to_ptr.hbm [resolvable:$true] %s137_s19 }
  0x1d   :  { %s125_s18 = sshll.u32 %s4881_s17, 4  ;;  %s4882_s20 = smov [#allocation18]   ;;  %s126_s18 = int_to_ptr.vmem [resolvable:$true] %s125_s18 }
  0x1e   :  { %131 = dma.hbm_to_vmem [thread:$0]  %s124_s16, 1024, %s126_s18, [#allocation16], %s4879_s14, %s4879_s14, %s4880_s3  }
  0x1f   :  { %s139_s21 = sshll.u32 %s4882_s20, 4  ;;  %s140_s21 = int_to_ptr.vmem [resolvable:$true] %s139_s21 }
  0x20   :  { %142 = dma.hbm_to_vmem [thread:$0]  %s138_s19, 16, %s140_s21, [#allocation19]  }
  0x21   :  { %4855 = dma.done.wait [#allocation4], 768  }
  0x22   :  { %4856 = vsyncadd [#allocation4], 4294966528 }
  0x23   :  { %4857 = dma.done.wait [#allocation7], 36896  }
  0x24   :  { %4858 = vsyncadd [#allocation7], 4294930400 }
  0x25   :  { %4859 = dma.done.wait [#allocation10], 224  }
  0x26   :  { %4860 = vsyncadd [#allocation10], 4294967072 }
  0x27   :  { %4861 = dma.done.wait [#allocation13], 528  }
  0x28   :  { %4862 = vsyncadd [#allocation13], 4294966768 }
  0x29   :  { %4863 = dma.done.wait [#allocation16], 1040  }
  0x2a   :  { %4864 = vsyncadd [#allocation16], 4294966256 }
  0x2b   :  { %4865 = dma.done.wait [#allocation19], 16  }
  0x2c   :  { %4866 = vsyncadd [#allocation19], 4294967280  ;;  %v3268_v0 = vld [vmem:[#allocation8 + $0x150] sm:$0xf]  ;;  %v4304_v1 = vld [vmem:[#allocation8 + $0x164] sm:$0xf0] }
  0x2d   :  { %v3460_v2 = vld [vmem:[#allocation8 + $0x2d0] sm:$0xf]  ;;  %v3269_v3 = vor.u32 %v4304_v1, %v3268_v0  ;;  %v4352_v4 = vld [vmem:[#allocation8 + $0x2e4] sm:$0xf0]  ;;  %v3244_v11 = vld [vmem:[#allocation8 + $0x120] sm:$0xf] }
  0x2e   :  { %v3652_v5 = vld [vmem:[#allocation8 + $0x450] sm:$0xf]  ;;  %v4400_v6 = vld [vmem:[#allocation8 + $0x464] sm:$0xf0]  ;;  %v3461_v7 = vor.u32 %v4352_v4, %v3460_v2  ;;  %v4298_v13 = vld [vmem:[#allocation8 + $0x134] sm:$0xf0] }
  0x2f   :  { %v3653_v8 = vor.u32 %v4400_v6, %v3652_v5  ;;  %v3844_v9 = vld [vmem:[#allocation8 + $0x5d0] sm:$0xf]  ;;  %v4448_v10 = vld [vmem:[#allocation8 + $0x5e4] sm:$0xf0]  ;;  %1967 = vmatpush.bf16.msra.mxu0 %v3269_v3  ;;  %v3436_v14 = vld [vmem:[#allocation8 + $0x2a0] sm:$0xf]  ;;  %v3245_v16 = vor.u32 %v4298_v13, %v3244_v11 }
  0x30   :  { %v3845_v12 = vor.u32 %v4448_v10, %v3844_v9  ;;  %v4346_v15 = vld [vmem:[#allocation8 + $0x2b4] sm:$0xf0]  ;;  %1981 = vmatpush.bf16.msra.mxu1 %v3461_v7  ;;  %v3628_v18 = vld [vmem:[#allocation8 + $0x420] sm:$0xf]  ;;  %v3220_v23 = vld [vmem:[#allocation8 + $0xf0] sm:$0xf] }
  0x31   :  { %1995 = vmatpush.bf16.msra.mxu2 %v3653_v8  ;;  %v3437_v17 = vor.u32 %v4346_v15, %v3436_v14  ;;  %v4394_v19 = vld [vmem:[#allocation8 + $0x434] sm:$0xf0]  ;;  %v3820_v20 = vld [vmem:[#allocation8 + $0x5a0] sm:$0xf]  ;;  %v4292_v24 = vld [vmem:[#allocation8 + $0x104] sm:$0xf0] }
  0x32   :  { %2009 = vmatpush.bf16.msra.mxu3 %v3845_v12  ;;  %v3629_v21 = vor.u32 %v4394_v19, %v3628_v18  ;;  %v4442_v22 = vld [vmem:[#allocation8 + $0x5b4] sm:$0xf0]  ;;  %v3412_v26 = vld [vmem:[#allocation8 + $0x270] sm:$0xf]  ;;  %v4340_v27 = vld [vmem:[#allocation8 + $0x284] sm:$0xf0]  ;;  %v3221_v29 = vor.u32 %v4292_v24, %v3220_v23 }
  0x33   :  { %v3821_v25 = vor.u32 %v4442_v22, %v3820_v20  ;;  %v3604_v28 = vld [vmem:[#allocation8 + $0x3f0] sm:$0xf]  ;;  %1968 = vmatpush.bf16.msra.mxu0 %v3245_v16  ;;  %v4388_v30 = vld [vmem:[#allocation8 + $0x404] sm:$0xf0]  ;;  %v3413_v33 = vor.u32 %v4340_v27, %v3412_v26  ;;  %v3196_v35 = vld [vmem:[#allocation8 + $0xc0] sm:$0xf] }
  0x34   :  { %v3796_v31 = vld [vmem:[#allocation8 + $0x570] sm:$0xf]  ;;  %v4436_v32 = vld [vmem:[#allocation8 + $0x584] sm:$0xf0]  ;;  %1982 = vmatpush.bf16.msra.mxu1 %v3437_v17  ;;  %v3605_v34 = vor.u32 %v4388_v30, %v3604_v28  ;;  %v4286_v36 = vld [vmem:[#allocation8 + $0xd4] sm:$0xf0] }
  0x35   :  { %1996 = vmatpush.bf16.msra.mxu2 %v3629_v21  ;;  %v3388_v37 = vld [vmem:[#allocation8 + $0x240] sm:$0xf]  ;;  %v3797_v38 = vor.u32 %v4436_v32, %v3796_v31  ;;  %v4334_v39 = vld [vmem:[#allocation8 + $0x254] sm:$0xf0]  ;;  %v3197_v44 = vor.u32 %v4286_v36, %v3196_v35  ;;  %v3172_v47 = vld [vmem:[#allocation8 + $0x90] sm:$0xf] }
  0x36   :  { %2010 = vmatpush.bf16.msra.mxu3 %v3821_v25  ;;  %v3580_v40 = vld [vmem:[#allocation8 + $0x3c0] sm:$0xf]  ;;  %v4382_v41 = vld [vmem:[#allocation8 + $0x3d4] sm:$0xf0]  ;;  %v3389_v45 = vor.u32 %v4334_v39, %v3388_v37  ;;  %v4280_v48 = vld [vmem:[#allocation8 + $0xa4] sm:$0xf0] }
  0x37   :  { %v3772_v42 = vld [vmem:[#allocation8 + $0x540] sm:$0xf]  ;;  %v4430_v43 = vld [vmem:[#allocation8 + $0x554] sm:$0xf0]  ;;  %1969 = vmatpush.bf16.msra.mxu0 %v3221_v29  ;;  %v3581_v46 = vor.u32 %v4382_v41, %v3580_v40  ;;  %v3364_v49 = vld [vmem:[#allocation8 + $0x210] sm:$0xf]  ;;  %v3173_v56 = vor.u32 %v4280_v48, %v3172_v47 }
  0x38   :  { %1983 = vmatpush.bf16.msra.mxu1 %v3413_v33  ;;  %v3773_v50 = vor.u32 %v4430_v43, %v3772_v42  ;;  %v4328_v51 = vld [vmem:[#allocation8 + $0x224] sm:$0xf0]  ;;  %v3556_v52 = vld [vmem:[#allocation8 + $0x390] sm:$0xf]  ;;  %v3148_v59 = vld [vmem:[#allocation8 + $0x60] sm:$0xf] }
  0x39   :  { %1997 = vmatpush.bf16.msra.mxu2 %v3605_v34  ;;  %v4376_v53 = vld [vmem:[#allocation8 + $0x3a4] sm:$0xf0]  ;;  %v3748_v54 = vld [vmem:[#allocation8 + $0x510] sm:$0xf]  ;;  %v3365_v57 = vor.u32 %v4328_v51, %v3364_v49  ;;  %v4274_v60 = vld [vmem:[#allocation8 + $0x74] sm:$0xf0] }
  0x3a   :  { %2011 = vmatpush.bf16.msra.mxu3 %v3797_v38  ;;  %v4424_v55 = vld [vmem:[#allocation8 + $0x524] sm:$0xf0]  ;;  %v3557_v58 = vor.u32 %v4376_v53, %v3556_v52  ;;  %v3340_v61 = vld [vmem:[#allocation8 + $0x1e0] sm:$0xf]  ;;  %v4322_v63 = vld [vmem:[#allocation8 + $0x1f4] sm:$0xf0]  ;;  %v3149_v4 = vor.u32 %v4274_v60, %v3148_v59 }
  0x3b   :  { %1970 = vmatpush.bf16.msra.mxu0 %v3197_v44  ;;  %v3749_v62 = vor.u32 %v4424_v55, %v3748_v54  ;;  %v3532_v0 = vld [vmem:[#allocation8 + $0x360] sm:$0xf]  ;;  %v4370_v1 = vld [vmem:[#allocation8 + $0x374] sm:$0xf0]  ;;  %v3341_v5 = vor.u32 %v4322_v63, %v3340_v61  ;;  %v3124_v7 = vld [vmem:[#allocation8 + $0x30] sm:$0xf] }
  0x3c   :  { %1984 = vmatpush.bf16.msra.mxu1 %v3389_v45  ;;  %v3724_v2 = vld [vmem:[#allocation8 + $0x4e0] sm:$0xf]  ;;  %v4418_v3 = vld [vmem:[#allocation8 + $0x4f4] sm:$0xf0]  ;;  %v3533_v6 = vor.u32 %v4370_v1, %v3532_v0  ;;  %v4268_v8 = vld [vmem:[#allocation8 + $0x44] sm:$0xf0] }
  0x3d   :  { %1998 = vmatpush.bf16.msra.mxu2 %v3581_v46  ;;  %v3316_v9 = vld [vmem:[#allocation8 + $0x1b0] sm:$0xf]  ;;  %v3725_v10 = vor.u32 %v4418_v3, %v3724_v2  ;;  %v4316_v11 = vld [vmem:[#allocation8 + $0x1c4] sm:$0xf0]  ;;  %v3125_v16 = vor.u32 %v4268_v8, %v3124_v7  ;;  %v3100_v17 = vld [vmem:[#allocation8] sm:$0xf] }
  0x3e   :  { %2012 = vmatpush.bf16.msra.mxu3 %v3773_v50  ;;  %v3508_v12 = vld [vmem:[#allocation8 + $0x330] sm:$0xf]  ;;  %v4364_v13 = vld [vmem:[#allocation8 + $0x344] sm:$0xf0]  ;;  %v4262_v18 = vld [vmem:[#allocation8 + $0x14] sm:$0xf0]  ;;  %v3317_v19 = vor.u32 %v4316_v11, %v3316_v9 }
  0x3f   :  { %1971 = vmatpush.bf16.msra.mxu0 %v3173_v56  ;;  %v3700_v14 = vld [vmem:[#allocation8 + $0x4b0] sm:$0xf]  ;;  %v4412_v15 = vld [vmem:[#allocation8 + $0x4c4] sm:$0xf0]  ;;  %v3509_v20 = vor.u32 %v4364_v13, %v3508_v12  ;;  %v3292_v21 = vld [vmem:[#allocation8 + $0x180] sm:$0xf]  ;;  %v3101_v31 = vor.u32 %v4262_v18, %v3100_v17 }
  0x40   :  { %1985 = vmatpush.bf16.msra.mxu1 %v3365_v57  ;;  %v4310_v22 = vld [vmem:[#allocation8 + $0x194] sm:$0xf0]  ;;  %v3484_v23 = vld [vmem:[#allocation8 + $0x300] sm:$0xf]  ;;  %v3701_v24 = vor.u32 %v4412_v15, %v3700_v14  ;;  %v4036_v28 = vld [vmem:[#allocation8 + $0x750] sm:$0xf] }
  0x41   :  { %1999 = vmatpush.bf16.msra.mxu2 %v3557_v58  ;;  %v4358_v25 = vld [vmem:[#allocation8 + $0x314] sm:$0xf0]  ;;  %v3676_v26 = vld [vmem:[#allocation8 + $0x480] sm:$0xf]  ;;  %v4496_v29 = vld [vmem:[#allocation8 + $0x764] sm:$0xf0]  ;;  %v3293_v35 = vor.u32 %v4310_v22, %v3292_v21 }
  0x42   :  { %2013 = vmatpush.bf16.msra.mxu3 %v3749_v62  ;;  %v4406_v27 = vld [vmem:[#allocation8 + $0x494] sm:$0xf0]  ;;  %v4228_v30 = vld [vmem:[#allocation8 + $0x8d0] sm:$0xf]  ;;  %v4544_v32 = vld [vmem:[#allocation8 + $0x8e4] sm:$0xf0]  ;;  %v3485_v36 = vor.u32 %v4358_v25, %v3484_v23  ;;  %v4037_v40 = vor.u32 %v4496_v29, %v4036_v28 }
  0x43   :  { %1972 = vmatpush.bf16.msra.mxu0 %v3149_v4  ;;  %v4301_v33 = vld [vmem:[#allocation8 + $0x154] sm:$0xf]  ;;  %v3270_v34 = vld [vmem:[#allocation8 + $0x168] sm:$0xf0]  ;;  %v3677_v39 = vor.u32 %v4406_v27, %v3676_v26  ;;  %v4012_v41 = vld [vmem:[#allocation8 + $0x720] sm:$0xf]  ;;  %v4229_v42 = vor.u32 %v4544_v32, %v4228_v30 }
  0x44   :  { %1986 = vmatpush.bf16.msra.mxu1 %v3341_v5  ;;  %v4349_v37 = vld [vmem:[#allocation8 + $0x2d4] sm:$0xf]  ;;  %v3462_v38 = vld [vmem:[#allocation8 + $0x2e8] sm:$0xf0]  ;;  %v3273_v43 = vor.u32 %v4301_v33, %v3270_v34  ;;  %v4490_v44 = vld [vmem:[#allocation8 + $0x734] sm:$0xf0] }
  0x45   :  { %2000 = vmatpush.bf16.msra.mxu2 %v3533_v6  ;;  %v4204_v45 = vld [vmem:[#allocation8 + $0x8a0] sm:$0xf]  ;;  %v4538_v46 = vld [vmem:[#allocation8 + $0x8b4] sm:$0xf0]  ;;  %v3465_v47 = vor.u32 %v4349_v37, %v3462_v38  ;;  %v4295_v48 = vld [vmem:[#allocation8 + $0x124] sm:$0xf]  ;;  %v4013_v54 = vor.u32 %v4490_v44, %v4012_v41 }
  0x46   :  { %2014 = vmatpush.bf16.msra.mxu3 %v3725_v10  ;;  %v3246_v49 = vld [vmem:[#allocation8 + $0x138] sm:$0xf0]  ;;  %v4343_v50 = vld [vmem:[#allocation8 + $0x2a4] sm:$0xf]  ;;  %v3076_v52 = vld [vmem:[#allocation3] sm:$0xf]  ;;  %v4205_v58 = vor.u32 %v4538_v46, %v4204_v45 }
  0x47   :  { %1973 = vmatpush.bf16.msra.mxu0 %v3125_v16  ;;  %v3438_v51 = vld [vmem:[#allocation8 + $0x2b8] sm:$0xf0]  ;;  %v4256_v53 = vld [vmem:[#allocation3 + $0x14] sm:$0xf0]  ;;  %v3988_v55 = vld [vmem:[#allocation8 + $0x6f0] sm:$0xf]  ;;  %v3249_v59 = vor.u32 %v4295_v48, %v3246_v49 }
  0x48   :  { %1987 = vmatpush.bf16.msra.mxu1 %v3317_v19  ;;  %v4484_v56 = vld [vmem:[#allocation8 + $0x704] sm:$0xf0]  ;;  %v4975_v57 = vor.u32 %v4256_v53, %v3076_v52  ;;  %v4180_v60 = vld [vmem:[#allocation8 + $0x870] sm:$0xf]  ;;  %v4289_v62 = vld [vmem:[#allocation8 + $0xf4] sm:$0xf]  ;;  %v3441_v63 = vor.u32 %v4343_v50, %v3438_v51 }
  0x49   :  { %2001 = vmatpush.bf16.msra.mxu2 %v3509_v20  ;;  %v4532_v61 = vld [vmem:[#allocation8 + $0x884] sm:$0xf0]  ;;  %v3222_v0 = vld [vmem:[#allocation8 + $0x108] sm:$0xf0]  ;;  %v4253_v1 = vld [vmem:[#allocation3 + $0x4] sm:$0xf]  ;;  %v3989_v7 = vor.u32 %v4484_v56, %v3988_v55 }
  0x4a   :  { %2015 = vmatpush.bf16.msra.mxu3 %v3701_v24  ;;  %v3078_v2 = vld [vmem:[#allocation3 + $0x18] sm:$0xf0]  ;;  %v4337_v3 = vld [vmem:[#allocation8 + $0x274] sm:$0xf]  ;;  %v3964_v5 = vld [vmem:[#allocation8 + $0x6c0] sm:$0xf]  ;;  %v4181_v11 = vor.u32 %v4532_v61, %v4180_v60  ;;  %v3225_v12 = vor.u32 %v4289_v62, %v3222_v0 }
  0x4b   :  { %1974 = vmatpush.bf16.msra.mxu0 %v3101_v31  ;;  %v3414_v4 = vld [vmem:[#allocation8 + $0x288] sm:$0xf0]  ;;  %v4978_v6 = vor.u32 %v4253_v1, %v3078_v2  ;;  %v4478_v8 = vld [vmem:[#allocation8 + $0x6d4] sm:$0xf0]  ;;  %v4156_v9 = vld [vmem:[#allocation8 + $0x840] sm:$0xf] }
  0x4c   :  { %1988 = vmatpush.bf16.msra.mxu1 %v3293_v35  ;;  %v4526_v10 = vld [vmem:[#allocation8 + $0x854] sm:$0xf0]  ;;  %v4283_v13 = vld [vmem:[#allocation8 + $0xc4] sm:$0xf]  ;;  %v3198_v14 = vld [vmem:[#allocation8 + $0xd8] sm:$0xf0]  ;;  %v3417_v16 = vor.u32 %v4337_v3, %v3414_v4  ;;  %v3965_v24 = vor.u32 %v4478_v8, %v3964_v5 }
  0x4d   :  { %2002 = vmatpush.bf16.msra.mxu2 %v3485_v36  ;;  %v3084_v15 = vld [vmem:[#allocation3 + $0x8] sm:$0xf]  ;;  %v4257_v17 = vld [vmem:[#allocation3 + $0x1c] sm:$0xf0]  ;;  %v4254_v18 = vld [vmem:[#allocation3 + $0xc] sm:$0xf]  ;;  %v4157_v25 = vor.u32 %v4526_v10, %v4156_v9  ;;  %v3201_v26 = vor.u32 %v4283_v13, %v3198_v14 }
  0x4e   :  { %2016 = vmatpush.bf16.msra.mxu3 %v3677_v39  ;;  %1975 = vmatmul.bf16.vlgmr.msra.gmra.mxu0 %v4975_v57  ;;  %v3086_v19 = vld [vmem:[#allocation3 + $0x20] sm:$0xf0]  ;;  %v4331_v20 = vld [vmem:[#allocation8 + $0x244] sm:$0xf]  ;;  %v3390_v21 = vld [vmem:[#allocation8 + $0x258] sm:$0xf0]  ;;  %v4981_v22 = vor.u32 %v4257_v17, %v3084_v15 }
  0x4f   :  { %2023 = vmatpush.bf16.msrb.mxu0 %v4037_v40  ;;  %1989 = vmatmul.bf16.vlgmr.msra.gmra.mxu1 %v4978_v6  ;;  %v4983_v23 = vor.u32 %v4254_v18, %v3086_v19  ;;  %v3940_v27 = vld [vmem:[#allocation8 + $0x690] sm:$0xf]  ;;  %v4472_v28 = vld [vmem:[#allocation8 + $0x6a4] sm:$0xf0]  ;;  %v3393_v30 = vor.u32 %v4331_v20, %v3390_v21  ;;  %v4277_v32 = vld [vmem:[#allocation8 + $0x94] sm:$0xf] }
  0x50   :  { %2037 = vmatpush.bf16.msrb.mxu1 %v4229_v42  ;;  %v4132_v29 = vld [vmem:[#allocation8 + $0x810] sm:$0xf]  ;;  %v4520_v31 = vld [vmem:[#allocation8 + $0x824] sm:$0xf0]  ;;  %v3174_v33 = vld [vmem:[#allocation8 + $0xa8] sm:$0xf0]  ;;  %2003 = vmatmul.bf16.vlgmr.msra.gmra.mxu2 %v4981_v22  ;;  %v3941_v36 = vor.u32 %v4472_v28, %v3940_v27 }
  0x51   :  { %2051 = vmatpush.bf16.msrb.mxu2 %v3273_v43  ;;  %v4325_v34 = vld [vmem:[#allocation8 + $0x214] sm:$0xf]  ;;  %v3366_v35 = vld [vmem:[#allocation8 + $0x228] sm:$0xf0]  ;;  %2017 = vmatmul.bf16.vlgmr.msra.gmra.mxu3 %v4983_v23  ;;  %v4133_v37 = vor.u32 %v4520_v31, %v4132_v29  ;;  %v3177_v38 = vor.u32 %v4277_v32, %v3174_v33  ;;  %v3916_v39 = vld [vmem:[#allocation8 + $0x660] sm:$0xf] }
  0x52   :  { %2065 = vmatpush.bf16.msrb.mxu3 %v3465_v47  ;;  %v4466_v40 = vld [vmem:[#allocation8 + $0x674] sm:$0xf0]  ;;  %v4108_v41 = vld [vmem:[#allocation8 + $0x7e0] sm:$0xf]  ;;  %v3369_v42 = vor.u32 %v4325_v34, %v3366_v35  ;;  %v4271_v44 = vld [vmem:[#allocation8 + $0x64] sm:$0xf] }
  0x53   :  { %2024 = vmatpush.bf16.msrb.mxu0 %v4013_v54  ;;  %v4514_v43 = vld [vmem:[#allocation8 + $0x7f4] sm:$0xf0]  ;;  %v3150_v45 = vld [vmem:[#allocation8 + $0x78] sm:$0xf0]  ;;  %v4319_v46 = vld [vmem:[#allocation8 + $0x1e4] sm:$0xf]  ;;  %v3917_v48 = vor.u32 %v4466_v40, %v3916_v39 }
  0x54   :  { %2038 = vmatpush.bf16.msrb.mxu1 %v4205_v58  ;;  %v3342_v47 = vld [vmem:[#allocation8 + $0x1f8] sm:$0xf0]  ;;  %v4109_v49 = vor.u32 %v4514_v43, %v4108_v41  ;;  %v3153_v50 = vor.u32 %v4271_v44, %v3150_v45  ;;  %v3892_v51 = vld [vmem:[#allocation8 + $0x630] sm:$0xf]  ;;  %v4460_v52 = vld [vmem:[#allocation8 + $0x644] sm:$0xf0] }
  0x55   :  { %2052 = vmatpush.bf16.msrb.mxu2 %v3249_v59  ;;  %v4084_v53 = vld [vmem:[#allocation8 + $0x7b0] sm:$0xf]  ;;  %v3345_v54 = vor.u32 %v4319_v46, %v3342_v47  ;;  %v4508_v55 = vld [vmem:[#allocation8 + $0x7c4] sm:$0xf0]  ;;  %v4265_v56 = vld [vmem:[#allocation8 + $0x34] sm:$0xf]  ;;  %v3893_v61 = vor.u32 %v4460_v52, %v3892_v51 }
  0x56   :  { %2066 = vmatpush.bf16.msrb.mxu3 %v3441_v63  ;;  %v3126_v58 = vld [vmem:[#allocation8 + $0x48] sm:$0xf0]  ;;  %v4313_v59 = vld [vmem:[#allocation8 + $0x1b4] sm:$0xf]  ;;  %v3868_v62 = vld [vmem:[#allocation8 + $0x600] sm:$0xf]  ;;  %v4085_v1 = vor.u32 %v4508_v55, %v4084_v53 }
  0x57   :  { %2025 = vmatpush.bf16.msrb.mxu0 %v3989_v7  ;;  %v3318_v60 = vld [vmem:[#allocation8 + $0x1c8] sm:$0xf0]  ;;  %v4454_v63 = vld [vmem:[#allocation8 + $0x614] sm:$0xf0]  ;;  %v4060_v0 = vld [vmem:[#allocation8 + $0x780] sm:$0xf]  ;;  %v3129_v2 = vor.u32 %v4265_v56, %v3126_v58 }
  0x58   :  { %2039 = vmatpush.bf16.msrb.mxu1 %v4181_v11  ;;  %v4502_v3 = vld [vmem:[#allocation8 + $0x794] sm:$0xf0]  ;;  %v4259_v4 = vld [vmem:[#allocation8 + $0x4] sm:$0xf]  ;;  %v3102_v5 = vld [vmem:[#allocation8 + $0x18] sm:$0xf0]  ;;  %v3321_v7 = vor.u32 %v4313_v59, %v3318_v60  ;;  %v3869_v14 = vor.u32 %v4454_v63, %v3868_v62 }
  0x59   :  { %2053 = vmatpush.bf16.msrb.mxu2 %v3225_v12  ;;  %v4307_v8 = vld [vmem:[#allocation8 + $0x184] sm:$0xf]  ;;  %v3294_v9 = vld [vmem:[#allocation8 + $0x198] sm:$0xf0]  ;;  %v4397_v10 = vld [vmem:[#allocation8 + $0x454] sm:$0xf]  ;;  %v4061_v18 = vor.u32 %v4502_v3, %v4060_v0  ;;  %v3105_v19 = vor.u32 %v4259_v4, %v3102_v5 }
  0x5a   :  { %2067 = vmatpush.bf16.msrb.mxu3 %v3417_v16  ;;  %v3654_v11 = vld [vmem:[#allocation8 + $0x468] sm:$0xf0]  ;;  %v4445_v12 = vld [vmem:[#allocation8 + $0x5d4] sm:$0xf]  ;;  %v3092_v21 = vld [vmem:[#allocation3 + $0x10] sm:$0xf] }
  0x5b   :  { %2026 = vmatpush.bf16.msrb.mxu0 %v3965_v24  ;;  %v3846_v13 = vld [vmem:[#allocation8 + $0x5e8] sm:$0xf0]  ;;  %v4493_v15 = vld [vmem:[#allocation8 + $0x754] sm:$0xf]  ;;  %v4255_v27 = vld [vmem:[#allocation3 + $0x14] sm:$0xf] }
  0x5c   :  { %2040 = vmatpush.bf16.msrb.mxu1 %v4157_v25  ;;  %v4038_v16 = vld [vmem:[#allocation8 + $0x768] sm:$0xf0]  ;;  %v4541_v17 = vld [vmem:[#allocation8 + $0x8d4] sm:$0xf]  ;;  %v3297_v25 = vor.u32 %v4307_v8, %v3294_v9  ;;  %v3094_v28 = vld [vmem:[#allocation3 + $0x28] sm:$0xf0]  ;;  %v3849_v29 = vor.u32 %v4445_v12, %v3846_v13 }
  0x5d   :  { %2054 = vmatpush.bf16.msrb.mxu2 %v3201_v26  ;;  %v4230_v20 = vld [vmem:[#allocation8 + $0x8e8] sm:$0xf0]  ;;  %v4258_v24 = vld [vmem:[#allocation3 + $0x24] sm:$0xf0]  ;;  %v3657_v26 = vor.u32 %v4397_v10, %v3654_v11  ;;  %v4391_v31 = vld [vmem:[#allocation8 + $0x424] sm:$0xf]  ;;  %v4989_v39 = vor.u32 %v4255_v27, %v3094_v28 }
  0x5e   :  { %2068 = vmatpush.bf16.msrb.mxu3 %v3393_v30  ;;  %v4041_v30 = vor.u32 %v4493_v15, %v4038_v16  ;;  %v3630_v32 = vld [vmem:[#allocation8 + $0x438] sm:$0xf0]  ;;  %v4439_v33 = vld [vmem:[#allocation8 + $0x5a4] sm:$0xf]  ;;  %v4233_v34 = vor.u32 %v4541_v17, %v4230_v20  ;;  %v4987_v35 = vor.u32 %v4258_v24, %v3092_v21  ;;  %v4385_v45 = vld [vmem:[#allocation8 + $0x3f4] sm:$0xf] }
  0x5f   :  { %2027 = vmatpush.bf16.msrb.mxu0 %v3941_v36  ;;  %v3822_v36 = vld [vmem:[#allocation8 + $0x5b8] sm:$0xf0]  ;;  %v4535_v40 = vld [vmem:[#allocation8 + $0x8a4] sm:$0xf]  ;;  %v3606_v46 = vld [vmem:[#allocation8 + $0x408] sm:$0xf0] }
  0x60   :  { %2041 = vmatpush.bf16.msrb.mxu1 %v4133_v37  ;;  %v4487_v37 = vld [vmem:[#allocation8 + $0x724] sm:$0xf]  ;;  %v4206_v41 = vld [vmem:[#allocation8 + $0x8b8] sm:$0xf0]  ;;  %v3825_v43 = vor.u32 %v4439_v33, %v3822_v36  ;;  %v4433_v47 = vld [vmem:[#allocation8 + $0x574] sm:$0xf] }
  0x61   :  { %2055 = vmatpush.bf16.msrb.mxu2 %v3177_v38  ;;  %v4014_v38 = vld [vmem:[#allocation8 + $0x738] sm:$0xf0]  ;;  %v3990_v51 = vld [vmem:[#allocation8 + $0x708] sm:$0xf0]  ;;  %v4529_v52 = vld [vmem:[#allocation8 + $0x874] sm:$0xf] }
  0x62   :  { %2069 = vmatpush.bf16.msrb.mxu3 %v3369_v42  ;;  %v3633_v42 = vor.u32 %v4391_v31, %v3630_v32  ;;  %v4017_v44 = vor.u32 %v4487_v37, %v4014_v38  ;;  %v4182_v53 = vld [vmem:[#allocation8 + $0x888] sm:$0xf0]  ;;  %v4379_v58 = vld [vmem:[#allocation8 + $0x3c4] sm:$0xf]  ;;  %v3582_v59 = vld [vmem:[#allocation8 + $0x3d8] sm:$0xf0] }
  0x63   :  { %2028 = vmatpush.bf16.msrb.mxu0 %v3917_v48  ;;  %v4209_v48 = vor.u32 %v4535_v40, %v4206_v41  ;;  %v4427_v60 = vld [vmem:[#allocation8 + $0x544] sm:$0xf]  ;;  %v3774_v62 = vld [vmem:[#allocation8 + $0x558] sm:$0xf0]  ;;  %v3585_v3 = vor.u32 %v4379_v58, %v3582_v59  ;;  %v3558_v8 = vld [vmem:[#allocation8 + $0x3a8] sm:$0xf0] }
  0x64   :  { %2042 = vmatpush.bf16.msrb.mxu1 %v4109_v49  ;;  %v3798_v49 = vld [vmem:[#allocation8 + $0x588] sm:$0xf0]  ;;  %v4475_v63 = vld [vmem:[#allocation8 + $0x6c4] sm:$0xf]  ;;  %v3966_v0 = vld [vmem:[#allocation8 + $0x6d8] sm:$0xf0]  ;;  %v3777_v4 = vor.u32 %v4427_v60, %v3774_v62 }
  0x65   :  { %2056 = vmatpush.bf16.msrb.mxu2 %v3153_v50  ;;  %v4481_v50 = vld [vmem:[#allocation8 + $0x6f4] sm:$0xf]  ;;  %v3801_v55 = vor.u32 %v4433_v47, %v3798_v49  ;;  %v3969_v5 = vor.u32 %v4475_v63, %v3966_v0  ;;  %v3750_v11 = vld [vmem:[#allocation8 + $0x528] sm:$0xf0]  ;;  %v3534_v20 = vld [vmem:[#allocation8 + $0x378] sm:$0xf0] }
  0x66   :  { %2070 = vmatpush.bf16.msrb.mxu3 %v3345_v54  ;;  %v3609_v54 = vor.u32 %v4385_v45, %v3606_v46  ;;  %v3993_v56 = vor.u32 %v4481_v50, %v3990_v51  ;;  %v4421_v9 = vld [vmem:[#allocation8 + $0x514] sm:$0xf]  ;;  %v3942_v13 = vld [vmem:[#allocation8 + $0x6a8] sm:$0xf0]  ;;  %v4415_v21 = vld [vmem:[#allocation8 + $0x4e4] sm:$0xf] }
  0x67   :  { %2029 = vmatpush.bf16.msrb.mxu0 %v3893_v61  ;;  %v4185_v61 = vor.u32 %v4529_v52, %v4182_v53  ;;  %v4469_v12 = vld [vmem:[#allocation8 + $0x694] sm:$0xf]  ;;  %v4134_v15 = vld [vmem:[#allocation8 + $0x828] sm:$0xf0]  ;;  %v3753_v17 = vor.u32 %v4421_v9, %v3750_v11  ;;  %v3918_v27 = vld [vmem:[#allocation8 + $0x678] sm:$0xf0] }
  0x68   :  { %2043 = vmatpush.bf16.msrb.mxu1 %v4085_v1  ;;  %v4523_v1 = vld [vmem:[#allocation8 + $0x844] sm:$0xf]  ;;  %v4361_v33 = vld [vmem:[#allocation8 + $0x334] sm:$0xf]  ;;  %v3702_v38 = vld [vmem:[#allocation8 + $0x4c8] sm:$0xf0] }
  0x69   :  { %2057 = vmatpush.bf16.msrb.mxu2 %v3129_v2  ;;  %v4158_v2 = vld [vmem:[#allocation8 + $0x858] sm:$0xf0]  ;;  %v4511_v28 = vld [vmem:[#allocation8 + $0x7e4] sm:$0xf]  ;;  %v4409_v36 = vld [vmem:[#allocation8 + $0x4b4] sm:$0xf] }
  0x6a   :  { %2071 = vmatpush.bf16.msrb.mxu3 %v3321_v7  ;;  %v4373_v7 = vld [vmem:[#allocation8 + $0x394] sm:$0xf]  ;;  %v4161_v10 = vor.u32 %v4523_v1, %v4158_v2  ;;  %v3894_v41 = vld [vmem:[#allocation8 + $0x648] sm:$0xf0]  ;;  %v3486_v46 = vld [vmem:[#allocation8 + $0x318] sm:$0xf0]  ;;  %v3705_v49 = vor.u32 %v4409_v36, %v3702_v38 }
  0x6b   :  { %2030 = vmatpush.bf16.msrb.mxu0 %v3869_v14  ;;  %v4517_v14 = vld [vmem:[#allocation8 + $0x814] sm:$0xf]  ;;  %v3561_v16 = vor.u32 %v4373_v7, %v3558_v8  ;;  %v4403_v47 = vld [vmem:[#allocation8 + $0x484] sm:$0xf]  ;;  %v3870_v52 = vld [vmem:[#allocation8 + $0x618] sm:$0xf0] }
  0x6c   :  { %2044 = vmatpush.bf16.msrb.mxu1 %v4061_v18  ;;  %v3945_v18 = vor.u32 %v4469_v12, %v3942_v13  ;;  %v4137_v24 = vor.u32 %v4517_v14, %v4134_v15  ;;  %v4457_v40 = vld [vmem:[#allocation8 + $0x634] sm:$0xf]  ;;  %v4451_v51 = vld [vmem:[#allocation8 + $0x604] sm:$0xf]  ;;  %v4305_v58 = vld [vmem:[#allocation8 + $0x16c] sm:$0xf0] }
  0x6d   :  { %2058 = vmatpush.bf16.msrb.mxu2 %v3105_v19  ;;  %v4367_v19 = vld [vmem:[#allocation8 + $0x364] sm:$0xf]  ;;  %v3897_v50 = vor.u32 %v4457_v40, %v3894_v41  ;;  %v3468_v59 = vld [vmem:[#allocation8 + $0x2d8] sm:$0xf]  ;;  %v4353_v60 = vld [vmem:[#allocation8 + $0x2ec] sm:$0xf0]  ;;  %v3873_v1 = vor.u32 %v4451_v51, %v3870_v52 }
  0x6e   :  { %2072 = vmatpush.bf16.msrb.mxu3 %v3297_v25  ;;  %2031 = vmatmul.bf16.vlgmr.msrb.gmra.mxu0 %v4987_v35  ;;  %v3726_v25 = vld [vmem:[#allocation8 + $0x4f8] sm:$0xf0]  ;;  %v4499_v53 = vld [vmem:[#allocation8 + $0x784] sm:$0xf]  ;;  %v3660_v62 = vld [vmem:[#allocation8 + $0x458] sm:$0xf]  ;;  %v3469_v7 = vor.u32 %v4353_v60, %v3468_v59 }
  0x6f   :  { %2079 = vmatpush.bf16.msra.mxu0 %v3657_v26  ;;  %2045 = vmatmul.bf16.vlgmr.msrb.gmra.mxu1 %v4989_v39  ;;  %v4463_v26 = vld [vmem:[#allocation8 + $0x664] sm:$0xf]  ;;  %v3729_v31 = vor.u32 %v4415_v21, %v3726_v25  ;;  %v4401_v63 = vld [vmem:[#allocation8 + $0x46c] sm:$0xf0]  ;;  %v3852_v2 = vld [vmem:[#allocation8 + $0x5d8] sm:$0xf] }
  0x70   :  { %2093 = vmatpush.bf16.msra.mxu1 %v3849_v29  ;;  %2059 = vmatmul.bf16.vlgmr.msrb.gmra.mxu2 %v4975_v57  ;;  %v4110_v29 = vld [vmem:[#allocation8 + $0x7f8] sm:$0xf0]  ;;  %v3921_v32 = vor.u32 %v4463_v26, %v3918_v27  ;;  %v3661_v8 = vor.u32 %v4401_v63, %v3660_v62  ;;  %v3252_v9 = vld [vmem:[#allocation8 + $0x128] sm:$0xf]  ;;  %v4347_v13 = vld [vmem:[#allocation8 + $0x2bc] sm:$0xf0] }
  0x71   :  { %2107 = vmatpush.bf16.msra.mxu2 %v4041_v30  ;;  %2073 = vmatmul.bf16.vlgmr.msrb.gmra.mxu3 %v4978_v6  ;;  %v3537_v30 = vor.u32 %v4367_v19, %v3534_v20  ;;  %v4113_v37 = vor.u32 %v4511_v28, %v4110_v29  ;;  %v3444_v11 = vld [vmem:[#allocation8 + $0x2a8] sm:$0xf]  ;;  %v4395_v15 = vld [vmem:[#allocation8 + $0x43c] sm:$0xf0]  ;;  %v3228_v21 = vld [vmem:[#allocation8 + $0xf8] sm:$0xf] }
  0x72   :  { %2121 = vmatpush.bf16.msra.mxu3 %v4233_v34  ;;  %v3510_v34 = vld [vmem:[#allocation8 + $0x348] sm:$0xf0]  ;;  %v3636_v14 = vld [vmem:[#allocation8 + $0x428] sm:$0xf]  ;;  %v3445_v19 = vor.u32 %v4347_v13, %v3444_v11  ;;  %v3420_v25 = vld [vmem:[#allocation8 + $0x278] sm:$0xf] }
  0x73   :  { %2080 = vmatpush.bf16.msra.mxu0 %v3633_v42  ;;  %v4505_v42 = vld [vmem:[#allocation8 + $0x7b4] sm:$0xf]  ;;  %v3513_v45 = vor.u32 %v4361_v33, %v3510_v34  ;;  %v3637_v20 = vor.u32 %v4395_v15, %v3636_v14  ;;  %v4341_v27 = vld [vmem:[#allocation8 + $0x28c] sm:$0xf0]  ;;  %v3612_v28 = vld [vmem:[#allocation8 + $0x3f8] sm:$0xf] }
  0x74   :  { %2094 = vmatpush.bf16.msra.mxu1 %v3825_v43  ;;  %v4086_v43 = vld [vmem:[#allocation8 + $0x7c8] sm:$0xf0]  ;;  %v4389_v29 = vld [vmem:[#allocation8 + $0x40c] sm:$0xf0]  ;;  %v3421_v33 = vor.u32 %v4341_v27, %v3420_v25  ;;  %v3204_v36 = vld [vmem:[#allocation8 + $0xc8] sm:$0xf] }
  0x75   :  { %2108 = vmatpush.bf16.msra.mxu2 %v4017_v44  ;;  %v4355_v44 = vld [vmem:[#allocation8 + $0x304] sm:$0xf]  ;;  %v3613_v34 = vor.u32 %v4389_v29, %v3612_v28  ;;  %v3396_v38 = vld [vmem:[#allocation8 + $0x248] sm:$0xf]  ;;  %v4335_v41 = vld [vmem:[#allocation8 + $0x25c] sm:$0xf0] }
  0x76   :  { %2122 = vmatpush.bf16.msra.mxu3 %v4209_v48  ;;  %v3678_v48 = vld [vmem:[#allocation8 + $0x498] sm:$0xf0]  ;;  %v3372_v51 = vld [vmem:[#allocation8 + $0x218] sm:$0xf]  ;;  %v3156_v62 = vld [vmem:[#allocation8 + $0x68] sm:$0xf] }
  0x77   :  { %2081 = vmatpush.bf16.msra.mxu0 %v3609_v54  ;;  %v4089_v54 = vor.u32 %v4505_v42, %v4086_v43  ;;  %v3681_v0 = vor.u32 %v4403_v47, %v3678_v48  ;;  %v3588_v42 = vld [vmem:[#allocation8 + $0x3c8] sm:$0xf]  ;;  %v4383_v43 = vld [vmem:[#allocation8 + $0x3dc] sm:$0xf0]  ;;  %v3397_v47 = vor.u32 %v4335_v41, %v3396_v38  ;;  %v3132_v11 = vld [vmem:[#allocation8 + $0x38] sm:$0xf] }
  0x78   :  { %2095 = vmatpush.bf16.msra.mxu1 %v3801_v55  ;;  %v4062_v55 = vld [vmem:[#allocation8 + $0x798] sm:$0xf0]  ;;  %v3589_v48 = vor.u32 %v4383_v43, %v3588_v42  ;;  %v4275_v63 = vld [vmem:[#allocation8 + $0x7c] sm:$0xf0]  ;;  %v3324_v13 = vld [vmem:[#allocation8 + $0x1b8] sm:$0xf] }
  0x79   :  { %2109 = vmatpush.bf16.msra.mxu2 %v3993_v56  ;;  %v3276_v56 = vld [vmem:[#allocation8 + $0x158] sm:$0xf]  ;;  %v4317_v15 = vld [vmem:[#allocation8 + $0x1cc] sm:$0xf0]  ;;  %v3300_v27 = vld [vmem:[#allocation8 + $0x188] sm:$0xf] }
  0x7a   :  { %2123 = vmatpush.bf16.msra.mxu3 %v4185_v61  ;;  %v3489_v61 = vor.u32 %v4355_v44, %v3486_v46  ;;  %v3780_v44 = vld [vmem:[#allocation8 + $0x548] sm:$0xf]  ;;  %v3325_v25 = vor.u32 %v4317_v15, %v3324_v13  ;;  %v4311_v28 = vld [vmem:[#allocation8 + $0x19c] sm:$0xf0]  ;;  %v4302_v41 = vld [vmem:[#allocation8 + $0x15c] sm:$0xf] }
  0x7b   :  { %2082 = vmatpush.bf16.msra.mxu0 %v3585_v3  ;;  %v4449_v3 = vld [vmem:[#allocation8 + $0x5ec] sm:$0xf0]  ;;  %v3492_v29 = vld [vmem:[#allocation8 + $0x308] sm:$0xf]  ;;  %v3278_v42 = vld [vmem:[#allocation8 + $0x170] sm:$0xf0]  ;;  %v3301_v43 = vor.u32 %v4311_v28, %v3300_v27 }
  0x7c   :  { %2096 = vmatpush.bf16.msra.mxu1 %v3777_v4  ;;  %v4065_v4 = vor.u32 %v4499_v53, %v4062_v55  ;;  %v3853_v12 = vor.u32 %v4449_v3, %v3852_v2  ;;  %v4329_v53 = vld [vmem:[#allocation8 + $0x22c] sm:$0xf0]  ;;  %v4323_v2 = vld [vmem:[#allocation8 + $0x1fc] sm:$0xf0]  ;;  %v3540_v3 = vld [vmem:[#allocation8 + $0x368] sm:$0xf] }
  0x7d   :  { %2110 = vmatpush.bf16.msra.mxu2 %v3969_v5  ;;  %v3277_v5 = vor.u32 %v4305_v58, %v3276_v56  ;;  %v4377_v55 = vld [vmem:[#allocation8 + $0x3ac] sm:$0xf0]  ;;  %v3756_v56 = vld [vmem:[#allocation8 + $0x518] sm:$0xf]  ;;  %v3373_v60 = vor.u32 %v4329_v53, %v3372_v51  ;;  %v4020_v51 = vld [vmem:[#allocation8 + $0x728] sm:$0xf] }
  0x7e   :  { %2124 = vmatpush.bf16.msra.mxu3 %v4161_v10  ;;  %v4299_v10 = vld [vmem:[#allocation8 + $0x13c] sm:$0xf0]  ;;  %v4425_v58 = vld [vmem:[#allocation8 + $0x52c] sm:$0xf0]  ;;  %v4212_v53 = vld [vmem:[#allocation8 + $0x8a8] sm:$0xf] }
  0x7f   :  { %2083 = vmatpush.bf16.msra.mxu0 %v3561_v16  ;;  %v3828_v16 = vld [vmem:[#allocation8 + $0x5a8] sm:$0xf]  ;;  %v3948_v27 = vld [vmem:[#allocation8 + $0x698] sm:$0xf]  ;;  %v4473_v28 = vld [vmem:[#allocation8 + $0x6ac] sm:$0xf0] }
  0x80   :  { %2097 = vmatpush.bf16.msra.mxu1 %v3753_v17  ;;  %v4443_v17 = vld [vmem:[#allocation8 + $0x5bc] sm:$0xf0]  ;;  %v3972_v13 = vld [vmem:[#allocation8 + $0x6c8] sm:$0xf]  ;;  %vm2673_vm0 = vcmask 1041408   ;;  %vm2723_vm1 = vcmask 64512  }
  0x81   :  { %2111 = vmatpush.bf16.msra.mxu2 %v3945_v18  ;;  %v3253_v18 = vor.u32 %v4299_v10, %v3252_v9  ;;  %v3829_v26 = vor.u32 %v4443_v17, %v3828_v16  ;;  %v3516_v16 = vld [vmem:[#allocation8 + $0x338] sm:$0xf]  ;;  %v4365_v17 = vld [vmem:[#allocation8 + $0x34c] sm:$0xf0]  ;;  %v4164_v15 = vld [vmem:[#allocation8 + $0x848] sm:$0xf] }
  0x82   :  { %2125 = vmatpush.bf16.msra.mxu3 %v4137_v24  ;;  %v4293_v24 = vld [vmem:[#allocation8 + $0x10c] sm:$0xf0]  ;;  %vm2675_vm2 = vcmask 1045508   ;;  %vm2677_vm3 = vcmask 1043456   ;;  %vm2689_vm4 = vcmask 1041409   ;;  %vm2691_vm5 = vcmask 1043459  }
  0x83   :  { %2084 = vmatpush.bf16.msra.mxu0 %v3537_v30  ;;  %v3804_v30 = vld [vmem:[#allocation8 + $0x578] sm:$0xf]  ;;  %vm2693_vm6 = vcmask 1045509   ;;  %vm2695_vm7 = vcmask 1047559   ;;  %vm2848_vm8 = vcmask 261120   ;;  %vm3027_vm9 = vcmask 523264  }
  0x84   :  { %2098 = vmatpush.bf16.msra.mxu1 %v3729_v31  ;;  %v4437_v31 = vld [vmem:[#allocation8 + $0x58c] sm:$0xf0]  ;;  %s3059_s16 = sshll.u32 %s5468_s11, 4  ;;  %s3060_s16 = int_to_ptr.hbm [resolvable:$true] %s3059_s16 }
  0x85   :  { %2112 = vmatpush.bf16.msra.mxu2 %v3921_v32  ;;  %v3229_v32 = vor.u32 %v4293_v24, %v3228_v21  ;;  %v3805_v40 = vor.u32 %v4437_v31, %v3804_v30  ;;  %v3108_v21 = vld [vmem:[#allocation8 + $0x8] sm:$0xf]  ;;  %v4263_v24 = vld [vmem:[#allocation8 + $0x1c] sm:$0xf0] }
  0x86   :  { %2126 = vmatpush.bf16.msra.mxu3 %v4113_v37  ;;  %v4287_v37 = vld [vmem:[#allocation8 + $0xdc] sm:$0xf0]  ;;  %v3109_v38 = vor.u32 %v4263_v24, %v3108_v21  ;;  %v3398_v21 = vld [vmem:[#allocation8 + $0x260] sm:$0xf0] }
  0x87   :  { %2085 = vmatpush.bf16.msra.mxu0 %v3513_v45  ;;  %v4431_v45 = vld [vmem:[#allocation8 + $0x55c] sm:$0xf0]  ;;  %v3205_v46 = vor.u32 %v4287_v37, %v3204_v36  ;;  %v4497_v36 = vld [vmem:[#allocation8 + $0x76c] sm:$0xf0]  ;;  %v4236_v37 = vld [vmem:[#allocation8 + $0x8d8] sm:$0xf] }
  0x88   :  { %2099 = vmatpush.bf16.msra.mxu1 %v3705_v49  ;;  %v3180_v49 = vld [vmem:[#allocation8 + $0x98] sm:$0xf]  ;;  %v3781_v52 = vor.u32 %v4431_v45, %v3780_v44  ;;  %v4359_v31 = vld [vmem:[#allocation8 + $0x31c] sm:$0xf0]  ;;  %v4350_v45 = vld [vmem:[#allocation8 + $0x2dc] sm:$0xf] }
  0x89   :  { %2113 = vmatpush.bf16.msra.mxu2 %v3897_v50  ;;  %v4281_v50 = vld [vmem:[#allocation8 + $0xac] sm:$0xf0]  ;;  %v3493_v44 = vor.u32 %v4359_v31, %v3492_v29  ;;  %v4140_v29 = vld [vmem:[#allocation8 + $0x818] sm:$0xf] }
  0x8a   :  { %2127 = vmatpush.bf16.msra.mxu3 %v4089_v54  ;;  %v3564_v54 = vld [vmem:[#allocation8 + $0x398] sm:$0xf]  ;;  %v3181_v59 = vor.u32 %v4281_v50, %v3180_v49  ;;  %v3281_v50 = vor.u32 %v4302_v41, %v3278_v42  ;;  %v4521_v31 = vld [vmem:[#allocation8 + $0x82c] sm:$0xf0]  ;;  %v3924_v41 = vld [vmem:[#allocation8 + $0x668] sm:$0xf] }
  0x8b   :  { %2086 = vmatpush.bf16.msra.mxu0 %v3489_v61  ;;  %v3565_v61 = vor.u32 %v4377_v55, %v3564_v54  ;;  %v4539_v55 = vld [vmem:[#allocation8 + $0x8bc] sm:$0xf0] }
  0x8c   :  { %2100 = vmatpush.bf16.msra.mxu1 %v3681_v0  ;;  %v3348_v0 = vld [vmem:[#allocation8 + $0x1e8] sm:$0xf]  ;;  %v4467_v42 = vld [vmem:[#allocation8 + $0x67c] sm:$0xf0] }
  0x8d   :  { %2114 = vmatpush.bf16.msra.mxu2 %v3873_v1  ;;  %v3757_v1 = vor.u32 %v4425_v58, %v3756_v56  ;;  %v3349_v9 = vor.u32 %v4323_v2, %v3348_v0  ;;  %v4296_v56 = vld [vmem:[#allocation8 + $0x12c] sm:$0xf]  ;;  %v3254_v58 = vld [vmem:[#allocation8 + $0x140] sm:$0xf0]  ;;  %v3996_v0 = vld [vmem:[#allocation8 + $0x6f8] sm:$0xf] }
  0x8e   :  { %2128 = vmatpush.bf16.msra.mxu3 %v4065_v4  ;;  %2087 = vmatmul.bf16.vlgmr.msra.gmra.mxu0 %v4981_v22  ;;  %v4371_v4 = vld [vmem:[#allocation8 + $0x37c] sm:$0xf0]  ;;  %v4188_v2 = vld [vmem:[#allocation8 + $0x878] sm:$0xf] }
  0x8f   :  { %2135 = vmatpush.bf16.msrb.mxu0 %v3277_v5  ;;  %2101 = vmatmul.bf16.vlgmr.msra.gmra.mxu1 %v4983_v23  ;;  %v3732_v5 = vld [vmem:[#allocation8 + $0x4e8] sm:$0xf]  ;;  %v3541_v10 = vor.u32 %v4371_v4, %v3540_v3  ;;  %v4533_v4 = vld [vmem:[#allocation8 + $0x88c] sm:$0xf0] }
  0x90   :  { %2149 = vmatpush.bf16.msrb.mxu1 %v3469_v7  ;;  %2115 = vmatmul.bf16.vlgmr.msra.gmra.mxu2 %v4987_v35  ;;  %v4419_v7 = vld [vmem:[#allocation8 + $0x4fc] sm:$0xf0] }
  0x91   :  { %2163 = vmatpush.bf16.msrb.mxu2 %v3661_v8  ;;  %2129 = vmatmul.bf16.vlgmr.msra.gmra.mxu3 %v4989_v39  ;;  %v3157_v8 = vor.u32 %v4275_v63, %v3156_v62  ;;  %v3733_v14 = vor.u32 %v4419_v7, %v3732_v5  ;;  %v4213_v62 = vor.u32 %v4539_v55, %v4212_v53  ;;  %v4290_v5 = vld [vmem:[#allocation8 + $0xfc] sm:$0xf]  ;;  %v3230_v7 = vld [vmem:[#allocation8 + $0x110] sm:$0xf0]  ;;  %v3900_v53 = vld [vmem:[#allocation8 + $0x638] sm:$0xf] }
  0x92   :  { %2177 = vmatpush.bf16.msrb.mxu3 %v3853_v12  ;;  %v4269_v12 = vld [vmem:[#allocation8 + $0x4c] sm:$0xf0]  ;;  %v3257_v63 = vor.u32 %v4296_v56, %v3254_v58  ;;  %v4092_v55 = vld [vmem:[#allocation8 + $0x7b8] sm:$0xf] }
  0x93   :  { %2136 = vmatpush.bf16.msrb.mxu0 %v3253_v18  ;;  %v3708_v18 = vld [vmem:[#allocation8 + $0x4b8] sm:$0xf]  ;;  %v4509_v58 = vld [vmem:[#allocation8 + $0x7cc] sm:$0xf0] }
  0x94   :  { %2150 = vmatpush.bf16.msrb.mxu1 %v3445_v19  ;;  %v4413_v19 = vld [vmem:[#allocation8 + $0x4cc] sm:$0xf0] }
  0x95   :  { %2164 = vmatpush.bf16.msrb.mxu2 %v3637_v20  ;;  %v3133_v20 = vor.u32 %v4269_v12, %v3132_v11  ;;  %v3709_v30 = vor.u32 %v4413_v19, %v3708_v18  ;;  %v4189_v11 = vor.u32 %v4533_v4, %v4188_v2  ;;  %v3233_v12 = vor.u32 %v4290_v5, %v3230_v7  ;;  %v4284_v18 = vld [vmem:[#allocation8 + $0xcc] sm:$0xf]  ;;  %v3206_v19 = vld [vmem:[#allocation8 + $0xe0] sm:$0xf0]  ;;  %v4068_v4 = vld [vmem:[#allocation8 + $0x788] sm:$0xf] }
  0x96   :  { %2178 = vmatpush.bf16.msrb.mxu3 %v3829_v26  ;;  %v3517_v26 = vor.u32 %v4365_v17, %v3516_v16  ;;  %v4527_v17 = vld [vmem:[#allocation8 + $0x85c] sm:$0xf0]  ;;  %v4093_v2 = vor.u32 %v4509_v58, %v4092_v55  ;;  %v4260_v7 = vld [vmem:[#allocation8 + $0xc] sm:$0xf] }
  0x97   :  { %2137 = vmatpush.bf16.msrb.mxu0 %v3229_v32  ;;  %v3684_v32 = vld [vmem:[#allocation8 + $0x488] sm:$0xf]  ;;  %v4503_v5 = vld [vmem:[#allocation8 + $0x79c] sm:$0xf0]  ;;  %v4380_v58 = vld [vmem:[#allocation8 + $0x3cc] sm:$0xf] }
  0x98   :  { %2151 = vmatpush.bf16.msrb.mxu1 %v3421_v33  ;;  %v4407_v33 = vld [vmem:[#allocation8 + $0x49c] sm:$0xf0] }
  0x99   :  { %2165 = vmatpush.bf16.msrb.mxu2 %v3613_v34  ;;  %v4044_v34 = vld [vmem:[#allocation8 + $0x758] sm:$0xf] }
  0x9a   :  { %2179 = vmatpush.bf16.msrb.mxu3 %v3805_v40  ;;  %v4545_v40 = vld [vmem:[#allocation8 + $0x8ec] sm:$0xf0] }
  0x9b   :  { %2138 = vmatpush.bf16.msrb.mxu0 %v3205_v46  ;;  %v3470_v46 = vld [vmem:[#allocation8 + $0x2f0] sm:$0xf0]  ;;  %v4237_v49 = vor.u32 %v4545_v40, %v4236_v37  ;;  %v3949_v37 = vor.u32 %v4473_v28, %v3948_v27 }
  0x9c   :  { %2152 = vmatpush.bf16.msrb.mxu1 %v3397_v47  ;;  %v3685_v47 = vor.u32 %v4407_v33, %v3684_v32  ;;  %v3473_v54 = vor.u32 %v4350_v45, %v3470_v46  ;;  %v4278_v32 = vld [vmem:[#allocation8 + $0x9c] sm:$0xf]  ;;  %v3182_v33 = vld [vmem:[#allocation8 + $0xb0] sm:$0xf0]  ;;  %v4515_v45 = vld [vmem:[#allocation8 + $0x7fc] sm:$0xf0] }
  0x9d   :  { %2166 = vmatpush.bf16.msrb.mxu2 %v3589_v48  ;;  %v4045_v48 = vor.u32 %v4497_v36, %v4044_v34  ;;  %v4326_v34 = vld [vmem:[#allocation8 + $0x21c] sm:$0xf]  ;;  %v3374_v36 = vld [vmem:[#allocation8 + $0x230] sm:$0xf0]  ;;  %v3185_v40 = vor.u32 %v4278_v32, %v3182_v33  ;;  %v4272_v46 = vld [vmem:[#allocation8 + $0x6c] sm:$0xf] }
  0x9e   :  { %2180 = vmatpush.bf16.msrb.mxu3 %v3781_v52  ;;  %v4491_v52 = vld [vmem:[#allocation8 + $0x73c] sm:$0xf0]  ;;  %v3830_v33 = vld [vmem:[#allocation8 + $0x5c0] sm:$0xf0] }
  0x9f   :  { %2139 = vmatpush.bf16.msrb.mxu0 %v3181_v59  ;;  %v4344_v59 = vld [vmem:[#allocation8 + $0x2ac] sm:$0xf] }
  0xa0   :  { %2153 = vmatpush.bf16.msrb.mxu1 %v3373_v60  ;;  %v3446_v60 = vld [vmem:[#allocation8 + $0x2c0] sm:$0xf0] }
  0xa1   :  { %2167 = vmatpush.bf16.msrb.mxu2 %v3565_v61  ;;  %v4021_v61 = vor.u32 %v4491_v52, %v4020_v51  ;;  %v3449_v3 = vor.u32 %v4344_v59, %v3446_v60  ;;  %v4266_v59 = vld [vmem:[#allocation8 + $0x3c] sm:$0xf]  ;;  %v3134_v60 = vld [vmem:[#allocation8 + $0x50] sm:$0xf0] }
  0xa2   :  { %2181 = vmatpush.bf16.msrb.mxu3 %v3757_v1  ;;  %v4485_v1 = vld [vmem:[#allocation8 + $0x70c] sm:$0xf0] }
  0xa3   :  { %2140 = vmatpush.bf16.msrb.mxu0 %v3157_v8  ;;  %v4338_v8 = vld [vmem:[#allocation8 + $0x27c] sm:$0xf] }
  0xa4   :  { %2154 = vmatpush.bf16.msrb.mxu1 %v3349_v9  ;;  %v3422_v9 = vld [vmem:[#allocation8 + $0x290] sm:$0xf0] }
  0xa5   :  { %2168 = vmatpush.bf16.msrb.mxu2 %v3541_v10  ;;  %v3997_v10 = vor.u32 %v4485_v1, %v3996_v0  ;;  %v3425_v16 = vor.u32 %v4338_v8, %v3422_v9  ;;  %v3876_v0 = vld [vmem:[#allocation8 + $0x608] sm:$0xf]  ;;  %v4455_v1 = vld [vmem:[#allocation8 + $0x61c] sm:$0xf0]  ;;  %v3110_v9 = vld [vmem:[#allocation8 + $0x20] sm:$0xf0] }
  0xa6   :  { %2182 = vmatpush.bf16.msrb.mxu3 %v3733_v14  ;;  %v4479_v14 = vld [vmem:[#allocation8 + $0x6dc] sm:$0xf0] }
  0xa7   :  { %2141 = vmatpush.bf16.msrb.mxu0 %v3133_v20  ;;  %v4332_v20 = vld [vmem:[#allocation8 + $0x24c] sm:$0xf]  ;;  %v3973_v24 = vor.u32 %v4479_v14, %v3972_v13  ;;  %v3662_v13 = vld [vmem:[#allocation8 + $0x470] sm:$0xf0]  ;;  %v4446_v14 = vld [vmem:[#allocation8 + $0x5dc] sm:$0xf] }
  0xa8   :  { %2155 = vmatpush.bf16.msrb.mxu1 %v3325_v25  ;;  %v4165_v25 = vor.u32 %v4527_v17, %v4164_v15  ;;  %v3877_v15 = vor.u32 %v4455_v1, %v3876_v0  ;;  %v4494_v17 = vld [vmem:[#allocation8 + $0x75c] sm:$0xf]  ;;  %v3974_v0 = vld [vmem:[#allocation8 + $0x6e0] sm:$0xf0]  ;;  %v4524_v1 = vld [vmem:[#allocation8 + $0x84c] sm:$0xf] }
  0xa9   :  { %2169 = vmatpush.bf16.msrb.mxu2 %v3517_v26  ;;  %v3209_v26 = vor.u32 %v4284_v18, %v3206_v19  ;;  %v4046_v18 = vld [vmem:[#allocation8 + $0x770] sm:$0xf0]  ;;  %v4069_v19 = vor.u32 %v4503_v5, %v4068_v4 }
  0xaa   :  { %2183 = vmatpush.bf16.msrb.mxu3 %v3709_v30  ;;  %v3401_v30 = vor.u32 %v4332_v20, %v3398_v21  ;;  %v3113_v20 = vor.u32 %v4260_v7, %v3110_v9  ;;  %v4542_v21 = vld [vmem:[#allocation8 + $0x8dc] sm:$0xf]  ;;  %v4049_v28 = vor.u32 %v4494_v17, %v4046_v18  ;;  %v4142_v17 = vld [vmem:[#allocation8 + $0x830] sm:$0xf0] }
  0xab   :  { %2142 = vmatpush.bf16.msrb.mxu0 %v3109_v38  ;;  %v4141_v38 = vor.u32 %v4521_v31, %v4140_v29  ;;  %v4392_v29 = vld [vmem:[#allocation8 + $0x42c] sm:$0xf]  ;;  %v4374_v9 = vld [vmem:[#allocation8 + $0x39c] sm:$0xf] }
  0xac   :  { %2156 = vmatpush.bf16.msrb.mxu1 %v3301_v43  ;;  %v4116_v43 = vld [vmem:[#allocation8 + $0x7e8] sm:$0xf]  ;;  %v4440_v31 = vld [vmem:[#allocation8 + $0x5ac] sm:$0xf] }
  0xad   :  { %2170 = vmatpush.bf16.msrb.mxu2 %v3493_v44  ;;  %v3377_v44 = vor.u32 %v4326_v34, %v3374_v36  ;;  %v4117_v51 = vor.u32 %v4515_v45, %v4116_v43  ;;  %v4488_v34 = vld [vmem:[#allocation8 + $0x72c] sm:$0xf]  ;;  %v4022_v36 = vld [vmem:[#allocation8 + $0x740] sm:$0xf0]  ;;  %v4434_v45 = vld [vmem:[#allocation8 + $0x57c] sm:$0xf] }
  0xae   :  { %2184 = vmatpush.bf16.msrb.mxu3 %v3685_v47  ;;  %2143 = vmatmul.bf16.vlgmr.msrb.gmra.mxu0 %v4975_v57  ;;  %v3158_v47 = vld [vmem:[#allocation8 + $0x80] sm:$0xf0]  ;;  %v4025_v43 = vor.u32 %v4488_v34, %v4022_v36 }
  0xaf   :  { %2191 = vmatpush.bf16.msra.mxu0 %v4045_v48  ;;  %2157 = vmatmul.bf16.vlgmr.msrb.gmra.mxu1 %v4978_v6  ;;  %v4320_v48 = vld [vmem:[#allocation8 + $0x1ec] sm:$0xf]  ;;  %v3161_v52 = vor.u32 %v4272_v46, %v3158_v47  ;;  %v5003_v46 = vld [vmem:[#allocation9] sm:$0x3f] }
  0xb0   :  { %2205 = vmatpush.bf16.msra.mxu1 %v4237_v49  ;;  %2171 = vmatmul.bf16.vlgmr.msrb.gmra.mxu2 %v4981_v22  ;;  %v3350_v49 = vld [vmem:[#allocation8 + $0x200] sm:$0xf0] }
  0xb1   :  { %2219 = vmatpush.bf16.msra.mxu2 %v3281_v50  ;;  %2185 = vmatmul.bf16.vlgmr.msrb.gmra.mxu3 %v4983_v23  ;;  %v3925_v50 = vor.u32 %v4467_v42, %v3924_v41  ;;  %v3353_v56 = vor.u32 %v4320_v48, %v3350_v49  ;;  %v4386_v41 = vld [vmem:[#allocation8 + $0x3fc] sm:$0xf]  ;;  %v3833_v42 = vor.u32 %v4440_v31, %v3830_v33  ;;  %v3806_v48 = vld [vmem:[#allocation8 + $0x590] sm:$0xf0]  ;;  %v3926_v31 = vld [vmem:[#allocation8 + $0x680] sm:$0xf0] }
  0xb2   :  { %2233 = vmatpush.bf16.msra.mxu3 %v3473_v54  ;;  %v4461_v54 = vld [vmem:[#allocation8 + $0x64c] sm:$0xf0]  ;;  %v4482_v49 = vld [vmem:[#allocation8 + $0x6fc] sm:$0xf]  ;;  %v3809_v55 = vor.u32 %v4434_v45, %v3806_v48  ;;  %v4118_v33 = vld [vmem:[#allocation8 + $0x800] sm:$0xf0] }
  0xb3   :  { %2192 = vmatpush.bf16.msra.mxu0 %v4021_v61  ;;  %v4314_v61 = vld [vmem:[#allocation8 + $0x1bc] sm:$0xf]  ;;  %v3710_v45 = vld [vmem:[#allocation8 + $0x4d0] sm:$0xf0] }
  0xb4   :  { %2206 = vmatpush.bf16.msra.mxu1 %v4213_v62  ;;  %v3326_v62 = vld [vmem:[#allocation8 + $0x1d0] sm:$0xf0] }
  0xb5   :  { %2220 = vmatpush.bf16.msra.mxu2 %v3257_v63  ;;  %v3901_v63 = vor.u32 %v4461_v54, %v3900_v53  ;;  %v3329_v8 = vor.u32 %v4314_v61, %v3326_v62  ;;  %v485_v54 = vperm.slane %v5003_v46, 0  ;;  %v3782_v62 = vld [vmem:[#allocation8 + $0x560] sm:$0xf0]  ;;  %v3902_v48 = vld [vmem:[#allocation8 + $0x650] sm:$0xf0] }
  0xb6   :  { %2234 = vmatpush.bf16.msra.mxu3 %v3449_v3  ;;  %v3137_v3 = vor.u32 %v4266_v59, %v3134_v60  ;;  %v3590_v59 = vld [vmem:[#allocation8 + $0x3e0] sm:$0xf0]  ;;  %v4428_v60 = vld [vmem:[#allocation8 + $0x54c] sm:$0xf] }
  0xb7   :  { %2193 = vmatpush.bf16.msra.mxu0 %v3997_v10  ;;  %v4308_v10 = vld [vmem:[#allocation8 + $0x18c] sm:$0xf]  ;;  %v3593_v4 = vor.u32 %v4380_v58, %v3590_v59  ;;  %v3785_v7 = vor.u32 %v4428_v60, %v3782_v62  ;;  %v3686_v60 = vld [vmem:[#allocation8 + $0x4a0] sm:$0xf0] }
  0xb8   :  { %2207 = vmatpush.bf16.msra.mxu1 %v4189_v11  ;;  %v3302_v11 = vld [vmem:[#allocation8 + $0x1a0] sm:$0xf0]  ;;  %v4404_v59 = vld [vmem:[#allocation8 + $0x48c] sm:$0xf] }
  0xb9   :  { %2221 = vmatpush.bf16.msra.mxu2 %v3233_v12  ;;  %v4398_v12 = vld [vmem:[#allocation8 + $0x45c] sm:$0xf] }
  0xba   :  { %2235 = vmatpush.bf16.msra.mxu3 %v3425_v16  ;;  %v3854_v16 = vld [vmem:[#allocation8 + $0x5f0] sm:$0xf0] }
  0xbb   :  { %2194 = vmatpush.bf16.msra.mxu0 %v3973_v24  ;;  %v4238_v24 = vld [vmem:[#allocation8 + $0x8f0] sm:$0xf0]  ;;  %v3857_v27 = vor.u32 %v4446_v14, %v3854_v16  ;;  %v4470_v14 = vld [vmem:[#allocation8 + $0x69c] sm:$0xf] }
  0xbc   :  { %2208 = vmatpush.bf16.msra.mxu1 %v4165_v25  ;;  %v3305_v25 = vor.u32 %v4308_v10, %v3302_v11  ;;  %v4241_v32 = vor.u32 %v4542_v21, %v4238_v24  ;;  %v3566_v10 = vld [vmem:[#allocation8 + $0x3b0] sm:$0xf0]  ;;  %v4422_v11 = vld [vmem:[#allocation8 + $0x51c] sm:$0xf] }
  0xbd   :  { %2222 = vmatpush.bf16.msra.mxu2 %v3209_v26  ;;  %v3665_v26 = vor.u32 %v4398_v12, %v3662_v13  ;;  %v3758_v13 = vld [vmem:[#allocation8 + $0x530] sm:$0xf0]  ;;  %v4518_v16 = vld [vmem:[#allocation8 + $0x81c] sm:$0xf] }
  0xbe   :  { %2236 = vmatpush.bf16.msra.mxu3 %v3401_v30  ;;  %v3638_v30 = vld [vmem:[#allocation8 + $0x440] sm:$0xf0]  ;;  %v3761_v21 = vor.u32 %v4422_v11, %v3758_v13  ;;  %v3668_v11 = vld [vmem:[#allocation8 + $0x460] sm:$0xf] }
  0xbf   :  { %2195 = vmatpush.bf16.msra.mxu0 %v3949_v37  ;;  %v4536_v37 = vld [vmem:[#allocation8 + $0x8ac] sm:$0xf] }
  0xc0   :  { %2209 = vmatpush.bf16.msra.mxu1 %v4141_v38  ;;  %v4214_v38 = vld [vmem:[#allocation8 + $0x8c0] sm:$0xf0] }
  0xc1   :  { %2223 = vmatpush.bf16.msra.mxu2 %v3185_v40  ;;  %v3641_v40 = vor.u32 %v4392_v29, %v3638_v30  ;;  %v4217_v47 = vor.u32 %v4536_v37, %v4214_v38  ;;  %v3734_v29 = vld [vmem:[#allocation8 + $0x500] sm:$0xf0]  ;;  %v4464_v30 = vld [vmem:[#allocation8 + $0x66c] sm:$0xf] }
  0xc2   :  { %2237 = vmatpush.bf16.msra.mxu3 %v3377_v44  ;;  %v3614_v44 = vld [vmem:[#allocation8 + $0x410] sm:$0xf0] }
  0xc3   :  { %2196 = vmatpush.bf16.msra.mxu0 %v3925_v50  ;;  %v3998_v50 = vld [vmem:[#allocation8 + $0x710] sm:$0xf0]  ;;  %v3617_v53 = vor.u32 %v4386_v41, %v3614_v44  ;;  %v4362_v41 = vld [vmem:[#allocation8 + $0x33c] sm:$0xf] }
  0xc4   :  { %2210 = vmatpush.bf16.msra.mxu1 %v4117_v51  ;;  %v4530_v51 = vld [vmem:[#allocation8 + $0x87c] sm:$0xf] }
  0xc5   :  { %2224 = vmatpush.bf16.msra.mxu2 %v3161_v52  ;;  %v4190_v52 = vld [vmem:[#allocation8 + $0x890] sm:$0xf0] }
  0xc6   :  { %2238 = vmatpush.bf16.msra.mxu3 %v3353_v56  ;;  %v4001_v56 = vor.u32 %v4482_v49, %v3998_v50  ;;  %v4193_v61 = vor.u32 %v4530_v51, %v4190_v52  ;;  %v4506_v49 = vld [vmem:[#allocation8 + $0x7bc] sm:$0xf]  ;;  %v4094_v50 = vld [vmem:[#allocation8 + $0x7d0] sm:$0xf0] }
  0xc7   :  { %2197 = vmatpush.bf16.msra.mxu0 %v3901_v63  ;;  %v4476_v63 = vld [vmem:[#allocation8 + $0x6cc] sm:$0xf] }
  0xc8   :  { %2211 = vmatpush.bf16.msra.mxu1 %v4093_v2  ;;  %v4166_v2 = vld [vmem:[#allocation8 + $0x860] sm:$0xf0] }
  0xc9   :  { %2225 = vmatpush.bf16.msra.mxu2 %v3137_v3  ;;  %v4169_v12 = vor.u32 %v4524_v1, %v4166_v2  ;;  %v4500_v1 = vld [vmem:[#allocation8 + $0x78c] sm:$0xf]  ;;  %v4070_v2 = vld [vmem:[#allocation8 + $0x7a0] sm:$0xf0] }
  0xca   :  { %2239 = vmatpush.bf16.msra.mxu3 %v3329_v8  ;;  %v3977_v8 = vor.u32 %v4476_v63, %v3974_v0  ;;  %v4097_v63 = vor.u32 %v4506_v49, %v4094_v50  ;;  %v3878_v0 = vld [vmem:[#allocation8 + $0x620] sm:$0xf0]  ;;  %v3812_v50 = vld [vmem:[#allocation8 + $0x580] sm:$0xf] }
  0xcb   :  { %2198 = vmatpush.bf16.msra.mxu0 %v3877_v15  ;;  %v1976_v3 = vpop.f32.mrf.mxu0  ;;  %v3950_v15 = vld [vmem:[#allocation8 + $0x6b0] sm:$0xf0] }
  0xcc   :  { %2212 = vmatpush.bf16.msra.mxu1 %v4069_v19  ;;  %v1977_v5 = vadd.f32 %v1976_v3, %v485_v54  ;;  %v1990_v18 = vpop.f32.mrf.mxu1  ;;  %v3569_v19 = vor.u32 %v4374_v9, %v3566_v10  ;;  %v3953_v24 = vor.u32 %v4470_v14, %v3950_v15  ;;  %v4354_v10 = vld [vmem:[#allocation8 + $0x2f4] sm:$0xf0]  ;;  %v3689_v14 = vor.u32 %v4404_v59, %v3686_v60  ;;  %v4336_v60 = vld [vmem:[#allocation8 + $0x264] sm:$0xf0] }
  0xcd   :  { %2226 = vmatpush.bf16.msra.mxu2 %v3113_v20 }
  0xce   :  { %2240 = vmatpush.bf16.msra.mxu3 %v3305_v25  ;;  %2199 = vmatmul.bf16.vlgmr.msra.gmra.mxu0 %v4987_v35  ;;  %v1991_v20 = vadd.f32 %v1990_v18, %v1977_v5  ;;  %v4368_v25 = vld [vmem:[#allocation8 + $0x36c] sm:$0xf]  ;;  %v3284_v5 = vld [vmem:[#allocation8 + $0x160] sm:$0xf]  ;;  %v4073_v18 = vor.u32 %v4500_v1, %v4070_v2  ;;  %v4432_v1 = vld [vmem:[#allocation8 + $0x564] sm:$0xf0] }
  0xcf   :  { %2247 = vmatpush.bf16.msrb.mxu0 %v3665_v26  ;;  %2213 = vmatmul.bf16.vlgmr.msra.gmra.mxu1 %v4989_v39  ;;  %v3542_v26 = vld [vmem:[#allocation8 + $0x380] sm:$0xf0] }
  0xd0   :  { %2261 = vmatpush.bf16.msrb.mxu1 %v3857_v27  ;;  %2227 = vmatmul.bf16.vlgmr.msra.gmra.mxu2 %v4975_v57  ;;  %v4416_v27 = vld [vmem:[#allocation8 + $0x4ec] sm:$0xf]  ;;  %v3545_v36 = vor.u32 %v4368_v25, %v3542_v26  ;;  %v4300_v25 = vld [vmem:[#allocation8 + $0x144] sm:$0xf0]  ;;  %v3452_v26 = vld [vmem:[#allocation8 + $0x2b0] sm:$0xf] }
  0xd1   :  { %2275 = vmatpush.bf16.msrb.mxu2 %v4049_v28  ;;  %2241 = vmatmul.bf16.vlgmr.msra.gmra.mxu3 %v4978_v6  ;;  %v4145_v28 = vor.u32 %v4518_v16, %v4142_v17  ;;  %v3737_v38 = vor.u32 %v4416_v27, %v3734_v29  ;;  %v3860_v16 = vld [vmem:[#allocation8 + $0x5e0] sm:$0xf]  ;;  %v4450_v17 = vld [vmem:[#allocation8 + $0x5f4] sm:$0xf0]  ;;  %v3644_v29 = vld [vmem:[#allocation8 + $0x430] sm:$0xf] }
  0xd2   :  { %2289 = vmatpush.bf16.msrb.mxu3 %v4241_v32  ;;  %v4512_v32 = vld [vmem:[#allocation8 + $0x7ec] sm:$0xf]  ;;  %v3861_v27 = vor.u32 %v4450_v17, %v3860_v16  ;;  %v4378_v16 = vld [vmem:[#allocation8 + $0x3b4] sm:$0xf0]  ;;  %v3764_v17 = vld [vmem:[#allocation8 + $0x520] sm:$0xf] }
  0xd3   :  { %2248 = vmatpush.bf16.msrb.mxu0 %v3641_v40  ;;  %v1978_v34 = vpop.f32.mrf.mxu0  ;;  %v3929_v40 = vor.u32 %v4464_v30, %v3926_v31  ;;  %v4121_v44 = vor.u32 %v4512_v32, %v4118_v33  ;;  %v2004_v62 = vpop.f32.mrf.mxu2  ;;  %v4396_v30 = vld [vmem:[#allocation8 + $0x444] sm:$0xf0]  ;;  %v3836_v31 = vld [vmem:[#allocation8 + $0x5b0] sm:$0xf] }
  0xd4   :  { %2262 = vmatpush.bf16.msrb.mxu1 %v3833_v42  ;;  %v1979_v37 = vadd.f32 %v1978_v34, %v485_v54  ;;  %v3518_v42 = vld [vmem:[#allocation8 + $0x350] sm:$0xf0]  ;;  %v1992_v51 = vpop.f32.mrf.mxu1  ;;  %v2005_v3 = vadd.f32 %v2004_v62, %v1991_v20  ;;  %v4444_v32 = vld [vmem:[#allocation8 + $0x5c4] sm:$0xf0] }
  0xd5   :  { %2276 = vmatpush.bf16.msrb.mxu2 %v4025_v43  ;;  %v4410_v43 = vld [vmem:[#allocation8 + $0x4bc] sm:$0xf]  ;;  %v3521_v52 = vor.u32 %v4362_v41, %v3518_v42  ;;  %v3236_v41 = vld [vmem:[#allocation8 + $0x100] sm:$0xf]  ;;  %v4294_v42 = vld [vmem:[#allocation8 + $0x114] sm:$0xf0] }
  0xd6   :  { %2290 = vmatpush.bf16.msrb.mxu3 %v4217_v47  ;;  %v4458_v47 = vld [vmem:[#allocation8 + $0x63c] sm:$0xf]  ;;  %v1993_v54 = vadd.f32 %v1992_v51, %v1979_v37  ;;  %v4438_v51 = vld [vmem:[#allocation8 + $0x594] sm:$0xf0]  ;;  %v4384_v62 = vld [vmem:[#allocation8 + $0x3e4] sm:$0xf0] }
  0xd7   :  { %2249 = vmatpush.bf16.msrb.mxu0 %v3617_v53  ;;  %v4356_v53 = vld [vmem:[#allocation8 + $0x30c] sm:$0xf]  ;;  %v3905_v58 = vor.u32 %v4458_v47, %v3902_v48  ;;  %v3620_v47 = vld [vmem:[#allocation8 + $0x400] sm:$0xf]  ;;  %v4390_v48 = vld [vmem:[#allocation8 + $0x414] sm:$0xf0]  ;;  %v3813_v59 = vor.u32 %v4438_v51, %v3812_v50 }
  0xd8   :  { %2263 = vmatpush.bf16.msrb.mxu1 %v3809_v55  ;;  %v3494_v55 = vld [vmem:[#allocation8 + $0x320] sm:$0xf0] }
  0xd9   :  { %2277 = vmatpush.bf16.msrb.mxu2 %v4001_v56  ;;  %v3713_v56 = vor.u32 %v4410_v43, %v3710_v45  ;;  %v3497_v9 = vor.u32 %v4356_v53, %v3494_v55  ;;  %v3428_v43 = vld [vmem:[#allocation8 + $0x280] sm:$0xf]  ;;  %v4342_v45 = vld [vmem:[#allocation8 + $0x294] sm:$0xf0]  ;;  %v3621_v55 = vor.u32 %v4390_v48, %v3620_v47 }
  0xda   :  { %2291 = vmatpush.bf16.msrb.mxu3 %v4193_v61  ;;  %v4452_v61 = vld [vmem:[#allocation8 + $0x60c] sm:$0xf]  ;;  %v3429_v53 = vor.u32 %v4342_v45, %v3428_v43  ;;  %v4270_v45 = vld [vmem:[#allocation8 + $0x54] sm:$0xf0]  ;;  %v3332_v47 = vld [vmem:[#allocation8 + $0x1c0] sm:$0xf] }
  0xdb   :  { %2250 = vmatpush.bf16.msrb.mxu0 %v3593_v4  ;;  %v2018_v4 = vpop.f32.mrf.mxu3  ;;  %v3881_v15 = vor.u32 %v4452_v61, %v3878_v0  ;;  %v2006_v33 = vpop.f32.mrf.mxu2  ;;  %v3596_v61 = vld [vmem:[#allocation8 + $0x3d0] sm:$0xf] }
  0xdc   :  { %2264 = vmatpush.bf16.msrb.mxu1 %v3785_v7  ;;  %v4306_v7 = vld [vmem:[#allocation8 + $0x174] sm:$0xf0]  ;;  %v5010_v13 = vadd.f32 %v2018_v4, %v2005_v3  ;;  %v3788_v0 = vld [vmem:[#allocation8 + $0x550] sm:$0xf] }
  0xdd   :  { %2278 = vmatpush.bf16.msrb.mxu2 %v3977_v8  ;;  %v3476_v8 = vld [vmem:[#allocation8 + $0x2e0] sm:$0xf] }
  0xde   :  { %2292 = vmatpush.bf16.msrb.mxu3 %v4169_v12  ;;  %v4402_v12 = vld [vmem:[#allocation8 + $0x474] sm:$0xf0]  ;;  %v3477_v20 = vor.u32 %v4354_v10, %v3476_v8  ;;  %v3188_v8 = vld [vmem:[#allocation8 + $0xa0] sm:$0xf] }
  0xdf   :  { %2251 = vmatpush.bf16.msrb.mxu0 %v3569_v19  ;;  %v3285_v19 = vor.u32 %v4306_v7, %v3284_v5  ;;  %v3597_v7 = vor.u32 %v4384_v62, %v3596_v61  ;;  %v3380_v10 = vld [vmem:[#allocation8 + $0x220] sm:$0xf]  ;;  %v3308_v62 = vld [vmem:[#allocation8 + $0x190] sm:$0xf] }
  0xe0   :  { %2265 = vmatpush.bf16.msrb.mxu1 %v3761_v21  ;;  %v3669_v21 = vor.u32 %v4402_v12, %v3668_v11  ;;  %v3789_v11 = vor.u32 %v4432_v1, %v3788_v0  ;;  %v3500_v0 = vld [vmem:[#allocation8 + $0x310] sm:$0xf] }
  0xe1   :  { %2279 = vmatpush.bf16.msrb.mxu2 %v3953_v24  ;;  %v3260_v24 = vld [vmem:[#allocation8 + $0x130] sm:$0xf] }
  0xe2   :  { %2293 = vmatpush.bf16.msrb.mxu3 %v4145_v28  ;;  %v4348_v28 = vld [vmem:[#allocation8 + $0x2c4] sm:$0xf0]  ;;  %v3261_v34 = vor.u32 %v4300_v25, %v3260_v24  ;;  %v3164_v24 = vld [vmem:[#allocation8 + $0x70] sm:$0xf] }
  0xe3   :  { %2252 = vmatpush.bf16.msrb.mxu0 %v3545_v36  ;;  %v2007_v36 = vadd.f32 %v2006_v33, %v1993_v54  ;;  %v2020_v37 = vpop.f32.mrf.mxu3  ;;  %v3212_v54 = vld [vmem:[#allocation8 + $0xd0] sm:$0xf]  ;;  %v4276_v25 = vld [vmem:[#allocation8 + $0x84] sm:$0xf0] }
  0xe4   :  { %2266 = vmatpush.bf16.msrb.mxu1 %v3737_v38  ;;  %v3453_v38 = vor.u32 %v4348_v28, %v3452_v26  ;;  %v3356_v26 = vld [vmem:[#allocation8 + $0x1f0] sm:$0xf]  ;;  %v4324_v28 = vld [vmem:[#allocation8 + $0x204] sm:$0xf0] }
  0xe5   :  { %2280 = vmatpush.bf16.msrb.mxu2 %v3929_v40  ;;  %v3645_v40 = vor.u32 %v4396_v30, %v3644_v29  ;;  %v5013_v49 = vadd.f32 %v2020_v37, %v2007_v36  ;;  %v3548_v29 = vld [vmem:[#allocation8 + $0x370] sm:$0xf]  ;;  %v4372_v30 = vld [vmem:[#allocation8 + $0x384] sm:$0xf0] }
  0xe6   :  { %2294 = vmatpush.bf16.msrb.mxu3 %v4121_v44  ;;  %v3837_v44 = vor.u32 %v4444_v32, %v3836_v31  ;;  %v3740_v33 = vld [vmem:[#allocation8 + $0x4f0] sm:$0xf]  ;;  %v3549_v43 = vor.u32 %v4372_v30, %v3548_v29 }
  0xe7   :  { %2253 = vmatpush.bf16.msrb.mxu0 %v3521_v52  ;;  %v3237_v52 = vor.u32 %v4294_v42, %v3236_v41  ;;  %v3357_v42 = vor.u32 %v4324_v28, %v3356_v26  ;;  %v4492_v28 = vld [vmem:[#allocation8 + $0x744] sm:$0xf0]  ;;  %v4220_v29 = vld [vmem:[#allocation8 + $0x8b0] sm:$0xf] }
  0xe8   :  { %2267 = vmatpush.bf16.msrb.mxu1 %v3713_v56  ;;  %v4288_v56 = vld [vmem:[#allocation8 + $0xe4] sm:$0xf0] }
  0xe9   :  { %2281 = vmatpush.bf16.msrb.mxu2 %v3905_v58  ;;  %v3404_v58 = vld [vmem:[#allocation8 + $0x250] sm:$0xf]  ;;  %v3213_v3 = vor.u32 %v4288_v56, %v3212_v54  ;;  %v4414_v54 = vld [vmem:[#allocation8 + $0x4d4] sm:$0xf0] }
  0xea   :  { %2295 = vmatpush.bf16.msrb.mxu3 %v4097_v63  ;;  %v3405_v5 = vor.u32 %v4336_v60, %v3404_v58  ;;  %v3116_v58 = vld [vmem:[#allocation8 + $0x10] sm:$0xf] }
  0xeb   :  { %2254 = vmatpush.bf16.msrb.mxu0 %v3497_v9  ;;  %v2032_v63 = vpop.f32.mrf.mxu0  ;;  %v4282_v9 = vld [vmem:[#allocation8 + $0xb4] sm:$0xf0] }
  0xec   :  { %2268 = vmatpush.bf16.msrb.mxu1 %v3689_v14  ;;  %v2033_v2 = vadd.f32 %v2032_v63, %v5010_v13  ;;  %v2046_v4 = vpop.f32.mrf.mxu1  ;;  %v4330_v14 = vld [vmem:[#allocation8 + $0x234] sm:$0xf0]  ;;  %v486_v13 = vperm.slane %v5003_v46, 1  ;;  %v4312_v63 = vld [vmem:[#allocation8 + $0x1a4] sm:$0xf0] }
  0xed   :  { %2282 = vmatpush.bf16.msrb.mxu2 %v3881_v15  ;;  %v3572_v15 = vld [vmem:[#allocation8 + $0x3a0] sm:$0xf] }
  0xee   :  { %2296 = vmatpush.bf16.msrb.mxu3 %v4073_v18  ;;  %2255 = vmatmul.bf16.vlgmr.msrb.gmra.mxu0 %v4981_v22  ;;  %v5019_v12 = vadd.f32 %v2046_v4, %v2033_v2  ;;  %v4426_v18 = vld [vmem:[#allocation8 + $0x534] sm:$0xf0]  ;;  %v4360_v2 = vld [vmem:[#allocation8 + $0x324] sm:$0xf0] }
  0xef   :  { %2303 = vmatpush.bf16.msra.mxu0 %v3285_v19  ;;  %2269 = vmatmul.bf16.vlgmr.msrb.gmra.mxu1 %v4983_v23  ;;  %v3189_v19 = vor.u32 %v4282_v9, %v3188_v8  ;;  %v4408_v4 = vld [vmem:[#allocation8 + $0x4a4] sm:$0xf0]  ;;  %v4498_v8 = vld [vmem:[#allocation8 + $0x774] sm:$0xf0]  ;;  %v4244_v9 = vld [vmem:[#allocation8 + $0x8e0] sm:$0xf] }
  0xf0   :  { %2317 = vmatpush.bf16.msra.mxu1 %v3477_v20  ;;  %2283 = vmatmul.bf16.vlgmr.msrb.gmra.mxu2 %v4987_v35  ;;  %v3381_v20 = vor.u32 %v4330_v14, %v3380_v10  ;;  %v4303_v14 = vld [vmem:[#allocation8 + $0x164] sm:$0xf] }
  0xf1   :  { %2331 = vmatpush.bf16.msra.mxu2 %v3669_v21  ;;  %2297 = vmatmul.bf16.vlgmr.msrb.gmra.mxu3 %v4989_v39  ;;  %v3573_v21 = vor.u32 %v4378_v16, %v3572_v15  ;;  %v3286_v15 = vld [vmem:[#allocation8 + $0x178] sm:$0xf0]  ;;  %v3309_v16 = vor.u32 %v4312_v63, %v3308_v62  ;;  %v4480_v62 = vld [vmem:[#allocation8 + $0x6e4] sm:$0xf0]  ;;  %v4172_v63 = vld [vmem:[#allocation8 + $0x850] sm:$0xf] }
  0xf2   :  { %2345 = vmatpush.bf16.msra.mxu3 %v3861_v27  ;;  %v3765_v27 = vor.u32 %v4426_v18, %v3764_v17  ;;  %v3501_v17 = vor.u32 %v4360_v2, %v3500_v0  ;;  %v4351_v18 = vld [vmem:[#allocation8 + $0x2e4] sm:$0xf]  ;;  %v3289_v26 = vor.u32 %v4303_v14, %v3286_v15  ;;  %v4285_v2 = vld [vmem:[#allocation8 + $0xd4] sm:$0xf] }
  0xf3   :  { %2304 = vmatpush.bf16.msra.mxu0 %v3261_v34  ;;  %v2060_v31 = vpop.f32.mrf.mxu2  ;;  %v2034_v32 = vpop.f32.mrf.mxu0  ;;  %v4420_v34 = vld [vmem:[#allocation8 + $0x504] sm:$0xf0] }
  0xf4   :  { %2318 = vmatpush.bf16.msra.mxu1 %v3453_v38  ;;  %v2061_v36 = vadd.f32 %v2060_v31, %v486_v13  ;;  %v2035_v37 = vadd.f32 %v2034_v32, %v5013_v49  ;;  %v3165_v38 = vor.u32 %v4276_v25, %v3164_v24  ;;  %v2074_v41 = vpop.f32.mrf.mxu3  ;;  %v3741_v50 = vor.u32 %v4420_v34, %v3740_v33  ;;  %v3716_v49 = vld [vmem:[#allocation8 + $0x4c0] sm:$0xf]  ;;  %v4540_v31 = vld [vmem:[#allocation8 + $0x8c4] sm:$0xf0]  ;;  %v4297_v32 = vld [vmem:[#allocation8 + $0x134] sm:$0xf] }
  0xf5   :  { %2332 = vmatpush.bf16.msra.mxu2 %v3645_v40  ;;  %v2048_v40 = vpop.f32.mrf.mxu1  ;;  %v3717_v1 = vor.u32 %v4414_v54, %v3716_v49  ;;  %v3262_v33 = vld [vmem:[#allocation8 + $0x148] sm:$0xf0]  ;;  %v4345_v34 = vld [vmem:[#allocation8 + $0x2b4] sm:$0xf] }
  0xf6   :  { %2346 = vmatpush.bf16.msra.mxu3 %v3837_v44  ;;  %v3140_v44 = vld [vmem:[#allocation8 + $0x40] sm:$0xf]  ;;  %v5025_v48 = vadd.f32 %v2074_v41, %v2061_v36  ;;  %v5027_v51 = vadd.f32 %v2048_v40, %v2035_v37  ;;  %v3454_v36 = vld [vmem:[#allocation8 + $0x2c8] sm:$0xf0]  ;;  %v4221_v41 = vor.u32 %v4540_v31, %v4220_v29  ;;  %v4468_v31 = vld [vmem:[#allocation8 + $0x684] sm:$0xf0] }
  0xf7   :  { %2305 = vmatpush.bf16.msra.mxu0 %v3237_v52  ;;  %v4318_v52 = vld [vmem:[#allocation8 + $0x1d4] sm:$0xf0]  ;;  %v3141_v56 = vor.u32 %v4270_v45, %v3140_v44  ;;  %v4196_v44 = vld [vmem:[#allocation8 + $0x880] sm:$0xf]  ;;  %v3457_v45 = vor.u32 %v4345_v34, %v3454_v36  ;;  %v4516_v36 = vld [vmem:[#allocation8 + $0x804] sm:$0xf0] }
  0xf8   :  { %2319 = vmatpush.bf16.msra.mxu1 %v3429_v53  ;;  %v3524_v53 = vld [vmem:[#allocation8 + $0x340] sm:$0xf]  ;;  %v3333_v60 = vor.u32 %v4318_v52, %v3332_v47  ;;  %v4534_v47 = vld [vmem:[#allocation8 + $0x894] sm:$0xf0]  ;;  %v3238_v52 = vld [vmem:[#allocation8 + $0x118] sm:$0xf0] }
  0xf9   :  { %2333 = vmatpush.bf16.msra.mxu2 %v3621_v55  ;;  %v4366_v55 = vld [vmem:[#allocation8 + $0x354] sm:$0xf0] }
  0xfa   :  { %2347 = vmatpush.bf16.msra.mxu3 %v3813_v59  ;;  %v4264_v59 = vld [vmem:[#allocation8 + $0x24] sm:$0xf0]  ;;  %v3525_v61 = vor.u32 %v4366_v55, %v3524_v53  ;;  %v4339_v53 = vld [vmem:[#allocation8 + $0x284] sm:$0xf]  ;;  %v3430_v55 = vld [vmem:[#allocation8 + $0x298] sm:$0xf0] }
  0xfb   :  { %2306 = vmatpush.bf16.msra.mxu0 %v3213_v3  ;;  %v3692_v3 = vld [vmem:[#allocation8 + $0x490] sm:$0xf]  ;;  %v3117_v10 = vor.u32 %v4264_v59, %v3116_v58  ;;  %v5035_v54 = vpop.f32.mrf.mxu2  ;;  %v4197_v58 = vor.u32 %v4534_v47, %v4196_v44  ;;  %v3433_v0 = vor.u32 %v4339_v53, %v3430_v55  ;;  %v4462_v53 = vld [vmem:[#allocation8 + $0x654] sm:$0xf0]  ;;  %v4100_v55 = vld [vmem:[#allocation8 + $0x7c0] sm:$0xf] }
  0xfc   :  { %2320 = vmatpush.bf16.msra.mxu1 %v3405_v5  ;;  %v2471_v5 = vmul.f32 %v5019_v12, %v5019_v12 }
  0xfd   :  { %2334 = vmatpush.bf16.msra.mxu2 %v3597_v7  ;;  %v4052_v7 = vld [vmem:[#allocation8 + $0x760] sm:$0xf] }
  0xfe   :  { %2348 = vmatpush.bf16.msra.mxu3 %v3789_v11  ;;  %v4546_v11 = vld [vmem:[#allocation8 + $0x8f4] sm:$0xf0]  ;;  %v2483_v24 = vmul.f32 %v2471_v5, %v5019_v12  ;;  %v4333_v5 = vld [vmem:[#allocation8 + $0x254] sm:$0xf] }
  0xff   :  { %2307 = vmatpush.bf16.msra.mxu0 %v3189_v19  ;;  %v3478_v19 = vld [vmem:[#allocation8 + $0x2f8] sm:$0xf0]  ;;  %v4245_v25 = vor.u32 %v4546_v11, %v4244_v9 }
 0x100   :  { %2321 = vmatpush.bf16.msra.mxu1 %v3381_v20  ;;  %v3693_v20 = vor.u32 %v4408_v4, %v3692_v3  ;;  %v3481_v30 = vor.u32 %v4351_v18, %v3478_v19  ;;  %v2495_v40 = vmul.f32 0.044715, %v2483_v24  ;;  %v3214_v3 = vld [vmem:[#allocation8 + $0xe8] sm:$0xf0]  ;;  %v3190_v24 = vld [vmem:[#allocation8 + $0xb8] sm:$0xf0] }
 0x101   :  { %2335 = vmatpush.bf16.msra.mxu2 %v3573_v21  ;;  %v4053_v21 = vor.u32 %v4498_v8, %v4052_v7  ;;  %v3406_v7 = vld [vmem:[#allocation8 + $0x268] sm:$0xf0]  ;;  %v3217_v15 = vor.u32 %v4285_v2, %v3214_v3  ;;  %v4456_v3 = vld [vmem:[#allocation8 + $0x624] sm:$0xf0] }
 0x102   :  { %2349 = vmatpush.bf16.msra.mxu3 %v3765_v27  ;;  %v4028_v27 = vld [vmem:[#allocation8 + $0x730] sm:$0xf]  ;;  %v3409_v18 = vor.u32 %v4333_v5, %v3406_v7  ;;  %v4504_v5 = vld [vmem:[#allocation8 + $0x7a4] sm:$0xf0] }
 0x103   :  { %2308 = vmatpush.bf16.msra.mxu0 %v3165_v38  ;;  %v4029_v37 = vor.u32 %v4492_v28, %v4028_v27  ;;  %v4004_v38 = vld [vmem:[#allocation8 + $0x700] sm:$0xf]  ;;  %v3382_v27 = vld [vmem:[#allocation8 + $0x238] sm:$0xf0] }
 0x104   :  { %2322 = vmatpush.bf16.msra.mxu1 %v3357_v42  ;;  %v3265_v42 = vor.u32 %v4297_v32, %v3262_v33  ;;  %v4124_v32 = vld [vmem:[#allocation8 + $0x7f0] sm:$0xf] }
 0x105   :  { %2336 = vmatpush.bf16.msra.mxu2 %v3549_v43  ;;  %v4486_v43 = vld [vmem:[#allocation8 + $0x714] sm:$0xf0]  ;;  %v4125_v47 = vor.u32 %v4516_v36, %v4124_v32  ;;  %v4393_v36 = vld [vmem:[#allocation8 + $0x434] sm:$0xf] }
 0x106   :  { %2350 = vmatpush.bf16.msra.mxu3 %v3741_v50  ;;  %v4291_v50 = vld [vmem:[#allocation8 + $0x104] sm:$0xf]  ;;  %v4005_v49 = vor.u32 %v4486_v43, %v4004_v38  ;;  %v3166_v38 = vld [vmem:[#allocation8 + $0x88] sm:$0xf0] }
 0x107   :  { %2309 = vmatpush.bf16.msra.mxu0 %v3141_v56  ;;  %v2507_v56 = vadd.f32 %v2495_v40, %v5019_v12  ;;  %v3241_v59 = vor.u32 %v4291_v50, %v3238_v52  ;;  %v3358_v43 = vld [vmem:[#allocation8 + $0x208] sm:$0xf0]  ;;  %v3908_v52 = vld [vmem:[#allocation8 + $0x640] sm:$0xf] }
 0x108   :  { %2323 = vmatpush.bf16.msra.mxu1 %v3333_v60  ;;  %v5039_v60 = vpop.f32.mrf.mxu3  ;;  %v3909_v2 = vor.u32 %v4462_v53, %v3908_v52  ;;  %v4537_v52 = vld [vmem:[#allocation8 + $0x8b4] sm:$0xf]  ;;  %v4222_v53 = vld [vmem:[#allocation8 + $0x8c8] sm:$0xf0] }
 0x109   :  { %2337 = vmatpush.bf16.msra.mxu2 %v3525_v61  ;;  %v3980_v61 = vld [vmem:[#allocation8 + $0x6d0] sm:$0xf]  ;;  %v2519_v11 = vmul.f32 0.7978846, %v2507_v56  ;;  %v4510_v56 = vld [vmem:[#allocation8 + $0x7d4] sm:$0xf0] }
 0x10a   :  { %2351 = vmatpush.bf16.msra.mxu3 %v3717_v1  ;;  %v4528_v1 = vld [vmem:[#allocation8 + $0x864] sm:$0xf0]  ;;  %v3981_v9 = vor.u32 %v4480_v62, %v3980_v61 }
 0x10b   :  { %2310 = vmatpush.bf16.msra.mxu0 %v3117_v10  ;;  %v2088_v4 = vpop.f32.mrf.mxu0  ;;  %v3956_v10 = vld [vmem:[#allocation8 + $0x6a0] sm:$0xf]  ;;  %v4173_v14 = vor.u32 %v4528_v1, %v4172_v63  ;;  %4566 = vtanh.f32 %v2519_v11  ;;  %v4315_v63 = vld [vmem:[#allocation8 + $0x1c4] sm:$0xf]  ;;  %v3884_v1 = vld [vmem:[#allocation8 + $0x610] sm:$0xf] }
 0x10c   :  { %2324 = vmatpush.bf16.msra.mxu1 %v3309_v16  ;;  %v2089_v8 = vadd.f32 %v2088_v4, %v5025_v48  ;;  %v4474_v16 = vld [vmem:[#allocation8 + $0x6b4] sm:$0xf0]  ;;  %v2102_v19 = vpop.f32.mrf.mxu1  ;;  %v4076_v4 = vld [vmem:[#allocation8 + $0x790] sm:$0xf]  ;;  %v3118_v11 = vld [vmem:[#allocation8 + $0x28] sm:$0xf0] }
 0x10d   :  { %2338 = vmatpush.bf16.msra.mxu2 %v3501_v17  ;;  %v4148_v17 = vld [vmem:[#allocation8 + $0x820] sm:$0xf]  ;;  %v3957_v48 = vor.u32 %v4474_v16, %v3956_v10  ;;  %v4261_v10 = vld [vmem:[#allocation8 + $0x14] sm:$0xf] }
 0x10e   :  { %2352 = vmatpush.bf16.msra.mxu3 %v3693_v20  ;;  %2311 = vmatmul.bf16.vlgmr.msra.gmra.mxu0 %v4975_v57  ;;  %v4522_v20 = vld [vmem:[#allocation8 + $0x834] sm:$0xf0] }
 0x10f   :  { %2359 = vmatpush.bf16.msrb.mxu0 %v4053_v21  ;;  %2325 = vmatmul.bf16.vlgmr.msra.gmra.mxu1 %v4978_v6  ;;  %v4279_v21 = vld [vmem:[#allocation8 + $0xa4] sm:$0xf]  ;;  %v4149_v28 = vor.u32 %v4522_v20, %v4148_v17  ;;  %v3310_v17 = vld [vmem:[#allocation8 + $0x1a8] sm:$0xf0]  ;;  %v3670_v20 = vld [vmem:[#allocation8 + $0x478] sm:$0xf0] }
 0x110   :  { %2373 = vmatpush.bf16.msrb.mxu1 %v4245_v25  ;;  %2339 = vmatmul.bf16.vlgmr.msra.gmra.mxu2 %v4981_v22  ;;  %v2103_v25 = vadd.f32 %v2102_v19, %v2089_v8  ;;  %v3193_v29 = vor.u32 %v4279_v21, %v3190_v24  ;;  %v4101_v8 = vor.u32 %v4510_v56, %v4100_v55  ;;  %v4447_v21 = vld [vmem:[#allocation8 + $0x5e4] sm:$0xf] }
 0x111   :  { %2387 = vmatpush.bf16.msrb.mxu2 %v3289_v26  ;;  %2353 = vmatmul.bf16.vlgmr.msra.gmra.mxu3 %v4983_v23  ;;  %v4327_v26 = vld [vmem:[#allocation8 + $0x224] sm:$0xf]  ;;  %v4567_v61 = vpop.eup %4566  ;;  %v3885_v24 = vor.u32 %v4456_v3, %v3884_v1  ;;  %v4198_v3 = vld [vmem:[#allocation8 + $0x898] sm:$0xf0] }
 0x112   :  { %2401 = vmatpush.bf16.msrb.mxu3 %v3481_v30  ;;  %v3932_v30 = vld [vmem:[#allocation8 + $0x670] sm:$0xf]  ;;  %v3385_v33 = vor.u32 %v4327_v26, %v3382_v27  ;;  %v4495_v26 = vld [vmem:[#allocation8 + $0x764] sm:$0xf]  ;;  %v4054_v27 = vld [vmem:[#allocation8 + $0x778] sm:$0xf0] }
 0x113   :  { %2360 = vmatpush.bf16.msrb.mxu0 %v4029_v37  ;;  %v2116_v34 = vpop.f32.mrf.mxu2  ;;  %v4273_v37 = vld [vmem:[#allocation8 + $0x74] sm:$0xf]  ;;  %v3933_v44 = vor.u32 %v4468_v31, %v3932_v30  ;;  %v4543_v30 = vld [vmem:[#allocation8 + $0x8e4] sm:$0xf]  ;;  %v4246_v31 = vld [vmem:[#allocation8 + $0x8f8] sm:$0xf0] }
 0x114   :  { %2374 = vmatpush.bf16.msrb.mxu1 %v4221_v41  ;;  %v2117_v40 = vadd.f32 %v2116_v34, %v2103_v25  ;;  %v2130_v41 = vpop.f32.mrf.mxu3  ;;  %v3169_v50 = vor.u32 %v4273_v37, %v3166_v38  ;;  %v3862_v25 = vld [vmem:[#allocation8 + $0x5f8] sm:$0xf0]  ;;  %v4483_v1 = vld [vmem:[#allocation8 + $0x704] sm:$0xf] }
 0x115   :  { %2388 = vmatpush.bf16.msrb.mxu2 %v3265_v42  ;;  %v4321_v42 = vld [vmem:[#allocation8 + $0x1f4] sm:$0xf]  ;;  %v3865_v38 = vor.u32 %v4447_v21, %v3862_v25  ;;  %v5053_v25 = vpop.f32.mrf.mxu0 }
 0x116   :  { %2402 = vmatpush.bf16.msrb.mxu3 %v3457_v45  ;;  %v5042_v45 = vadd.f32 %v2130_v41, %v2117_v40  ;;  %v4057_v40 = vor.u32 %v4495_v26, %v4054_v27  ;;  %v3646_v41 = vld [vmem:[#allocation8 + $0x448] sm:$0xf0] }
 0x117   :  { %2361 = vmatpush.bf16.msrb.mxu0 %v4005_v49  ;;  %v3361_v49 = vor.u32 %v4321_v42, %v3358_v43  ;;  %v4441_v42 = vld [vmem:[#allocation8 + $0x5b4] sm:$0xf]  ;;  %v4249_v43 = vor.u32 %v4543_v30, %v4246_v31 }
 0x118   :  { %2375 = vmatpush.bf16.msrb.mxu1 %v4197_v58  ;;  %v4267_v58 = vld [vmem:[#allocation8 + $0x44] sm:$0xf]  ;;  %v2472_v62 = vmul.f32 %v5042_v45, %v5042_v45 }
 0x119   :  { %2389 = vmatpush.bf16.msrb.mxu2 %v3241_v59  ;;  %v3142_v59 = vld [vmem:[#allocation8 + $0x58] sm:$0xf0] }
 0x11a   :  { %2403 = vmatpush.bf16.msrb.mxu3 %v3433_v0  ;;  %v3334_v0 = vld [vmem:[#allocation8 + $0x1d8] sm:$0xf0]  ;;  %v2484_v7 = vmul.f32 %v2472_v62, %v5042_v45  ;;  %v4435_v62 = vld [vmem:[#allocation8 + $0x584] sm:$0xf] }
 0x11b   :  { %2362 = vmatpush.bf16.msrb.mxu0 %v3981_v9  ;;  %v3145_v9 = vor.u32 %v4267_v58, %v3142_v59  ;;  %v3337_v16 = vor.u32 %v4315_v63, %v3334_v0  ;;  %v4387_v59 = vld [vmem:[#allocation8 + $0x404] sm:$0xf]  ;;  %v4225_v63 = vor.u32 %v4537_v52, %v4222_v53  ;;  %v3814_v0 = vld [vmem:[#allocation8 + $0x598] sm:$0xf0] }
 0x11c   :  { %2376 = vmatpush.bf16.msrb.mxu1 %v4173_v14  ;;  %v4309_v14 = vld [vmem:[#allocation8 + $0x194] sm:$0xf]  ;;  %v2496_v19 = vmul.f32 0.044715, %v2484_v7 }
 0x11d   :  { %2390 = vmatpush.bf16.msrb.mxu2 %v3217_v15  ;;  %v2543_v15 = vadd.f32 1.0, %v4567_v61  ;;  %v3622_v61 = vld [vmem:[#allocation8 + $0x418] sm:$0xf0]  ;;  %v4381_v7 = vld [vmem:[#allocation8 + $0x3d4] sm:$0xf] }
 0x11e   :  { %2404 = vmatpush.bf16.msrb.mxu3 %v3409_v18  ;;  %v4399_v18 = vld [vmem:[#allocation8 + $0x464] sm:$0xf] }
 0x11f   :  { %2363 = vmatpush.bf16.msrb.mxu0 %v3957_v48  ;;  %v2508_v48 = vadd.f32 %v2496_v19, %v5042_v45  ;;  %v2555_v32 = vmul.f32 0.5, %v2543_v15  ;;  %v3673_v34 = vor.u32 %v4399_v18, %v3670_v20  ;;  %v3790_v15 = vld [vmem:[#allocation8 + $0x568] sm:$0xf0]  ;;  %v4525_v19 = vld [vmem:[#allocation8 + $0x854] sm:$0xf] }
 0x120   :  { %2377 = vmatpush.bf16.msrb.mxu1 %v4149_v28  ;;  %v4077_v28 = vor.u32 %v4504_v5, %v4076_v4  ;;  %v3625_v5 = vor.u32 %v4387_v59, %v3622_v61  ;;  %v3982_v18 = vld [vmem:[#allocation8 + $0x6e8] sm:$0xf0] }
 0x121   :  { %2391 = vmatpush.bf16.msrb.mxu2 %v3193_v29  ;;  %v3121_v29 = vor.u32 %v4261_v10, %v3118_v11  ;;  %v2520_v37 = vmul.f32 0.7978846, %v2508_v48  ;;  %v2567_v55 = vmul.f32 %v2555_v32, %v5019_v12  ;;  %v4531_v12 = vld [vmem:[#allocation8 + $0x884] sm:$0xf]  ;;  %v3598_v11 = vld [vmem:[#allocation8 + $0x3e8] sm:$0xf0] }
 0x122   :  { %2405 = vmatpush.bf16.msrb.mxu3 %v3385_v33  ;;  %v3313_v33 = vor.u32 %v4309_v14, %v3310_v17  ;;  %v4429_v14 = vld [vmem:[#allocation8 + $0x554] sm:$0xf]  ;;  %v4201_v17 = vor.u32 %v4531_v12, %v4198_v3  ;;  %v4174_v20 = vld [vmem:[#allocation8 + $0x868] sm:$0xf0]  ;;  %v4375_v48 = vld [vmem:[#allocation8 + $0x3a4] sm:$0xf] }
 0x123   :  { %2364 = vmatpush.bf16.msrb.mxu0 %v3933_v44  ;;  %v3838_v44 = vld [vmem:[#allocation8 + $0x5c8] sm:$0xf0]  ;;  %4568 = vtanh.f32 %v2520_v37  ;;  %v2581_v4 = vrot.slane %v2567_v55, 4  ;;  %v3793_v26 = vor.u32 %v4429_v14, %v3790_v15  ;;  %v4177_v31 = vor.u32 %v4525_v19, %v4174_v20  ;;  %v3766_v32 = vld [vmem:[#allocation8 + $0x538] sm:$0xf0] }
 0x124   :  { %2378 = vmatpush.bf16.msrb.mxu1 %v4125_v47  ;;  %v4489_v47 = vld [vmem:[#allocation8 + $0x734] sm:$0xf]  ;;  %v3841_v56 = vor.u32 %v4441_v42, %v3838_v44  ;;  %v4150_v37 = vld [vmem:[#allocation8 + $0x838] sm:$0xf0]  ;;  %v4126_v59 = vld [vmem:[#allocation8 + $0x808] sm:$0xf0] }
 0x125   :  { %2392 = vmatpush.bf16.msrb.mxu2 %v3169_v50  ;;  %v4030_v50 = vld [vmem:[#allocation8 + $0x748] sm:$0xf0]  ;;  %v2582_v21 = vadd.f32 %v2581_v4, %v2567_v55  ;;  %v4363_v12 = vld [vmem:[#allocation8 + $0x344] sm:$0xf]  ;;  %v3526_v3 = vld [vmem:[#allocation8 + $0x358] sm:$0xf0] }
 0x126   :  { %2406 = vmatpush.bf16.msrb.mxu3 %v3361_v49  ;;  %v3649_v49 = vor.u32 %v4393_v36, %v3646_v41  ;;  %v4033_v58 = vor.u32 %v4489_v47, %v4030_v50  ;;  %v4519_v36 = vld [vmem:[#allocation8 + $0x824] sm:$0xf]  ;;  %v5056_v41 = vpop.f32.mrf.mxu1  ;;  %v4369_v47 = vld [vmem:[#allocation8 + $0x374] sm:$0xf]  ;;  %v3550_v50 = vld [vmem:[#allocation8 + $0x388] sm:$0xf0] }
 0x127   :  { %2365 = vmatpush.bf16.msrb.mxu0 %v3909_v2  ;;  %v4006_v2 = vld [vmem:[#allocation8 + $0x718] sm:$0xf0]  ;;  %v4153_v53 = vor.u32 %v4519_v36, %v4150_v37  ;;  %v3742_v55 = vld [vmem:[#allocation8 + $0x508] sm:$0xf0]  ;;  %v4411_v4 = vld [vmem:[#allocation8 + $0x4c4] sm:$0xf] }
 0x128   :  { %2379 = vmatpush.bf16.msrb.mxu1 %v4101_v8  ;;  %v4009_v10 = vor.u32 %v4483_v1, %v4006_v2  ;;  %v4102_v14 = vld [vmem:[#allocation8 + $0x7d8] sm:$0xf0] }
 0x129   :  { %2393 = vmatpush.bf16.msrb.mxu2 %v3145_v9  ;;  %v4569_v8 = vpop.eup %4568  ;;  %v3817_v9 = vor.u32 %v4435_v62, %v3814_v0 }
 0x12a   :  { %2407 = vmatpush.bf16.msrb.mxu3 %v3337_v16  ;;  %v2544_v16 = vadd.f32 1.0, %v4569_v8  ;;  %v3718_v8 = vld [vmem:[#allocation8 + $0x4d8] sm:$0xf0] }
 0x12b   :  { %2366 = vmatpush.bf16.msrb.mxu0 %v3885_v24  ;;  %v2144_v2 = vpop.f32.mrf.mxu0  ;;  %v3721_v19 = vor.u32 %v4411_v4, %v3718_v8 }
 0x12c   :  { %2380 = vmatpush.bf16.msrb.mxu1 %v4077_v28  ;;  %v2556_v24 = vmul.f32 0.5, %v2544_v16  ;;  %v3574_v28 = vld [vmem:[#allocation8 + $0x3b8] sm:$0xf0] }
 0x12d   :  { %2394 = vmatpush.bf16.msrb.mxu2 %v3121_v29  ;;  %v4423_v29 = vld [vmem:[#allocation8 + $0x524] sm:$0xf]  ;;  %v3577_v42 = vor.u32 %v4375_v48, %v3574_v28  ;;  %v3694_v48 = vld [vmem:[#allocation8 + $0x4a8] sm:$0xf0]  ;;  %v4453_v28 = vld [vmem:[#allocation8 + $0x614] sm:$0xf] }
 0x12e   :  { %2408 = vmatpush.bf16.msrb.mxu3 %v3313_v33  ;;  %2367 = vmatmul.bf16.vlgmr.msrb.gmra.mxu0 %v4987_v35  ;;  %v2568_v30 = vmul.f32 %v2556_v24, %v5042_v45  ;;  %v4471_v33 = vld [vmem:[#allocation8 + $0x6a4] sm:$0xf]  ;;  %v4417_v45 = vld [vmem:[#allocation8 + $0x4f4] sm:$0xf]  ;;  %v3502_v24 = vld [vmem:[#allocation8 + $0x328] sm:$0xf0] }
 0x12f   :  { %2415 = vmatpush.bf16.msra.mxu0 %v3673_v34  ;;  %2381 = vmatmul.bf16.vlgmr.msrb.gmra.mxu1 %v4989_v39  ;;  %v3958_v34 = vld [vmem:[#allocation8 + $0x6b8] sm:$0xf0]  ;;  %v3745_v0 = vor.u32 %v4417_v45, %v3742_v55 }
 0x130   :  { %2429 = vmatpush.bf16.msra.mxu1 %v3865_v38  ;;  %2395 = vmatmul.bf16.vlgmr.msrb.gmra.mxu2 %v4975_v57  ;;  %v4477_v57 = vld [vmem:[#allocation8 + $0x6d4] sm:$0xf]  ;;  %v2583_v38 = vrot.slane %v2582_v21, 2  ;;  %v3961_v44 = vor.u32 %v4471_v33, %v3958_v34  ;;  %v2132_v34 = vpop.f32.mrf.mxu3 }
 0x131   :  { %2443 = vmatpush.bf16.msra.mxu2 %v4057_v40  ;;  %2409 = vmatmul.bf16.vlgmr.msrb.gmra.mxu3 %v4978_v6  ;;  %v3601_v6 = vor.u32 %v4381_v7, %v3598_v11  ;;  %v3985_v27 = vor.u32 %v4477_v57, %v3982_v18  ;;  %v2587_v40 = vrot.slane %v2568_v30, 4  ;;  %v4507_v11 = vld [vmem:[#allocation8 + $0x7c4] sm:$0xf]  ;;  %v3529_v57 = vor.u32 %v4363_v12, %v3526_v3  ;;  %v2158_v18 = vpop.f32.mrf.mxu1 }
 0x132   :  { %2457 = vmatpush.bf16.msra.mxu3 %v4249_v43  ;;  %v3769_v43 = vor.u32 %v4423_v29, %v3766_v32  ;;  %v2584_v61 = vadd.f32 %v2583_v38, %v2582_v21  ;;  %v4357_v21 = vld [vmem:[#allocation8 + $0x314] sm:$0xf]  ;;  %v3886_v29 = vld [vmem:[#allocation8 + $0x628] sm:$0xf0] }
 0x133   :  { %2416 = vmatpush.bf16.msra.mxu0 %v3649_v49  ;;  %v2588_v52 = vadd.f32 %v2587_v40, %v2568_v30  ;;  %v4465_v49 = vld [vmem:[#allocation8 + $0x674] sm:$0xf]  ;;  %v3505_v36 = vor.u32 %v4357_v21, %v3502_v24  ;;  %v3889_v38 = vor.u32 %v4453_v28, %v3886_v29 }
 0x134   :  { %2430 = vmatpush.bf16.msra.mxu1 %v3841_v56  ;;  %v3934_v56 = vld [vmem:[#allocation8 + $0x688] sm:$0xf0]  ;;  %v2585_v15 = vrot.slane %v2584_v61, 1  ;;  %v4501_v30 = vld [vmem:[#allocation8 + $0x794] sm:$0xf] }
 0x135   :  { %2444 = vmatpush.bf16.msra.mxu2 %v4033_v58  ;;  %v4513_v58 = vld [vmem:[#allocation8 + $0x7f4] sm:$0xf]  ;;  %v2589_v62 = vrot.slane %v2588_v52, 2  ;;  %v3937_v1 = vor.u32 %v4465_v49, %v3934_v56 }
 0x136   :  { %2458 = vmatpush.bf16.msra.mxu3 %v4225_v63  ;;  %v3553_v63 = vor.u32 %v4369_v47, %v3550_v50  ;;  %v4129_v7 = vor.u32 %v4513_v58, %v4126_v59  ;;  %v2586_v32 = vadd.f32 %v2585_v15, %v2584_v61  ;;  %v5063_v47 = vld [vmem:[#allocation9] sm:$0x3f] }
 0x137   :  { %2417 = vmatpush.bf16.msra.mxu0 %v3625_v5  ;;  %v2590_v5 = vadd.f32 %v2589_v62, %v2588_v52  ;;  %v487_v50 = vperm.slane %v5063_v47, 2 }
 0x138   :  { %2431 = vmatpush.bf16.msra.mxu1 %v3817_v9  ;;  %v4459_v9 = vld [vmem:[#allocation8 + $0x644] sm:$0xf]  ;;  %v2186_v49 = vpop.f32.mrf.mxu3 }
 0x139   :  { %2445 = vmatpush.bf16.msra.mxu2 %v4009_v10  ;;  %v3910_v10 = vld [vmem:[#allocation8 + $0x658] sm:$0xf0]  ;;  %v2591_v16 = vrot.slane %v2590_v5, 1  ;;  %v2160_v52 = vpop.f32.mrf.mxu1  ;;  %v2145_v55 = vadd.f32 %v2144_v2, %v487_v50 }
 0x13a   :  { %2459 = vmatpush.bf16.msra.mxu3 %v4201_v17  ;;  %v5058_v17 = vpop.f32.mrf.mxu2  ;;  %v3913_v20 = vor.u32 %v4459_v9, %v3910_v10  ;;  %v2717_v2 = vld [vmem:[#allocation6] sm:$0x3] }
 0x13b   :  { %2418 = vmatpush.bf16.msra.mxu0 %v3601_v6  ;;  %v4405_v6 = vld [vmem:[#allocation8 + $0x494] sm:$0xf]  ;;  %v2159_v59 = vadd.f32 %v2158_v18, %v2145_v55 }
 0x13c   :  { %2432 = vmatpush.bf16.msra.mxu1 %v3793_v26  ;;  %v2592_v26 = vadd.f32 %v2591_v16, %v2590_v5  ;;  %v3697_v37 = vor.u32 %v4405_v6, %v3694_v48  ;;  %v2477_v16 = vmul.f32 %v5027_v51, %v5027_v51 }
 0x13d   :  { %2446 = vmatpush.bf16.msra.mxu2 %v3985_v27  ;;  %v4105_v27 = vor.u32 %v4507_v11, %v4102_v14  ;;  %v488_v11 = vperm.slane %v5063_v47, 3 }
 0x13e   :  { %2460 = vmatpush.bf16.msra.mxu3 %v4177_v31  ;;  %v4078_v31 = vld [vmem:[#allocation8 + $0x7a8] sm:$0xf0]  ;;  %v2665_v33 = vrot.slane %v2592_v26, 6 }
 0x13f   :  { %2419 = vmatpush.bf16.msra.mxu0 %v3577_v42  ;;  %v4081_v42 = vor.u32 %v4501_v30, %v4078_v31 }
 0x140   :  { %2433 = vmatpush.bf16.msra.mxu1 %v3769_v43  ;;  %v5061_v40 = vsel %vm2673_vm0, %v2586_v32, %v2665_v33  ;;  %v2146_v43 = vpop.f32.mrf.mxu0 }
 0x141   :  { %2447 = vmatpush.bf16.msra.mxu2 %v3961_v44  ;;  %v2718_v44 = vld [vmem:[#allocation11] sm:$0xff]  ;;  %v2147_v56 = vadd.f32 %v2146_v43, %v487_v50 }
 0x142   :  { %2461 = vmatpush.bf16.msra.mxu3 %v4153_v53  ;;  %v2172_v45 = vpop.f32.mrf.mxu2  ;;  %v2063_v53 = vadd.f32 %v5035_v54, %v486_v13  ;;  %v2188_v54 = vpop.f32.mrf.mxu3 }
 0x143   :  { %2420 = vmatpush.bf16.msra.mxu0 %v3553_v63  ;;  %v2161_v61 = vadd.f32 %v2160_v52, %v2147_v56  ;;  %v2173_v46 = vadd.f32 %v2172_v45, %v2159_v59 }
 0x144   :  { %2434 = vmatpush.bf16.msra.mxu1 %v3745_v0  ;;  %v2077_v58 = vadd.f32 %v5039_v60, %v2063_v53 }
 0x145   :  { %2448 = vmatpush.bf16.msra.mxu2 %v3937_v1  ;;  %v2187_v1 = vadd.f32 %v2186_v49, %v2173_v46 }
 0x146   :  { %2462 = vmatpush.bf16.msra.mxu3 %v4129_v7 }
 0x147   :  { %2421 = vmatpush.bf16.msra.mxu0 %v3529_v57 }
 0x148   :  { %2435 = vmatpush.bf16.msra.mxu1 %v3721_v19 }
 0x149   :  { %2449 = vmatpush.bf16.msra.mxu2 %v3913_v20  ;;  %v2489_v20 = vmul.f32 %v2477_v16, %v5027_v51 }
 0x14a   :  { %2463 = vmatpush.bf16.msra.mxu3 %v4105_v27  ;;  %v2174_v63 = vpop.f32.mrf.mxu2 }
 0x14b   :  { %2422 = vmatpush.bf16.msra.mxu0 %v3505_v36  ;;  %v2200_v62 = vpop.f32.mrf.mxu0  ;;  %v2175_v13 = vadd.f32 %v2174_v63, %v2161_v61  ;;  %v2501_v29 = vmul.f32 0.044715, %v2489_v20 }
 0x14c   :  { %2436 = vmatpush.bf16.msra.mxu1 %v3697_v37  ;;  %v2214_v0 = vpop.f32.mrf.mxu1  ;;  %v2201_v60 = vadd.f32 %v2200_v62, %v2187_v1 }
 0x14d   :  { %2450 = vmatpush.bf16.msra.mxu2 %v3889_v38  ;;  %v2513_v38 = vadd.f32 %v2501_v29, %v5027_v51  ;;  %v2759_v29 = vld [vmem:[%s5463_s6 + $0x58] sm:$0xff] }
 0x14e   :  { %2464 = vmatpush.bf16.msra.mxu3 %v4081_v42  ;;  %2423 = vmatmul.bf16.vlgmr.msra.gmra.mxu0 %v4981_v22  ;;  %v2091_v22 = vadd.f32 %v5053_v25, %v2077_v58  ;;  %v5079_v25 = vadd.f32 %v2214_v0, %v2201_v60 }
 0x14f   :  { %2437 = vmatmul.bf16.vlgmr.msra.gmra.mxu1 %v4983_v23  ;;  %v2525_v55 = vmul.f32 0.7978846, %v2513_v38 }
 0x150   :  { %2742 = vmatpush.msrb.mxu1 %v2718_v44  ;;  %2451 = vmatmul.bf16.vlgmr.msra.gmra.mxu2 %v4987_v35  ;;  %v2105_v23 = vadd.f32 %v5056_v41, %v2091_v22  ;;  %v2189_v35 = vadd.f32 %v2188_v54, %v2175_v13  ;;  %v2473_v10 = vmul.f32 %v5079_v25, %v5079_v25 }
 0x151   :  { %2465 = vmatmul.bf16.vlgmr.msra.gmra.mxu3 %v4989_v39 }
 0x152   :  { %v2119_v39 = vadd.f32 %v5058_v17, %v2105_v23  ;;  %v2485_v17 = vmul.f32 %v2473_v10, %v5079_v25 }
 0x153   :  { %v2202_v12 = vpop.f32.mrf.mxu0  ;;  %v2228_v8 = vpop.f32.mrf.mxu2 }
 0x154   :  { %v2203_v3 = vadd.f32 %v2202_v12, %v2189_v35  ;;  %v5077_v4 = vadd.f32 %v2132_v34, %v2119_v39  ;;  %v2216_v5 = vpop.f32.mrf.mxu1  ;;  %v2242_v9 = vpop.f32.mrf.mxu3  ;;  %v2229_v57 = vadd.f32 %v2228_v8, %v488_v11  ;;  %v2497_v21 = vmul.f32 0.044715, %v2485_v17  ;;  %v2763_v35 = vld [vmem:[%s5463_s6 + $0x78] sm:$0xff]  ;;  %v2761_v17 = vld [vmem:[%s5463_s6 + $0x68] sm:$0xff] }
 0x155   :  { %v2795_v39 = vld [vmem:[%s5463_s6 + $0x178] sm:$0xff]  ;;  %2889 = vmatpush.msrb.mxu2 %v2763_v35 }
 0x156   :  { %v5081_v7 = vadd.f32 %v2216_v5, %v2203_v3  ;;  %v2478_v41 = vmul.f32 %v5077_v4, %v5077_v4  ;;  %v2243_v24 = vadd.f32 %v2242_v9, %v2229_v57  ;;  %v2509_v30 = vadd.f32 %v2497_v21, %v5079_v25  ;;  %2929 = vmatpush.msrb.mxu0 %v2795_v39  ;;  %v2762_v3 = vld [vmem:[%s5463_s6 + $0x70] sm:$0xff]  ;;  %v2777_v57 = vld [vmem:[%s5463_s6 + $0xe8] sm:$0xff]  ;;  %v2760_v21 = vld [vmem:[%s5463_s6 + $0x60] sm:$0xff] }
 0x157   :  { %v2778_v5 = vld [vmem:[%s5463_s6 + $0xf0] sm:$0xff]  ;;  %2890 = vmatpush.msrb.mxu2 %v2762_v3  ;;  %v2769_v3 = vld [vmem:[%s5463_s6 + $0xa8] sm:$0xff] }
 0x158   :  { %v2479_v14 = vmul.f32 %v5081_v7, %v5081_v7  ;;  %v2490_v15 = vmul.f32 %v2478_v41, %v5077_v4  ;;  %v2521_v42 = vmul.f32 0.7978846, %v2509_v30  ;;  %v2794_v41 = vld [vmem:[%s5463_s6 + $0x170] sm:$0xff]  ;;  %v2775_v30 = vld [vmem:[%s5463_s6 + $0xd8] sm:$0xff] }
 0x159   :  { %2930 = vmatpush.msrb.mxu0 %v2794_v41  ;;  %2891 = vmatpush.msrb.mxu2 %v2761_v17 }
 0x15a   :  { %v2491_v18 = vmul.f32 %v2479_v14, %v5081_v7  ;;  %v2502_v19 = vmul.f32 0.044715, %v2490_v15 }
 0x15b   :  { %v2230_v6 = vpop.f32.mrf.mxu2  ;;  %2892 = vmatpush.msrb.mxu2 %v2760_v21  ;;  %v2783_v21 = vld [vmem:[%s5463_s6 + $0x118] sm:$0xff] }
 0x15c   :  { %v2503_v26 = vmul.f32 0.044715, %v2491_v18  ;;  %v2244_v27 = vpop.f32.mrf.mxu3  ;;  %v2514_v48 = vadd.f32 %v2502_v19, %v5077_v4  ;;  %v2231_v34 = vadd.f32 %v2230_v6, %v488_v11  ;;  %v4883_v11 = vmov 0.0   ;;  %v2793_v18 = vld [vmem:[%s5463_s6 + $0x168] sm:$0xff]  ;;  %v2792_v6 = vld [vmem:[%s5463_s6 + $0x160] sm:$0xff] }
 0x15d   :  { %188 = vst [vmem:[#allocation2 + $0x8] sm:$0xf] %v4883_v11  ;;  %2931 = vmatpush.msrb.mxu0 %v2793_v18  ;;  %2893 = vmatpush.msrb.mxu2 %v2759_v29  ;;  %v2768_v11 = vld [vmem:[%s5463_s6 + $0xa0] sm:$0xff]  ;;  %v2782_v29 = vld [vmem:[%s5463_s6 + $0x110] sm:$0xff] }
 0x15e   :  { %v2515_v33 = vadd.f32 %v2503_v26, %v5081_v7  ;;  %v2526_v36 = vmul.f32 0.7978846, %v2514_v48  ;;  %v2245_v44 = vadd.f32 %v2244_v27, %v2231_v34  ;;  %v2774_v34 = vld [vmem:[%s5463_s6 + $0xd0] sm:$0xff] }
 0x15f   :  { %4250 = vmatmul.msk.f32.vlgmr.msrb.gmra.mxu1 %vm2723_vm1, %v2717_v2  ;;  %v2779_v2 = vld [vmem:[%s5463_s6 + $0xf8] sm:$0xff]  ;;  %2932 = vmatpush.msrb.mxu0 %v2792_v6 }
 0x160   :  { %v2527_v43 = vmul.f32 0.7978846, %v2515_v33  ;;  %4570 = vtanh.f32 %v2526_v36  ;;  %2909 = vmatpush.msrb.mxu3 %v2779_v2  ;;  %v2790_v36 = vld [vmem:[%s5463_s6 + $0x150] sm:$0xff] }
 0x161   :  { %4572 = vtanh.f32 %v2521_v42 }
 0x162   :  { %4574 = vtanh.f32 %v2527_v43  ;;  %2910 = vmatpush.msrb.mxu3 %v2778_v5  ;;  %v2785_v5 = vld [vmem:[%s5463_s6 + $0x128] sm:$0xff] }
 0x163   :  { %4576 = vtanh.f32 %v2525_v55  ;;  %v2772_v55 = vld [vmem:[%s5463_s6 + $0xc0] sm:$0xff] }
 0x164   :  { %2911 = vmatpush.msrb.mxu3 %v2777_v57 }
 0x166   :  { %v4571_v61 = vpop.eup %4570 }
 0x167   :  { %v4573_v22 = vpop.eup %4572  ;;  %v2550_v13 = vadd.f32 1.0, %v4571_v61 }
 0x168   :  { %v4575_v0 = vpop.eup %4574  ;;  %v2545_v9 = vadd.f32 1.0, %v4573_v22  ;;  %v2787_v22 = vld [vmem:[%s5463_s6 + $0x138] sm:$0xff] }
 0x169   :  { %v4577_v8 = vpop.eup %4576  ;;  %v2551_v10 = vadd.f32 1.0, %v4575_v0  ;;  %v2562_v14 = vmul.f32 0.5, %v2550_v13  ;;  %v2754_v13 = vld [vmem:[%s5463_s6 + $0x30] sm:$0xff] }
 0x16a   :  { %v2549_v19 = vadd.f32 1.0, %v4577_v8  ;;  %v2557_v26 = vmul.f32 0.5, %v2545_v9 }
 0x16b   :  { %v2256_v28 = vpop.f32.mrf.mxu0  ;;  %v2563_v27 = vmul.f32 0.5, %v2551_v10  ;;  %v2574_v48 = vmul.f32 %v2562_v14, %v5077_v4  ;;  %v2758_v4 = vld [vmem:[%s5463_s6 + $0x50] sm:$0xff]  ;;  %v2752_v10 = vld [vmem:[%s5463_s6 + $0x20] sm:$0xff] }
 0x16c   :  { %v2257_v31 = vadd.f32 %v2256_v28, %v2243_v24  ;;  %v2270_v32 = vpop.f32.mrf.mxu1  ;;  %v2776_v24 = vld [vmem:[%s5463_s6 + $0xe0] sm:$0xff]  ;;  %2894 = vmatpush.msrb.mxu2 %v2758_v4  ;;  %v2765_v4 = vld [vmem:[%s5463_s6 + $0x88] sm:$0xff] }
 0x16d   :  { %2912 = vmatpush.msrb.mxu3 %v2776_v24  ;;  %v2575_v38 = vmul.f32 %v2563_v27, %v5081_v7  ;;  %v2623_v43 = vrot.slane %v2574_v48, 4  ;;  %v2784_v14 = vld [vmem:[%s5463_s6 + $0x120] sm:$0xff] }
 0x16e   :  { %v2271_v37 = vadd.f32 %v2270_v32, %v2257_v31  ;;  %v2791_v31 = vld [vmem:[%s5463_s6 + $0x158] sm:$0xff]  ;;  %v2561_v32 = vmul.f32 0.5, %v2549_v19 }
 0x16f   :  { %2913 = vmatpush.msrb.mxu3 %v2775_v30  ;;  %2933 = vmatpush.msrb.mxu0 %v2791_v31  ;;  %v2751_v19 = vld [vmem:[%s5463_s6 + $0x18] sm:$0xff] }
 0x170   :  { %v2573_v7 = vmul.f32 %v2561_v32, %v5027_v51  ;;  %v2624_v51 = vadd.f32 %v2623_v43, %v2574_v48  ;;  %v2750_v48 = vld [vmem:[%s5463_s6 + $0x10] sm:$0xff]  ;;  %v2748_v43 = vld [vmem:[%s5463_s6] sm:$0xff] }
 0x171   :  { %2914 = vmatpush.msrb.mxu3 %v2774_v34  ;;  %2934 = vmatpush.msrb.mxu0 %v2790_v36  ;;  %v2781_v34 = vld [vmem:[%s5463_s6 + $0x108] sm:$0xff] }
 0x172   :  { %v2617_v0 = vrot.slane %v2573_v7, 4  ;;  %v2625_v39 = vrot.slane %v2624_v51, 2 }
 0x173   :  { %v2284_v50 = vpop.f32.mrf.mxu2  ;;  %v2258_v52 = vpop.f32.mrf.mxu0 }
 0x174   :  { %v2285_v45 = vadd.f32 %v2284_v50, %v2271_v37  ;;  %v2298_v53 = vpop.f32.mrf.mxu3  ;;  %v2259_v49 = vadd.f32 %v2258_v52, %v2245_v44  ;;  %v2272_v58 = vpop.f32.mrf.mxu1  ;;  %v2569_v37 = vmul.f32 %v2557_v26, %v5079_v25  ;;  %v2757_v50 = vld [vmem:[%s5463_s6 + $0x48] sm:$0xff]  ;;  %v2618_v9 = vadd.f32 %v2617_v0, %v2573_v7 }
 0x175   :  { %v2789_v25 = vld [vmem:[%s5463_s6 + $0x148] sm:$0xff]  ;;  %2895 = vmatpush.msrb.mxu2 %v2757_v50  ;;  %v2626_v18 = vadd.f32 %v2625_v39, %v2624_v51  ;;  %v2780_v50 = vld [vmem:[%s5463_s6 + $0x100] sm:$0xff] }
 0x176   :  { %v5100_v56 = vadd.f32 %v2298_v53, %v2285_v45  ;;  %v2273_v63 = vadd.f32 %v2272_v58, %v2259_v49  ;;  %v2773_v45 = vld [vmem:[%s5463_s6 + $0xc8] sm:$0xff]  ;;  %2935 = vmatpush.msrb.mxu0 %v2789_v25  ;;  %v2756_v53 = vld [vmem:[%s5463_s6 + $0x40] sm:$0xff]  ;;  %v2593_v58 = vrot.slane %v2569_v37, 4  ;;  %v2619_v26 = vrot.slane %v2618_v9, 2 }
 0x177   :  { %2915 = vmatpush.msrb.mxu3 %v2773_v45  ;;  %v2788_v49 = vld [vmem:[%s5463_s6 + $0x140] sm:$0xff]  ;;  %2896 = vmatpush.msrb.mxu2 %v2756_v53  ;;  %v2627_v32 = vrot.slane %v2626_v18, 1 }
 0x178   :  { %v2474_v59 = vmul.f32 %v5100_v56, %v5100_v56  ;;  %2936 = vmatpush.msrb.mxu0 %v2788_v49  ;;  %v2847_v49 = vld [vmem:[#allocation14 + $0x18] sm:$0xff] }
 0x179   :  { %2916 = vmatpush.msrb.mxu3 %v2772_v55  ;;  %v2628_v7 = vadd.f32 %v2627_v32, %v2626_v18  ;;  %2864 = vmatpush.msra.mxu1 %v2847_v49  ;;  %v2805_v32 = vld [vmem:[%s5463_s6 + $0x1c8] sm:$0xff] }
 0x17a   :  { %v2486_v62 = vmul.f32 %v2474_v59, %v5100_v56  ;;  %v2629_v59 = vrot.slane %v2575_v38, 4  ;;  %2937 = vmatpush.msrb.mxu0 %v2787_v22 }
 0x17b   :  { %v2286_v46 = vpop.f32.mrf.mxu2 }
 0x17c   :  { %v2498_v54 = vmul.f32 0.044715, %v2486_v62  ;;  %v2287_v23 = vadd.f32 %v2286_v46, %v2273_v63  ;;  %v2300_v1 = vpop.f32.mrf.mxu3  ;;  %v2755_v62 = vld [vmem:[%s5463_s6 + $0x38] sm:$0xff]  ;;  %v2630_v35 = vadd.f32 %v2629_v59, %v2575_v38  ;;  %v2620_v38 = vadd.f32 %v2619_v26, %v2618_v9 }
 0x17d   :  { %v2771_v63 = vld [vmem:[%s5463_s6 + $0xb8] sm:$0xff]  ;;  %2897 = vmatpush.msrb.mxu2 %v2755_v62  ;;  %v2846_v62 = vld [vmem:[#allocation14 + $0x10] sm:$0xff] }
 0x17e   :  { %v2510_v12 = vadd.f32 %v2498_v54, %v5100_v56  ;;  %v5115_v60 = vadd.f32 %v2300_v1, %v2287_v23  ;;  %2917 = vmatpush.msrb.mxu3 %v2771_v63  ;;  %v2770_v54 = vld [vmem:[%s5463_s6 + $0xb0] sm:$0xff]  ;;  %v2594_v1 = vadd.f32 %v2593_v58, %v2569_v37  ;;  %v2621_v58 = vrot.slane %v2620_v38, 1  ;;  %2865 = vmatpush.msra.mxu1 %v2846_v62 }
 0x17f   :  { %v2786_v23 = vld [vmem:[%s5463_s6 + $0x130] sm:$0xff]  ;;  %2898 = vmatpush.msrb.mxu2 %v2754_v13  ;;  %v2669_v63 = vrot.slane %v2628_v7, 6  ;;  %v2845_v13 = vld [vmem:[#allocation14 + $0x8] sm:$0xff]  ;;  %v2801_v7 = vld [vmem:[%s5463_s6 + $0x1a8] sm:$0xff] }
 0x180   :  { %v2522_v15 = vmul.f32 0.7978846, %v2510_v12  ;;  %v2480_v16 = vmul.f32 %v5115_v60, %v5115_v60  ;;  %2918 = vmatpush.msrb.mxu3 %v2770_v54  ;;  %2938 = vmatpush.msrb.mxu0 %v2786_v23  ;;  %v2753_v12 = vld [vmem:[%s5463_s6 + $0x28] sm:$0xff]  ;;  %v2622_v54 = vadd.f32 %v2621_v58, %v2620_v38  ;;  %v2798_v62 = vld [vmem:[%s5463_s6 + $0x190] sm:$0xff] }
 0x181   :  { %2899 = vmatpush.msrb.mxu2 %v2753_v12  ;;  %2866 = vmatpush.msra.mxu1 %v2845_v13 }
 0x182   :  { %4578 = vtanh.f32 %v2522_v15  ;;  %v2492_v20 = vmul.f32 %v2480_v16, %v5115_v60  ;;  %2919 = vmatpush.msrb.mxu3 %v2769_v3  ;;  %2939 = vmatpush.msrb.mxu0 %v2785_v5  ;;  %v2595_v15 = vrot.slane %v2594_v1, 2  ;;  %v2631_v16 = vrot.slane %v2630_v35, 2  ;;  %v2811_v3 = vld [vmem:[%s5463_s6 + $0x1f8] sm:$0xff] }
 0x183   :  { %2900 = vmatpush.msrb.mxu2 %v2752_v10  ;;  %v2680_v39 = vsel %vm2673_vm0, %v2622_v54, %v2669_v63 }
 0x184   :  { %v2504_v28 = vmul.f32 0.044715, %v2492_v20  ;;  %2920 = vmatpush.msrb.mxu3 %v2768_v11  ;;  %2940 = vmatpush.msrb.mxu0 %v2784_v14  ;;  %v2767_v20 = vld [vmem:[%s5463_s6 + $0x98] sm:$0xff]  ;;  %v2596_v30 = vadd.f32 %v2595_v15, %v2594_v1  ;;  %v2810_v11 = vld [vmem:[%s5463_s6 + $0x1f0] sm:$0xff] }
 0x185   :  { %2901 = vmatpush.msrb.mxu2 %v2751_v19 }
 0x186   :  { %v2516_v33 = vadd.f32 %v2504_v28, %v5115_v60  ;;  %2921 = vmatpush.msrb.mxu3 %v2767_v20  ;;  %2941 = vmatpush.msrb.mxu0 %v2783_v21  ;;  %v2766_v28 = vld [vmem:[%s5463_s6 + $0x90] sm:$0xff]  ;;  %v2597_v45 = vrot.slane %v2596_v30, 1  ;;  %v2808_v21 = vld [vmem:[%s5463_s6 + $0x1e0] sm:$0xff] }
 0x187   :  { %2902 = vmatpush.msrb.mxu2 %v2750_v48  ;;  %v2807_v48 = vld [vmem:[%s5463_s6 + $0x1d8] sm:$0xff] }
 0x188   :  { %v4579_v42 = vpop.eup %4578  ;;  %v2528_v44 = vmul.f32 0.7978846, %v2516_v33  ;;  %2922 = vmatpush.msrb.mxu3 %v2766_v28  ;;  %2942 = vmatpush.msrb.mxu0 %v2782_v29  ;;  %v2749_v33 = vld [vmem:[%s5463_s6 + $0x8] sm:$0xff]  ;;  %v2598_v59 = vadd.f32 %v2597_v45, %v2596_v30  ;;  %v2806_v29 = vld [vmem:[%s5463_s6 + $0x1d0] sm:$0xff] }
 0x189   :  { %v2546_v52 = vadd.f32 1.0, %v4579_v42  ;;  %2903 = vmatpush.msrb.mxu2 %v2749_v33 }
 0x18a   :  { %4580 = vtanh.f32 %v2528_v44  ;;  %2923 = vmatpush.msrb.mxu3 %v2765_v4  ;;  %2943 = vmatpush.msrb.mxu0 %v2781_v34  ;;  %v2764_v44 = vld [vmem:[%s5463_s6 + $0x80] sm:$0xff]  ;;  %v2666_v1 = vrot.slane %v2598_v59, 4  ;;  %v2799_v59 = vld [vmem:[%s5463_s6 + $0x198] sm:$0xff] }
 0x18b   :  { %v2558_v61 = vmul.f32 0.5, %v2546_v52  ;;  %v5235_v27 = vpop.f32.mrf.mxu0  ;;  %2904 = vmatpush.msrb.mxu2 %v2748_v43  ;;  %v2804_v4 = vld [vmem:[%s5463_s6 + $0x1c0] sm:$0xff] }
 0x18c   :  { %v5255_v42 = vpop.f32.mrf.mxu1  ;;  %2924 = vmatpush.msrb.mxu3 %v2764_v44  ;;  %2944 = vmatpush.msrb.mxu0 %v2780_v50 }
 0x18d   :  { %v2570_v46 = vmul.f32 %v2558_v61, %v5100_v56 }
 0x18f   :  { %v2599_v2 = vrot.slane %v2570_v46, 4 }
 0x190   :  { %v4581_v56 = vpop.eup %4580 }
 0x191   :  { %v2600_v41 = vadd.f32 %v2599_v2, %v2570_v46  ;;  %v2552_v8 = vadd.f32 1.0, %v4581_v56  ;;  %v2844_v56 = vld [vmem:[#allocation14] sm:$0xff] }
 0x192   :  { %2867 = vmatpush.msra.mxu1 %v2844_v56 }
 0x193   :  { %v2601_v17 = vrot.slane %v2600_v41, 2  ;;  %v2564_v57 = vmul.f32 0.5, %v2552_v8  ;;  %v2314_v22 = vpop.f32.mrf.mxu0  ;;  %v2340_v23 = vpop.f32.mrf.mxu2  ;;  %v489_v8 = vperm.slane %v5063_v47, 4 }
 0x194   :  { %v2328_v12 = vpop.f32.mrf.mxu1  ;;  %2949 = vmatpush.msrb.mxu1 %v2811_v3  ;;  %v2354_v10 = vpop.f32.mrf.mxu3 }
 0x195   :  { %v2602_v24 = vadd.f32 %v2601_v17, %v2600_v41  ;;  %v2576_v6 = vmul.f32 %v2564_v57, %v5115_v60  ;;  %v2632_v60 = vadd.f32 %v2631_v16, %v2630_v35  ;;  %v2315_v15 = vadd.f32 %v2314_v22, %v489_v8  ;;  %v2809_v17 = vld [vmem:[%s5463_s6 + $0x1e8] sm:$0xff] }
 0x196   :  { %2950 = vmatpush.msrb.mxu1 %v2810_v11  ;;  %v2313_v18 = vadd.f32 %v5235_v27, %v489_v8  ;;  %v2797_v22 = vld [vmem:[%s5463_s6 + $0x188] sm:$0xff] }
 0x197   :  { %v2635_v31 = vrot.slane %v2576_v6, 4  ;;  %v2603_v36 = vrot.slane %v2602_v24, 1  ;;  %v2633_v25 = vrot.slane %v2632_v60, 1 }
 0x198   :  { %2951 = vmatpush.msrb.mxu1 %v2809_v17  ;;  %v2327_v27 = vadd.f32 %v5255_v42, %v2313_v18  ;;  %v2802_v42 = vld [vmem:[%s5463_s6 + $0x1b0] sm:$0xff] }
 0x199   :  { %v2636_v37 = vadd.f32 %v2635_v31, %v2576_v6  ;;  %v2604_v53 = vadd.f32 %v2603_v36, %v2602_v24  ;;  %v2634_v61 = vadd.f32 %v2633_v25, %v2632_v60  ;;  %v2329_v24 = vadd.f32 %v2328_v12, %v2315_v15 }
 0x19a   :  { %2952 = vmatpush.msrb.mxu1 %v2808_v21  ;;  %v2341_v33 = vadd.f32 %v2340_v23, %v2327_v27 }
 0x19b   :  { %v2637_v52 = vrot.slane %v2636_v37, 2  ;;  %v2667_v46 = vrot.slane %v2604_v53, 2  ;;  %v2670_v35 = vrot.slane %v2634_v61, 4  ;;  %v2342_v26 = vpop.f32.mrf.mxu2 }
 0x19c   :  { %2953 = vmatpush.msrb.mxu1 %v2807_v48  ;;  %v2343_v30 = vadd.f32 %v2342_v26, %v2329_v24  ;;  %v2356_v31 = vpop.f32.mrf.mxu3  ;;  %v2355_v38 = vadd.f32 %v2354_v10, %v2341_v33 }
 0x19d   :  { %v2638_v55 = vadd.f32 %v2637_v52, %v2636_v37  ;;  %v2676_v5 = vsel %vm2675_vm2, %v2666_v1, %v2667_v46  ;;  %v2803_v37 = vld [vmem:[%s5463_s6 + $0x1b8] sm:$0xff] }
 0x19e   :  { %v2678_v16 = vsel %vm2677_vm3, %v5061_v40, %v2676_v5  ;;  %2954 = vmatpush.msrb.mxu1 %v2806_v29  ;;  %v2357_v34 = vadd.f32 %v2356_v31, %v2343_v30 }
 0x19f   :  { %v2639_v51 = vrot.slane %v2638_v55, 1 }
 0x1a0   :  { %2955 = vmatpush.msrb.mxu1 %v2805_v32 }
 0x1a1   :  { %v2640_v0 = vadd.f32 %v2639_v51, %v2638_v55  ;;  %v2800_v55 = vld [vmem:[%s5463_s6 + $0x1a0] sm:$0xff]  ;;  %v490_v51 = vperm.slane %v5063_v47, 5 }
 0x1a2   :  { %2956 = vmatpush.msrb.mxu1 %v2804_v4  ;;  %v2796_v47 = vld [vmem:[%s5463_s6 + $0x180] sm:$0xff] }
 0x1a3   :  { %v2671_v2 = vrot.slane %v2640_v0, 2 }
 0x1a4   :  { %2957 = vmatpush.msrb.mxu1 %v2803_v37  ;;  %v2843_v37 = vld [vmem:[%s5463_s6 + $0x2f8] sm:$0xff] }
 0x1a5   :  { %v2681_v41 = vsel %vm2675_vm2, %v2670_v35, %v2671_v2  ;;  %2989 = vmatpush.msra.mxu3 %v2843_v37 }
 0x1a6   :  { %v2682_v9 = vsel %vm2677_vm3, %v2680_v39, %v2681_v41  ;;  %2958 = vmatpush.msrb.mxu1 %v2802_v42 }
 0x1a7   :  { %v2688_v14 = vrot.slane %v2682_v9, 7 }
 0x1a8   :  { %2959 = vmatpush.msrb.mxu1 %v2801_v7  ;;  %v2841_v7 = vld [vmem:[%s5463_s6 + $0x2e8] sm:$0xff] }
 0x1a9   :  { %v2690_v57 = vsel %vm2689_vm4, %v2688_v14, %v2678_v16 }
 0x1aa   :  { %v2692_v19 = vsel %vm2691_vm5, %v2688_v14, %v2690_v57  ;;  %2960 = vmatpush.msrb.mxu1 %v2800_v55 }
 0x1ab   :  { %v2368_v20 = vpop.f32.mrf.mxu0  ;;  %v2694_v40 = vsel %vm2693_vm6, %v2688_v14, %v2692_v19 }
 0x1ac   :  { %v2696_v6 = vsel %vm2695_vm7, %v2688_v14, %v2694_v40  ;;  %v2382_v28 = vpop.f32.mrf.mxu1  ;;  %v2369_v25 = vadd.f32 %v2368_v20, %v2355_v38  ;;  %2961 = vmatpush.msrb.mxu1 %v2799_v59  ;;  %v2840_v59 = vld [vmem:[%s5463_s6 + $0x2e0] sm:$0xff] }
 0x1ad   :  { %v2715_v60 = vmul.f32 0.125, %v2696_v6  ;;  %v4563_v6 = vld [vmem:[#allocation12] ss:$0 sm:$0xff] }
 0x1ae   :  { %v5316_v61 = vadd.f32 %v2382_v28, %v2369_v25  ;;  %2962 = vmatpush.msrb.mxu1 %v2798_v62 }
 0x1af   :  { %2874 = vst [vmem:[#allocation1] ss:$4 sm:$0xff] %v2715_v60 }
 0x1b0   :  { %v2475_v46 = vmul.f32 %v5316_v61, %v5316_v61  ;;  %2963 = vmatpush.msrb.mxu1 %v2797_v22 }
 0x1b2   :  { %2964 = vmatpush.msrb.mxu1 %v2796_v47  ;;  %v2487_v23 = vmul.f32 %v2475_v46, %v5316_v61  ;;  %v2839_v47 = vld [vmem:[%s5463_s6 + $0x2d8] sm:$0xff] }
 0x1b3   :  { %v2370_v36 = vpop.f32.mrf.mxu0  ;;  %v2396_v53 = vpop.f32.mrf.mxu2 }
 0x1b4   :  { %v2371_v43 = vadd.f32 %v2370_v36, %v2357_v34  ;;  %v2384_v44 = vpop.f32.mrf.mxu1  ;;  %v2410_v58 = vpop.f32.mrf.mxu3  ;;  %v2397_v0 = vadd.f32 %v2396_v53, %v490_v51  ;;  %v2499_v3 = vmul.f32 0.044715, %v2487_v23  ;;  %v2827_v36 = vld [vmem:[%s5463_s6 + $0x278] sm:$0xff]  ;;  %v2822_v23 = vld [vmem:[%s5463_s6 + $0x250] sm:$0xff] }
 0x1b5   :  { %2969 = vmatpush.msra.mxu2 %v2827_v36  ;;  %v2829_v36 = vld [vmem:[%s5463_s6 + $0x288] sm:$0xff] }
 0x1b6   :  { %v2877_v50 = vld.sshfl [vmem:[#allocation1] sm:$0xff pattern:$0x73625140]  ;;  %v2878_v45 = vld.sshfl [vmem:[#allocation1 + $0x8] sm:$0xff pattern:$0x73625140]  ;;  %v5311_v49 = vadd.f32 %v2384_v44, %v2371_v43  ;;  %v2411_v1 = vadd.f32 %v2410_v58, %v2397_v0  ;;  %v2511_v10 = vadd.f32 %v2499_v3, %v5316_v61 }
 0x1b7   :  { %2905 = vmatmul.f32.vlgmr.msrb.gmra.mxu2 %v2877_v50  ;;  %2925 = vmatmul.f32.vlgmr.msrb.gmra.mxu3 %v2878_v45  ;;  %v2879_v52 = vld.sshfl [vmem:[#allocation1 + $0x10] sm:$0xff pattern:$0x73625140]  ;;  %v2824_v58 = vld [vmem:[%s5463_s6 + $0x260] sm:$0xff]  ;;  %v2823_v0 = vld [vmem:[%s5463_s6 + $0x258] sm:$0xff] }
 0x1b8   :  { %2945 = vmatmul.f32.vlgmr.msrb.gmra.mxu0 %v2879_v52  ;;  %v2481_v63 = vmul.f32 %v5311_v49, %v5311_v49  ;;  %v2523_v20 = vmul.f32 0.7978846, %v2511_v10  ;;  %v2826_v44 = vld [vmem:[%s5463_s6 + $0x270] sm:$0xff]  ;;  %v2825_v52 = vld [vmem:[%s5463_s6 + $0x268] sm:$0xff] }
 0x1b9   :  { %v2842_v50 = vld [vmem:[%s5463_s6 + $0x2f0] sm:$0xff]  ;;  %2970 = vmatpush.msra.mxu2 %v2826_v44 }
 0x1ba   :  { %v2493_v13 = vmul.f32 %v2481_v63, %v5311_v49  ;;  %2990 = vmatpush.msra.mxu3 %v2842_v50  ;;  %v2880_v63 = vld.sshfl [vmem:[#allocation1 + $0x18] sm:$0xff pattern:$0x73625140] }
 0x1bb   :  { %v2398_v54 = vpop.f32.mrf.mxu2  ;;  %2971 = vmatpush.msra.mxu2 %v2825_v52 }
 0x1bc   :  { %v2412_v35 = vpop.f32.mrf.mxu3  ;;  %v2505_v39 = vmul.f32 0.044715, %v2493_v13  ;;  %v2399_v5 = vadd.f32 %v2398_v54, %v490_v51  ;;  %2991 = vmatpush.msra.mxu3 %v2841_v7 }
 0x1bd   :  { %2972 = vmatpush.msra.mxu2 %v2824_v58 }
 0x1be   :  { %v2517_v41 = vadd.f32 %v2505_v39, %v5311_v49  ;;  %v2413_v11 = vadd.f32 %v2412_v35, %v2399_v5  ;;  %2992 = vmatpush.msra.mxu3 %v2840_v59  ;;  %v2820_v39 = vld [vmem:[%s5463_s6 + $0x240] sm:$0xff]  ;;  %v2819_v5 = vld [vmem:[%s5463_s6 + $0x238] sm:$0xff] }
 0x1bf   :  { %2973 = vmatpush.msra.mxu2 %v2823_v0 }
 0x1c0   :  { %v2529_v57 = vmul.f32 0.7978846, %v2517_v41  ;;  %2993 = vmatpush.msra.mxu3 %v2839_v47 }
 0x1c1   :  { %2974 = vmatpush.msra.mxu2 %v2822_v23 }
 0x1c2   :  { %4582 = vtanh.f32 %v2529_v57 }
 0x1c3   :  { %4584 = vtanh.f32 %v2523_v20 }
 0x1c8   :  { %v4583_v32 = vpop.eup %4582 }
 0x1c9   :  { %v4585_v38 = vpop.eup %4584  ;;  %v2553_v43 = vadd.f32 1.0, %v4583_v32 }
 0x1ca   :  { %v2547_v25 = vadd.f32 1.0, %v4585_v38 }
 0x1cb   :  { %v2424_v2 = vpop.f32.mrf.mxu0  ;;  %v2565_v55 = vmul.f32 0.5, %v2553_v43  ;;  %v2828_v43 = vld [vmem:[%s5463_s6 + $0x280] sm:$0xff] }
 0x1cc   :  { %v2438_v56 = vpop.f32.mrf.mxu1  ;;  %v2425_v12 = vadd.f32 %v2424_v2, %v2411_v1  ;;  %v2559_v22 = vmul.f32 0.5, %v2547_v25  ;;  %v2838_v1 = vld [vmem:[%s5463_s6 + $0x2d0] sm:$0xff] }
 0x1cd   :  { %v2577_v13 = vmul.f32 %v2565_v55, %v5311_v49  ;;  %2994 = vmatpush.msra.mxu3 %v2838_v1  ;;  %v2821_v49 = vld [vmem:[%s5463_s6 + $0x248] sm:$0xff] }
 0x1ce   :  { %v2439_v8 = vadd.f32 %v2438_v56, %v2425_v12  ;;  %v2571_v35 = vmul.f32 %v2559_v22, %v5316_v61  ;;  %v2837_v56 = vld [vmem:[%s5463_s6 + $0x2c8] sm:$0xff]  ;;  %2975 = vmatpush.msra.mxu2 %v2821_v49  ;;  %v2836_v61 = vld [vmem:[%s5463_s6 + $0x2c0] sm:$0xff]  ;;  %v2580_v22 = vld [vmem:[#allocation2 + $0x8] sm:$0xf] }
 0x1cf   :  { %v2641_v12 = vrot.slane %v2577_v13, 4  ;;  %2995 = vmatpush.msra.mxu3 %v2837_v56  ;;  %v3021_v49 = vld [vmem:[#allocation17 + $0x30] sm:$0xff]  ;;  %v3020_v56 = vld [vmem:[#allocation17 + $0x28] sm:$0xff] }
 0x1d0   :  { %2976 = vmatpush.msra.mxu2 %v2820_v39  ;;  %v3019_v39 = vld [vmem:[#allocation17 + $0x20] sm:$0xff] }
 0x1d1   :  { %2996 = vmatpush.msra.mxu3 %v2836_v61  ;;  %v3018_v61 = vld [vmem:[#allocation17 + $0x18] sm:$0xff] }
 0x1d2   :  { %2977 = vmatpush.msra.mxu2 %v2819_v5  ;;  %v3015_v5 = vld [vmem:[#allocation17] sm:$0xff] }
 0x1d3   :  { %v2452_v9 = vpop.f32.mrf.mxu2  ;;  %v2426_v16 = vpop.f32.mrf.mxu0 }
 0x1d4   :  { %v2453_v14 = vadd.f32 %v2452_v9, %v2439_v8  ;;  %v2466_v15 = vpop.f32.mrf.mxu3  ;;  %v2440_v17 = vpop.f32.mrf.mxu1  ;;  %v2427_v19 = vadd.f32 %v2426_v16, %v2413_v11  ;;  %v2835_v8 = vld [vmem:[%s5463_s6 + $0x2b8] sm:$0xff]  ;;  %v2605_v9 = vrot.slane %v2571_v35, 4  ;;  %v2642_v16 = vadd.f32 %v2641_v12, %v2577_v13  ;;  %v3017_v12 = vld [vmem:[#allocation17 + $0x10] sm:$0xff] }
 0x1d5   :  { %2997 = vmatpush.msra.mxu3 %v2835_v8 }
 0x1d6   :  { %v5336_v18 = vadd.f32 %v2466_v15, %v2453_v14  ;;  %v2441_v24 = vadd.f32 %v2440_v17, %v2427_v19  ;;  %v2818_v14 = vld [vmem:[%s5463_s6 + $0x230] sm:$0xff]  ;;  %v2833_v19 = vld [vmem:[%s5463_s6 + $0x2a8] sm:$0xff]  ;;  %v2606_v20 = vadd.f32 %v2605_v9, %v2571_v35 }
 0x1d7   :  { %v2834_v15 = vld [vmem:[%s5463_s6 + $0x2b0] sm:$0xff]  ;;  %2978 = vmatpush.msra.mxu2 %v2818_v14 }
 0x1d8   :  { %v2476_v21 = vmul.f32 %v5336_v18, %v5336_v18  ;;  %2998 = vmatpush.msra.mxu3 %v2834_v15 }
 0x1da   :  { %v2488_v40 = vmul.f32 %v2476_v21, %v5336_v18  ;;  %2999 = vmatpush.msra.mxu3 %v2833_v19  ;;  %v4564_v19 = vld [vmem:[#allocation15] ss:$0 sm:$0xff] }
 0x1db   :  { %v2454_v26 = vpop.f32.mrf.mxu2 }
 0x1dc   :  { %v2500_v48 = vmul.f32 0.044715, %v2488_v40  ;;  %v2455_v27 = vadd.f32 %v2454_v26, %v2441_v24  ;;  %v2468_v28 = vpop.f32.mrf.mxu3  ;;  %v2744_v29 = vpop.f32.mrf.mxu1  ;;  %v2816_v40 = vld [vmem:[%s5463_s6 + $0x220] sm:$0xff] }
 0x1dd   :  { %v2745_v31 = vadd.f32 %v4563_v6, %v2744_v29  ;;  %v2832_v24 = vld [vmem:[%s5463_s6 + $0x2a0] sm:$0xff]  ;;  %v2643_v6 = vrot.slane %v2642_v16, 2  ;;  %v2607_v29 = vrot.slane %v2606_v20, 2 }
 0x1de   :  { %v2512_v30 = vadd.f32 %v2500_v48, %v5336_v18  ;;  %v5342_v60 = vadd.f32 %v2468_v28, %v2455_v27  ;;  %v2815_v27 = vld [vmem:[%s5463_s6 + $0x218] sm:$0xff]  ;;  %3000 = vmatpush.msra.mxu3 %v2832_v24 }
 0x1df   :  { %v2747_v34 = vmax.f32 %v2745_v31, 0.0  ;;  %v2831_v28 = vld [vmem:[%s5463_s6 + $0x298] sm:$0xff]  ;;  %v2830_v31 = vld [vmem:[%s5463_s6 + $0x290] sm:$0xff]  ;;  %v2644_v32 = vadd.f32 %v2643_v6, %v2642_v16  ;;  %v2608_v37 = vadd.f32 %v2607_v29, %v2606_v20 }
 0x1e0   :  { %v2524_v33 = vmul.f32 0.7978846, %v2512_v30  ;;  %v2482_v4 = vmul.f32 %v5342_v60, %v5342_v60  ;;  %3001 = vmatpush.msra.mxu3 %v2831_v28  ;;  %v4565_v6 = vld [vmem:[#allocation18] ss:$0 sm:$0xff] }
 0x1e1   :  { %4251 = vmatmul.msk.f32.vlgmr.msra.gmra.mxu1 %vm2848_vm8, %v2747_v34  ;;  %v2813_v34 = vld [vmem:[%s5463_s6 + $0x208] sm:$0xff]  ;;  %v2645_v44 = vrot.slane %v2644_v32, 1  ;;  %v2609_v25 = vrot.slane %v2608_v37, 1 }
 0x1e2   :  { %4586 = vtanh.f32 %v2524_v33  ;;  %v2494_v42 = vmul.f32 %v2482_v4, %v5342_v60  ;;  %3002 = vmatpush.msra.mxu3 %v2830_v31 }
 0x1e3   :  { %v2646_v7 = vadd.f32 %v2645_v44, %v2644_v32  ;;  %v2610_v58 = vadd.f32 %v2609_v25, %v2608_v37 }
 0x1e4   :  { %v2506_v45 = vmul.f32 0.044715, %v2494_v42  ;;  %v2812_v42 = vld [vmem:[%s5463_s6 + $0x200] sm:$0xff]  ;;  %3003 = vmatpush.msra.mxu3 %v2829_v36 }
 0x1e6   :  { %v2518_v53 = vadd.f32 %v2506_v45, %v5342_v60  ;;  %3004 = vmatpush.msra.mxu3 %v2828_v43 }
 0x1e8   :  { %v4587_v51 = vpop.eup %4586  ;;  %v2530_v62 = vmul.f32 0.7978846, %v2518_v53 }
 0x1e9   :  { %v2548_v46 = vadd.f32 1.0, %v4587_v51  ;;  %2965 = vmatmul.f32.vlgmr.msrb.gmra.mxu1 %v2880_v63 }
 0x1ea   :  { %4588 = vtanh.f32 %v2530_v62 }
 0x1eb   :  { %v2560_v54 = vmul.f32 0.5, %v2548_v46 }
 0x1ed   :  { %v2572_v2 = vmul.f32 %v2560_v54, %v5336_v18  ;;  %v2817_v18 = vld [vmem:[%s5463_s6 + $0x228] sm:$0xff] }
 0x1ee   :  { %2979 = vmatpush.msra.mxu2 %v2817_v18 }
 0x1ef   :  { %v2611_v3 = vrot.slane %v2572_v2, 4 }
 0x1f0   :  { %v4589_v41 = vpop.eup %4588  ;;  %2980 = vmatpush.msra.mxu2 %v2816_v40 }
 0x1f1   :  { %v2612_v10 = vadd.f32 %v2611_v3, %v2572_v2  ;;  %v2554_v11 = vadd.f32 1.0, %v4589_v41  ;;  %v3022_v2 = vld [vmem:[#allocation17 + $0x38] sm:$0xff]  ;;  %v3016_v3 = vld [vmem:[#allocation17 + $0x8] sm:$0xff] }
 0x1f2   :  { %2981 = vmatpush.msra.mxu2 %v2815_v27  ;;  %3039 = vmatpush.msra.mxu0 %v3022_v2 }
 0x1f3   :  { %v2613_v17 = vrot.slane %v2612_v10, 2  ;;  %v2566_v57 = vmul.f32 0.5, %v2554_v11 }
 0x1f4   :  { %3040 = vmatpush.msra.mxu0 %v3021_v49 }
 0x1f5   :  { %v2578_v21 = vmul.f32 %v2566_v57, %v5342_v60  ;;  %v2614_v26 = vadd.f32 %v2613_v17, %v2612_v10  ;;  %v2814_v60 = vld [vmem:[%s5463_s6 + $0x210] sm:$0xff]  ;;  %s4884_s6 = smov [#allocation20]  }
 0x1f6   :  { %2982 = vmatpush.msra.mxu2 %v2814_v60  ;;  %3041 = vmatpush.msra.mxu0 %v3020_v56  ;;  %s3057_s3 = sshll.u32 %s4884_s6, 4  ;;  %s3058_s3 = int_to_ptr.vmem [resolvable:$true] %s3057_s3 }
 0x1f7   :  { %v2647_v48 = vrot.slane %v2578_v21, 4  ;;  %v2615_v33 = vrot.slane %v2614_v26, 1 }
 0x1f8   :  { %2983 = vmatpush.msra.mxu2 %v2813_v34  ;;  %3042 = vmatpush.msra.mxu0 %v3019_v39 }
 0x1f9   :  { %v2648_v30 = vadd.f32 %v2647_v48, %v2578_v21  ;;  %v2616_v50 = vadd.f32 %v2615_v33, %v2614_v26 }
 0x1fa   :  { %2984 = vmatpush.msra.mxu2 %v2812_v42  ;;  %3043 = vmatpush.msra.mxu0 %v3018_v61 }
 0x1fb   :  { %v2649_v4 = vrot.slane %v2648_v30, 2  ;;  %v2668_v53 = vrot.slane %v2616_v50, 6 }
 0x1fc   :  { %3044 = vmatpush.msra.mxu0 %v3017_v12 }
 0x1fd   :  { %v2650_v38 = vadd.f32 %v2649_v4, %v2648_v30  ;;  %v2679_v62 = vsel %vm2673_vm0, %v2610_v58, %v2668_v53 }
 0x1fe   :  { %3045 = vmatpush.msra.mxu0 %v3016_v3 }
 0x1ff   :  { %v2651_v45 = vrot.slane %v2650_v38, 1 }
 0x200   :  { %3046 = vmatpush.msra.mxu0 %v3015_v5 }
 0x201   :  { %v2652_v52 = vadd.f32 %v2651_v45, %v2650_v38 }
 0x203   :  { %v2672_v55 = vrot.slane %v2652_v52, 6 }
 0x205   :  { %v2683_v59 = vsel %vm2673_vm0, %v2646_v7, %v2672_v55 }
 0x206   :  { %v2699_v51 = vrot.slane %v2683_v59, 7 }
 0x208   :  { %v2700_v63 = vsel %vm2689_vm4, %v2699_v51, %v2679_v62 }
 0x209   :  { %v2701_v46 = vsel %vm2691_vm5, %v2699_v51, %v2700_v63 }
 0x20a   :  { %v2702_v0 = vsel %vm2693_vm6, %v2699_v51, %v2701_v46 }
 0x20b   :  { %v2703_v47 = vsel %vm2695_vm7, %v2699_v51, %v2702_v0 }
 0x20c   :  { %v2707_v13 = vadd.f32 %v2703_v47, %v2580_v22 }
 0x20e   :  { %2709 = vst [vmem:[#allocation2 + $0x8] sm:$0xf] %v2707_v13 }
 0x215   :  { %v2714_v54 = vld [vmem:[#allocation2 + $0x8] sm:$0xf] }
 0x216   :  { %v2716_v23 = vmul.f32 0.125, %v2714_v54 }
 0x218   :  { %2876 = vst [vmem:[#allocation1 + $0x20] ss:$4 sm:$0xff] %v2716_v23 }
 0x21f   :  { %v2881_v1 = vld.sshfl [vmem:[#allocation1 + $0x20] sm:$0xff pattern:$0x73625140]  ;;  %v2882_v35 = vld.sshfl [vmem:[#allocation1 + $0x28] sm:$0xff pattern:$0x73625140] }
 0x220   :  { %2985 = vmatmul.f32.vlgmr.msra.gmra.mxu2 %v2881_v1  ;;  %3005 = vmatmul.f32.vlgmr.msra.gmra.mxu3 %v2882_v35 }
 0x235   :  { %v2946_v14 = vpop.f32.mrf.mxu0 }
 0x23a   :  { %v2906_v8 = vpop.f32.mrf.mxu2  ;;  %v2926_v10 = vpop.f32.mrf.mxu3 }
 0x25e   :  { %v2869_v41 = vpop.f32.mrf.mxu1 }
 0x25f   :  { %v2907_v9 = vadd.f32 %v2906_v8, %v2869_v41 }
 0x261   :  { %v2927_v11 = vadd.f32 %v2926_v10, %v2907_v9 }
 0x263   :  { %v2947_v16 = vadd.f32 %v2946_v14, %v2927_v11 }
 0x266   :  { %v2966_v15 = vpop.f32.mrf.mxu1 }
 0x267   :  { %v2967_v17 = vadd.f32 %v2966_v15, %v2947_v16 }
 0x2a3   :  { %v2986_v57 = vpop.f32.mrf.mxu2  ;;  %v3006_v20 = vpop.f32.mrf.mxu3 }
 0x2a4   :  { %v2987_v18 = vadd.f32 %v2986_v57, %v2967_v17 }
 0x2a6   :  { %v3007_v21 = vadd.f32 %v3006_v20, %v2987_v18 }
 0x2a8   :  { %v3013_v40 = vadd.f32 %v4564_v19, %v3007_v21 }
 0x2aa   :  { %v3014_v24 = vmax.f32 %v3013_v40, 0.0 }
 0x2ac   :  { %4252 = vmatmul.msk.f32.vlgmr.msra.gmra.mxu0 %vm3027_vm9, %v3014_v24 }
 0x329   :  { %v3048_v26 = vpop.f32.mrf.mxu0 }
 0x32a   :  { %v3049_v48 = vadd.f32 %v4565_v6, %v3048_v26 }
 0x32c   :  { %3051 = vst [vmem:[#allocation20] sm:$0x3] %v3049_v48 }
 0x32d   :  { %3062 = dma.vmem_to_hbm [thread:$0]  %s3058_s3, 32, %s3060_s16, [#allocation5]  }
 0x32e   :  { %4867 = dma.done.wait [#allocation5], 32  }
 0x32f   :  { %4868 = vsyncadd [#allocation5], 4294967264 }
 0x330   :  { %3067 = vsyncpa [#allocation4], 1 }
 0x331   :  { %3068 = vsyncpa [#allocation7], 1 }
 0x332   :  { %3069 = vsyncpa [#allocation10], 1 }
 0x333   :  { %3070 = vsyncpa [#allocation13], 1 }
 0x334   :  { %3071 = vsyncpa [#allocation16], 1 }
 0x335   :  { %3072 = vsyncpa [#allocation19], 1 }
 0x336   :  { %3073 = vsyncpa [#allocation5], 1 }

// kernel: tpu_custom_call.1
= control target key start
LH: loop header
LB: loop body
LE: loop exit
PB: predicated region body
PF: predicated region fallthrough
CT: control target
= control target key end

     0   :  { %16 = vsyncpa [#allocation4], 0  ;;  %s5457_s0 = inlined_call_operand.hbm [shape: bf16[2,8,768], index: 0, kind: input, shape index: {}]   ;;  %s5458_s1 = inlined_call_operand.hbm [shape: f32[2,8], index: 1, kind: input, shape index: {}]   ;;  %s5459_s2 = inlined_call_operand.hbm [shape: bf16[768,768], index: 2, kind: input, shape index: {}]   ;;  %s5460_s3 = inlined_call_operand.hbm [shape: f32[1,768], index: 3, kind: input, shape index: {}]   ;;  %s5461_s4 = inlined_call_operand.hbm [shape: f32[8,32], index: 4, kind: input, shape index: {}]   ;;  %s5462_s5 = inlined_call_operand.hbm [shape: f32[1,32], index: 5, kind: input, shape index: {}]   ;;  %s5463_s6 = inlined_call_operand.vmem [shape: f32[768,64], index: 6, kind: input, shape index: {}]   ;;  %s5464_s7 = inlined_call_operand.hbm [shape: f32[32,64], index: 7, kind: input, shape index: {}]   ;;  %s5465_s8 = inlined_call_operand.hbm [shape: f32[1,64], index: 8, kind: input, shape index: {}]   ;;  %s5466_s9 = inlined_call_operand.hbm [shape: f32[64,128], index: 9, kind: input, shape index: {}]   ;;  %s5467_s10 = inlined_call_operand.hbm [shape: f32[1,128], index: 10, kind: input, shape index: {}]   ;;  %s5468_s11 = inlined_call_operand.hbm [shape: f32[2,128], index: 11, kind: output, shape index: {}]  }
   0x1   :  { %17 = vsyncpa [#allocation7], 0 }
   0x2   :  { %18 = vsyncpa [#allocation10], 0 }
   0x3   :  { %19 = vsyncpa [#allocation13], 0 }
   0x4   :  { %20 = vsyncpa [#allocation16], 0 }
   0x5   :  { %21 = vsyncpa [#allocation19], 0  ;;  %s41_s19 = sshll.u32 %s5458_s1, 4  ;;  %s42_s19 = int_to_ptr.hbm [resolvable:$true] %s41_s19 }
   0x6   :  { %22 = vsyncpa [#allocation5], 0  ;;  %s4869_s20 = smov [#allocation6]   ;;  %s65_s24 = sshll.u32 %s5460_s3, 4  ;;  %s66_s24 = int_to_ptr.hbm [resolvable:$true] %s65_s24 }
   0x7   :  { %s43_s21 = sshll.u32 %s4869_s20, 4  ;;  %s4870_s25 = smov [#allocation9]   ;;  %s44_s21 = int_to_ptr.vmem [resolvable:$true] %s43_s21 }
   0x8   :  { %46 = dma.hbm_to_vmem [thread:$0]  %s42_s19, 32, %s44_s21, [#allocation7]  }
   0x9   :  { %s67_s26 = sshll.u32 %s4870_s25, 4  ;;  %s87_s29 = sshll.u32 %s5462_s5, 4  ;;  %s68_s26 = int_to_ptr.vmem [resolvable:$true] %s67_s26  ;;  %s88_s29 = int_to_ptr.hbm [resolvable:$true] %s87_s29 }
   0xa   :  { %70 = dma.hbm_to_vmem [thread:$0]  %s66_s24, 96, %s68_s26, [#allocation10]  }
   0xb   :  { %s113_s12 = sshll.u32 %s5465_s8, 4  ;;  %s4871_s13 = smov [#allocation12]   ;;  %s114_s12 = int_to_ptr.hbm [resolvable:$true] %s113_s12 }
   0xc   :  { %s89_s14 = sshll.u32 %s4871_s13, 4  ;;  %s4872_s3 = smov [#allocation15]   ;;  %s90_s14 = int_to_ptr.vmem [resolvable:$true] %s89_s14 }
   0xd   :  { %92 = dma.hbm_to_vmem [thread:$0]  %s88_s29, 16, %s90_s14, [#allocation13]  }
   0xe   :  { %s115_s15 = sshll.u32 %s4872_s3, 4  ;;  %s27_s18 = sshll.u32 %s5457_s0, 4  ;;  %s116_s15 = int_to_ptr.vmem [resolvable:$true] %s115_s15  ;;  %s28_s18 = int_to_ptr.hbm [resolvable:$true] %s27_s18 }
   0xf   :  { %118 = dma.hbm_to_vmem [thread:$0]  %s114_s12, 16, %s116_s15, [#allocation16]  }
  0x10   :  { %s4873_s5 = smov [#allocation3]   ;;  %s51_s8 = sshll.u32 %s5459_s2, 4  ;;  %s52_s8 = int_to_ptr.hbm [resolvable:$true] %s51_s8 }
  0x11   :  { %s29_s19 = sshll.u32 %s4873_s5, 4  ;;  %s4874_s22 = smov 384   ;;  %s30_s19 = int_to_ptr.vmem [resolvable:$true] %s29_s19 }
  0x12   :  { %s4875_s23 = smov 24   ;;  %s4876_s24 = smov [#allocation8]  }
  0x13   :  { %35 = dma.hbm_to_vmem [thread:$0]  %s28_s18, 768, %s30_s19, [#allocation4], %s4874_s22, %s4874_s22, %s4875_s23  }
  0x14   :  { %s53_s25 = sshll.u32 %s4876_s24, 4  ;;  %s76_s0 = sshll.u32 %s5461_s4, 4  ;;  %s54_s25 = int_to_ptr.vmem [resolvable:$true] %s53_s25  ;;  %s77_s0 = int_to_ptr.hbm [resolvable:$true] %s76_s0 }
  0x15   :  { %59 = dma.hbm_to_vmem [thread:$0]  %s52_s8, 36864, %s54_s25, [#allocation7], %s4874_s22, %s4874_s22, %s4875_s23  }
  0x16   :  { %s99_s1 = sshll.u32 %s5464_s7, 4  ;;  %s4877_s30 = smov [#allocation11]   ;;  %s100_s1 = int_to_ptr.hbm [resolvable:$true] %s99_s1 }
  0x17   :  { %s78_s12 = sshll.u32 %s4877_s30, 4  ;;  %s4878_s2 = smov [#allocation14]   ;;  %s79_s12 = int_to_ptr.vmem [resolvable:$true] %s78_s12 }
  0x18   :  { %81 = dma.hbm_to_vmem [thread:$0]  %s77_s0, 128, %s79_s12, [#allocation10]  }
  0x19   :  { %s101_s13 = sshll.u32 %s4878_s2, 4  ;;  %s4879_s14 = smov 128   ;;  %s102_s13 = int_to_ptr.vmem [resolvable:$true] %s101_s13 }
  0x1a   :  { %s4880_s3 = smov 8   ;;  %s123_s16 = sshll.u32 %s5466_s9, 4  ;;  %s124_s16 = int_to_ptr.hbm [resolvable:$true] %s123_s16 }
  0x1b   :  { %107 = dma.hbm_to_vmem [thread:$0]  %s100_s1, 512, %s102_s13, [#allocation13], %s4879_s14, %s4879_s14, %s4880_s3  }
  0x1c   :  { %s4881_s17 = smov [#allocation17]   ;;  %s137_s19 = sshll.u32 %s5467_s10, 4  ;;  %s138_s19 = int_to_ptr.hbm [resolvable:$true] %s137_s19 }
  0x1d   :  { %s125_s18 = sshll.u32 %s4881_s17, 4  ;;  %s4882_s20 = smov [#allocation18]   ;;  %s126_s18 = int_to_ptr.vmem [resolvable:$true] %s125_s18 }
  0x1e   :  { %131 = dma.hbm_to_vmem [thread:$0]  %s124_s16, 1024, %s126_s18, [#allocation16], %s4879_s14, %s4879_s14, %s4880_s3  }
  0x1f   :  { %s139_s21 = sshll.u32 %s4882_s20, 4  ;;  %s140_s21 = int_to_ptr.vmem [resolvable:$true] %s139_s21 }
  0x20   :  { %142 = dma.hbm_to_vmem [thread:$0]  %s138_s19, 16, %s140_s21, [#allocation19]  }
  0x21   :  { %4855 = dma.done.wait [#allocation4], 768  }
  0x22   :  { %4856 = vsyncadd [#allocation4], 4294966528 }
  0x23   :  { %4857 = dma.done.wait [#allocation7], 36896  }
  0x24   :  { %4858 = vsyncadd [#allocation7], 4294930400 }
  0x25   :  { %4859 = dma.done.wait [#allocation10], 224  }
  0x26   :  { %4860 = vsyncadd [#allocation10], 4294967072 }
  0x27   :  { %4861 = dma.done.wait [#allocation13], 528  }
  0x28   :  { %4862 = vsyncadd [#allocation13], 4294966768 }
  0x29   :  { %4863 = dma.done.wait [#allocation16], 1040  }
  0x2a   :  { %4864 = vsyncadd [#allocation16], 4294966256 }
  0x2b   :  { %4865 = dma.done.wait [#allocation19], 16  }
  0x2c   :  { %4866 = vsyncadd [#allocation19], 4294967280  ;;  %v3268_v0 = vld [vmem:[#allocation8 + $0x150] sm:$0xf]  ;;  %v4304_v1 = vld [vmem:[#allocation8 + $0x164] sm:$0xf0] }
  0x2d   :  { %v3460_v2 = vld [vmem:[#allocation8 + $0x2d0] sm:$0xf]  ;;  %v3269_v3 = vor.u32 %v4304_v1, %v3268_v0  ;;  %v4352_v4 = vld [vmem:[#allocation8 + $0x2e4] sm:$0xf0]  ;;  %v3244_v11 = vld [vmem:[#allocation8 + $0x120] sm:$0xf] }
  0x2e   :  { %v3652_v5 = vld [vmem:[#allocation8 + $0x450] sm:$0xf]  ;;  %v4400_v6 = vld [vmem:[#allocation8 + $0x464] sm:$0xf0]  ;;  %v3461_v7 = vor.u32 %v4352_v4, %v3460_v2  ;;  %v4298_v13 = vld [vmem:[#allocation8 + $0x134] sm:$0xf0] }
  0x2f   :  { %v3653_v8 = vor.u32 %v4400_v6, %v3652_v5  ;;  %v3844_v9 = vld [vmem:[#allocation8 + $0x5d0] sm:$0xf]  ;;  %v4448_v10 = vld [vmem:[#allocation8 + $0x5e4] sm:$0xf0]  ;;  %1967 = vmatpush.bf16.msra.mxu0 %v3269_v3  ;;  %v3436_v14 = vld [vmem:[#allocation8 + $0x2a0] sm:$0xf]  ;;  %v3245_v16 = vor.u32 %v4298_v13, %v3244_v11 }
  0x30   :  { %v3845_v12 = vor.u32 %v4448_v10, %v3844_v9  ;;  %v4346_v15 = vld [vmem:[#allocation8 + $0x2b4] sm:$0xf0]  ;;  %1981 = vmatpush.bf16.msra.mxu1 %v3461_v7  ;;  %v3628_v18 = vld [vmem:[#allocation8 + $0x420] sm:$0xf]  ;;  %v3220_v23 = vld [vmem:[#allocation8 + $0xf0] sm:$0xf] }
  0x31   :  { %1995 = vmatpush.bf16.msra.mxu2 %v3653_v8  ;;  %v3437_v17 = vor.u32 %v4346_v15, %v3436_v14  ;;  %v4394_v19 = vld [vmem:[#allocation8 + $0x434] sm:$0xf0]  ;;  %v3820_v20 = vld [vmem:[#allocation8 + $0x5a0] sm:$0xf]  ;;  %v4292_v24 = vld [vmem:[#allocation8 + $0x104] sm:$0xf0] }
  0x32   :  { %2009 = vmatpush.bf16.msra.mxu3 %v3845_v12  ;;  %v3629_v21 = vor.u32 %v4394_v19, %v3628_v18  ;;  %v4442_v22 = vld [vmem:[#allocation8 + $0x5b4] sm:$0xf0]  ;;  %v3412_v26 = vld [vmem:[#allocation8 + $0x270] sm:$0xf]  ;;  %v4340_v27 = vld [vmem:[#allocation8 + $0x284] sm:$0xf0]  ;;  %v3221_v29 = vor.u32 %v4292_v24, %v3220_v23 }
  0x33   :  { %v3821_v25 = vor.u32 %v4442_v22, %v3820_v20  ;;  %v3604_v28 = vld [vmem:[#allocation8 + $0x3f0] sm:$0xf]  ;;  %1968 = vmatpush.bf16.msra.mxu0 %v3245_v16  ;;  %v4388_v30 = vld [vmem:[#allocation8 + $0x404] sm:$0xf0]  ;;  %v3413_v33 = vor.u32 %v4340_v27, %v3412_v26  ;;  %v3196_v35 = vld [vmem:[#allocation8 + $0xc0] sm:$0xf] }
  0x34   :  { %v3796_v31 = vld [vmem:[#allocation8 + $0x570] sm:$0xf]  ;;  %v4436_v32 = vld [vmem:[#allocation8 + $0x584] sm:$0xf0]  ;;  %1982 = vmatpush.bf16.msra.mxu1 %v3437_v17  ;;  %v3605_v34 = vor.u32 %v4388_v30, %v3604_v28  ;;  %v4286_v36 = vld [vmem:[#allocation8 + $0xd4] sm:$0xf0] }
  0x35   :  { %1996 = vmatpush.bf16.msra.mxu2 %v3629_v21  ;;  %v3388_v37 = vld [vmem:[#allocation8 + $0x240] sm:$0xf]  ;;  %v3797_v38 = vor.u32 %v4436_v32, %v3796_v31  ;;  %v4334_v39 = vld [vmem:[#allocation8 + $0x254] sm:$0xf0]  ;;  %v3197_v44 = vor.u32 %v4286_v36, %v3196_v35  ;;  %v3172_v47 = vld [vmem:[#allocation8 + $0x90] sm:$0xf] }
  0x36   :  { %2010 = vmatpush.bf16.msra.mxu3 %v3821_v25  ;;  %v3580_v40 = vld [vmem:[#allocation8 + $0x3c0] sm:$0xf]  ;;  %v4382_v41 = vld [vmem:[#allocation8 + $0x3d4] sm:$0xf0]  ;;  %v3389_v45 = vor.u32 %v4334_v39, %v3388_v37  ;;  %v4280_v48 = vld [vmem:[#allocation8 + $0xa4] sm:$0xf0] }
  0x37   :  { %v3772_v42 = vld [vmem:[#allocation8 + $0x540] sm:$0xf]  ;;  %v4430_v43 = vld [vmem:[#allocation8 + $0x554] sm:$0xf0]  ;;  %1969 = vmatpush.bf16.msra.mxu0 %v3221_v29  ;;  %v3581_v46 = vor.u32 %v4382_v41, %v3580_v40  ;;  %v3364_v49 = vld [vmem:[#allocation8 + $0x210] sm:$0xf]  ;;  %v3173_v56 = vor.u32 %v4280_v48, %v3172_v47 }
  0x38   :  { %1983 = vmatpush.bf16.msra.mxu1 %v3413_v33  ;;  %v3773_v50 = vor.u32 %v4430_v43, %v3772_v42  ;;  %v4328_v51 = vld [vmem:[#allocation8 + $0x224] sm:$0xf0]  ;;  %v3556_v52 = vld [vmem:[#allocation8 + $0x390] sm:$0xf]  ;;  %v3148_v59 = vld [vmem:[#allocation8 + $0x60] sm:$0xf] }
  0x39   :  { %1997 = vmatpush.bf16.msra.mxu2 %v3605_v34  ;;  %v4376_v53 = vld [vmem:[#allocation8 + $0x3a4] sm:$0xf0]  ;;  %v3748_v54 = vld [vmem:[#allocation8 + $0x510] sm:$0xf]  ;;  %v3365_v57 = vor.u32 %v4328_v51, %v3364_v49  ;;  %v4274_v60 = vld [vmem:[#allocation8 + $0x74] sm:$0xf0] }
  0x3a   :  { %2011 = vmatpush.bf16.msra.mxu3 %v3797_v38  ;;  %v4424_v55 = vld [vmem:[#allocation8 + $0x524] sm:$0xf0]  ;;  %v3557_v58 = vor.u32 %v4376_v53, %v3556_v52  ;;  %v3340_v61 = vld [vmem:[#allocation8 + $0x1e0] sm:$0xf]  ;;  %v4322_v63 = vld [vmem:[#allocation8 + $0x1f4] sm:$0xf0]  ;;  %v3149_v4 = vor.u32 %v4274_v60, %v3148_v59 }
  0x3b   :  { %1970 = vmatpush.bf16.msra.mxu0 %v3197_v44  ;;  %v3749_v62 = vor.u32 %v4424_v55, %v3748_v54  ;;  %v3532_v0 = vld [vmem:[#allocation8 + $0x360] sm:$0xf]  ;;  %v4370_v1 = vld [vmem:[#allocation8 + $0x374] sm:$0xf0]  ;;  %v3341_v5 = vor.u32 %v4322_v63, %v3340_v61  ;;  %v3124_v7 = vld [vmem:[#allocation8 + $0x30] sm:$0xf] }
  0x3c   :  { %1984 = vmatpush.bf16.msra.mxu1 %v3389_v45  ;;  %v3724_v2 = vld [vmem:[#allocation8 + $0x4e0] sm:$0xf]  ;;  %v4418_v3 = vld [vmem:[#allocation8 + $0x4f4] sm:$0xf0]  ;;  %v3533_v6 = vor.u32 %v4370_v1, %v3532_v0  ;;  %v4268_v8 = vld [vmem:[#allocation8 + $0x44] sm:$0xf0] }
  0x3d   :  { %1998 = vmatpush.bf16.msra.mxu2 %v3581_v46  ;;  %v3316_v9 = vld [vmem:[#allocation8 + $0x1b0] sm:$0xf]  ;;  %v3725_v10 = vor.u32 %v4418_v3, %v3724_v2  ;;  %v4316_v11 = vld [vmem:[#allocation8 + $0x1c4] sm:$0xf0]  ;;  %v3125_v16 = vor.u32 %v4268_v8, %v3124_v7  ;;  %v3100_v17 = vld [vmem:[#allocation8] sm:$0xf] }
  0x3e   :  { %2012 = vmatpush.bf16.msra.mxu3 %v3773_v50  ;;  %v3508_v12 = vld [vmem:[#allocation8 + $0x330] sm:$0xf]  ;;  %v4364_v13 = vld [vmem:[#allocation8 + $0x344] sm:$0xf0]  ;;  %v4262_v18 = vld [vmem:[#allocation8 + $0x14] sm:$0xf0]  ;;  %v3317_v19 = vor.u32 %v4316_v11, %v3316_v9 }
  0x3f   :  { %1971 = vmatpush.bf16.msra.mxu0 %v3173_v56  ;;  %v3700_v14 = vld [vmem:[#allocation8 + $0x4b0] sm:$0xf]  ;;  %v4412_v15 = vld [vmem:[#allocation8 + $0x4c4] sm:$0xf0]  ;;  %v3509_v20 = vor.u32 %v4364_v13, %v3508_v12  ;;  %v3292_v21 = vld [vmem:[#allocation8 + $0x180] sm:$0xf]  ;;  %v3101_v31 = vor.u32 %v4262_v18, %v3100_v17 }
  0x40   :  { %1985 = vmatpush.bf16.msra.mxu1 %v3365_v57  ;;  %v4310_v22 = vld [vmem:[#allocation8 + $0x194] sm:$0xf0]  ;;  %v3484_v23 = vld [vmem:[#allocation8 + $0x300] sm:$0xf]  ;;  %v3701_v24 = vor.u32 %v4412_v15, %v3700_v14  ;;  %v4036_v28 = vld [vmem:[#allocation8 + $0x750] sm:$0xf] }
  0x41   :  { %1999 = vmatpush.bf16.msra.mxu2 %v3557_v58  ;;  %v4358_v25 = vld [vmem:[#allocation8 + $0x314] sm:$0xf0]  ;;  %v3676_v26 = vld [vmem:[#allocation8 + $0x480] sm:$0xf]  ;;  %v4496_v29 = vld [vmem:[#allocation8 + $0x764] sm:$0xf0]  ;;  %v3293_v35 = vor.u32 %v4310_v22, %v3292_v21 }
  0x42   :  { %2013 = vmatpush.bf16.msra.mxu3 %v3749_v62  ;;  %v4406_v27 = vld [vmem:[#allocation8 + $0x494] sm:$0xf0]  ;;  %v4228_v30 = vld [vmem:[#allocation8 + $0x8d0] sm:$0xf]  ;;  %v4544_v32 = vld [vmem:[#allocation8 + $0x8e4] sm:$0xf0]  ;;  %v3485_v36 = vor.u32 %v4358_v25, %v3484_v23  ;;  %v4037_v40 = vor.u32 %v4496_v29, %v4036_v28 }
  0x43   :  { %1972 = vmatpush.bf16.msra.mxu0 %v3149_v4  ;;  %v4301_v33 = vld [vmem:[#allocation8 + $0x154] sm:$0xf]  ;;  %v3270_v34 = vld [vmem:[#allocation8 + $0x168] sm:$0xf0]  ;;  %v3677_v39 = vor.u32 %v4406_v27, %v3676_v26  ;;  %v4012_v41 = vld [vmem:[#allocation8 + $0x720] sm:$0xf]  ;;  %v4229_v42 = vor.u32 %v4544_v32, %v4228_v30 }
  0x44   :  { %1986 = vmatpush.bf16.msra.mxu1 %v3341_v5  ;;  %v4349_v37 = vld [vmem:[#allocation8 + $0x2d4] sm:$0xf]  ;;  %v3462_v38 = vld [vmem:[#allocation8 + $0x2e8] sm:$0xf0]  ;;  %v3273_v43 = vor.u32 %v4301_v33, %v3270_v34  ;;  %v4490_v44 = vld [vmem:[#allocation8 + $0x734] sm:$0xf0] }
  0x45   :  { %2000 = vmatpush.bf16.msra.mxu2 %v3533_v6  ;;  %v4204_v45 = vld [vmem:[#allocation8 + $0x8a0] sm:$0xf]  ;;  %v4538_v46 = vld [vmem:[#allocation8 + $0x8b4] sm:$0xf0]  ;;  %v3465_v47 = vor.u32 %v4349_v37, %v3462_v38  ;;  %v4295_v48 = vld [vmem:[#allocation8 + $0x124] sm:$0xf]  ;;  %v4013_v54 = vor.u32 %v4490_v44, %v4012_v41 }
  0x46   :  { %2014 = vmatpush.bf16.msra.mxu3 %v3725_v10  ;;  %v3246_v49 = vld [vmem:[#allocation8 + $0x138] sm:$0xf0]  ;;  %v4343_v50 = vld [vmem:[#allocation8 + $0x2a4] sm:$0xf]  ;;  %v3076_v52 = vld [vmem:[#allocation3] sm:$0xf]  ;;  %v4205_v58 = vor.u32 %v4538_v46, %v4204_v45 }
  0x47   :  { %1973 = vmatpush.bf16.msra.mxu0 %v3125_v16  ;;  %v3438_v51 = vld [vmem:[#allocation8 + $0x2b8] sm:$0xf0]  ;;  %v4256_v53 = vld [vmem:[#allocation3 + $0x14] sm:$0xf0]  ;;  %v3988_v55 = vld [vmem:[#allocation8 + $0x6f0] sm:$0xf]  ;;  %v3249_v59 = vor.u32 %v4295_v48, %v3246_v49 }
  0x48   :  { %1987 = vmatpush.bf16.msra.mxu1 %v3317_v19  ;;  %v4484_v56 = vld [vmem:[#allocation8 + $0x704] sm:$0xf0]  ;;  %v4975_v57 = vor.u32 %v4256_v53, %v3076_v52  ;;  %v4180_v60 = vld [vmem:[#allocation8 + $0x870] sm:$0xf]  ;;  %v4289_v62 = vld [vmem:[#allocation8 + $0xf4] sm:$0xf]  ;;  %v3441_v63 = vor.u32 %v4343_v50, %v3438_v51 }
  0x49   :  { %2001 = vmatpush.bf16.msra.mxu2 %v3509_v20  ;;  %v4532_v61 = vld [vmem:[#allocation8 + $0x884] sm:$0xf0]  ;;  %v3222_v0 = vld [vmem:[#allocation8 + $0x108] sm:$0xf0]  ;;  %v4253_v1 = vld [vmem:[#allocation3 + $0x4] sm:$0xf]  ;;  %v3989_v7 = vor.u32 %v4484_v56, %v3988_v55 }
  0x4a   :  { %2015 = vmatpush.bf16.msra.mxu3 %v3701_v24  ;;  %v3078_v2 = vld [vmem:[#allocation3 + $0x18] sm:$0xf0]  ;;  %v4337_v3 = vld [vmem:[#allocation8 + $0x274] sm:$0xf]  ;;  %v3964_v5 = vld [vmem:[#allocation8 + $0x6c0] sm:$0xf]  ;;  %v4181_v11 = vor.u32 %v4532_v61, %v4180_v60  ;;  %v3225_v12 = vor.u32 %v4289_v62, %v3222_v0 }
  0x4b   :  { %1974 = vmatpush.bf16.msra.mxu0 %v3101_v31  ;;  %v3414_v4 = vld [vmem:[#allocation8 + $0x288] sm:$0xf0]  ;;  %v4978_v6 = vor.u32 %v4253_v1, %v3078_v2  ;;  %v4478_v8 = vld [vmem:[#allocation8 + $0x6d4] sm:$0xf0]  ;;  %v4156_v9 = vld [vmem:[#allocation8 + $0x840] sm:$0xf] }
  0x4c   :  { %1988 = vmatpush.bf16.msra.mxu1 %v3293_v35  ;;  %v4526_v10 = vld [vmem:[#allocation8 + $0x854] sm:$0xf0]  ;;  %v4283_v13 = vld [vmem:[#allocation8 + $0xc4] sm:$0xf]  ;;  %v3198_v14 = vld [vmem:[#allocation8 + $0xd8] sm:$0xf0]  ;;  %v3417_v16 = vor.u32 %v4337_v3, %v3414_v4  ;;  %v3965_v24 = vor.u32 %v4478_v8, %v3964_v5 }
  0x4d   :  { %2002 = vmatpush.bf16.msra.mxu2 %v3485_v36  ;;  %v3084_v15 = vld [vmem:[#allocation3 + $0x8] sm:$0xf]  ;;  %v4257_v17 = vld [vmem:[#allocation3 + $0x1c] sm:$0xf0]  ;;  %v4254_v18 = vld [vmem:[#allocation3 + $0xc] sm:$0xf]  ;;  %v4157_v25 = vor.u32 %v4526_v10, %v4156_v9  ;;  %v3201_v26 = vor.u32 %v4283_v13, %v3198_v14 }
  0x4e   :  { %2016 = vmatpush.bf16.msra.mxu3 %v3677_v39  ;;  %1975 = vmatmul.bf16.vlgmr.msra.gmra.mxu0 %v4975_v57  ;;  %v3086_v19 = vld [vmem:[#allocation3 + $0x20] sm:$0xf0]  ;;  %v4331_v20 = vld [vmem:[#allocation8 + $0x244] sm:$0xf]  ;;  %v3390_v21 = vld [vmem:[#allocation8 + $0x258] sm:$0xf0]  ;;  %v4981_v22 = vor.u32 %v4257_v17, %v3084_v15 }
  0x4f   :  { %2023 = vmatpush.bf16.msrb.mxu0 %v4037_v40  ;;  %1989 = vmatmul.bf16.vlgmr.msra.gmra.mxu1 %v4978_v6  ;;  %v4983_v23 = vor.u32 %v4254_v18, %v3086_v19  ;;  %v3940_v27 = vld [vmem:[#allocation8 + $0x690] sm:$0xf]  ;;  %v4472_v28 = vld [vmem:[#allocation8 + $0x6a4] sm:$0xf0]  ;;  %v3393_v30 = vor.u32 %v4331_v20, %v3390_v21  ;;  %v4277_v32 = vld [vmem:[#allocation8 + $0x94] sm:$0xf] }
  0x50   :  { %2037 = vmatpush.bf16.msrb.mxu1 %v4229_v42  ;;  %v4132_v29 = vld [vmem:[#allocation8 + $0x810] sm:$0xf]  ;;  %v4520_v31 = vld [vmem:[#allocation8 + $0x824] sm:$0xf0]  ;;  %v3174_v33 = vld [vmem:[#allocation8 + $0xa8] sm:$0xf0]  ;;  %2003 = vmatmul.bf16.vlgmr.msra.gmra.mxu2 %v4981_v22  ;;  %v3941_v36 = vor.u32 %v4472_v28, %v3940_v27 }
  0x51   :  { %2051 = vmatpush.bf16.msrb.mxu2 %v3273_v43  ;;  %v4325_v34 = vld [vmem:[#allocation8 + $0x214] sm:$0xf]  ;;  %v3366_v35 = vld [vmem:[#allocation8 + $0x228] sm:$0xf0]  ;;  %2017 = vmatmul.bf16.vlgmr.msra.gmra.mxu3 %v4983_v23  ;;  %v4133_v37 = vor.u32 %v4520_v31, %v4132_v29  ;;  %v3177_v38 = vor.u32 %v4277_v32, %v3174_v33  ;;  %v3916_v39 = vld [vmem:[#allocation8 + $0x660] sm:$0xf] }
  0x52   :  { %2065 = vmatpush.bf16.msrb.mxu3 %v3465_v47  ;;  %v4466_v40 = vld [vmem:[#allocation8 + $0x674] sm:$0xf0]  ;;  %v4108_v41 = vld [vmem:[#allocation8 + $0x7e0] sm:$0xf]  ;;  %v3369_v42 = vor.u32 %v4325_v34, %v3366_v35  ;;  %v4271_v44 = vld [vmem:[#allocation8 + $0x64] sm:$0xf] }
  0x53   :  { %2024 = vmatpush.bf16.msrb.mxu0 %v4013_v54  ;;  %v4514_v43 = vld [vmem:[#allocation8 + $0x7f4] sm:$0xf0]  ;;  %v3150_v45 = vld [vmem:[#allocation8 + $0x78] sm:$0xf0]  ;;  %v4319_v46 = vld [vmem:[#allocation8 + $0x1e4] sm:$0xf]  ;;  %v3917_v48 = vor.u32 %v4466_v40, %v3916_v39 }
  0x54   :  { %2038 = vmatpush.bf16.msrb.mxu1 %v4205_v58  ;;  %v3342_v47 = vld [vmem:[#allocation8 + $0x1f8] sm:$0xf0]  ;;  %v4109_v49 = vor.u32 %v4514_v43, %v4108_v41  ;;  %v3153_v50 = vor.u32 %v4271_v44, %v3150_v45  ;;  %v3892_v51 = vld [vmem:[#allocation8 + $0x630] sm:$0xf]  ;;  %v4460_v52 = vld [vmem:[#allocation8 + $0x644] sm:$0xf0] }
  0x55   :  { %2052 = vmatpush.bf16.msrb.mxu2 %v3249_v59  ;;  %v4084_v53 = vld [vmem:[#allocation8 + $0x7b0] sm:$0xf]  ;;  %v3345_v54 = vor.u32 %v4319_v46, %v3342_v47  ;;  %v4508_v55 = vld [vmem:[#allocation8 + $0x7c4] sm:$0xf0]  ;;  %v4265_v56 = vld [vmem:[#allocation8 + $0x34] sm:$0xf]  ;;  %v3893_v61 = vor.u32 %v4460_v52, %v3892_v51 }
  0x56   :  { %2066 = vmatpush.bf16.msrb.mxu3 %v3441_v63  ;;  %v3126_v58 = vld [vmem:[#allocation8 + $0x48] sm:$0xf0]  ;;  %v4313_v59 = vld [vmem:[#allocation8 + $0x1b4] sm:$0xf]  ;;  %v3868_v62 = vld [vmem:[#allocation8 + $0x600] sm:$0xf]  ;;  %v4085_v1 = vor.u32 %v4508_v55, %v4084_v53 }
  0x57   :  { %2025 = vmatpush.bf16.msrb.mxu0 %v3989_v7  ;;  %v3318_v60 = vld [vmem:[#allocation8 + $0x1c8] sm:$0xf0]  ;;  %v4454_v63 = vld [vmem:[#allocation8 + $0x614] sm:$0xf0]  ;;  %v4060_v0 = vld [vmem:[#allocation8 + $0x780] sm:$0xf]  ;;  %v3129_v2 = vor.u32 %v4265_v56, %v3126_v58 }
  0x58   :  { %2039 = vmatpush.bf16.msrb.mxu1 %v4181_v11  ;;  %v4502_v3 = vld [vmem:[#allocation8 + $0x794] sm:$0xf0]  ;;  %v4259_v4 = vld [vmem:[#allocation8 + $0x4] sm:$0xf]  ;;  %v3102_v5 = vld [vmem:[#allocation8 + $0x18] sm:$0xf0]  ;;  %v3321_v7 = vor.u32 %v4313_v59, %v3318_v60  ;;  %v3869_v14 = vor.u32 %v4454_v63, %v3868_v62 }
  0x59   :  { %2053 = vmatpush.bf16.msrb.mxu2 %v3225_v12  ;;  %v4307_v8 = vld [vmem:[#allocation8 + $0x184] sm:$0xf]  ;;  %v3294_v9 = vld [vmem:[#allocation8 + $0x198] sm:$0xf0]  ;;  %v4397_v10 = vld [vmem:[#allocation8 + $0x454] sm:$0xf]  ;;  %v4061_v18 = vor.u32 %v4502_v3, %v4060_v0  ;;  %v3105_v19 = vor.u32 %v4259_v4, %v3102_v5 }
  0x5a   :  { %2067 = vmatpush.bf16.msrb.mxu3 %v3417_v16  ;;  %v3654_v11 = vld [vmem:[#allocation8 + $0x468] sm:$0xf0]  ;;  %v4445_v12 = vld [vmem:[#allocation8 + $0x5d4] sm:$0xf]  ;;  %v3092_v21 = vld [vmem:[#allocation3 + $0x10] sm:$0xf] }
  0x5b   :  { %2026 = vmatpush.bf16.msrb.mxu0 %v3965_v24  ;;  %v3846_v13 = vld [vmem:[#allocation8 + $0x5e8] sm:$0xf0]  ;;  %v4493_v15 = vld [vmem:[#allocation8 + $0x754] sm:$0xf]  ;;  %v4255_v27 = vld [vmem:[#allocation3 + $0x14] sm:$0xf] }
  0x5c   :  { %2040 = vmatpush.bf16.msrb.mxu1 %v4157_v25  ;;  %v4038_v16 = vld [vmem:[#allocation8 + $0x768] sm:$0xf0]  ;;  %v4541_v17 = vld [vmem:[#allocation8 + $0x8d4] sm:$0xf]  ;;  %v3297_v25 = vor.u32 %v4307_v8, %v3294_v9  ;;  %v3094_v28 = vld [vmem:[#allocation3 + $0x28] sm:$0xf0]  ;;  %v3849_v29 = vor.u32 %v4445_v12, %v3846_v13 }
  0x5d   :  { %2054 = vmatpush.bf16.msrb.mxu2 %v3201_v26  ;;  %v4230_v20 = vld [vmem:[#allocation8 + $0x8e8] sm:$0xf0]  ;;  %v4258_v24 = vld [vmem:[#allocation3 + $0x24] sm:$0xf0]  ;;  %v3657_v26 = vor.u32 %v4397_v10, %v3654_v11  ;;  %v4391_v31 = vld [vmem:[#allocation8 + $0x424] sm:$0xf]  ;;  %v4989_v39 = vor.u32 %v4255_v27, %v3094_v28 }
  0x5e   :  { %2068 = vmatpush.bf16.msrb.mxu3 %v3393_v30  ;;  %v4041_v30 = vor.u32 %v4493_v15, %v4038_v16  ;;  %v3630_v32 = vld [vmem:[#allocation8 + $0x438] sm:$0xf0]  ;;  %v4439_v33 = vld [vmem:[#allocation8 + $0x5a4] sm:$0xf]  ;;  %v4233_v34 = vor.u32 %v4541_v17, %v4230_v20  ;;  %v4987_v35 = vor.u32 %v4258_v24, %v3092_v21  ;;  %v4385_v45 = vld [vmem:[#allocation8 + $0x3f4] sm:$0xf] }
  0x5f   :  { %2027 = vmatpush.bf16.msrb.mxu0 %v3941_v36  ;;  %v3822_v36 = vld [vmem:[#allocation8 + $0x5b8] sm:$0xf0]  ;;  %v4535_v40 = vld [vmem:[#allocation8 + $0x8a4] sm:$0xf]  ;;  %v3606_v46 = vld [vmem:[#allocation8 + $0x408] sm:$0xf0] }
  0x60   :  { %2041 = vmatpush.bf16.msrb.mxu1 %v4133_v37  ;;  %v4487_v37 = vld [vmem:[#allocation8 + $0x724] sm:$0xf]  ;;  %v4206_v41 = vld [vmem:[#allocation8 + $0x8b8] sm:$0xf0]  ;;  %v3825_v43 = vor.u32 %v4439_v33, %v3822_v36  ;;  %v4433_v47 = vld [vmem:[#allocation8 + $0x574] sm:$0xf] }
  0x61   :  { %2055 = vmatpush.bf16.msrb.mxu2 %v3177_v38  ;;  %v4014_v38 = vld [vmem:[#allocation8 + $0x738] sm:$0xf0]  ;;  %v3990_v51 = vld [vmem:[#allocation8 + $0x708] sm:$0xf0]  ;;  %v4529_v52 = vld [vmem:[#allocation8 + $0x874] sm:$0xf] }
  0x62   :  { %2069 = vmatpush.bf16.msrb.mxu3 %v3369_v42  ;;  %v3633_v42 = vor.u32 %v4391_v31, %v3630_v32  ;;  %v4017_v44 = vor.u32 %v4487_v37, %v4014_v38  ;;  %v4182_v53 = vld [vmem:[#allocation8 + $0x888] sm:$0xf0]  ;;  %v4379_v58 = vld [vmem:[#allocation8 + $0x3c4] sm:$0xf]  ;;  %v3582_v59 = vld [vmem:[#allocation8 + $0x3d8] sm:$0xf0] }
  0x63   :  { %2028 = vmatpush.bf16.msrb.mxu0 %v3917_v48  ;;  %v4209_v48 = vor.u32 %v4535_v40, %v4206_v41  ;;  %v4427_v60 = vld [vmem:[#allocation8 + $0x544] sm:$0xf]  ;;  %v3774_v62 = vld [vmem:[#allocation8 + $0x558] sm:$0xf0]  ;;  %v3585_v3 = vor.u32 %v4379_v58, %v3582_v59  ;;  %v3558_v8 = vld [vmem:[#allocation8 + $0x3a8] sm:$0xf0] }
  0x64   :  { %2042 = vmatpush.bf16.msrb.mxu1 %v4109_v49  ;;  %v3798_v49 = vld [vmem:[#allocation8 + $0x588] sm:$0xf0]  ;;  %v4475_v63 = vld [vmem:[#allocation8 + $0x6c4] sm:$0xf]  ;;  %v3966_v0 = vld [vmem:[#allocation8 + $0x6d8] sm:$0xf0]  ;;  %v3777_v4 = vor.u32 %v4427_v60, %v3774_v62 }
  0x65   :  { %2056 = vmatpush.bf16.msrb.mxu2 %v3153_v50  ;;  %v4481_v50 = vld [vmem:[#allocation8 + $0x6f4] sm:$0xf]  ;;  %v3801_v55 = vor.u32 %v4433_v47, %v3798_v49  ;;  %v3969_v5 = vor.u32 %v4475_v63, %v3966_v0  ;;  %v3750_v11 = vld [vmem:[#allocation8 + $0x528] sm:$0xf0]  ;;  %v3534_v20 = vld [vmem:[#allocation8 + $0x378] sm:$0xf0] }
  0x66   :  { %2070 = vmatpush.bf16.msrb.mxu3 %v3345_v54  ;;  %v3609_v54 = vor.u32 %v4385_v45, %v3606_v46  ;;  %v3993_v56 = vor.u32 %v4481_v50, %v3990_v51  ;;  %v4421_v9 = vld [vmem:[#allocation8 + $0x514] sm:$0xf]  ;;  %v3942_v13 = vld [vmem:[#allocation8 + $0x6a8] sm:$0xf0]  ;;  %v4415_v21 = vld [vmem:[#allocation8 + $0x4e4] sm:$0xf] }
  0x67   :  { %2029 = vmatpush.bf16.msrb.mxu0 %v3893_v61  ;;  %v4185_v61 = vor.u32 %v4529_v52, %v4182_v53  ;;  %v4469_v12 = vld [vmem:[#allocation8 + $0x694] sm:$0xf]  ;;  %v4134_v15 = vld [vmem:[#allocation8 + $0x828] sm:$0xf0]  ;;  %v3753_v17 = vor.u32 %v4421_v9, %v3750_v11  ;;  %v3918_v27 = vld [vmem:[#allocation8 + $0x678] sm:$0xf0] }
  0x68   :  { %2043 = vmatpush.bf16.msrb.mxu1 %v4085_v1  ;;  %v4523_v1 = vld [vmem:[#allocation8 + $0x844] sm:$0xf]  ;;  %v4361_v33 = vld [vmem:[#allocation8 + $0x334] sm:$0xf]  ;;  %v3702_v38 = vld [vmem:[#allocation8 + $0x4c8] sm:$0xf0] }
  0x69   :  { %2057 = vmatpush.bf16.msrb.mxu2 %v3129_v2  ;;  %v4158_v2 = vld [vmem:[#allocation8 + $0x858] sm:$0xf0]  ;;  %v4511_v28 = vld [vmem:[#allocation8 + $0x7e4] sm:$0xf]  ;;  %v4409_v36 = vld [vmem:[#allocation8 + $0x4b4] sm:$0xf] }
  0x6a   :  { %2071 = vmatpush.bf16.msrb.mxu3 %v3321_v7  ;;  %v4373_v7 = vld [vmem:[#allocation8 + $0x394] sm:$0xf]  ;;  %v4161_v10 = vor.u32 %v4523_v1, %v4158_v2  ;;  %v3894_v41 = vld [vmem:[#allocation8 + $0x648] sm:$0xf0]  ;;  %v3486_v46 = vld [vmem:[#allocation8 + $0x318] sm:$0xf0]  ;;  %v3705_v49 = vor.u32 %v4409_v36, %v3702_v38 }
  0x6b   :  { %2030 = vmatpush.bf16.msrb.mxu0 %v3869_v14  ;;  %v4517_v14 = vld [vmem:[#allocation8 + $0x814] sm:$0xf]  ;;  %v3561_v16 = vor.u32 %v4373_v7, %v3558_v8  ;;  %v4403_v47 = vld [vmem:[#allocation8 + $0x484] sm:$0xf]  ;;  %v3870_v52 = vld [vmem:[#allocation8 + $0x618] sm:$0xf0] }
  0x6c   :  { %2044 = vmatpush.bf16.msrb.mxu1 %v4061_v18  ;;  %v3945_v18 = vor.u32 %v4469_v12, %v3942_v13  ;;  %v4137_v24 = vor.u32 %v4517_v14, %v4134_v15  ;;  %v4457_v40 = vld [vmem:[#allocation8 + $0x634] sm:$0xf]  ;;  %v4451_v51 = vld [vmem:[#allocation8 + $0x604] sm:$0xf]  ;;  %v4305_v58 = vld [vmem:[#allocation8 + $0x16c] sm:$0xf0] }
  0x6d   :  { %2058 = vmatpush.bf16.msrb.mxu2 %v3105_v19  ;;  %v4367_v19 = vld [vmem:[#allocation8 + $0x364] sm:$0xf]  ;;  %v3897_v50 = vor.u32 %v4457_v40, %v3894_v41  ;;  %v3468_v59 = vld [vmem:[#allocation8 + $0x2d8] sm:$0xf]  ;;  %v4353_v60 = vld [vmem:[#allocation8 + $0x2ec] sm:$0xf0]  ;;  %v3873_v1 = vor.u32 %v4451_v51, %v3870_v52 }
  0x6e   :  { %2072 = vmatpush.bf16.msrb.mxu3 %v3297_v25  ;;  %2031 = vmatmul.bf16.vlgmr.msrb.gmra.mxu0 %v4987_v35  ;;  %v3726_v25 = vld [vmem:[#allocation8 + $0x4f8] sm:$0xf0]  ;;  %v4499_v53 = vld [vmem:[#allocation8 + $0x784] sm:$0xf]  ;;  %v3660_v62 = vld [vmem:[#allocation8 + $0x458] sm:$0xf]  ;;  %v3469_v7 = vor.u32 %v4353_v60, %v3468_v59 }
  0x6f   :  { %2079 = vmatpush.bf16.msra.mxu0 %v3657_v26  ;;  %2045 = vmatmul.bf16.vlgmr.msrb.gmra.mxu1 %v4989_v39  ;;  %v4463_v26 = vld [vmem:[#allocation8 + $0x664] sm:$0xf]  ;;  %v3729_v31 = vor.u32 %v4415_v21, %v3726_v25  ;;  %v4401_v63 = vld [vmem:[#allocation8 + $0x46c] sm:$0xf0]  ;;  %v3852_v2 = vld [vmem:[#allocation8 + $0x5d8] sm:$0xf] }
  0x70   :  { %2093 = vmatpush.bf16.msra.mxu1 %v3849_v29  ;;  %2059 = vmatmul.bf16.vlgmr.msrb.gmra.mxu2 %v4975_v57  ;;  %v4110_v29 = vld [vmem:[#allocation8 + $0x7f8] sm:$0xf0]  ;;  %v3921_v32 = vor.u32 %v4463_v26, %v3918_v27  ;;  %v3661_v8 = vor.u32 %v4401_v63, %v3660_v62  ;;  %v3252_v9 = vld [vmem:[#allocation8 + $0x128] sm:$0xf]  ;;  %v4347_v13 = vld [vmem:[#allocation8 + $0x2bc] sm:$0xf0] }
  0x71   :  { %2107 = vmatpush.bf16.msra.mxu2 %v4041_v30  ;;  %2073 = vmatmul.bf16.vlgmr.msrb.gmra.mxu3 %v4978_v6  ;;  %v3537_v30 = vor.u32 %v4367_v19, %v3534_v20  ;;  %v4113_v37 = vor.u32 %v4511_v28, %v4110_v29  ;;  %v3444_v11 = vld [vmem:[#allocation8 + $0x2a8] sm:$0xf]  ;;  %v4395_v15 = vld [vmem:[#allocation8 + $0x43c] sm:$0xf0]  ;;  %v3228_v21 = vld [vmem:[#allocation8 + $0xf8] sm:$0xf] }
  0x72   :  { %2121 = vmatpush.bf16.msra.mxu3 %v4233_v34  ;;  %v3510_v34 = vld [vmem:[#allocation8 + $0x348] sm:$0xf0]  ;;  %v3636_v14 = vld [vmem:[#allocation8 + $0x428] sm:$0xf]  ;;  %v3445_v19 = vor.u32 %v4347_v13, %v3444_v11  ;;  %v3420_v25 = vld [vmem:[#allocation8 + $0x278] sm:$0xf] }
  0x73   :  { %2080 = vmatpush.bf16.msra.mxu0 %v3633_v42  ;;  %v4505_v42 = vld [vmem:[#allocation8 + $0x7b4] sm:$0xf]  ;;  %v3513_v45 = vor.u32 %v4361_v33, %v3510_v34  ;;  %v3637_v20 = vor.u32 %v4395_v15, %v3636_v14  ;;  %v4341_v27 = vld [vmem:[#allocation8 + $0x28c] sm:$0xf0]  ;;  %v3612_v28 = vld [vmem:[#allocation8 + $0x3f8] sm:$0xf] }
  0x74   :  { %2094 = vmatpush.bf16.msra.mxu1 %v3825_v43  ;;  %v4086_v43 = vld [vmem:[#allocation8 + $0x7c8] sm:$0xf0]  ;;  %v4389_v29 = vld [vmem:[#allocation8 + $0x40c] sm:$0xf0]  ;;  %v3421_v33 = vor.u32 %v4341_v27, %v3420_v25  ;;  %v3204_v36 = vld [vmem:[#allocation8 + $0xc8] sm:$0xf] }
  0x75   :  { %2108 = vmatpush.bf16.msra.mxu2 %v4017_v44  ;;  %v4355_v44 = vld [vmem:[#allocation8 + $0x304] sm:$0xf]  ;;  %v3613_v34 = vor.u32 %v4389_v29, %v3612_v28  ;;  %v3396_v38 = vld [vmem:[#allocation8 + $0x248] sm:$0xf]  ;;  %v4335_v41 = vld [vmem:[#allocation8 + $0x25c] sm:$0xf0] }
  0x76   :  { %2122 = vmatpush.bf16.msra.mxu3 %v4209_v48  ;;  %v3678_v48 = vld [vmem:[#allocation8 + $0x498] sm:$0xf0]  ;;  %v3372_v51 = vld [vmem:[#allocation8 + $0x218] sm:$0xf]  ;;  %v3156_v62 = vld [vmem:[#allocation8 + $0x68] sm:$0xf] }
  0x77   :  { %2081 = vmatpush.bf16.msra.mxu0 %v3609_v54  ;;  %v4089_v54 = vor.u32 %v4505_v42, %v4086_v43  ;;  %v3681_v0 = vor.u32 %v4403_v47, %v3678_v48  ;;  %v3588_v42 = vld [vmem:[#allocation8 + $0x3c8] sm:$0xf]  ;;  %v4383_v43 = vld [vmem:[#allocation8 + $0x3dc] sm:$0xf0]  ;;  %v3397_v47 = vor.u32 %v4335_v41, %v3396_v38  ;;  %v3132_v11 = vld [vmem:[#allocation8 + $0x38] sm:$0xf] }
  0x78   :  { %2095 = vmatpush.bf16.msra.mxu1 %v3801_v55  ;;  %v4062_v55 = vld [vmem:[#allocation8 + $0x798] sm:$0xf0]  ;;  %v3589_v48 = vor.u32 %v4383_v43, %v3588_v42  ;;  %v4275_v63 = vld [vmem:[#allocation8 + $0x7c] sm:$0xf0]  ;;  %v3324_v13 = vld [vmem:[#allocation8 + $0x1b8] sm:$0xf] }
  0x79   :  { %2109 = vmatpush.bf16.msra.mxu2 %v3993_v56  ;;  %v3276_v56 = vld [vmem:[#allocation8 + $0x158] sm:$0xf]  ;;  %v4317_v15 = vld [vmem:[#allocation8 + $0x1cc] sm:$0xf0]  ;;  %v3300_v27 = vld [vmem:[#allocation8 + $0x188] sm:$0xf] }
  0x7a   :  { %2123 = vmatpush.bf16.msra.mxu3 %v4185_v61  ;;  %v3489_v61 = vor.u32 %v4355_v44, %v3486_v46  ;;  %v3780_v44 = vld [vmem:[#allocation8 + $0x548] sm:$0xf]  ;;  %v3325_v25 = vor.u32 %v4317_v15, %v3324_v13  ;;  %v4311_v28 = vld [vmem:[#allocation8 + $0x19c] sm:$0xf0]  ;;  %v4302_v41 = vld [vmem:[#allocation8 + $0x15c] sm:$0xf] }
  0x7b   :  { %2082 = vmatpush.bf16.msra.mxu0 %v3585_v3  ;;  %v4449_v3 = vld [vmem:[#allocation8 + $0x5ec] sm:$0xf0]  ;;  %v3492_v29 = vld [vmem:[#allocation8 + $0x308] sm:$0xf]  ;;  %v3278_v42 = vld [vmem:[#allocation8 + $0x170] sm:$0xf0]  ;;  %v3301_v43 = vor.u32 %v4311_v28, %v3300_v27 }
  0x7c   :  { %2096 = vmatpush.bf16.msra.mxu1 %v3777_v4  ;;  %v4065_v4 = vor.u32 %v4499_v53, %v4062_v55  ;;  %v3853_v12 = vor.u32 %v4449_v3, %v3852_v2  ;;  %v4329_v53 = vld [vmem:[#allocation8 + $0x22c] sm:$0xf0]  ;;  %v4323_v2 = vld [vmem:[#allocation8 + $0x1fc] sm:$0xf0]  ;;  %v3540_v3 = vld [vmem:[#allocation8 + $0x368] sm:$0xf] }
  0x7d   :  { %2110 = vmatpush.bf16.msra.mxu2 %v3969_v5  ;;  %v3277_v5 = vor.u32 %v4305_v58, %v3276_v56  ;;  %v4377_v55 = vld [vmem:[#allocation8 + $0x3ac] sm:$0xf0]  ;;  %v3756_v56 = vld [vmem:[#allocation8 + $0x518] sm:$0xf]  ;;  %v3373_v60 = vor.u32 %v4329_v53, %v3372_v51  ;;  %v4020_v51 = vld [vmem:[#allocation8 + $0x728] sm:$0xf] }
  0x7e   :  { %2124 = vmatpush.bf16.msra.mxu3 %v4161_v10  ;;  %v4299_v10 = vld [vmem:[#allocation8 + $0x13c] sm:$0xf0]  ;;  %v4425_v58 = vld [vmem:[#allocation8 + $0x52c] sm:$0xf0]  ;;  %v4212_v53 = vld [vmem:[#allocation8 + $0x8a8] sm:$0xf] }
  0x7f   :  { %2083 = vmatpush.bf16.msra.mxu0 %v3561_v16  ;;  %v3828_v16 = vld [vmem:[#allocation8 + $0x5a8] sm:$0xf]  ;;  %v3948_v27 = vld [vmem:[#allocation8 + $0x698] sm:$0xf]  ;;  %v4473_v28 = vld [vmem:[#allocation8 + $0x6ac] sm:$0xf0] }
  0x80   :  { %2097 = vmatpush.bf16.msra.mxu1 %v3753_v17  ;;  %v4443_v17 = vld [vmem:[#allocation8 + $0x5bc] sm:$0xf0]  ;;  %v3972_v13 = vld [vmem:[#allocation8 + $0x6c8] sm:$0xf]  ;;  %vm2673_vm0 = vcmask 1041408   ;;  %vm2723_vm1 = vcmask 64512  }
  0x81   :  { %2111 = vmatpush.bf16.msra.mxu2 %v3945_v18  ;;  %v3253_v18 = vor.u32 %v4299_v10, %v3252_v9  ;;  %v3829_v26 = vor.u32 %v4443_v17, %v3828_v16  ;;  %v3516_v16 = vld [vmem:[#allocation8 + $0x338] sm:$0xf]  ;;  %v4365_v17 = vld [vmem:[#allocation8 + $0x34c] sm:$0xf0]  ;;  %v4164_v15 = vld [vmem:[#allocation8 + $0x848] sm:$0xf] }
  0x82   :  { %2125 = vmatpush.bf16.msra.mxu3 %v4137_v24  ;;  %v4293_v24 = vld [vmem:[#allocation8 + $0x10c] sm:$0xf0]  ;;  %vm2675_vm2 = vcmask 1045508   ;;  %vm2677_vm3 = vcmask 1043456   ;;  %vm2689_vm4 = vcmask 1041409   ;;  %vm2691_vm5 = vcmask 1043459  }
  0x83   :  { %2084 = vmatpush.bf16.msra.mxu0 %v3537_v30  ;;  %v3804_v30 = vld [vmem:[#allocation8 + $0x578] sm:$0xf]  ;;  %vm2693_vm6 = vcmask 1045509   ;;  %vm2695_vm7 = vcmask 1047559   ;;  %vm2848_vm8 = vcmask 261120   ;;  %vm3027_vm9 = vcmask 523264  }
  0x84   :  { %2098 = vmatpush.bf16.msra.mxu1 %v3729_v31  ;;  %v4437_v31 = vld [vmem:[#allocation8 + $0x58c] sm:$0xf0]  ;;  %s3059_s16 = sshll.u32 %s5468_s11, 4  ;;  %s3060_s16 = int_to_ptr.hbm [resolvable:$true] %s3059_s16 }
  0x85   :  { %2112 = vmatpush.bf16.msra.mxu2 %v3921_v32  ;;  %v3229_v32 = vor.u32 %v4293_v24, %v3228_v21  ;;  %v3805_v40 = vor.u32 %v4437_v31, %v3804_v30  ;;  %v3108_v21 = vld [vmem:[#allocation8 + $0x8] sm:$0xf]  ;;  %v4263_v24 = vld [vmem:[#allocation8 + $0x1c] sm:$0xf0] }
  0x86   :  { %2126 = vmatpush.bf16.msra.mxu3 %v4113_v37  ;;  %v4287_v37 = vld [vmem:[#allocation8 + $0xdc] sm:$0xf0]  ;;  %v3109_v38 = vor.u32 %v4263_v24, %v3108_v21  ;;  %v3398_v21 = vld [vmem:[#allocation8 + $0x260] sm:$0xf0] }
  0x87   :  { %2085 = vmatpush.bf16.msra.mxu0 %v3513_v45  ;;  %v4431_v45 = vld [vmem:[#allocation8 + $0x55c] sm:$0xf0]  ;;  %v3205_v46 = vor.u32 %v4287_v37, %v3204_v36  ;;  %v4497_v36 = vld [vmem:[#allocation8 + $0x76c] sm:$0xf0]  ;;  %v4236_v37 = vld [vmem:[#allocation8 + $0x8d8] sm:$0xf] }
  0x88   :  { %2099 = vmatpush.bf16.msra.mxu1 %v3705_v49  ;;  %v3180_v49 = vld [vmem:[#allocation8 + $0x98] sm:$0xf]  ;;  %v3781_v52 = vor.u32 %v4431_v45, %v3780_v44  ;;  %v4359_v31 = vld [vmem:[#allocation8 + $0x31c] sm:$0xf0]  ;;  %v4350_v45 = vld [vmem:[#allocation8 + $0x2dc] sm:$0xf] }
  0x89   :  { %2113 = vmatpush.bf16.msra.mxu2 %v3897_v50  ;;  %v4281_v50 = vld [vmem:[#allocation8 + $0xac] sm:$0xf0]  ;;  %v3493_v44 = vor.u32 %v4359_v31, %v3492_v29  ;;  %v4140_v29 = vld [vmem:[#allocation8 + $0x818] sm:$0xf] }
  0x8a   :  { %2127 = vmatpush.bf16.msra.mxu3 %v4089_v54  ;;  %v3564_v54 = vld [vmem:[#allocation8 + $0x398] sm:$0xf]  ;;  %v3181_v59 = vor.u32 %v4281_v50, %v3180_v49  ;;  %v3281_v50 = vor.u32 %v4302_v41, %v3278_v42  ;;  %v4521_v31 = vld [vmem:[#allocation8 + $0x82c] sm:$0xf0]  ;;  %v3924_v41 = vld [vmem:[#allocation8 + $0x668] sm:$0xf] }
  0x8b   :  { %2086 = vmatpush.bf16.msra.mxu0 %v3489_v61  ;;  %v3565_v61 = vor.u32 %v4377_v55, %v3564_v54  ;;  %v4539_v55 = vld [vmem:[#allocation8 + $0x8bc] sm:$0xf0] }
  0x8c   :  { %2100 = vmatpush.bf16.msra.mxu1 %v3681_v0  ;;  %v3348_v0 = vld [vmem:[#allocation8 + $0x1e8] sm:$0xf]  ;;  %v4467_v42 = vld [vmem:[#allocation8 + $0x67c] sm:$0xf0] }
  0x8d   :  { %2114 = vmatpush.bf16.msra.mxu2 %v3873_v1  ;;  %v3757_v1 = vor.u32 %v4425_v58, %v3756_v56  ;;  %v3349_v9 = vor.u32 %v4323_v2, %v3348_v0  ;;  %v4296_v56 = vld [vmem:[#allocation8 + $0x12c] sm:$0xf]  ;;  %v3254_v58 = vld [vmem:[#allocation8 + $0x140] sm:$0xf0]  ;;  %v3996_v0 = vld [vmem:[#allocation8 + $0x6f8] sm:$0xf] }
  0x8e   :  { %2128 = vmatpush.bf16.msra.mxu3 %v4065_v4  ;;  %2087 = vmatmul.bf16.vlgmr.msra.gmra.mxu0 %v4981_v22  ;;  %v4371_v4 = vld [vmem:[#allocation8 + $0x37c] sm:$0xf0]  ;;  %v4188_v2 = vld [vmem:[#allocation8 + $0x878] sm:$0xf] }
  0x8f   :  { %2135 = vmatpush.bf16.msrb.mxu0 %v3277_v5  ;;  %2101 = vmatmul.bf16.vlgmr.msra.gmra.mxu1 %v4983_v23  ;;  %v3732_v5 = vld [vmem:[#allocation8 + $0x4e8] sm:$0xf]  ;;  %v3541_v10 = vor.u32 %v4371_v4, %v3540_v3  ;;  %v4533_v4 = vld [vmem:[#allocation8 + $0x88c] sm:$0xf0] }
  0x90   :  { %2149 = vmatpush.bf16.msrb.mxu1 %v3469_v7  ;;  %2115 = vmatmul.bf16.vlgmr.msra.gmra.mxu2 %v4987_v35  ;;  %v4419_v7 = vld [vmem:[#allocation8 + $0x4fc] sm:$0xf0] }
  0x91   :  { %2163 = vmatpush.bf16.msrb.mxu2 %v3661_v8  ;;  %2129 = vmatmul.bf16.vlgmr.msra.gmra.mxu3 %v4989_v39  ;;  %v3157_v8 = vor.u32 %v4275_v63, %v3156_v62  ;;  %v3733_v14 = vor.u32 %v4419_v7, %v3732_v5  ;;  %v4213_v62 = vor.u32 %v4539_v55, %v4212_v53  ;;  %v4290_v5 = vld [vmem:[#allocation8 + $0xfc] sm:$0xf]  ;;  %v3230_v7 = vld [vmem:[#allocation8 + $0x110] sm:$0xf0]  ;;  %v3900_v53 = vld [vmem:[#allocation8 + $0x638] sm:$0xf] }
  0x92   :  { %2177 = vmatpush.bf16.msrb.mxu3 %v3853_v12  ;;  %v4269_v12 = vld [vmem:[#allocation8 + $0x4c] sm:$0xf0]  ;;  %v3257_v63 = vor.u32 %v4296_v56, %v3254_v58  ;;  %v4092_v55 = vld [vmem:[#allocation8 + $0x7b8] sm:$0xf] }
  0x93   :  { %2136 = vmatpush.bf16.msrb.mxu0 %v3253_v18  ;;  %v3708_v18 = vld [vmem:[#allocation8 + $0x4b8] sm:$0xf]  ;;  %v4509_v58 = vld [vmem:[#allocation8 + $0x7cc] sm:$0xf0] }
  0x94   :  { %2150 = vmatpush.bf16.msrb.mxu1 %v3445_v19  ;;  %v4413_v19 = vld [vmem:[#allocation8 + $0x4cc] sm:$0xf0] }
  0x95   :  { %2164 = vmatpush.bf16.msrb.mxu2 %v3637_v20  ;;  %v3133_v20 = vor.u32 %v4269_v12, %v3132_v11  ;;  %v3709_v30 = vor.u32 %v4413_v19, %v3708_v18  ;;  %v4189_v11 = vor.u32 %v4533_v4, %v4188_v2  ;;  %v3233_v12 = vor.u32 %v4290_v5, %v3230_v7  ;;  %v4284_v18 = vld [vmem:[#allocation8 + $0xcc] sm:$0xf]  ;;  %v3206_v19 = vld [vmem:[#allocation8 + $0xe0] sm:$0xf0]  ;;  %v4068_v4 = vld [vmem:[#allocation8 + $0x788] sm:$0xf] }
  0x96   :  { %2178 = vmatpush.bf16.msrb.mxu3 %v3829_v26  ;;  %v3517_v26 = vor.u32 %v4365_v17, %v3516_v16  ;;  %v4527_v17 = vld [vmem:[#allocation8 + $0x85c] sm:$0xf0]  ;;  %v4093_v2 = vor.u32 %v4509_v58, %v4092_v55  ;;  %v4260_v7 = vld [vmem:[#allocation8 + $0xc] sm:$0xf] }
  0x97   :  { %2137 = vmatpush.bf16.msrb.mxu0 %v3229_v32  ;;  %v3684_v32 = vld [vmem:[#allocation8 + $0x488] sm:$0xf]  ;;  %v4503_v5 = vld [vmem:[#allocation8 + $0x79c] sm:$0xf0]  ;;  %v4380_v58 = vld [vmem:[#allocation8 + $0x3cc] sm:$0xf] }
  0x98   :  { %2151 = vmatpush.bf16.msrb.mxu1 %v3421_v33  ;;  %v4407_v33 = vld [vmem:[#allocation8 + $0x49c] sm:$0xf0] }
  0x99   :  { %2165 = vmatpush.bf16.msrb.mxu2 %v3613_v34  ;;  %v4044_v34 = vld [vmem:[#allocation8 + $0x758] sm:$0xf] }
  0x9a   :  { %2179 = vmatpush.bf16.msrb.mxu3 %v3805_v40  ;;  %v4545_v40 = vld [vmem:[#allocation8 + $0x8ec] sm:$0xf0] }
  0x9b   :  { %2138 = vmatpush.bf16.msrb.mxu0 %v3205_v46  ;;  %v3470_v46 = vld [vmem:[#allocation8 + $0x2f0] sm:$0xf0]  ;;  %v4237_v49 = vor.u32 %v4545_v40, %v4236_v37  ;;  %v3949_v37 = vor.u32 %v4473_v28, %v3948_v27 }
  0x9c   :  { %2152 = vmatpush.bf16.msrb.mxu1 %v3397_v47  ;;  %v3685_v47 = vor.u32 %v4407_v33, %v3684_v32  ;;  %v3473_v54 = vor.u32 %v4350_v45, %v3470_v46  ;;  %v4278_v32 = vld [vmem:[#allocation8 + $0x9c] sm:$0xf]  ;;  %v3182_v33 = vld [vmem:[#allocation8 + $0xb0] sm:$0xf0]  ;;  %v4515_v45 = vld [vmem:[#allocation8 + $0x7fc] sm:$0xf0] }
  0x9d   :  { %2166 = vmatpush.bf16.msrb.mxu2 %v3589_v48  ;;  %v4045_v48 = vor.u32 %v4497_v36, %v4044_v34  ;;  %v4326_v34 = vld [vmem:[#allocation8 + $0x21c] sm:$0xf]  ;;  %v3374_v36 = vld [vmem:[#allocation8 + $0x230] sm:$0xf0]  ;;  %v3185_v40 = vor.u32 %v4278_v32, %v3182_v33  ;;  %v4272_v46 = vld [vmem:[#allocation8 + $0x6c] sm:$0xf] }
  0x9e   :  { %2180 = vmatpush.bf16.msrb.mxu3 %v3781_v52  ;;  %v4491_v52 = vld [vmem:[#allocation8 + $0x73c] sm:$0xf0]  ;;  %v3830_v33 = vld [vmem:[#allocation8 + $0x5c0] sm:$0xf0] }
  0x9f   :  { %2139 = vmatpush.bf16.msrb.mxu0 %v3181_v59  ;;  %v4344_v59 = vld [vmem:[#allocation8 + $0x2ac] sm:$0xf] }
  0xa0   :  { %2153 = vmatpush.bf16.msrb.mxu1 %v3373_v60  ;;  %v3446_v60 = vld [vmem:[#allocation8 + $0x2c0] sm:$0xf0] }
  0xa1   :  { %2167 = vmatpush.bf16.msrb.mxu2 %v3565_v61  ;;  %v4021_v61 = vor.u32 %v4491_v52, %v4020_v51  ;;  %v3449_v3 = vor.u32 %v4344_v59, %v3446_v60  ;;  %v4266_v59 = vld [vmem:[#allocation8 + $0x3c] sm:$0xf]  ;;  %v3134_v60 = vld [vmem:[#allocation8 + $0x50] sm:$0xf0] }
  0xa2   :  { %2181 = vmatpush.bf16.msrb.mxu3 %v3757_v1  ;;  %v4485_v1 = vld [vmem:[#allocation8 + $0x70c] sm:$0xf0] }
  0xa3   :  { %2140 = vmatpush.bf16.msrb.mxu0 %v3157_v8  ;;  %v4338_v8 = vld [vmem:[#allocation8 + $0x27c] sm:$0xf] }
  0xa4   :  { %2154 = vmatpush.bf16.msrb.mxu1 %v3349_v9  ;;  %v3422_v9 = vld [vmem:[#allocation8 + $0x290] sm:$0xf0] }
  0xa5   :  { %2168 = vmatpush.bf16.msrb.mxu2 %v3541_v10  ;;  %v3997_v10 = vor.u32 %v4485_v1, %v3996_v0  ;;  %v3425_v16 = vor.u32 %v4338_v8, %v3422_v9  ;;  %v3876_v0 = vld [vmem:[#allocation8 + $0x608] sm:$0xf]  ;;  %v4455_v1 = vld [vmem:[#allocation8 + $0x61c] sm:$0xf0]  ;;  %v3110_v9 = vld [vmem:[#allocation8 + $0x20] sm:$0xf0] }
  0xa6   :  { %2182 = vmatpush.bf16.msrb.mxu3 %v3733_v14  ;;  %v4479_v14 = vld [vmem:[#allocation8 + $0x6dc] sm:$0xf0] }
  0xa7   :  { %2141 = vmatpush.bf16.msrb.mxu0 %v3133_v20  ;;  %v4332_v20 = vld [vmem:[#allocation8 + $0x24c] sm:$0xf]  ;;  %v3973_v24 = vor.u32 %v4479_v14, %v3972_v13  ;;  %v3662_v13 = vld [vmem:[#allocation8 + $0x470] sm:$0xf0]  ;;  %v4446_v14 = vld [vmem:[#allocation8 + $0x5dc] sm:$0xf] }
  0xa8   :  { %2155 = vmatpush.bf16.msrb.mxu1 %v3325_v25  ;;  %v4165_v25 = vor.u32 %v4527_v17, %v4164_v15  ;;  %v3877_v15 = vor.u32 %v4455_v1, %v3876_v0  ;;  %v4494_v17 = vld [vmem:[#allocation8 + $0x75c] sm:$0xf]  ;;  %v3974_v0 = vld [vmem:[#allocation8 + $0x6e0] sm:$0xf0]  ;;  %v4524_v1 = vld [vmem:[#allocation8 + $0x84c] sm:$0xf] }
  0xa9   :  { %2169 = vmatpush.bf16.msrb.mxu2 %v3517_v26  ;;  %v3209_v26 = vor.u32 %v4284_v18, %v3206_v19  ;;  %v4046_v18 = vld [vmem:[#allocation8 + $0x770] sm:$0xf0]  ;;  %v4069_v19 = vor.u32 %v4503_v5, %v4068_v4 }
  0xaa   :  { %2183 = vmatpush.bf16.msrb.mxu3 %v3709_v30  ;;  %v3401_v30 = vor.u32 %v4332_v20, %v3398_v21  ;;  %v3113_v20 = vor.u32 %v4260_v7, %v3110_v9  ;;  %v4542_v21 = vld [vmem:[#allocation8 + $0x8dc] sm:$0xf]  ;;  %v4049_v28 = vor.u32 %v4494_v17, %v4046_v18  ;;  %v4142_v17 = vld [vmem:[#allocation8 + $0x830] sm:$0xf0] }
  0xab   :  { %2142 = vmatpush.bf16.msrb.mxu0 %v3109_v38  ;;  %v4141_v38 = vor.u32 %v4521_v31, %v4140_v29  ;;  %v4392_v29 = vld [vmem:[#allocation8 + $0x42c] sm:$0xf]  ;;  %v4374_v9 = vld [vmem:[#allocation8 + $0x39c] sm:$0xf] }
  0xac   :  { %2156 = vmatpush.bf16.msrb.mxu1 %v3301_v43  ;;  %v4116_v43 = vld [vmem:[#allocation8 + $0x7e8] sm:$0xf]  ;;  %v4440_v31 = vld [vmem:[#allocation8 + $0x5ac] sm:$0xf] }
  0xad   :  { %2170 = vmatpush.bf16.msrb.mxu2 %v3493_v44  ;;  %v3377_v44 = vor.u32 %v4326_v34, %v3374_v36  ;;  %v4117_v51 = vor.u32 %v4515_v45, %v4116_v43  ;;  %v4488_v34 = vld [vmem:[#allocation8 + $0x72c] sm:$0xf]  ;;  %v4022_v36 = vld [vmem:[#allocation8 + $0x740] sm:$0xf0]  ;;  %v4434_v45 = vld [vmem:[#allocation8 + $0x57c] sm:$0xf] }
  0xae   :  { %2184 = vmatpush.bf16.msrb.mxu3 %v3685_v47  ;;  %2143 = vmatmul.bf16.vlgmr.msrb.gmra.mxu0 %v4975_v57  ;;  %v3158_v47 = vld [vmem:[#allocation8 + $0x80] sm:$0xf0]  ;;  %v4025_v43 = vor.u32 %v4488_v34, %v4022_v36 }
  0xaf   :  { %2191 = vmatpush.bf16.msra.mxu0 %v4045_v48  ;;  %2157 = vmatmul.bf16.vlgmr.msrb.gmra.mxu1 %v4978_v6  ;;  %v4320_v48 = vld [vmem:[#allocation8 + $0x1ec] sm:$0xf]  ;;  %v3161_v52 = vor.u32 %v4272_v46, %v3158_v47  ;;  %v5003_v46 = vld [vmem:[#allocation9] sm:$0x3f] }
  0xb0   :  { %2205 = vmatpush.bf16.msra.mxu1 %v4237_v49  ;;  %2171 = vmatmul.bf16.vlgmr.msrb.gmra.mxu2 %v4981_v22  ;;  %v3350_v49 = vld [vmem:[#allocation8 + $0x200] sm:$0xf0] }
  0xb1   :  { %2219 = vmatpush.bf16.msra.mxu2 %v3281_v50  ;;  %2185 = vmatmul.bf16.vlgmr.msrb.gmra.mxu3 %v4983_v23  ;;  %v3925_v50 = vor.u32 %v4467_v42, %v3924_v41  ;;  %v3353_v56 = vor.u32 %v4320_v48, %v3350_v49  ;;  %v4386_v41 = vld [vmem:[#allocation8 + $0x3fc] sm:$0xf]  ;;  %v3833_v42 = vor.u32 %v4440_v31, %v3830_v33  ;;  %v3806_v48 = vld [vmem:[#allocation8 + $0x590] sm:$0xf0]  ;;  %v3926_v31 = vld [vmem:[#allocation8 + $0x680] sm:$0xf0] }
  0xb2   :  { %2233 = vmatpush.bf16.msra.mxu3 %v3473_v54  ;;  %v4461_v54 = vld [vmem:[#allocation8 + $0x64c] sm:$0xf0]  ;;  %v4482_v49 = vld [vmem:[#allocation8 + $0x6fc] sm:$0xf]  ;;  %v3809_v55 = vor.u32 %v4434_v45, %v3806_v48  ;;  %v4118_v33 = vld [vmem:[#allocation8 + $0x800] sm:$0xf0] }
  0xb3   :  { %2192 = vmatpush.bf16.msra.mxu0 %v4021_v61  ;;  %v4314_v61 = vld [vmem:[#allocation8 + $0x1bc] sm:$0xf]  ;;  %v3710_v45 = vld [vmem:[#allocation8 + $0x4d0] sm:$0xf0] }
  0xb4   :  { %2206 = vmatpush.bf16.msra.mxu1 %v4213_v62  ;;  %v3326_v62 = vld [vmem:[#allocation8 + $0x1d0] sm:$0xf0] }
  0xb5   :  { %2220 = vmatpush.bf16.msra.mxu2 %v3257_v63  ;;  %v3901_v63 = vor.u32 %v4461_v54, %v3900_v53  ;;  %v3329_v8 = vor.u32 %v4314_v61, %v3326_v62  ;;  %v485_v54 = vperm.slane %v5003_v46, 0  ;;  %v3782_v62 = vld [vmem:[#allocation8 + $0x560] sm:$0xf0]  ;;  %v3902_v48 = vld [vmem:[#allocation8 + $0x650] sm:$0xf0] }
  0xb6   :  { %2234 = vmatpush.bf16.msra.mxu3 %v3449_v3  ;;  %v3137_v3 = vor.u32 %v4266_v59, %v3134_v60  ;;  %v3590_v59 = vld [vmem:[#allocation8 + $0x3e0] sm:$0xf0]  ;;  %v4428_v60 = vld [vmem:[#allocation8 + $0x54c] sm:$0xf] }
  0xb7   :  { %2193 = vmatpush.bf16.msra.mxu0 %v3997_v10  ;;  %v4308_v10 = vld [vmem:[#allocation8 + $0x18c] sm:$0xf]  ;;  %v3593_v4 = vor.u32 %v4380_v58, %v3590_v59  ;;  %v3785_v7 = vor.u32 %v4428_v60, %v3782_v62  ;;  %v3686_v60 = vld [vmem:[#allocation8 + $0x4a0] sm:$0xf0] }
  0xb8   :  { %2207 = vmatpush.bf16.msra.mxu1 %v4189_v11  ;;  %v3302_v11 = vld [vmem:[#allocation8 + $0x1a0] sm:$0xf0]  ;;  %v4404_v59 = vld [vmem:[#allocation8 + $0x48c] sm:$0xf] }
  0xb9   :  { %2221 = vmatpush.bf16.msra.mxu2 %v3233_v12  ;;  %v4398_v12 = vld [vmem:[#allocation8 + $0x45c] sm:$0xf] }
  0xba   :  { %2235 = vmatpush.bf16.msra.mxu3 %v3425_v16  ;;  %v3854_v16 = vld [vmem:[#allocation8 + $0x5f0] sm:$0xf0] }
  0xbb   :  { %2194 = vmatpush.bf16.msra.mxu0 %v3973_v24  ;;  %v4238_v24 = vld [vmem:[#allocation8 + $0x8f0] sm:$0xf0]  ;;  %v3857_v27 = vor.u32 %v4446_v14, %v3854_v16  ;;  %v4470_v14 = vld [vmem:[#allocation8 + $0x69c] sm:$0xf] }
  0xbc   :  { %2208 = vmatpush.bf16.msra.mxu1 %v4165_v25  ;;  %v3305_v25 = vor.u32 %v4308_v10, %v3302_v11  ;;  %v4241_v32 = vor.u32 %v4542_v21, %v4238_v24  ;;  %v3566_v10 = vld [vmem:[#allocation8 + $0x3b0] sm:$0xf0]  ;;  %v4422_v11 = vld [vmem:[#allocation8 + $0x51c] sm:$0xf] }
  0xbd   :  { %2222 = vmatpush.bf16.msra.mxu2 %v3209_v26  ;;  %v3665_v26 = vor.u32 %v4398_v12, %v3662_v13  ;;  %v3758_v13 = vld [vmem:[#allocation8 + $0x530] sm:$0xf0]  ;;  %v4518_v16 = vld [vmem:[#allocation8 + $0x81c] sm:$0xf] }
  0xbe   :  { %2236 = vmatpush.bf16.msra.mxu3 %v3401_v30  ;;  %v3638_v30 = vld [vmem:[#allocation8 + $0x440] sm:$0xf0]  ;;  %v3761_v21 = vor.u32 %v4422_v11, %v3758_v13  ;;  %v3668_v11 = vld [vmem:[#allocation8 + $0x460] sm:$0xf] }
  0xbf   :  { %2195 = vmatpush.bf16.msra.mxu0 %v3949_v37  ;;  %v4536_v37 = vld [vmem:[#allocation8 + $0x8ac] sm:$0xf] }
  0xc0   :  { %2209 = vmatpush.bf16.msra.mxu1 %v4141_v38  ;;  %v4214_v38 = vld [vmem:[#allocation8 + $0x8c0] sm:$0xf0] }
  0xc1   :  { %2223 = vmatpush.bf16.msra.mxu2 %v3185_v40  ;;  %v3641_v40 = vor.u32 %v4392_v29, %v3638_v30  ;;  %v4217_v47 = vor.u32 %v4536_v37, %v4214_v38  ;;  %v3734_v29 = vld [vmem:[#allocation8 + $0x500] sm:$0xf0]  ;;  %v4464_v30 = vld [vmem:[#allocation8 + $0x66c] sm:$0xf] }
  0xc2   :  { %2237 = vmatpush.bf16.msra.mxu3 %v3377_v44  ;;  %v3614_v44 = vld [vmem:[#allocation8 + $0x410] sm:$0xf0] }
  0xc3   :  { %2196 = vmatpush.bf16.msra.mxu0 %v3925_v50  ;;  %v3998_v50 = vld [vmem:[#allocation8 + $0x710] sm:$0xf0]  ;;  %v3617_v53 = vor.u32 %v4386_v41, %v3614_v44  ;;  %v4362_v41 = vld [vmem:[#allocation8 + $0x33c] sm:$0xf] }
  0xc4   :  { %2210 = vmatpush.bf16.msra.mxu1 %v4117_v51  ;;  %v4530_v51 = vld [vmem:[#allocation8 + $0x87c] sm:$0xf] }
  0xc5   :  { %2224 = vmatpush.bf16.msra.mxu2 %v3161_v52  ;;  %v4190_v52 = vld [vmem:[#allocation8 + $0x890] sm:$0xf0] }
  0xc6   :  { %2238 = vmatpush.bf16.msra.mxu3 %v3353_v56  ;;  %v4001_v56 = vor.u32 %v4482_v49, %v3998_v50  ;;  %v4193_v61 = vor.u32 %v4530_v51, %v4190_v52  ;;  %v4506_v49 = vld [vmem:[#allocation8 + $0x7bc] sm:$0xf]  ;;  %v4094_v50 = vld [vmem:[#allocation8 + $0x7d0] sm:$0xf0] }
  0xc7   :  { %2197 = vmatpush.bf16.msra.mxu0 %v3901_v63  ;;  %v4476_v63 = vld [vmem:[#allocation8 + $0x6cc] sm:$0xf] }
  0xc8   :  { %2211 = vmatpush.bf16.msra.mxu1 %v4093_v2  ;;  %v4166_v2 = vld [vmem:[#allocation8 + $0x860] sm:$0xf0] }
  0xc9   :  { %2225 = vmatpush.bf16.msra.mxu2 %v3137_v3  ;;  %v4169_v12 = vor.u32 %v4524_v1, %v4166_v2  ;;  %v4500_v1 = vld [vmem:[#allocation8 + $0x78c] sm:$0xf]  ;;  %v4070_v2 = vld [vmem:[#allocation8 + $0x7a0] sm:$0xf0] }
  0xca   :  { %2239 = vmatpush.bf16.msra.mxu3 %v3329_v8  ;;  %v3977_v8 = vor.u32 %v4476_v63, %v3974_v0  ;;  %v4097_v63 = vor.u32 %v4506_v49, %v4094_v50  ;;  %v3878_v0 = vld [vmem:[#allocation8 + $0x620] sm:$0xf0]  ;;  %v3812_v50 = vld [vmem:[#allocation8 + $0x580] sm:$0xf] }
  0xcb   :  { %2198 = vmatpush.bf16.msra.mxu0 %v3877_v15  ;;  %v1976_v3 = vpop.f32.mrf.mxu0  ;;  %v3950_v15 = vld [vmem:[#allocation8 + $0x6b0] sm:$0xf0] }
  0xcc   :  { %2212 = vmatpush.bf16.msra.mxu1 %v4069_v19  ;;  %v1977_v5 = vadd.f32 %v1976_v3, %v485_v54  ;;  %v1990_v18 = vpop.f32.mrf.mxu1  ;;  %v3569_v19 = vor.u32 %v4374_v9, %v3566_v10  ;;  %v3953_v24 = vor.u32 %v4470_v14, %v3950_v15  ;;  %v4354_v10 = vld [vmem:[#allocation8 + $0x2f4] sm:$0xf0]  ;;  %v3689_v14 = vor.u32 %v4404_v59, %v3686_v60  ;;  %v4336_v60 = vld [vmem:[#allocation8 + $0x264] sm:$0xf0] }
  0xcd   :  { %2226 = vmatpush.bf16.msra.mxu2 %v3113_v20 }
  0xce   :  { %2240 = vmatpush.bf16.msra.mxu3 %v3305_v25  ;;  %2199 = vmatmul.bf16.vlgmr.msra.gmra.mxu0 %v4987_v35  ;;  %v1991_v20 = vadd.f32 %v1990_v18, %v1977_v5  ;;  %v4368_v25 = vld [vmem:[#allocation8 + $0x36c] sm:$0xf]  ;;  %v3284_v5 = vld [vmem:[#allocation8 + $0x160] sm:$0xf]  ;;  %v4073_v18 = vor.u32 %v4500_v1, %v4070_v2  ;;  %v4432_v1 = vld [vmem:[#allocation8 + $0x564] sm:$0xf0] }
  0xcf   :  { %2247 = vmatpush.bf16.msrb.mxu0 %v3665_v26  ;;  %2213 = vmatmul.bf16.vlgmr.msra.gmra.mxu1 %v4989_v39  ;;  %v3542_v26 = vld [vmem:[#allocation8 + $0x380] sm:$0xf0] }
  0xd0   :  { %2261 = vmatpush.bf16.msrb.mxu1 %v3857_v27  ;;  %2227 = vmatmul.bf16.vlgmr.msra.gmra.mxu2 %v4975_v57  ;;  %v4416_v27 = vld [vmem:[#allocation8 + $0x4ec] sm:$0xf]  ;;  %v3545_v36 = vor.u32 %v4368_v25, %v3542_v26  ;;  %v4300_v25 = vld [vmem:[#allocation8 + $0x144] sm:$0xf0]  ;;  %v3452_v26 = vld [vmem:[#allocation8 + $0x2b0] sm:$0xf] }
  0xd1   :  { %2275 = vmatpush.bf16.msrb.mxu2 %v4049_v28  ;;  %2241 = vmatmul.bf16.vlgmr.msra.gmra.mxu3 %v4978_v6  ;;  %v4145_v28 = vor.u32 %v4518_v16, %v4142_v17  ;;  %v3737_v38 = vor.u32 %v4416_v27, %v3734_v29  ;;  %v3860_v16 = vld [vmem:[#allocation8 + $0x5e0] sm:$0xf]  ;;  %v4450_v17 = vld [vmem:[#allocation8 + $0x5f4] sm:$0xf0]  ;;  %v3644_v29 = vld [vmem:[#allocation8 + $0x430] sm:$0xf] }
  0xd2   :  { %2289 = vmatpush.bf16.msrb.mxu3 %v4241_v32  ;;  %v4512_v32 = vld [vmem:[#allocation8 + $0x7ec] sm:$0xf]  ;;  %v3861_v27 = vor.u32 %v4450_v17, %v3860_v16  ;;  %v4378_v16 = vld [vmem:[#allocation8 + $0x3b4] sm:$0xf0]  ;;  %v3764_v17 = vld [vmem:[#allocation8 + $0x520] sm:$0xf] }
  0xd3   :  { %2248 = vmatpush.bf16.msrb.mxu0 %v3641_v40  ;;  %v1978_v34 = vpop.f32.mrf.mxu0  ;;  %v3929_v40 = vor.u32 %v4464_v30, %v3926_v31  ;;  %v4121_v44 = vor.u32 %v4512_v32, %v4118_v33  ;;  %v2004_v62 = vpop.f32.mrf.mxu2  ;;  %v4396_v30 = vld [vmem:[#allocation8 + $0x444] sm:$0xf0]  ;;  %v3836_v31 = vld [vmem:[#allocation8 + $0x5b0] sm:$0xf] }
  0xd4   :  { %2262 = vmatpush.bf16.msrb.mxu1 %v3833_v42  ;;  %v1979_v37 = vadd.f32 %v1978_v34, %v485_v54  ;;  %v3518_v42 = vld [vmem:[#allocation8 + $0x350] sm:$0xf0]  ;;  %v1992_v51 = vpop.f32.mrf.mxu1  ;;  %v2005_v3 = vadd.f32 %v2004_v62, %v1991_v20  ;;  %v4444_v32 = vld [vmem:[#allocation8 + $0x5c4] sm:$0xf0] }
  0xd5   :  { %2276 = vmatpush.bf16.msrb.mxu2 %v4025_v43  ;;  %v4410_v43 = vld [vmem:[#allocation8 + $0x4bc] sm:$0xf]  ;;  %v3521_v52 = vor.u32 %v4362_v41, %v3518_v42  ;;  %v3236_v41 = vld [vmem:[#allocation8 + $0x100] sm:$0xf]  ;;  %v4294_v42 = vld [vmem:[#allocation8 + $0x114] sm:$0xf0] }
  0xd6   :  { %2290 = vmatpush.bf16.msrb.mxu3 %v4217_v47  ;;  %v4458_v47 = vld [vmem:[#allocation8 + $0x63c] sm:$0xf]  ;;  %v1993_v54 = vadd.f32 %v1992_v51, %v1979_v37  ;;  %v4438_v51 = vld [vmem:[#allocation8 + $0x594] sm:$0xf0]  ;;  %v4384_v62 = vld [vmem:[#allocation8 + $0x3e4] sm:$0xf0] }
  0xd7   :  { %2249 = vmatpush.bf16.msrb.mxu0 %v3617_v53  ;;  %v4356_v53 = vld [vmem:[#allocation8 + $0x30c] sm:$0xf]  ;;  %v3905_v58 = vor.u32 %v4458_v47, %v3902_v48  ;;  %v3620_v47 = vld [vmem:[#allocation8 + $0x400] sm:$0xf]  ;;  %v4390_v48 = vld [vmem:[#allocation8 + $0x414] sm:$0xf0]  ;;  %v3813_v59 = vor.u32 %v4438_v51, %v3812_v50 }
  0xd8   :  { %2263 = vmatpush.bf16.msrb.mxu1 %v3809_v55  ;;  %v3494_v55 = vld [vmem:[#allocation8 + $0x320] sm:$0xf0] }
  0xd9   :  { %2277 = vmatpush.bf16.msrb.mxu2 %v4001_v56  ;;  %v3713_v56 = vor.u32 %v4410_v43, %v3710_v45  ;;  %v3497_v9 = vor.u32 %v4356_v53, %v3494_v55  ;;  %v3428_v43 = vld [vmem:[#allocation8 + $0x280] sm:$0xf]  ;;  %v4342_v45 = vld [vmem:[#allocation8 + $0x294] sm:$0xf0]  ;;  %v3621_v55 = vor.u32 %v4390_v48, %v3620_v47 }
  0xda   :  { %2291 = vmatpush.bf16.msrb.mxu3 %v4193_v61  ;;  %v4452_v61 = vld [vmem:[#allocation8 + $0x60c] sm:$0xf]  ;;  %v3429_v53 = vor.u32 %v4342_v45, %v3428_v43  ;;  %v4270_v45 = vld [vmem:[#allocation8 + $0x54] sm:$0xf0]  ;;  %v3332_v47 = vld [vmem:[#allocation8 + $0x1c0] sm:$0xf] }
  0xdb   :  { %2250 = vmatpush.bf16.msrb.mxu0 %v3593_v4  ;;  %v2018_v4 = vpop.f32.mrf.mxu3  ;;  %v3881_v15 = vor.u32 %v4452_v61, %v3878_v0  ;;  %v2006_v33 = vpop.f32.mrf.mxu2  ;;  %v3596_v61 = vld [vmem:[#allocation8 + $0x3d0] sm:$0xf] }
  0xdc   :  { %2264 = vmatpush.bf16.msrb.mxu1 %v3785_v7  ;;  %v4306_v7 = vld [vmem:[#allocation8 + $0x174] sm:$0xf0]  ;;  %v5010_v13 = vadd.f32 %v2018_v4, %v2005_v3  ;;  %v3788_v0 = vld [vmem:[#allocation8 + $0x550] sm:$0xf] }
  0xdd   :  { %2278 = vmatpush.bf16.msrb.mxu2 %v3977_v8  ;;  %v3476_v8 = vld [vmem:[#allocation8 + $0x2e0] sm:$0xf] }
  0xde   :  { %2292 = vmatpush.bf16.msrb.mxu3 %v4169_v12  ;;  %v4402_v12 = vld [vmem:[#allocation8 + $0x474] sm:$0xf0]  ;;  %v3477_v20 = vor.u32 %v4354_v10, %v3476_v8  ;;  %v3188_v8 = vld [vmem:[#allocation8 + $0xa0] sm:$0xf] }
  0xdf   :  { %2251 = vmatpush.bf16.msrb.mxu0 %v3569_v19  ;;  %v3285_v19 = vor.u32 %v4306_v7, %v3284_v5  ;;  %v3597_v7 = vor.u32 %v4384_v62, %v3596_v61  ;;  %v3380_v10 = vld [vmem:[#allocation8 + $0x220] sm:$0xf]  ;;  %v3308_v62 = vld [vmem:[#allocation8 + $0x190] sm:$0xf] }
  0xe0   :  { %2265 = vmatpush.bf16.msrb.mxu1 %v3761_v21  ;;  %v3669_v21 = vor.u32 %v4402_v12, %v3668_v11  ;;  %v3789_v11 = vor.u32 %v4432_v1, %v3788_v0  ;;  %v3500_v0 = vld [vmem:[#allocation8 + $0x310] sm:$0xf] }
  0xe1   :  { %2279 = vmatpush.bf16.msrb.mxu2 %v3953_v24  ;;  %v3260_v24 = vld [vmem:[#allocation8 + $0x130] sm:$0xf] }
  0xe2   :  { %2293 = vmatpush.bf16.msrb.mxu3 %v4145_v28  ;;  %v4348_v28 = vld [vmem:[#allocation8 + $0x2c4] sm:$0xf0]  ;;  %v3261_v34 = vor.u32 %v4300_v25, %v3260_v24  ;;  %v3164_v24 = vld [vmem:[#allocation8 + $0x70] sm:$0xf] }
  0xe3   :  { %2252 = vmatpush.bf16.msrb.mxu0 %v3545_v36  ;;  %v2007_v36 = vadd.f32 %v2006_v33, %v1993_v54  ;;  %v2020_v37 = vpop.f32.mrf.mxu3  ;;  %v3212_v54 = vld [vmem:[#allocation8 + $0xd0] sm:$0xf]  ;;  %v4276_v25 = vld [vmem:[#allocation8 + $0x84] sm:$0xf0] }
  0xe4   :  { %2266 = vmatpush.bf16.msrb.mxu1 %v3737_v38  ;;  %v3453_v38 = vor.u32 %v4348_v28, %v3452_v26  ;;  %v3356_v26 = vld [vmem:[#allocation8 + $0x1f0] sm:$0xf]  ;;  %v4324_v28 = vld [vmem:[#allocation8 + $0x204] sm:$0xf0] }
  0xe5   :  { %2280 = vmatpush.bf16.msrb.mxu2 %v3929_v40  ;;  %v3645_v40 = vor.u32 %v4396_v30, %v3644_v29  ;;  %v5013_v49 = vadd.f32 %v2020_v37, %v2007_v36  ;;  %v3548_v29 = vld [vmem:[#allocation8 + $0x370] sm:$0xf]  ;;  %v4372_v30 = vld [vmem:[#allocation8 + $0x384] sm:$0xf0] }
  0xe6   :  { %2294 = vmatpush.bf16.msrb.mxu3 %v4121_v44  ;;  %v3837_v44 = vor.u32 %v4444_v32, %v3836_v31  ;;  %v3740_v33 = vld [vmem:[#allocation8 + $0x4f0] sm:$0xf]  ;;  %v3549_v43 = vor.u32 %v4372_v30, %v3548_v29 }
  0xe7   :  { %2253 = vmatpush.bf16.msrb.mxu0 %v3521_v52  ;;  %v3237_v52 = vor.u32 %v4294_v42, %v3236_v41  ;;  %v3357_v42 = vor.u32 %v4324_v28, %v3356_v26  ;;  %v4492_v28 = vld [vmem:[#allocation8 + $0x744] sm:$0xf0]  ;;  %v4220_v29 = vld [vmem:[#allocation8 + $0x8b0] sm:$0xf] }
  0xe8   :  { %2267 = vmatpush.bf16.msrb.mxu1 %v3713_v56  ;;  %v4288_v56 = vld [vmem:[#allocation8 + $0xe4] sm:$0xf0] }
  0xe9   :  { %2281 = vmatpush.bf16.msrb.mxu2 %v3905_v58  ;;  %v3404_v58 = vld [vmem:[#allocation8 + $0x250] sm:$0xf]  ;;  %v3213_v3 = vor.u32 %v4288_v56, %v3212_v54  ;;  %v4414_v54 = vld [vmem:[#allocation8 + $0x4d4] sm:$0xf0] }
  0xea   :  { %2295 = vmatpush.bf16.msrb.mxu3 %v4097_v63  ;;  %v3405_v5 = vor.u32 %v4336_v60, %v3404_v58  ;;  %v3116_v58 = vld [vmem:[#allocation8 + $0x10] sm:$0xf] }
  0xeb   :  { %2254 = vmatpush.bf16.msrb.mxu0 %v3497_v9  ;;  %v2032_v63 = vpop.f32.mrf.mxu0  ;;  %v4282_v9 = vld [vmem:[#allocation8 + $0xb4] sm:$0xf0] }
  0xec   :  { %2268 = vmatpush.bf16.msrb.mxu1 %v3689_v14  ;;  %v2033_v2 = vadd.f32 %v2032_v63, %v5010_v13  ;;  %v2046_v4 = vpop.f32.mrf.mxu1  ;;  %v4330_v14 = vld [vmem:[#allocation8 + $0x234] sm:$0xf0]  ;;  %v486_v13 = vperm.slane %v5003_v46, 1  ;;  %v4312_v63 = vld [vmem:[#allocation8 + $0x1a4] sm:$0xf0] }
  0xed   :  { %2282 = vmatpush.bf16.msrb.mxu2 %v3881_v15  ;;  %v3572_v15 = vld [vmem:[#allocation8 + $0x3a0] sm:$0xf] }
  0xee   :  { %2296 = vmatpush.bf16.msrb.mxu3 %v4073_v18  ;;  %2255 = vmatmul.bf16.vlgmr.msrb.gmra.mxu0 %v4981_v22  ;;  %v5019_v12 = vadd.f32 %v2046_v4, %v2033_v2  ;;  %v4426_v18 = vld [vmem:[#allocation8 + $0x534] sm:$0xf0]  ;;  %v4360_v2 = vld [vmem:[#allocation8 + $0x324] sm:$0xf0] }
  0xef   :  { %2303 = vmatpush.bf16.msra.mxu0 %v3285_v19  ;;  %2269 = vmatmul.bf16.vlgmr.msrb.gmra.mxu1 %v4983_v23  ;;  %v3189_v19 = vor.u32 %v4282_v9, %v3188_v8  ;;  %v4408_v4 = vld [vmem:[#allocation8 + $0x4a4] sm:$0xf0]  ;;  %v4498_v8 = vld [vmem:[#allocation8 + $0x774] sm:$0xf0]  ;;  %v4244_v9 = vld [vmem:[#allocation8 + $0x8e0] sm:$0xf] }
  0xf0   :  { %2317 = vmatpush.bf16.msra.mxu1 %v3477_v20  ;;  %2283 = vmatmul.bf16.vlgmr.msrb.gmra.mxu2 %v4987_v35  ;;  %v3381_v20 = vor.u32 %v4330_v14, %v3380_v10  ;;  %v4303_v14 = vld [vmem:[#allocation8 + $0x164] sm:$0xf] }
  0xf1   :  { %2331 = vmatpush.bf16.msra.mxu2 %v3669_v21  ;;  %2297 = vmatmul.bf16.vlgmr.msrb.gmra.mxu3 %v4989_v39  ;;  %v3573_v21 = vor.u32 %v4378_v16, %v3572_v15  ;;  %v3286_v15 = vld [vmem:[#allocation8 + $0x178] sm:$0xf0]  ;;  %v3309_v16 = vor.u32 %v4312_v63, %v3308_v62  ;;  %v4480_v62 = vld [vmem:[#allocation8 + $0x6e4] sm:$0xf0]  ;;  %v4172_v63 = vld [vmem:[#allocation8 + $0x850] sm:$0xf] }
  0xf2   :  { %2345 = vmatpush.bf16.msra.mxu3 %v3861_v27  ;;  %v3765_v27 = vor.u32 %v4426_v18, %v3764_v17  ;;  %v3501_v17 = vor.u32 %v4360_v2, %v3500_v0  ;;  %v4351_v18 = vld [vmem:[#allocation8 + $0x2e4] sm:$0xf]  ;;  %v3289_v26 = vor.u32 %v4303_v14, %v3286_v15  ;;  %v4285_v2 = vld [vmem:[#allocation8 + $0xd4] sm:$0xf] }
  0xf3   :  { %2304 = vmatpush.bf16.msra.mxu0 %v3261_v34  ;;  %v2060_v31 = vpop.f32.mrf.mxu2  ;;  %v2034_v32 = vpop.f32.mrf.mxu0  ;;  %v4420_v34 = vld [vmem:[#allocation8 + $0x504] sm:$0xf0] }
  0xf4   :  { %2318 = vmatpush.bf16.msra.mxu1 %v3453_v38  ;;  %v2061_v36 = vadd.f32 %v2060_v31, %v486_v13  ;;  %v2035_v37 = vadd.f32 %v2034_v32, %v5013_v49  ;;  %v3165_v38 = vor.u32 %v4276_v25, %v3164_v24  ;;  %v2074_v41 = vpop.f32.mrf.mxu3  ;;  %v3741_v50 = vor.u32 %v4420_v34, %v3740_v33  ;;  %v3716_v49 = vld [vmem:[#allocation8 + $0x4c0] sm:$0xf]  ;;  %v4540_v31 = vld [vmem:[#allocation8 + $0x8c4] sm:$0xf0]  ;;  %v4297_v32 = vld [vmem:[#allocation8 + $0x134] sm:$0xf] }
  0xf5   :  { %2332 = vmatpush.bf16.msra.mxu2 %v3645_v40  ;;  %v2048_v40 = vpop.f32.mrf.mxu1  ;;  %v3717_v1 = vor.u32 %v4414_v54, %v3716_v49  ;;  %v3262_v33 = vld [vmem:[#allocation8 + $0x148] sm:$0xf0]  ;;  %v4345_v34 = vld [vmem:[#allocation8 + $0x2b4] sm:$0xf] }
  0xf6   :  { %2346 = vmatpush.bf16.msra.mxu3 %v3837_v44  ;;  %v3140_v44 = vld [vmem:[#allocation8 + $0x40] sm:$0xf]  ;;  %v5025_v48 = vadd.f32 %v2074_v41, %v2061_v36  ;;  %v5027_v51 = vadd.f32 %v2048_v40, %v2035_v37  ;;  %v3454_v36 = vld [vmem:[#allocation8 + $0x2c8] sm:$0xf0]  ;;  %v4221_v41 = vor.u32 %v4540_v31, %v4220_v29  ;;  %v4468_v31 = vld [vmem:[#allocation8 + $0x684] sm:$0xf0] }
  0xf7   :  { %2305 = vmatpush.bf16.msra.mxu0 %v3237_v52  ;;  %v4318_v52 = vld [vmem:[#allocation8 + $0x1d4] sm:$0xf0]  ;;  %v3141_v56 = vor.u32 %v4270_v45, %v3140_v44  ;;  %v4196_v44 = vld [vmem:[#allocation8 + $0x880] sm:$0xf]  ;;  %v3457_v45 = vor.u32 %v4345_v34, %v3454_v36  ;;  %v4516_v36 = vld [vmem:[#allocation8 + $0x804] sm:$0xf0] }
  0xf8   :  { %2319 = vmatpush.bf16.msra.mxu1 %v3429_v53  ;;  %v3524_v53 = vld [vmem:[#allocation8 + $0x340] sm:$0xf]  ;;  %v3333_v60 = vor.u32 %v4318_v52, %v3332_v47  ;;  %v4534_v47 = vld [vmem:[#allocation8 + $0x894] sm:$0xf0]  ;;  %v3238_v52 = vld [vmem:[#allocation8 + $0x118] sm:$0xf0] }
  0xf9   :  { %2333 = vmatpush.bf16.msra.mxu2 %v3621_v55  ;;  %v4366_v55 = vld [vmem:[#allocation8 + $0x354] sm:$0xf0] }
  0xfa   :  { %2347 = vmatpush.bf16.msra.mxu3 %v3813_v59  ;;  %v4264_v59 = vld [vmem:[#allocation8 + $0x24] sm:$0xf0]  ;;  %v3525_v61 = vor.u32 %v4366_v55, %v3524_v53  ;;  %v4339_v53 = vld [vmem:[#allocation8 + $0x284] sm:$0xf]  ;;  %v3430_v55 = vld [vmem:[#allocation8 + $0x298] sm:$0xf0] }
  0xfb   :  { %2306 = vmatpush.bf16.msra.mxu0 %v3213_v3  ;;  %v3692_v3 = vld [vmem:[#allocation8 + $0x490] sm:$0xf]  ;;  %v3117_v10 = vor.u32 %v4264_v59, %v3116_v58  ;;  %v5035_v54 = vpop.f32.mrf.mxu2  ;;  %v4197_v58 = vor.u32 %v4534_v47, %v4196_v44  ;;  %v3433_v0 = vor.u32 %v4339_v53, %v3430_v55  ;;  %v4462_v53 = vld [vmem:[#allocation8 + $0x654] sm:$0xf0]  ;;  %v4100_v55 = vld [vmem:[#allocation8 + $0x7c0] sm:$0xf] }
  0xfc   :  { %2320 = vmatpush.bf16.msra.mxu1 %v3405_v5  ;;  %v2471_v5 = vmul.f32 %v5019_v12, %v5019_v12 }
  0xfd   :  { %2334 = vmatpush.bf16.msra.mxu2 %v3597_v7  ;;  %v4052_v7 = vld [vmem:[#allocation8 + $0x760] sm:$0xf] }
  0xfe   :  { %2348 = vmatpush.bf16.msra.mxu3 %v3789_v11  ;;  %v4546_v11 = vld [vmem:[#allocation8 + $0x8f4] sm:$0xf0]  ;;  %v2483_v24 = vmul.f32 %v2471_v5, %v5019_v12  ;;  %v4333_v5 = vld [vmem:[#allocation8 + $0x254] sm:$0xf] }
  0xff   :  { %2307 = vmatpush.bf16.msra.mxu0 %v3189_v19  ;;  %v3478_v19 = vld [vmem:[#allocation8 + $0x2f8] sm:$0xf0]  ;;  %v4245_v25 = vor.u32 %v4546_v11, %v4244_v9 }
 0x100   :  { %2321 = vmatpush.bf16.msra.mxu1 %v3381_v20  ;;  %v3693_v20 = vor.u32 %v4408_v4, %v3692_v3  ;;  %v3481_v30 = vor.u32 %v4351_v18, %v3478_v19  ;;  %v2495_v40 = vmul.f32 0.044715, %v2483_v24  ;;  %v3214_v3 = vld [vmem:[#allocation8 + $0xe8] sm:$0xf0]  ;;  %v3190_v24 = vld [vmem:[#allocation8 + $0xb8] sm:$0xf0] }
 0x101   :  { %2335 = vmatpush.bf16.msra.mxu2 %v3573_v21  ;;  %v4053_v21 = vor.u32 %v4498_v8, %v4052_v7  ;;  %v3406_v7 = vld [vmem:[#allocation8 + $0x268] sm:$0xf0]  ;;  %v3217_v15 = vor.u32 %v4285_v2, %v3214_v3  ;;  %v4456_v3 = vld [vmem:[#allocation8 + $0x624] sm:$0xf0] }
 0x102   :  { %2349 = vmatpush.bf16.msra.mxu3 %v3765_v27  ;;  %v4028_v27 = vld [vmem:[#allocation8 + $0x730] sm:$0xf]  ;;  %v3409_v18 = vor.u32 %v4333_v5, %v3406_v7  ;;  %v4504_v5 = vld [vmem:[#allocation8 + $0x7a4] sm:$0xf0] }
 0x103   :  { %2308 = vmatpush.bf16.msra.mxu0 %v3165_v38  ;;  %v4029_v37 = vor.u32 %v4492_v28, %v4028_v27  ;;  %v4004_v38 = vld [vmem:[#allocation8 + $0x700] sm:$0xf]  ;;  %v3382_v27 = vld [vmem:[#allocation8 + $0x238] sm:$0xf0] }
 0x104   :  { %2322 = vmatpush.bf16.msra.mxu1 %v3357_v42  ;;  %v3265_v42 = vor.u32 %v4297_v32, %v3262_v33  ;;  %v4124_v32 = vld [vmem:[#allocation8 + $0x7f0] sm:$0xf] }
 0x105   :  { %2336 = vmatpush.bf16.msra.mxu2 %v3549_v43  ;;  %v4486_v43 = vld [vmem:[#allocation8 + $0x714] sm:$0xf0]  ;;  %v4125_v47 = vor.u32 %v4516_v36, %v4124_v32  ;;  %v4393_v36 = vld [vmem:[#allocation8 + $0x434] sm:$0xf] }
 0x106   :  { %2350 = vmatpush.bf16.msra.mxu3 %v3741_v50  ;;  %v4291_v50 = vld [vmem:[#allocation8 + $0x104] sm:$0xf]  ;;  %v4005_v49 = vor.u32 %v4486_v43, %v4004_v38  ;;  %v3166_v38 = vld [vmem:[#allocation8 + $0x88] sm:$0xf0] }
 0x107   :  { %2309 = vmatpush.bf16.msra.mxu0 %v3141_v56  ;;  %v2507_v56 = vadd.f32 %v2495_v40, %v5019_v12  ;;  %v3241_v59 = vor.u32 %v4291_v50, %v3238_v52  ;;  %v3358_v43 = vld [vmem:[#allocation8 + $0x208] sm:$0xf0]  ;;  %v3908_v52 = vld [vmem:[#allocation8 + $0x640] sm:$0xf] }
 0x108   :  { %2323 = vmatpush.bf16.msra.mxu1 %v3333_v60  ;;  %v5039_v60 = vpop.f32.mrf.mxu3  ;;  %v3909_v2 = vor.u32 %v4462_v53, %v3908_v52  ;;  %v4537_v52 = vld [vmem:[#allocation8 + $0x8b4] sm:$0xf]  ;;  %v4222_v53 = vld [vmem:[#allocation8 + $0x8c8] sm:$0xf0] }
 0x109   :  { %2337 = vmatpush.bf16.msra.mxu2 %v3525_v61  ;;  %v3980_v61 = vld [vmem:[#allocation8 + $0x6d0] sm:$0xf]  ;;  %v2519_v11 = vmul.f32 0.7978846, %v2507_v56  ;;  %v4510_v56 = vld [vmem:[#allocation8 + $0x7d4] sm:$0xf0] }
 0x10a   :  { %2351 = vmatpush.bf16.msra.mxu3 %v3717_v1  ;;  %v4528_v1 = vld [vmem:[#allocation8 + $0x864] sm:$0xf0]  ;;  %v3981_v9 = vor.u32 %v4480_v62, %v3980_v61 }
 0x10b   :  { %2310 = vmatpush.bf16.msra.mxu0 %v3117_v10  ;;  %v2088_v4 = vpop.f32.mrf.mxu0  ;;  %v3956_v10 = vld [vmem:[#allocation8 + $0x6a0] sm:$0xf]  ;;  %v4173_v14 = vor.u32 %v4528_v1, %v4172_v63  ;;  %4566 = vtanh.f32 %v2519_v11  ;;  %v4315_v63 = vld [vmem:[#allocation8 + $0x1c4] sm:$0xf]  ;;  %v3884_v1 = vld [vmem:[#allocation8 + $0x610] sm:$0xf] }
 0x10c   :  { %2324 = vmatpush.bf16.msra.mxu1 %v3309_v16  ;;  %v2089_v8 = vadd.f32 %v2088_v4, %v5025_v48  ;;  %v4474_v16 = vld [vmem:[#allocation8 + $0x6b4] sm:$0xf0]  ;;  %v2102_v19 = vpop.f32.mrf.mxu1  ;;  %v4076_v4 = vld [vmem:[#allocation8 + $0x790] sm:$0xf]  ;;  %v3118_v11 = vld [vmem:[#allocation8 + $0x28] sm:$0xf0] }
 0x10d   :  { %2338 = vmatpush.bf16.msra.mxu2 %v3501_v17  ;;  %v4148_v17 = vld [vmem:[#allocation8 + $0x820] sm:$0xf]  ;;  %v3957_v48 = vor.u32 %v4474_v16, %v3956_v10  ;;  %v4261_v10 = vld [vmem:[#allocation8 + $0x14] sm:$0xf] }
 0x10e   :  { %2352 = vmatpush.bf16.msra.mxu3 %v3693_v20  ;;  %2311 = vmatmul.bf16.vlgmr.msra.gmra.mxu0 %v4975_v57  ;;  %v4522_v20 = vld [vmem:[#allocation8 + $0x834] sm:$0xf0] }
 0x10f   :  { %2359 = vmatpush.bf16.msrb.mxu0 %v4053_v21  ;;  %2325 = vmatmul.bf16.vlgmr.msra.gmra.mxu1 %v4978_v6  ;;  %v4279_v21 = vld [vmem:[#allocation8 + $0xa4] sm:$0xf]  ;;  %v4149_v28 = vor.u32 %v4522_v20, %v4148_v17  ;;  %v3310_v17 = vld [vmem:[#allocation8 + $0x1a8] sm:$0xf0]  ;;  %v3670_v20 = vld [vmem:[#allocation8 + $0x478] sm:$0xf0] }
 0x110   :  { %2373 = vmatpush.bf16.msrb.mxu1 %v4245_v25  ;;  %2339 = vmatmul.bf16.vlgmr.msra.gmra.mxu2 %v4981_v22  ;;  %v2103_v25 = vadd.f32 %v2102_v19, %v2089_v8  ;;  %v3193_v29 = vor.u32 %v4279_v21, %v3190_v24  ;;  %v4101_v8 = vor.u32 %v4510_v56, %v4100_v55  ;;  %v4447_v21 = vld [vmem:[#allocation8 + $0x5e4] sm:$0xf] }
 0x111   :  { %2387 = vmatpush.bf16.msrb.mxu2 %v3289_v26  ;;  %2353 = vmatmul.bf16.vlgmr.msra.gmra.mxu3 %v4983_v23  ;;  %v4327_v26 = vld [vmem:[#allocation8 + $0x224] sm:$0xf]  ;;  %v4567_v61 = vpop.eup %4566  ;;  %v3885_v24 = vor.u32 %v4456_v3, %v3884_v1  ;;  %v4198_v3 = vld [vmem:[#allocation8 + $0x898] sm:$0xf0] }
 0x112   :  { %2401 = vmatpush.bf16.msrb.mxu3 %v3481_v30  ;;  %v3932_v30 = vld [vmem:[#allocation8 + $0x670] sm:$0xf]  ;;  %v3385_v33 = vor.u32 %v4327_v26, %v3382_v27  ;;  %v4495_v26 = vld [vmem:[#allocation8 + $0x764] sm:$0xf]  ;;  %v4054_v27 = vld [vmem:[#allocation8 + $0x778] sm:$0xf0] }
 0x113   :  { %2360 = vmatpush.bf16.msrb.mxu0 %v4029_v37  ;;  %v2116_v34 = vpop.f32.mrf.mxu2  ;;  %v4273_v37 = vld [vmem:[#allocation8 + $0x74] sm:$0xf]  ;;  %v3933_v44 = vor.u32 %v4468_v31, %v3932_v30  ;;  %v4543_v30 = vld [vmem:[#allocation8 + $0x8e4] sm:$0xf]  ;;  %v4246_v31 = vld [vmem:[#allocation8 + $0x8f8] sm:$0xf0] }
 0x114   :  { %2374 = vmatpush.bf16.msrb.mxu1 %v4221_v41  ;;  %v2117_v40 = vadd.f32 %v2116_v34, %v2103_v25  ;;  %v2130_v41 = vpop.f32.mrf.mxu3  ;;  %v3169_v50 = vor.u32 %v4273_v37, %v3166_v38  ;;  %v3862_v25 = vld [vmem:[#allocation8 + $0x5f8] sm:$0xf0]  ;;  %v4483_v1 = vld [vmem:[#allocation8 + $0x704] sm:$0xf] }
 0x115   :  { %2388 = vmatpush.bf16.msrb.mxu2 %v3265_v42  ;;  %v4321_v42 = vld [vmem:[#allocation8 + $0x1f4] sm:$0xf]  ;;  %v3865_v38 = vor.u32 %v4447_v21, %v3862_v25  ;;  %v5053_v25 = vpop.f32.mrf.mxu0 }
 0x116   :  { %2402 = vmatpush.bf16.msrb.mxu3 %v3457_v45  ;;  %v5042_v45 = vadd.f32 %v2130_v41, %v2117_v40  ;;  %v4057_v40 = vor.u32 %v4495_v26, %v4054_v27  ;;  %v3646_v41 = vld [vmem:[#allocation8 + $0x448] sm:$0xf0] }
 0x117   :  { %2361 = vmatpush.bf16.msrb.mxu0 %v4005_v49  ;;  %v3361_v49 = vor.u32 %v4321_v42, %v3358_v43  ;;  %v4441_v42 = vld [vmem:[#allocation8 + $0x5b4] sm:$0xf]  ;;  %v4249_v43 = vor.u32 %v4543_v30, %v4246_v31 }
 0x118   :  { %2375 = vmatpush.bf16.msrb.mxu1 %v4197_v58  ;;  %v4267_v58 = vld [vmem:[#allocation8 + $0x44] sm:$0xf]  ;;  %v2472_v62 = vmul.f32 %v5042_v45, %v5042_v45 }
 0x119   :  { %2389 = vmatpush.bf16.msrb.mxu2 %v3241_v59  ;;  %v3142_v59 = vld [vmem:[#allocation8 + $0x58] sm:$0xf0] }
 0x11a   :  { %2403 = vmatpush.bf16.msrb.mxu3 %v3433_v0  ;;  %v3334_v0 = vld [vmem:[#allocation8 + $0x1d8] sm:$0xf0]  ;;  %v2484_v7 = vmul.f32 %v2472_v62, %v5042_v45  ;;  %v4435_v62 = vld [vmem:[#allocation8 + $0x584] sm:$0xf] }
 0x11b   :  { %2362 = vmatpush.bf16.msrb.mxu0 %v3981_v9  ;;  %v3145_v9 = vor.u32 %v4267_v58, %v3142_v59  ;;  %v3337_v16 = vor.u32 %v4315_v63, %v3334_v0  ;;  %v4387_v59 = vld [vmem:[#allocation8 + $0x404] sm:$0xf]  ;;  %v4225_v63 = vor.u32 %v4537_v52, %v4222_v53  ;;  %v3814_v0 = vld [vmem:[#allocation8 + $0x598] sm:$0xf0] }
 0x11c   :  { %2376 = vmatpush.bf16.msrb.mxu1 %v4173_v14  ;;  %v4309_v14 = vld [vmem:[#allocation8 + $0x194] sm:$0xf]  ;;  %v2496_v19 = vmul.f32 0.044715, %v2484_v7 }
 0x11d   :  { %2390 = vmatpush.bf16.msrb.mxu2 %v3217_v15  ;;  %v2543_v15 = vadd.f32 1.0, %v4567_v61  ;;  %v3622_v61 = vld [vmem:[#allocation8 + $0x418] sm:$0xf0]  ;;  %v4381_v7 = vld [vmem:[#allocation8 + $0x3d4] sm:$0xf] }
 0x11e   :  { %2404 = vmatpush.bf16.msrb.mxu3 %v3409_v18  ;;  %v4399_v18 = vld [vmem:[#allocation8 + $0x464] sm:$0xf] }
 0x11f   :  { %2363 = vmatpush.bf16.msrb.mxu0 %v3957_v48  ;;  %v2508_v48 = vadd.f32 %v2496_v19, %v5042_v45  ;;  %v2555_v32 = vmul.f32 0.5, %v2543_v15  ;;  %v3673_v34 = vor.u32 %v4399_v18, %v3670_v20  ;;  %v3790_v15 = vld [vmem:[#allocation8 + $0x568] sm:$0xf0]  ;;  %v4525_v19 = vld [vmem:[#allocation8 + $0x854] sm:$0xf] }
 0x120   :  { %2377 = vmatpush.bf16.msrb.mxu1 %v4149_v28  ;;  %v4077_v28 = vor.u32 %v4504_v5, %v4076_v4  ;;  %v3625_v5 = vor.u32 %v4387_v59, %v3622_v61  ;;  %v3982_v18 = vld [vmem:[#allocation8 + $0x6e8] sm:$0xf0] }
 0x121   :  { %2391 = vmatpush.bf16.msrb.mxu2 %v3193_v29  ;;  %v3121_v29 = vor.u32 %v4261_v10, %v3118_v11  ;;  %v2520_v37 = vmul.f32 0.7978846, %v2508_v48  ;;  %v2567_v55 = vmul.f32 %v2555_v32, %v5019_v12  ;;  %v4531_v12 = vld [vmem:[#allocation8 + $0x884] sm:$0xf]  ;;  %v3598_v11 = vld [vmem:[#allocation8 + $0x3e8] sm:$0xf0] }
 0x122   :  { %2405 = vmatpush.bf16.msrb.mxu3 %v3385_v33  ;;  %v3313_v33 = vor.u32 %v4309_v14, %v3310_v17  ;;  %v4429_v14 = vld [vmem:[#allocation8 + $0x554] sm:$0xf]  ;;  %v4201_v17 = vor.u32 %v4531_v12, %v4198_v3  ;;  %v4174_v20 = vld [vmem:[#allocation8 + $0x868] sm:$0xf0]  ;;  %v4375_v48 = vld [vmem:[#allocation8 + $0x3a4] sm:$0xf] }
 0x123   :  { %2364 = vmatpush.bf16.msrb.mxu0 %v3933_v44  ;;  %v3838_v44 = vld [vmem:[#allocation8 + $0x5c8] sm:$0xf0]  ;;  %4568 = vtanh.f32 %v2520_v37  ;;  %v2581_v4 = vrot.slane %v2567_v55, 4  ;;  %v3793_v26 = vor.u32 %v4429_v14, %v3790_v15  ;;  %v4177_v31 = vor.u32 %v4525_v19, %v4174_v20  ;;  %v3766_v32 = vld [vmem:[#allocation8 + $0x538] sm:$0xf0] }
 0x124   :  { %2378 = vmatpush.bf16.msrb.mxu1 %v4125_v47  ;;  %v4489_v47 = vld [vmem:[#allocation8 + $0x734] sm:$0xf]  ;;  %v3841_v56 = vor.u32 %v4441_v42, %v3838_v44  ;;  %v4150_v37 = vld [vmem:[#allocation8 + $0x838] sm:$0xf0]  ;;  %v4126_v59 = vld [vmem:[#allocation8 + $0x808] sm:$0xf0] }
 0x125   :  { %2392 = vmatpush.bf16.msrb.mxu2 %v3169_v50  ;;  %v4030_v50 = vld [vmem:[#allocation8 + $0x748] sm:$0xf0]  ;;  %v2582_v21 = vadd.f32 %v2581_v4, %v2567_v55  ;;  %v4363_v12 = vld [vmem:[#allocation8 + $0x344] sm:$0xf]  ;;  %v3526_v3 = vld [vmem:[#allocation8 + $0x358] sm:$0xf0] }
 0x126   :  { %2406 = vmatpush.bf16.msrb.mxu3 %v3361_v49  ;;  %v3649_v49 = vor.u32 %v4393_v36, %v3646_v41  ;;  %v4033_v58 = vor.u32 %v4489_v47, %v4030_v50  ;;  %v4519_v36 = vld [vmem:[#allocation8 + $0x824] sm:$0xf]  ;;  %v5056_v41 = vpop.f32.mrf.mxu1  ;;  %v4369_v47 = vld [vmem:[#allocation8 + $0x374] sm:$0xf]  ;;  %v3550_v50 = vld [vmem:[#allocation8 + $0x388] sm:$0xf0] }
 0x127   :  { %2365 = vmatpush.bf16.msrb.mxu0 %v3909_v2  ;;  %v4006_v2 = vld [vmem:[#allocation8 + $0x718] sm:$0xf0]  ;;  %v4153_v53 = vor.u32 %v4519_v36, %v4150_v37  ;;  %v3742_v55 = vld [vmem:[#allocation8 + $0x508] sm:$0xf0]  ;;  %v4411_v4 = vld [vmem:[#allocation8 + $0x4c4] sm:$0xf] }
 0x128   :  { %2379 = vmatpush.bf16.msrb.mxu1 %v4101_v8  ;;  %v4009_v10 = vor.u32 %v4483_v1, %v4006_v2  ;;  %v4102_v14 = vld [vmem:[#allocation8 + $0x7d8] sm:$0xf0] }
 0x129   :  { %2393 = vmatpush.bf16.msrb.mxu2 %v3145_v9  ;;  %v4569_v8 = vpop.eup %4568  ;;  %v3817_v9 = vor.u32 %v4435_v62, %v3814_v0 }
 0x12a   :  { %2407 = vmatpush.bf16.msrb.mxu3 %v3337_v16  ;;  %v2544_v16 = vadd.f32 1.0, %v4569_v8  ;;  %v3718_v8 = vld [vmem:[#allocation8 + $0x4d8] sm:$0xf0] }
 0x12b   :  { %2366 = vmatpush.bf16.msrb.mxu0 %v3885_v24  ;;  %v2144_v2 = vpop.f32.mrf.mxu0  ;;  %v3721_v19 = vor.u32 %v4411_v4, %v3718_v8 }
 0x12c   :  { %2380 = vmatpush.bf16.msrb.mxu1 %v4077_v28  ;;  %v2556_v24 = vmul.f32 0.5, %v2544_v16  ;;  %v3574_v28 = vld [vmem:[#allocation8 + $0x3b8] sm:$0xf0] }
 0x12d   :  { %2394 = vmatpush.bf16.msrb.mxu2 %v3121_v29  ;;  %v4423_v29 = vld [vmem:[#allocation8 + $0x524] sm:$0xf]  ;;  %v3577_v42 = vor.u32 %v4375_v48, %v3574_v28  ;;  %v3694_v48 = vld [vmem:[#allocation8 + $0x4a8] sm:$0xf0]  ;;  %v4453_v28 = vld [vmem:[#allocation8 + $0x614] sm:$0xf] }
 0x12e   :  { %2408 = vmatpush.bf16.msrb.mxu3 %v3313_v33  ;;  %2367 = vmatmul.bf16.vlgmr.msrb.gmra.mxu0 %v4987_v35  ;;  %v2568_v30 = vmul.f32 %v2556_v24, %v5042_v45  ;;  %v4471_v33 = vld [vmem:[#allocation8 + $0x6a4] sm:$0xf]  ;;  %v4417_v45 = vld [vmem:[#allocation8 + $0x4f4] sm:$0xf]  ;;  %v3502_v24 = vld [vmem:[#allocation8 + $0x328] sm:$0xf0] }
 0x12f   :  { %2415 = vmatpush.bf16.msra.mxu0 %v3673_v34  ;;  %2381 = vmatmul.bf16.vlgmr.msrb.gmra.mxu1 %v4989_v39  ;;  %v3958_v34 = vld [vmem:[#allocation8 + $0x6b8] sm:$0xf0]  ;;  %v3745_v0 = vor.u32 %v4417_v45, %v3742_v55 }
 0x130   :  { %2429 = vmatpush.bf16.msra.mxu1 %v3865_v38  ;;  %2395 = vmatmul.bf16.vlgmr.msrb.gmra.mxu2 %v4975_v57  ;;  %v4477_v57 = vld [vmem:[#allocation8 + $0x6d4] sm:$0xf]  ;;  %v2583_v38 = vrot.slane %v2582_v21, 2  ;;  %v3961_v44 = vor.u32 %v4471_v33, %v3958_v34  ;;  %v2132_v34 = vpop.f32.mrf.mxu3 }
 0x131   :  { %2443 = vmatpush.bf16.msra.mxu2 %v4057_v40  ;;  %2409 = vmatmul.bf16.vlgmr.msrb.gmra.mxu3 %v4978_v6  ;;  %v3601_v6 = vor.u32 %v4381_v7, %v3598_v11  ;;  %v3985_v27 = vor.u32 %v4477_v57, %v3982_v18  ;;  %v2587_v40 = vrot.slane %v2568_v30, 4  ;;  %v4507_v11 = vld [vmem:[#allocation8 + $0x7c4] sm:$0xf]  ;;  %v3529_v57 = vor.u32 %v4363_v12, %v3526_v3  ;;  %v2158_v18 = vpop.f32.mrf.mxu1 }
 0x132   :  { %2457 = vmatpush.bf16.msra.mxu3 %v4249_v43  ;;  %v3769_v43 = vor.u32 %v4423_v29, %v3766_v32  ;;  %v2584_v61 = vadd.f32 %v2583_v38, %v2582_v21  ;;  %v4357_v21 = vld [vmem:[#allocation8 + $0x314] sm:$0xf]  ;;  %v3886_v29 = vld [vmem:[#allocation8 + $0x628] sm:$0xf0] }
 0x133   :  { %2416 = vmatpush.bf16.msra.mxu0 %v3649_v49  ;;  %v2588_v52 = vadd.f32 %v2587_v40, %v2568_v30  ;;  %v4465_v49 = vld [vmem:[#allocation8 + $0x674] sm:$0xf]  ;;  %v3505_v36 = vor.u32 %v4357_v21, %v3502_v24  ;;  %v3889_v38 = vor.u32 %v4453_v28, %v3886_v29 }
 0x134   :  { %2430 = vmatpush.bf16.msra.mxu1 %v3841_v56  ;;  %v3934_v56 = vld [vmem:[#allocation8 + $0x688] sm:$0xf0]  ;;  %v2585_v15 = vrot.slane %v2584_v61, 1  ;;  %v4501_v30 = vld [vmem:[#allocation8 + $0x794] sm:$0xf] }
 0x135   :  { %2444 = vmatpush.bf16.msra.mxu2 %v4033_v58  ;;  %v4513_v58 = vld [vmem:[#allocation8 + $0x7f4] sm:$0xf]  ;;  %v2589_v62 = vrot.slane %v2588_v52, 2  ;;  %v3937_v1 = vor.u32 %v4465_v49, %v3934_v56 }
 0x136   :  { %2458 = vmatpush.bf16.msra.mxu3 %v4225_v63  ;;  %v3553_v63 = vor.u32 %v4369_v47, %v3550_v50  ;;  %v4129_v7 = vor.u32 %v4513_v58, %v4126_v59  ;;  %v2586_v32 = vadd.f32 %v2585_v15, %v2584_v61  ;;  %v5063_v47 = vld [vmem:[#allocation9] sm:$0x3f] }
 0x137   :  { %2417 = vmatpush.bf16.msra.mxu0 %v3625_v5  ;;  %v2590_v5 = vadd.f32 %v2589_v62, %v2588_v52  ;;  %v487_v50 = vperm.slane %v5063_v47, 2 }
 0x138   :  { %2431 = vmatpush.bf16.msra.mxu1 %v3817_v9  ;;  %v4459_v9 = vld [vmem:[#allocation8 + $0x644] sm:$0xf]  ;;  %v2186_v49 = vpop.f32.mrf.mxu3 }
 0x139   :  { %2445 = vmatpush.bf16.msra.mxu2 %v4009_v10  ;;  %v3910_v10 = vld [vmem:[#allocation8 + $0x658] sm:$0xf0]  ;;  %v2591_v16 = vrot.slane %v2590_v5, 1  ;;  %v2160_v52 = vpop.f32.mrf.mxu1  ;;  %v2145_v55 = vadd.f32 %v2144_v2, %v487_v50 }
 0x13a   :  { %2459 = vmatpush.bf16.msra.mxu3 %v4201_v17  ;;  %v5058_v17 = vpop.f32.mrf.mxu2  ;;  %v3913_v20 = vor.u32 %v4459_v9, %v3910_v10  ;;  %v2717_v2 = vld [vmem:[#allocation6] sm:$0x3] }
 0x13b   :  { %2418 = vmatpush.bf16.msra.mxu0 %v3601_v6  ;;  %v4405_v6 = vld [vmem:[#allocation8 + $0x494] sm:$0xf]  ;;  %v2159_v59 = vadd.f32 %v2158_v18, %v2145_v55 }
 0x13c   :  { %2432 = vmatpush.bf16.msra.mxu1 %v3793_v26  ;;  %v2592_v26 = vadd.f32 %v2591_v16, %v2590_v5  ;;  %v3697_v37 = vor.u32 %v4405_v6, %v3694_v48  ;;  %v2477_v16 = vmul.f32 %v5027_v51, %v5027_v51 }
 0x13d   :  { %2446 = vmatpush.bf16.msra.mxu2 %v3985_v27  ;;  %v4105_v27 = vor.u32 %v4507_v11, %v4102_v14  ;;  %v488_v11 = vperm.slane %v5063_v47, 3 }
 0x13e   :  { %2460 = vmatpush.bf16.msra.mxu3 %v4177_v31  ;;  %v4078_v31 = vld [vmem:[#allocation8 + $0x7a8] sm:$0xf0]  ;;  %v2665_v33 = vrot.slane %v2592_v26, 6 }
 0x13f   :  { %2419 = vmatpush.bf16.msra.mxu0 %v3577_v42  ;;  %v4081_v42 = vor.u32 %v4501_v30, %v4078_v31 }
 0x140   :  { %2433 = vmatpush.bf16.msra.mxu1 %v3769_v43  ;;  %v5061_v40 = vsel %vm2673_vm0, %v2586_v32, %v2665_v33  ;;  %v2146_v43 = vpop.f32.mrf.mxu0 }
 0x141   :  { %2447 = vmatpush.bf16.msra.mxu2 %v3961_v44  ;;  %v2718_v44 = vld [vmem:[#allocation11] sm:$0xff]  ;;  %v2147_v56 = vadd.f32 %v2146_v43, %v487_v50 }
 0x142   :  { %2461 = vmatpush.bf16.msra.mxu3 %v4153_v53  ;;  %v2172_v45 = vpop.f32.mrf.mxu2  ;;  %v2063_v53 = vadd.f32 %v5035_v54, %v486_v13  ;;  %v2188_v54 = vpop.f32.mrf.mxu3 }
 0x143   :  { %2420 = vmatpush.bf16.msra.mxu0 %v3553_v63  ;;  %v2161_v61 = vadd.f32 %v2160_v52, %v2147_v56  ;;  %v2173_v46 = vadd.f32 %v2172_v45, %v2159_v59 }
 0x144   :  { %2434 = vmatpush.bf16.msra.mxu1 %v3745_v0  ;;  %v2077_v58 = vadd.f32 %v5039_v60, %v2063_v53 }
 0x145   :  { %2448 = vmatpush.bf16.msra.mxu2 %v3937_v1  ;;  %v2187_v1 = vadd.f32 %v2186_v49, %v2173_v46 }
 0x146   :  { %2462 = vmatpush.bf16.msra.mxu3 %v4129_v7 }
 0x147   :  { %2421 = vmatpush.bf16.msra.mxu0 %v3529_v57 }
 0x148   :  { %2435 = vmatpush.bf16.msra.mxu1 %v3721_v19 }
 0x149   :  { %2449 = vmatpush.bf16.msra.mxu2 %v3913_v20  ;;  %v2489_v20 = vmul.f32 %v2477_v16, %v5027_v51 }
 0x14a   :  { %2463 = vmatpush.bf16.msra.mxu3 %v4105_v27  ;;  %v2174_v63 = vpop.f32.mrf.mxu2 }
 0x14b   :  { %2422 = vmatpush.bf16.msra.mxu0 %v3505_v36  ;;  %v2200_v62 = vpop.f32.mrf.mxu0  ;;  %v2175_v13 = vadd.f32 %v2174_v63, %v2161_v61  ;;  %v2501_v29 = vmul.f32 0.044715, %v2489_v20 }
 0x14c   :  { %2436 = vmatpush.bf16.msra.mxu1 %v3697_v37  ;;  %v2214_v0 = vpop.f32.mrf.mxu1  ;;  %v2201_v60 = vadd.f32 %v2200_v62, %v2187_v1 }
 0x14d   :  { %2450 = vmatpush.bf16.msra.mxu2 %v3889_v38  ;;  %v2513_v38 = vadd.f32 %v2501_v29, %v5027_v51  ;;  %v2759_v29 = vld [vmem:[%s5463_s6 + $0x58] sm:$0xff] }
 0x14e   :  { %2464 = vmatpush.bf16.msra.mxu3 %v4081_v42  ;;  %2423 = vmatmul.bf16.vlgmr.msra.gmra.mxu0 %v4981_v22  ;;  %v2091_v22 = vadd.f32 %v5053_v25, %v2077_v58  ;;  %v5079_v25 = vadd.f32 %v2214_v0, %v2201_v60 }
 0x14f   :  { %2437 = vmatmul.bf16.vlgmr.msra.gmra.mxu1 %v4983_v23  ;;  %v2525_v55 = vmul.f32 0.7978846, %v2513_v38 }
 0x150   :  { %2742 = vmatpush.msrb.mxu1 %v2718_v44  ;;  %2451 = vmatmul.bf16.vlgmr.msra.gmra.mxu2 %v4987_v35  ;;  %v2105_v23 = vadd.f32 %v5056_v41, %v2091_v22  ;;  %v2189_v35 = vadd.f32 %v2188_v54, %v2175_v13  ;;  %v2473_v10 = vmul.f32 %v5079_v25, %v5079_v25 }
 0x151   :  { %2465 = vmatmul.bf16.vlgmr.msra.gmra.mxu3 %v4989_v39 }
 0x152   :  { %v2119_v39 = vadd.f32 %v5058_v17, %v2105_v23  ;;  %v2485_v17 = vmul.f32 %v2473_v10, %v5079_v25 }
 0x153   :  { %v2202_v12 = vpop.f32.mrf.mxu0  ;;  %v2228_v8 = vpop.f32.mrf.mxu2 }
 0x154   :  { %v2203_v3 = vadd.f32 %v2202_v12, %v2189_v35  ;;  %v5077_v4 = vadd.f32 %v2132_v34, %v2119_v39  ;;  %v2216_v5 = vpop.f32.mrf.mxu1  ;;  %v2242_v9 = vpop.f32.mrf.mxu3  ;;  %v2229_v57 = vadd.f32 %v2228_v8, %v488_v11  ;;  %v2497_v21 = vmul.f32 0.044715, %v2485_v17  ;;  %v2763_v35 = vld [vmem:[%s5463_s6 + $0x78] sm:$0xff]  ;;  %v2761_v17 = vld [vmem:[%s5463_s6 + $0x68] sm:$0xff] }
 0x155   :  { %v2795_v39 = vld [vmem:[%s5463_s6 + $0x178] sm:$0xff]  ;;  %2889 = vmatpush.msrb.mxu2 %v2763_v35 }
 0x156   :  { %v5081_v7 = vadd.f32 %v2216_v5, %v2203_v3  ;;  %v2478_v41 = vmul.f32 %v5077_v4, %v5077_v4  ;;  %v2243_v24 = vadd.f32 %v2242_v9, %v2229_v57  ;;  %v2509_v30 = vadd.f32 %v2497_v21, %v5079_v25  ;;  %2929 = vmatpush.msrb.mxu0 %v2795_v39  ;;  %v2762_v3 = vld [vmem:[%s5463_s6 + $0x70] sm:$0xff]  ;;  %v2777_v57 = vld [vmem:[%s5463_s6 + $0xe8] sm:$0xff]  ;;  %v2760_v21 = vld [vmem:[%s5463_s6 + $0x60] sm:$0xff] }
 0x157   :  { %v2778_v5 = vld [vmem:[%s5463_s6 + $0xf0] sm:$0xff]  ;;  %2890 = vmatpush.msrb.mxu2 %v2762_v3  ;;  %v2769_v3 = vld [vmem:[%s5463_s6 + $0xa8] sm:$0xff] }
 0x158   :  { %v2479_v14 = vmul.f32 %v5081_v7, %v5081_v7  ;;  %v2490_v15 = vmul.f32 %v2478_v41, %v5077_v4  ;;  %v2521_v42 = vmul.f32 0.7978846, %v2509_v30  ;;  %v2794_v41 = vld [vmem:[%s5463_s6 + $0x170] sm:$0xff]  ;;  %v2775_v30 = vld [vmem:[%s5463_s6 + $0xd8] sm:$0xff] }
 0x159   :  { %2930 = vmatpush.msrb.mxu0 %v2794_v41  ;;  %2891 = vmatpush.msrb.mxu2 %v2761_v17 }
 0x15a   :  { %v2491_v18 = vmul.f32 %v2479_v14, %v5081_v7  ;;  %v2502_v19 = vmul.f32 0.044715, %v2490_v15 }
 0x15b   :  { %v2230_v6 = vpop.f32.mrf.mxu2  ;;  %2892 = vmatpush.msrb.mxu2 %v2760_v21  ;;  %v2783_v21 = vld [vmem:[%s5463_s6 + $0x118] sm:$0xff] }
 0x15c   :  { %v2503_v26 = vmul.f32 0.044715, %v2491_v18  ;;  %v2244_v27 = vpop.f32.mrf.mxu3  ;;  %v2514_v48 = vadd.f32 %v2502_v19, %v5077_v4  ;;  %v2231_v34 = vadd.f32 %v2230_v6, %v488_v11  ;;  %v4883_v11 = vmov 0.0   ;;  %v2793_v18 = vld [vmem:[%s5463_s6 + $0x168] sm:$0xff]  ;;  %v2792_v6 = vld [vmem:[%s5463_s6 + $0x160] sm:$0xff] }
 0x15d   :  { %188 = vst [vmem:[#allocation2 + $0x8] sm:$0xf] %v4883_v11  ;;  %2931 = vmatpush.msrb.mxu0 %v2793_v18  ;;  %2893 = vmatpush.msrb.mxu2 %v2759_v29  ;;  %v2768_v11 = vld [vmem:[%s5463_s6 + $0xa0] sm:$0xff]  ;;  %v2782_v29 = vld [vmem:[%s5463_s6 + $0x110] sm:$0xff] }
 0x15e   :  { %v2515_v33 = vadd.f32 %v2503_v26, %v5081_v7  ;;  %v2526_v36 = vmul.f32 0.7978846, %v2514_v48  ;;  %v2245_v44 = vadd.f32 %v2244_v27, %v2231_v34  ;;  %v2774_v34 = vld [vmem:[%s5463_s6 + $0xd0] sm:$0xff] }
 0x15f   :  { %4250 = vmatmul.msk.f32.vlgmr.msrb.gmra.mxu1 %vm2723_vm1, %v2717_v2  ;;  %v2779_v2 = vld [vmem:[%s5463_s6 + $0xf8] sm:$0xff]  ;;  %2932 = vmatpush.msrb.mxu0 %v2792_v6 }
 0x160   :  { %v2527_v43 = vmul.f32 0.7978846, %v2515_v33  ;;  %4570 = vtanh.f32 %v2526_v36  ;;  %2909 = vmatpush.msrb.mxu3 %v2779_v2  ;;  %v2790_v36 = vld [vmem:[%s5463_s6 + $0x150] sm:$0xff] }
 0x161   :  { %4572 = vtanh.f32 %v2521_v42 }
 0x162   :  { %4574 = vtanh.f32 %v2527_v43  ;;  %2910 = vmatpush.msrb.mxu3 %v2778_v5  ;;  %v2785_v5 = vld [vmem:[%s5463_s6 + $0x128] sm:$0xff] }
 0x163   :  { %4576 = vtanh.f32 %v2525_v55  ;;  %v2772_v55 = vld [vmem:[%s5463_s6 + $0xc0] sm:$0xff] }
 0x164   :  { %2911 = vmatpush.msrb.mxu3 %v2777_v57 }
 0x166   :  { %v4571_v61 = vpop.eup %4570 }
 0x167   :  { %v4573_v22 = vpop.eup %4572  ;;  %v2550_v13 = vadd.f32 1.0, %v4571_v61 }
 0x168   :  { %v4575_v0 = vpop.eup %4574  ;;  %v2545_v9 = vadd.f32 1.0, %v4573_v22  ;;  %v2787_v22 = vld [vmem:[%s5463_s6 + $0x138] sm:$0xff] }
 0x169   :  { %v4577_v8 = vpop.eup %4576  ;;  %v2551_v10 = vadd.f32 1.0, %v4575_v0  ;;  %v2562_v14 = vmul.f32 0.5, %v2550_v13  ;;  %v2754_v13 = vld [vmem:[%s5463_s6 + $0x30] sm:$0xff] }
 0x16a   :  { %v2549_v19 = vadd.f32 1.0, %v4577_v8  ;;  %v2557_v26 = vmul.f32 0.5, %v2545_v9 }
 0x16b   :  { %v2256_v28 = vpop.f32.mrf.mxu0  ;;  %v2563_v27 = vmul.f32 0.5, %v2551_v10  ;;  %v2574_v48 = vmul.f32 %v2562_v14, %v5077_v4  ;;  %v2758_v4 = vld [vmem:[%s5463_s6 + $0x50] sm:$0xff]  ;;  %v2752_v10 = vld [vmem:[%s5463_s6 + $0x20] sm:$0xff] }
 0x16c   :  { %v2257_v31 = vadd.f32 %v2256_v28, %v2243_v24  ;;  %v2270_v32 = vpop.f32.mrf.mxu1  ;;  %v2776_v24 = vld [vmem:[%s5463_s6 + $0xe0] sm:$0xff]  ;;  %2894 = vmatpush.msrb.mxu2 %v2758_v4  ;;  %v2765_v4 = vld [vmem:[%s5463_s6 + $0x88] sm:$0xff] }
 0x16d   :  { %2912 = vmatpush.msrb.mxu3 %v2776_v24  ;;  %v2575_v38 = vmul.f32 %v2563_v27, %v5081_v7  ;;  %v2623_v43 = vrot.slane %v2574_v48, 4  ;;  %v2784_v14 = vld [vmem:[%s5463_s6 + $0x120] sm:$0xff] }
 0x16e   :  { %v2271_v37 = vadd.f32 %v2270_v32, %v2257_v31  ;;  %v2791_v31 = vld [vmem:[%s5463_s6 + $0x158] sm:$0xff]  ;;  %v2561_v32 = vmul.f32 0.5, %v2549_v19 }
 0x16f   :  { %2913 = vmatpush.msrb.mxu3 %v2775_v30  ;;  %2933 = vmatpush.msrb.mxu0 %v2791_v31  ;;  %v2751_v19 = vld [vmem:[%s5463_s6 + $0x18] sm:$0xff] }
 0x170   :  { %v2573_v7 = vmul.f32 %v2561_v32, %v5027_v51  ;;  %v2624_v51 = vadd.f32 %v2623_v43, %v2574_v48  ;;  %v2750_v48 = vld [vmem:[%s5463_s6 + $0x10] sm:$0xff]  ;;  %v2748_v43 = vld [vmem:[%s5463_s6] sm:$0xff] }
 0x171   :  { %2914 = vmatpush.msrb.mxu3 %v2774_v34  ;;  %2934 = vmatpush.msrb.mxu0 %v2790_v36  ;;  %v2781_v34 = vld [vmem:[%s5463_s6 + $0x108] sm:$0xff] }
 0x172   :  { %v2617_v0 = vrot.slane %v2573_v7, 4  ;;  %v2625_v39 = vrot.slane %v2624_v51, 2 }
 0x173   :  { %v2284_v50 = vpop.f32.mrf.mxu2  ;;  %v2258_v52 = vpop.f32.mrf.mxu0 }
 0x174   :  { %v2285_v45 = vadd.f32 %v2284_v50, %v2271_v37  ;;  %v2298_v53 = vpop.f32.mrf.mxu3  ;;  %v2259_v49 = vadd.f32 %v2258_v52, %v2245_v44  ;;  %v2272_v58 = vpop.f32.mrf.mxu1  ;;  %v2569_v37 = vmul.f32 %v2557_v26, %v5079_v25  ;;  %v2757_v50 = vld [vmem:[%s5463_s6 + $0x48] sm:$0xff]  ;;  %v2618_v9 = vadd.f32 %v2617_v0, %v2573_v7 }
 0x175   :  { %v2789_v25 = vld [vmem:[%s5463_s6 + $0x148] sm:$0xff]  ;;  %2895 = vmatpush.msrb.mxu2 %v2757_v50  ;;  %v2626_v18 = vadd.f32 %v2625_v39, %v2624_v51  ;;  %v2780_v50 = vld [vmem:[%s5463_s6 + $0x100] sm:$0xff] }
 0x176   :  { %v5100_v56 = vadd.f32 %v2298_v53, %v2285_v45  ;;  %v2273_v63 = vadd.f32 %v2272_v58, %v2259_v49  ;;  %v2773_v45 = vld [vmem:[%s5463_s6 + $0xc8] sm:$0xff]  ;;  %2935 = vmatpush.msrb.mxu0 %v2789_v25  ;;  %v2756_v53 = vld [vmem:[%s5463_s6 + $0x40] sm:$0xff]  ;;  %v2593_v58 = vrot.slane %v2569_v37, 4  ;;  %v2619_v26 = vrot.slane %v2618_v9, 2 }
 0x177   :  { %2915 = vmatpush.msrb.mxu3 %v2773_v45  ;;  %v2788_v49 = vld [vmem:[%s5463_s6 + $0x140] sm:$0xff]  ;;  %2896 = vmatpush.msrb.mxu2 %v2756_v53  ;;  %v2627_v32 = vrot.slane %v2626_v18, 1 }
 0x178   :  { %v2474_v59 = vmul.f32 %v5100_v56, %v5100_v56  ;;  %2936 = vmatpush.msrb.mxu0 %v2788_v49  ;;  %v2847_v49 = vld [vmem:[#allocation14 + $0x18] sm:$0xff] }
 0x179   :  { %2916 = vmatpush.msrb.mxu3 %v2772_v55  ;;  %v2628_v7 = vadd.f32 %v2627_v32, %v2626_v18  ;;  %2864 = vmatpush.msra.mxu1 %v2847_v49  ;;  %v2805_v32 = vld [vmem:[%s5463_s6 + $0x1c8] sm:$0xff] }
 0x17a   :  { %v2486_v62 = vmul.f32 %v2474_v59, %v5100_v56  ;;  %v2629_v59 = vrot.slane %v2575_v38, 4  ;;  %2937 = vmatpush.msrb.mxu0 %v2787_v22 }
 0x17b   :  { %v2286_v46 = vpop.f32.mrf.mxu2 }
 0x17c   :  { %v2498_v54 = vmul.f32 0.044715, %v2486_v62  ;;  %v2287_v23 = vadd.f32 %v2286_v46, %v2273_v63  ;;  %v2300_v1 = vpop.f32.mrf.mxu3  ;;  %v2755_v62 = vld [vmem:[%s5463_s6 + $0x38] sm:$0xff]  ;;  %v2630_v35 = vadd.f32 %v2629_v59, %v2575_v38  ;;  %v2620_v38 = vadd.f32 %v2619_v26, %v2618_v9 }
 0x17d   :  { %v2771_v63 = vld [vmem:[%s5463_s6 + $0xb8] sm:$0xff]  ;;  %2897 = vmatpush.msrb.mxu2 %v2755_v62  ;;  %v2846_v62 = vld [vmem:[#allocation14 + $0x10] sm:$0xff] }
 0x17e   :  { %v2510_v12 = vadd.f32 %v2498_v54, %v5100_v56  ;;  %v5115_v60 = vadd.f32 %v2300_v1, %v2287_v23  ;;  %2917 = vmatpush.msrb.mxu3 %v2771_v63  ;;  %v2770_v54 = vld [vmem:[%s5463_s6 + $0xb0] sm:$0xff]  ;;  %v2594_v1 = vadd.f32 %v2593_v58, %v2569_v37  ;;  %v2621_v58 = vrot.slane %v2620_v38, 1  ;;  %2865 = vmatpush.msra.mxu1 %v2846_v62 }
 0x17f   :  { %v2786_v23 = vld [vmem:[%s5463_s6 + $0x130] sm:$0xff]  ;;  %2898 = vmatpush.msrb.mxu2 %v2754_v13  ;;  %v2669_v63 = vrot.slane %v2628_v7, 6  ;;  %v2845_v13 = vld [vmem:[#allocation14 + $0x8] sm:$0xff]  ;;  %v2801_v7 = vld [vmem:[%s5463_s6 + $0x1a8] sm:$0xff] }
 0x180   :  { %v2522_v15 = vmul.f32 0.7978846, %v2510_v12  ;;  %v2480_v16 = vmul.f32 %v5115_v60, %v5115_v60  ;;  %2918 = vmatpush.msrb.mxu3 %v2770_v54  ;;  %2938 = vmatpush.msrb.mxu0 %v2786_v23  ;;  %v2753_v12 = vld [vmem:[%s5463_s6 + $0x28] sm:$0xff]  ;;  %v2622_v54 = vadd.f32 %v2621_v58, %v2620_v38  ;;  %v2798_v62 = vld [vmem:[%s5463_s6 + $0x190] sm:$0xff] }
 0x181   :  { %2899 = vmatpush.msrb.mxu2 %v2753_v12  ;;  %2866 = vmatpush.msra.mxu1 %v2845_v13 }
 0x182   :  { %4578 = vtanh.f32 %v2522_v15  ;;  %v2492_v20 = vmul.f32 %v2480_v16, %v5115_v60  ;;  %2919 = vmatpush.msrb.mxu3 %v2769_v3  ;;  %2939 = vmatpush.msrb.mxu0 %v2785_v5  ;;  %v2595_v15 = vrot.slane %v2594_v1, 2  ;;  %v2631_v16 = vrot.slane %v2630_v35, 2  ;;  %v2811_v3 = vld [vmem:[%s5463_s6 + $0x1f8] sm:$0xff] }
 0x183   :  { %2900 = vmatpush.msrb.mxu2 %v2752_v10  ;;  %v2680_v39 = vsel %vm2673_vm0, %v2622_v54, %v2669_v63 }
 0x184   :  { %v2504_v28 = vmul.f32 0.044715, %v2492_v20  ;;  %2920 = vmatpush.msrb.mxu3 %v2768_v11  ;;  %2940 = vmatpush.msrb.mxu0 %v2784_v14  ;;  %v2767_v20 = vld [vmem:[%s5463_s6 + $0x98] sm:$0xff]  ;;  %v2596_v30 = vadd.f32 %v2595_v15, %v2594_v1  ;;  %v2810_v11 = vld [vmem:[%s5463_s6 + $0x1f0] sm:$0xff] }
 0x185   :  { %2901 = vmatpush.msrb.mxu2 %v2751_v19 }
 0x186   :  { %v2516_v33 = vadd.f32 %v2504_v28, %v5115_v60  ;;  %2921 = vmatpush.msrb.mxu3 %v2767_v20  ;;  %2941 = vmatpush.msrb.mxu0 %v2783_v21  ;;  %v2766_v28 = vld [vmem:[%s5463_s6 + $0x90] sm:$0xff]  ;;  %v2597_v45 = vrot.slane %v2596_v30, 1  ;;  %v2808_v21 = vld [vmem:[%s5463_s6 + $0x1e0] sm:$0xff] }
 0x187   :  { %2902 = vmatpush.msrb.mxu2 %v2750_v48  ;;  %v2807_v48 = vld [vmem:[%s5463_s6 + $0x1d8] sm:$0xff] }
 0x188   :  { %v4579_v42 = vpop.eup %4578  ;;  %v2528_v44 = vmul.f32 0.7978846, %v2516_v33  ;;  %2922 = vmatpush.msrb.mxu3 %v2766_v28  ;;  %2942 = vmatpush.msrb.mxu0 %v2782_v29  ;;  %v2749_v33 = vld [vmem:[%s5463_s6 + $0x8] sm:$0xff]  ;;  %v2598_v59 = vadd.f32 %v2597_v45, %v2596_v30  ;;  %v2806_v29 = vld [vmem:[%s5463_s6 + $0x1d0] sm:$0xff] }
 0x189   :  { %v2546_v52 = vadd.f32 1.0, %v4579_v42  ;;  %2903 = vmatpush.msrb.mxu2 %v2749_v33 }
 0x18a   :  { %4580 = vtanh.f32 %v2528_v44  ;;  %2923 = vmatpush.msrb.mxu3 %v2765_v4  ;;  %2943 = vmatpush.msrb.mxu0 %v2781_v34  ;;  %v2764_v44 = vld [vmem:[%s5463_s6 + $0x80] sm:$0xff]  ;;  %v2666_v1 = vrot.slane %v2598_v59, 4  ;;  %v2799_v59 = vld [vmem:[%s5463_s6 + $0x198] sm:$0xff] }
 0x18b   :  { %v2558_v61 = vmul.f32 0.5, %v2546_v52  ;;  %v5235_v27 = vpop.f32.mrf.mxu0  ;;  %2904 = vmatpush.msrb.mxu2 %v2748_v43  ;;  %v2804_v4 = vld [vmem:[%s5463_s6 + $0x1c0] sm:$0xff] }
 0x18c   :  { %v5255_v42 = vpop.f32.mrf.mxu1  ;;  %2924 = vmatpush.msrb.mxu3 %v2764_v44  ;;  %2944 = vmatpush.msrb.mxu0 %v2780_v50 }
 0x18d   :  { %v2570_v46 = vmul.f32 %v2558_v61, %v5100_v56 }
 0x18f   :  { %v2599_v2 = vrot.slane %v2570_v46, 4 }
 0x190   :  { %v4581_v56 = vpop.eup %4580 }
 0x191   :  { %v2600_v41 = vadd.f32 %v2599_v2, %v2570_v46  ;;  %v2552_v8 = vadd.f32 1.0, %v4581_v56  ;;  %v2844_v56 = vld [vmem:[#allocation14] sm:$0xff] }
 0x192   :  { %2867 = vmatpush.msra.mxu1 %v2844_v56 }
 0x193   :  { %v2601_v17 = vrot.slane %v2600_v41, 2  ;;  %v2564_v57 = vmul.f32 0.5, %v2552_v8  ;;  %v2314_v22 = vpop.f32.mrf.mxu0  ;;  %v2340_v23 = vpop.f32.mrf.mxu2  ;;  %v489_v8 = vperm.slane %v5063_v47, 4 }
 0x194   :  { %v2328_v12 = vpop.f32.mrf.mxu1  ;;  %2949 = vmatpush.msrb.mxu1 %v2811_v3  ;;  %v2354_v10 = vpop.f32.mrf.mxu3 }
 0x195   :  { %v2602_v24 = vadd.f32 %v2601_v17, %v2600_v41  ;;  %v2576_v6 = vmul.f32 %v2564_v57, %v5115_v60  ;;  %v2632_v60 = vadd.f32 %v2631_v16, %v2630_v35  ;;  %v2315_v15 = vadd.f32 %v2314_v22, %v489_v8  ;;  %v2809_v17 = vld [vmem:[%s5463_s6 + $0x1e8] sm:$0xff] }
 0x196   :  { %2950 = vmatpush.msrb.mxu1 %v2810_v11  ;;  %v2313_v18 = vadd.f32 %v5235_v27, %v489_v8  ;;  %v2797_v22 = vld [vmem:[%s5463_s6 + $0x188] sm:$0xff] }
 0x197   :  { %v2635_v31 = vrot.slane %v2576_v6, 4  ;;  %v2603_v36 = vrot.slane %v2602_v24, 1  ;;  %v2633_v25 = vrot.slane %v2632_v60, 1 }
 0x198   :  { %2951 = vmatpush.msrb.mxu1 %v2809_v17  ;;  %v2327_v27 = vadd.f32 %v5255_v42, %v2313_v18  ;;  %v2802_v42 = vld [vmem:[%s5463_s6 + $0x1b0] sm:$0xff] }
 0x199   :  { %v2636_v37 = vadd.f32 %v2635_v31, %v2576_v6  ;;  %v2604_v53 = vadd.f32 %v2603_v36, %v2602_v24  ;;  %v2634_v61 = vadd.f32 %v2633_v25, %v2632_v60  ;;  %v2329_v24 = vadd.f32 %v2328_v12, %v2315_v15 }
 0x19a   :  { %2952 = vmatpush.msrb.mxu1 %v2808_v21  ;;  %v2341_v33 = vadd.f32 %v2340_v23, %v2327_v27 }
 0x19b   :  { %v2637_v52 = vrot.slane %v2636_v37, 2  ;;  %v2667_v46 = vrot.slane %v2604_v53, 2  ;;  %v2670_v35 = vrot.slane %v2634_v61, 4  ;;  %v2342_v26 = vpop.f32.mrf.mxu2 }
 0x19c   :  { %2953 = vmatpush.msrb.mxu1 %v2807_v48  ;;  %v2343_v30 = vadd.f32 %v2342_v26, %v2329_v24  ;;  %v2356_v31 = vpop.f32.mrf.mxu3  ;;  %v2355_v38 = vadd.f32 %v2354_v10, %v2341_v33 }
 0x19d   :  { %v2638_v55 = vadd.f32 %v2637_v52, %v2636_v37  ;;  %v2676_v5 = vsel %vm2675_vm2, %v2666_v1, %v2667_v46  ;;  %v2803_v37 = vld [vmem:[%s5463_s6 + $0x1b8] sm:$0xff] }
 0x19e   :  { %v2678_v16 = vsel %vm2677_vm3, %v5061_v40, %v2676_v5  ;;  %2954 = vmatpush.msrb.mxu1 %v2806_v29  ;;  %v2357_v34 = vadd.f32 %v2356_v31, %v2343_v30 }
 0x19f   :  { %v2639_v51 = vrot.slane %v2638_v55, 1 }
 0x1a0   :  { %2955 = vmatpush.msrb.mxu1 %v2805_v32 }
 0x1a1   :  { %v2640_v0 = vadd.f32 %v2639_v51, %v2638_v55  ;;  %v2800_v55 = vld [vmem:[%s5463_s6 + $0x1a0] sm:$0xff]  ;;  %v490_v51 = vperm.slane %v5063_v47, 5 }
 0x1a2   :  { %2956 = vmatpush.msrb.mxu1 %v2804_v4  ;;  %v2796_v47 = vld [vmem:[%s5463_s6 + $0x180] sm:$0xff] }
 0x1a3   :  { %v2671_v2 = vrot.slane %v2640_v0, 2 }
 0x1a4   :  { %2957 = vmatpush.msrb.mxu1 %v2803_v37  ;;  %v2843_v37 = vld [vmem:[%s5463_s6 + $0x2f8] sm:$0xff] }
 0x1a5   :  { %v2681_v41 = vsel %vm2675_vm2, %v2670_v35, %v2671_v2  ;;  %2989 = vmatpush.msra.mxu3 %v2843_v37 }
 0x1a6   :  { %v2682_v9 = vsel %vm2677_vm3, %v2680_v39, %v2681_v41  ;;  %2958 = vmatpush.msrb.mxu1 %v2802_v42 }
 0x1a7   :  { %v2688_v14 = vrot.slane %v2682_v9, 7 }
 0x1a8   :  { %2959 = vmatpush.msrb.mxu1 %v2801_v7  ;;  %v2841_v7 = vld [vmem:[%s5463_s6 + $0x2e8] sm:$0xff] }
 0x1a9   :  { %v2690_v57 = vsel %vm2689_vm4, %v2688_v14, %v2678_v16 }
 0x1aa   :  { %v2692_v19 = vsel %vm2691_vm5, %v2688_v14, %v2690_v57  ;;  %2960 = vmatpush.msrb.mxu1 %v2800_v55 }
 0x1ab   :  { %v2368_v20 = vpop.f32.mrf.mxu0  ;;  %v2694_v40 = vsel %vm2693_vm6, %v2688_v14, %v2692_v19 }
 0x1ac   :  { %v2696_v6 = vsel %vm2695_vm7, %v2688_v14, %v2694_v40  ;;  %v2382_v28 = vpop.f32.mrf.mxu1  ;;  %v2369_v25 = vadd.f32 %v2368_v20, %v2355_v38  ;;  %2961 = vmatpush.msrb.mxu1 %v2799_v59  ;;  %v2840_v59 = vld [vmem:[%s5463_s6 + $0x2e0] sm:$0xff] }
 0x1ad   :  { %v2715_v60 = vmul.f32 0.125, %v2696_v6  ;;  %v4563_v6 = vld [vmem:[#allocation12] ss:$0 sm:$0xff] }
 0x1ae   :  { %v5316_v61 = vadd.f32 %v2382_v28, %v2369_v25  ;;  %2962 = vmatpush.msrb.mxu1 %v2798_v62 }
 0x1af   :  { %2874 = vst [vmem:[#allocation1] ss:$4 sm:$0xff] %v2715_v60 }
 0x1b0   :  { %v2475_v46 = vmul.f32 %v5316_v61, %v5316_v61  ;;  %2963 = vmatpush.msrb.mxu1 %v2797_v22 }
 0x1b2   :  { %2964 = vmatpush.msrb.mxu1 %v2796_v47  ;;  %v2487_v23 = vmul.f32 %v2475_v46, %v5316_v61  ;;  %v2839_v47 = vld [vmem:[%s5463_s6 + $0x2d8] sm:$0xff] }
 0x1b3   :  { %v2370_v36 = vpop.f32.mrf.mxu0  ;;  %v2396_v53 = vpop.f32.mrf.mxu2 }
 0x1b4   :  { %v2371_v43 = vadd.f32 %v2370_v36, %v2357_v34  ;;  %v2384_v44 = vpop.f32.mrf.mxu1  ;;  %v2410_v58 = vpop.f32.mrf.mxu3  ;;  %v2397_v0 = vadd.f32 %v2396_v53, %v490_v51  ;;  %v2499_v3 = vmul.f32 0.044715, %v2487_v23  ;;  %v2827_v36 = vld [vmem:[%s5463_s6 + $0x278] sm:$0xff]  ;;  %v2822_v23 = vld [vmem:[%s5463_s6 + $0x250] sm:$0xff] }
 0x1b5   :  { %2969 = vmatpush.msra.mxu2 %v2827_v36  ;;  %v2829_v36 = vld [vmem:[%s5463_s6 + $0x288] sm:$0xff] }
 0x1b6   :  { %v2877_v50 = vld.sshfl [vmem:[#allocation1] sm:$0xff pattern:$0x73625140]  ;;  %v2878_v45 = vld.sshfl [vmem:[#allocation1 + $0x8] sm:$0xff pattern:$0x73625140]  ;;  %v5311_v49 = vadd.f32 %v2384_v44, %v2371_v43  ;;  %v2411_v1 = vadd.f32 %v2410_v58, %v2397_v0  ;;  %v2511_v10 = vadd.f32 %v2499_v3, %v5316_v61 }
 0x1b7   :  { %2905 = vmatmul.f32.vlgmr.msrb.gmra.mxu2 %v2877_v50  ;;  %2925 = vmatmul.f32.vlgmr.msrb.gmra.mxu3 %v2878_v45  ;;  %v2879_v52 = vld.sshfl [vmem:[#allocation1 + $0x10] sm:$0xff pattern:$0x73625140]  ;;  %v2824_v58 = vld [vmem:[%s5463_s6 + $0x260] sm:$0xff]  ;;  %v2823_v0 = vld [vmem:[%s5463_s6 + $0x258] sm:$0xff] }
 0x1b8   :  { %2945 = vmatmul.f32.vlgmr.msrb.gmra.mxu0 %v2879_v52  ;;  %v2481_v63 = vmul.f32 %v5311_v49, %v5311_v49  ;;  %v2523_v20 = vmul.f32 0.7978846, %v2511_v10  ;;  %v2826_v44 = vld [vmem:[%s5463_s6 + $0x270] sm:$0xff]  ;;  %v2825_v52 = vld [vmem:[%s5463_s6 + $0x268] sm:$0xff] }
 0x1b9   :  { %v2842_v50 = vld [vmem:[%s5463_s6 + $0x2f0] sm:$0xff]  ;;  %2970 = vmatpush.msra.mxu2 %v2826_v44 }
 0x1ba   :  { %v2493_v13 = vmul.f32 %v2481_v63, %v5311_v49  ;;  %2990 = vmatpush.msra.mxu3 %v2842_v50  ;;  %v2880_v63 = vld.sshfl [vmem:[#allocation1 + $0x18] sm:$0xff pattern:$0x73625140] }
 0x1bb   :  { %v2398_v54 = vpop.f32.mrf.mxu2  ;;  %2971 = vmatpush.msra.mxu2 %v2825_v52 }
 0x1bc   :  { %v2412_v35 = vpop.f32.mrf.mxu3  ;;  %v2505_v39 = vmul.f32 0.044715, %v2493_v13  ;;  %v2399_v5 = vadd.f32 %v2398_v54, %v490_v51  ;;  %2991 = vmatpush.msra.mxu3 %v2841_v7 }
 0x1bd   :  { %2972 = vmatpush.msra.mxu2 %v2824_v58 }
 0x1be   :  { %v2517_v41 = vadd.f32 %v2505_v39, %v5311_v49  ;;  %v2413_v11 = vadd.f32 %v2412_v35, %v2399_v5  ;;  %2992 = vmatpush.msra.mxu3 %v2840_v59  ;;  %v2820_v39 = vld [vmem:[%s5463_s6 + $0x240] sm:$0xff]  ;;  %v2819_v5 = vld [vmem:[%s5463_s6 + $0x238] sm:$0xff] }
 0x1bf   :  { %2973 = vmatpush.msra.mxu2 %v2823_v0 }
 0x1c0   :  { %v2529_v57 = vmul.f32 0.7978846, %v2517_v41  ;;  %2993 = vmatpush.msra.mxu3 %v2839_v47 }
 0x1c1   :  { %2974 = vmatpush.msra.mxu2 %v2822_v23 }
 0x1c2   :  { %4582 = vtanh.f32 %v2529_v57 }
 0x1c3   :  { %4584 = vtanh.f32 %v2523_v20 }
 0x1c8   :  { %v4583_v32 = vpop.eup %4582 }
 0x1c9   :  { %v4585_v38 = vpop.eup %4584  ;;  %v2553_v43 = vadd.f32 1.0, %v4583_v32 }
 0x1ca   :  { %v2547_v25 = vadd.f32 1.0, %v4585_v38 }
 0x1cb   :  { %v2424_v2 = vpop.f32.mrf.mxu0  ;;  %v2565_v55 = vmul.f32 0.5, %v2553_v43  ;;  %v2828_v43 = vld [vmem:[%s5463_s6 + $0x280] sm:$0xff] }
 0x1cc   :  { %v2438_v56 = vpop.f32.mrf.mxu1  ;;  %v2425_v12 = vadd.f32 %v2424_v2, %v2411_v1  ;;  %v2559_v22 = vmul.f32 0.5, %v2547_v25  ;;  %v2838_v1 = vld [vmem:[%s5463_s6 + $0x2d0] sm:$0xff] }
 0x1cd   :  { %v2577_v13 = vmul.f32 %v2565_v55, %v5311_v49  ;;  %2994 = vmatpush.msra.mxu3 %v2838_v1  ;;  %v2821_v49 = vld [vmem:[%s5463_s6 + $0x248] sm:$0xff] }
 0x1ce   :  { %v2439_v8 = vadd.f32 %v2438_v56, %v2425_v12  ;;  %v2571_v35 = vmul.f32 %v2559_v22, %v5316_v61  ;;  %v2837_v56 = vld [vmem:[%s5463_s6 + $0x2c8] sm:$0xff]  ;;  %2975 = vmatpush.msra.mxu2 %v2821_v49  ;;  %v2836_v61 = vld [vmem:[%s5463_s6 + $0x2c0] sm:$0xff]  ;;  %v2580_v22 = vld [vmem:[#allocation2 + $0x8] sm:$0xf] }
 0x1cf   :  { %v2641_v12 = vrot.slane %v2577_v13, 4  ;;  %2995 = vmatpush.msra.mxu3 %v2837_v56  ;;  %v3021_v49 = vld [vmem:[#allocation17 + $0x30] sm:$0xff]  ;;  %v3020_v56 = vld [vmem:[#allocation17 + $0x28] sm:$0xff] }
 0x1d0   :  { %2976 = vmatpush.msra.mxu2 %v2820_v39  ;;  %v3019_v39 = vld [vmem:[#allocation17 + $0x20] sm:$0xff] }
 0x1d1   :  { %2996 = vmatpush.msra.mxu3 %v2836_v61  ;;  %v3018_v61 = vld [vmem:[#allocation17 + $0x18] sm:$0xff] }
 0x1d2   :  { %2977 = vmatpush.msra.mxu2 %v2819_v5  ;;  %v3015_v5 = vld [vmem:[#allocation17] sm:$0xff] }
 0x1d3   :  { %v2452_v9 = vpop.f32.mrf.mxu2  ;;  %v2426_v16 = vpop.f32.mrf.mxu0 }
 0x1d4   :  { %v2453_v14 = vadd.f32 %v2452_v9, %v2439_v8  ;;  %v2466_v15 = vpop.f32.mrf.mxu3  ;;  %v2440_v17 = vpop.f32.mrf.mxu1  ;;  %v2427_v19 = vadd.f32 %v2426_v16, %v2413_v11  ;;  %v2835_v8 = vld [vmem:[%s5463_s6 + $0x2b8] sm:$0xff]  ;;  %v2605_v9 = vrot.slane %v2571_v35, 4  ;;  %v2642_v16 = vadd.f32 %v2641_v12, %v2577_v13  ;;  %v3017_v12 = vld [vmem:[#allocation17 + $0x10] sm:$0xff] }
 0x1d5   :  { %2997 = vmatpush.msra.mxu3 %v2835_v8 }
 0x1d6   :  { %v5336_v18 = vadd.f32 %v2466_v15, %v2453_v14  ;;  %v2441_v24 = vadd.f32 %v2440_v17, %v2427_v19  ;;  %v2818_v14 = vld [vmem:[%s5463_s6 + $0x230] sm:$0xff]  ;;  %v2833_v19 = vld [vmem:[%s5463_s6 + $0x2a8] sm:$0xff]  ;;  %v2606_v20 = vadd.f32 %v2605_v9, %v2571_v35 }
 0x1d7   :  { %v2834_v15 = vld [vmem:[%s5463_s6 + $0x2b0] sm:$0xff]  ;;  %2978 = vmatpush.msra.mxu2 %v2818_v14 }
 0x1d8   :  { %v2476_v21 = vmul.f32 %v5336_v18, %v5336_v18  ;;  %2998 = vmatpush.msra.mxu3 %v2834_v15 }
 0x1da   :  { %v2488_v40 = vmul.f32 %v2476_v21, %v5336_v18  ;;  %2999 = vmatpush.msra.mxu3 %v2833_v19  ;;  %v4564_v19 = vld [vmem:[#allocation15] ss:$0 sm:$0xff] }
 0x1db   :  { %v2454_v26 = vpop.f32.mrf.mxu2 }
 0x1dc   :  { %v2500_v48 = vmul.f32 0.044715, %v2488_v40  ;;  %v2455_v27 = vadd.f32 %v2454_v26, %v2441_v24  ;;  %v2468_v28 = vpop.f32.mrf.mxu3  ;;  %v2744_v29 = vpop.f32.mrf.mxu1  ;;  %v2816_v40 = vld [vmem:[%s5463_s6 + $0x220] sm:$0xff] }
 0x1dd   :  { %v2745_v31 = vadd.f32 %v4563_v6, %v2744_v29  ;;  %v2832_v24 = vld [vmem:[%s5463_s6 + $0x2a0] sm:$0xff]  ;;  %v2643_v6 = vrot.slane %v2642_v16, 2  ;;  %v2607_v29 = vrot.slane %v2606_v20, 2 }
 0x1de   :  { %v2512_v30 = vadd.f32 %v2500_v48, %v5336_v18  ;;  %v5342_v60 = vadd.f32 %v2468_v28, %v2455_v27  ;;  %v2815_v27 = vld [vmem:[%s5463_s6 + $0x218] sm:$0xff]  ;;  %3000 = vmatpush.msra.mxu3 %v2832_v24 }
 0x1df   :  { %v2747_v34 = vmax.f32 %v2745_v31, 0.0  ;;  %v2831_v28 = vld [vmem:[%s5463_s6 + $0x298] sm:$0xff]  ;;  %v2830_v31 = vld [vmem:[%s5463_s6 + $0x290] sm:$0xff]  ;;  %v2644_v32 = vadd.f32 %v2643_v6, %v2642_v16  ;;  %v2608_v37 = vadd.f32 %v2607_v29, %v2606_v20 }
 0x1e0   :  { %v2524_v33 = vmul.f32 0.7978846, %v2512_v30  ;;  %v2482_v4 = vmul.f32 %v5342_v60, %v5342_v60  ;;  %3001 = vmatpush.msra.mxu3 %v2831_v28  ;;  %v4565_v6 = vld [vmem:[#allocation18] ss:$0 sm:$0xff] }
 0x1e1   :  { %4251 = vmatmul.msk.f32.vlgmr.msra.gmra.mxu1 %vm2848_vm8, %v2747_v34  ;;  %v2813_v34 = vld [vmem:[%s5463_s6 + $0x208] sm:$0xff]  ;;  %v2645_v44 = vrot.slane %v2644_v32, 1  ;;  %v2609_v25 = vrot.slane %v2608_v37, 1 }
 0x1e2   :  { %4586 = vtanh.f32 %v2524_v33  ;;  %v2494_v42 = vmul.f32 %v2482_v4, %v5342_v60  ;;  %3002 = vmatpush.msra.mxu3 %v2830_v31 }
 0x1e3   :  { %v2646_v7 = vadd.f32 %v2645_v44, %v2644_v32  ;;  %v2610_v58 = vadd.f32 %v2609_v25, %v2608_v37 }
 0x1e4   :  { %v2506_v45 = vmul.f32 0.044715, %v2494_v42  ;;  %v2812_v42 = vld [vmem:[%s5463_s6 + $0x200] sm:$0xff]  ;;  %3003 = vmatpush.msra.mxu3 %v2829_v36 }
 0x1e6   :  { %v2518_v53 = vadd.f32 %v2506_v45, %v5342_v60  ;;  %3004 = vmatpush.msra.mxu3 %v2828_v43 }
 0x1e8   :  { %v4587_v51 = vpop.eup %4586  ;;  %v2530_v62 = vmul.f32 0.7978846, %v2518_v53 }
 0x1e9   :  { %v2548_v46 = vadd.f32 1.0, %v4587_v51  ;;  %2965 = vmatmul.f32.vlgmr.msrb.gmra.mxu1 %v2880_v63 }
 0x1ea   :  { %4588 = vtanh.f32 %v2530_v62 }
 0x1eb   :  { %v2560_v54 = vmul.f32 0.5, %v2548_v46 }
 0x1ed   :  { %v2572_v2 = vmul.f32 %v2560_v54, %v5336_v18  ;;  %v2817_v18 = vld [vmem:[%s5463_s6 + $0x228] sm:$0xff] }
 0x1ee   :  { %2979 = vmatpush.msra.mxu2 %v2817_v18 }
 0x1ef   :  { %v2611_v3 = vrot.slane %v2572_v2, 4 }
 0x1f0   :  { %v4589_v41 = vpop.eup %4588  ;;  %2980 = vmatpush.msra.mxu2 %v2816_v40 }
 0x1f1   :  { %v2612_v10 = vadd.f32 %v2611_v3, %v2572_v2  ;;  %v2554_v11 = vadd.f32 1.0, %v4589_v41  ;;  %v3022_v2 = vld [vmem:[#allocation17 + $0x38] sm:$0xff]  ;;  %v3016_v3 = vld [vmem:[#allocation17 + $0x8] sm:$0xff] }
 0x1f2   :  { %2981 = vmatpush.msra.mxu2 %v2815_v27  ;;  %3039 = vmatpush.msra.mxu0 %v3022_v2 }
 0x1f3   :  { %v2613_v17 = vrot.slane %v2612_v10, 2  ;;  %v2566_v57 = vmul.f32 0.5, %v2554_v11 }
 0x1f4   :  { %3040 = vmatpush.msra.mxu0 %v3021_v49 }
 0x1f5   :  { %v2578_v21 = vmul.f32 %v2566_v57, %v5342_v60  ;;  %v2614_v26 = vadd.f32 %v2613_v17, %v2612_v10  ;;  %v2814_v60 = vld [vmem:[%s5463_s6 + $0x210] sm:$0xff]  ;;  %s4884_s6 = smov [#allocation20]  }
 0x1f6   :  { %2982 = vmatpush.msra.mxu2 %v2814_v60  ;;  %3041 = vmatpush.msra.mxu0 %v3020_v56  ;;  %s3057_s3 = sshll.u32 %s4884_s6, 4  ;;  %s3058_s3 = int_to_ptr.vmem [resolvable:$true] %s3057_s3 }
 0x1f7   :  { %v2647_v48 = vrot.slane %v2578_v21, 4  ;;  %v2615_v33 = vrot.slane %v2614_v26, 1 }
 0x1f8   :  { %2983 = vmatpush.msra.mxu2 %v2813_v34  ;;  %3042 = vmatpush.msra.mxu0 %v3019_v39 }
 0x1f9   :  { %v2648_v30 = vadd.f32 %v2647_v48, %v2578_v21  ;;  %v2616_v50 = vadd.f32 %v2615_v33, %v2614_v26 }
 0x1fa   :  { %2984 = vmatpush.msra.mxu2 %v2812_v42  ;;  %3043 = vmatpush.msra.mxu0 %v3018_v61 }
 0x1fb   :  { %v2649_v4 = vrot.slane %v2648_v30, 2  ;;  %v2668_v53 = vrot.slane %v2616_v50, 6 }
 0x1fc   :  { %3044 = vmatpush.msra.mxu0 %v3017_v12 }
 0x1fd   :  { %v2650_v38 = vadd.f32 %v2649_v4, %v2648_v30  ;;  %v2679_v62 = vsel %vm2673_vm0, %v2610_v58, %v2668_v53 }
 0x1fe   :  { %3045 = vmatpush.msra.mxu0 %v3016_v3 }
 0x1ff   :  { %v2651_v45 = vrot.slane %v2650_v38, 1 }
 0x200   :  { %3046 = vmatpush.msra.mxu0 %v3015_v5 }
 0x201   :  { %v2652_v52 = vadd.f32 %v2651_v45, %v2650_v38 }
 0x203   :  { %v2672_v55 = vrot.slane %v2652_v52, 6 }
 0x205   :  { %v2683_v59 = vsel %vm2673_vm0, %v2646_v7, %v2672_v55 }
 0x206   :  { %v2699_v51 = vrot.slane %v2683_v59, 7 }
 0x208   :  { %v2700_v63 = vsel %vm2689_vm4, %v2699_v51, %v2679_v62 }
 0x209   :  { %v2701_v46 = vsel %vm2691_vm5, %v2699_v51, %v2700_v63 }
 0x20a   :  { %v2702_v0 = vsel %vm2693_vm6, %v2699_v51, %v2701_v46 }
 0x20b   :  { %v2703_v47 = vsel %vm2695_vm7, %v2699_v51, %v2702_v0 }
 0x20c   :  { %v2707_v13 = vadd.f32 %v2703_v47, %v2580_v22 }
 0x20e   :  { %2709 = vst [vmem:[#allocation2 + $0x8] sm:$0xf] %v2707_v13 }
 0x215   :  { %v2714_v54 = vld [vmem:[#allocation2 + $0x8] sm:$0xf] }
 0x216   :  { %v2716_v23 = vmul.f32 0.125, %v2714_v54 }
 0x218   :  { %2876 = vst [vmem:[#allocation1 + $0x20] ss:$4 sm:$0xff] %v2716_v23 }
 0x21f   :  { %v2881_v1 = vld.sshfl [vmem:[#allocation1 + $0x20] sm:$0xff pattern:$0x73625140]  ;;  %v2882_v35 = vld.sshfl [vmem:[#allocation1 + $0x28] sm:$0xff pattern:$0x73625140] }
 0x220   :  { %2985 = vmatmul.f32.vlgmr.msra.gmra.mxu2 %v2881_v1  ;;  %3005 = vmatmul.f32.vlgmr.msra.gmra.mxu3 %v2882_v35 }
 0x235   :  { %v2946_v14 = vpop.f32.mrf.mxu0 }
 0x23a   :  { %v2906_v8 = vpop.f32.mrf.mxu2  ;;  %v2926_v10 = vpop.f32.mrf.mxu3 }
 0x25e   :  { %v2869_v41 = vpop.f32.mrf.mxu1 }
 0x25f   :  { %v2907_v9 = vadd.f32 %v2906_v8, %v2869_v41 }
 0x261   :  { %v2927_v11 = vadd.f32 %v2926_v10, %v2907_v9 }
 0x263   :  { %v2947_v16 = vadd.f32 %v2946_v14, %v2927_v11 }
 0x266   :  { %v2966_v15 = vpop.f32.mrf.mxu1 }
 0x267   :  { %v2967_v17 = vadd.f32 %v2966_v15, %v2947_v16 }
 0x2a3   :  { %v2986_v57 = vpop.f32.mrf.mxu2  ;;  %v3006_v20 = vpop.f32.mrf.mxu3 }
 0x2a4   :  { %v2987_v18 = vadd.f32 %v2986_v57, %v2967_v17 }
 0x2a6   :  { %v3007_v21 = vadd.f32 %v3006_v20, %v2987_v18 }
 0x2a8   :  { %v3013_v40 = vadd.f32 %v4564_v19, %v3007_v21 }
 0x2aa   :  { %v3014_v24 = vmax.f32 %v3013_v40, 0.0 }
 0x2ac   :  { %4252 = vmatmul.msk.f32.vlgmr.msra.gmra.mxu0 %vm3027_vm9, %v3014_v24 }
 0x329   :  { %v3048_v26 = vpop.f32.mrf.mxu0 }
 0x32a   :  { %v3049_v48 = vadd.f32 %v4565_v6, %v3048_v26 }
 0x32c   :  { %3051 = vst [vmem:[#allocation20] sm:$0x3] %v3049_v48 }
 0x32d   :  { %3062 = dma.vmem_to_hbm [thread:$0]  %s3058_s3, 32, %s3060_s16, [#allocation5]  }
 0x32e   :  { %4867 = dma.done.wait [#allocation5], 32  }
 0x32f   :  { %4868 = vsyncadd [#allocation5], 4294967264 }
 0x330   :  { %3067 = vsyncpa [#allocation4], 1 }
 0x331   :  { %3068 = vsyncpa [#allocation7], 1 }
 0x332   :  { %3069 = vsyncpa [#allocation10], 1 }
 0x333   :  { %3070 = vsyncpa [#allocation13], 1 }
 0x334   :  { %3071 = vsyncpa [#allocation16], 1 }
 0x335   :  { %3072 = vsyncpa [#allocation19], 1 }
 0x336   :  { %3073 = vsyncpa [#allocation5], 1 }

</bundles_post_ra>
